<compile_context>
chip_gen: v7x
topology: tpu7x:2x2x1
jax: 0.10.0
libtpu: 0.0.40
codegen_flags: <defaults>
</compile_context>

<pallas_src>
import math
import functools

import jax
import jax.numpy as jnp
from jax.experimental import pallas as pl
from jax.experimental.pallas import tpu as pltpu


# ----------------------------------------------------------------------------
# In-kernel helpers (traced Python, all compute stays in VMEM / vregs).
# ----------------------------------------------------------------------------
def _proj(x2, w_ref, b_ref):
    """x2: (M, din) @ W (din, dout) + b (1, dout)."""
    return jnp.dot(x2, w_ref[...], preferred_element_type=jnp.float32) + b_ref[...]


def _mab_core(Qp, K3, wkv_ref, bkv_ref, wo_ref, bo_ref, masks, num_heads, scale):
    """Multihead Attention Block given already-projected queries.

    Qp: (Bt, Nq, dv)  = Q @ Wq + bq
    K3: (Bt, Nk, dk)  raw keys/values input
    Returns (Bt, Nq, dv).
    """
    Bt, Nq, dv = Qp.shape
    _, Nk, dk = K3.shape
    ds = dv // num_heads

    # Fused K|V projection: one matmul, 2*dv output lanes.
    KV = _proj(K3.reshape(Bt * Nk, dk), wkv_ref, bkv_ref).reshape(Bt, Nk, 2 * dv)
    Kp = KV[:, :, :dv]
    Vp = KV[:, :, dv:]

    # Per-head attention, batched over the whole batch tile.  The context is
    # accumulated full-width (head-masked V), which is mathematically equal to
    # concatenating per-head A_h @ V_h along the feature axis but avoids the
    # lane-axis concatenate of 8-lane slices.
    ctx = jnp.zeros((Bt, Nq, dv), jnp.float32)
    for h in range(num_heads):  # static unroll, num_heads is small
        qh = Qp[:, :, h * ds:(h + 1) * ds]
        kh = Kp[:, :, h * ds:(h + 1) * ds]
        logits = jnp.einsum("bqd,bkd->bqk", qh, kh,
                            preferred_element_type=jnp.float32) * scale
        m = jnp.max(logits, axis=-1, keepdims=True)
        p = jnp.exp(logits - m)
        denom = jnp.sum(p, axis=-1, keepdims=True)
        attn = p * pl.reciprocal(denom, approx=True)  # divide -> EUP slot
        ctx = ctx + jnp.einsum("bqk,bkd->bqd", attn, Vp * masks[h],
                               preferred_element_type=jnp.float32)

    O = Qp + ctx                                      # projected-Q residual
    Of = O.reshape(Bt * Nq, dv)
    Of = Of + jax.nn.relu(_proj(Of, wo_ref, bo_ref))  # O + relu(O @ Wo + bo)
    return Of.reshape(Bt, Nq, dv)


def _make_fused_kernel(num_heads, dim_v):
    scale = 1.0 / math.sqrt(dim_v)
    ds = dim_v // num_heads

    def kernel(x_ref, *refs):
        # refs layout: 5 MAB groups x (wq, bq, wkv, bkv, wo, bo), then
        # I1, I2, S, W_out, b_out, and finally the output ref.
        mab_groups = [refs[i * 6:(i + 1) * 6] for i in range(5)]
        i1_ref, i2_ref, s_ref, wout_ref, bout_ref, o_ref = refs[30:]

        X = x_ref[...]                     # (Bt, N, dim_input)
        Bt = X.shape[0]

        # Head masks: built once from an iota, reused by all five MABs.
        lane = jax.lax.broadcasted_iota(jnp.int32, (1, 1, dim_v), 2)
        masks = [((lane >= h * ds) & (lane < (h + 1) * ds)).astype(jnp.float32)
                 for h in range(num_heads)]

        def mab_shared_q(ind_ref, K3, grp):
            # Q = inducing points / seeds: identical across the batch, so the
            # Q projection is computed once and broadcast in-register.
            wq, bq, wkv, bkv, wo, bo = grp
            Qs = _proj(ind_ref[...], wq, bq)                  # (Nq, dv)
            Qp = jnp.broadcast_to(Qs[None], (Bt,) + Qs.shape)  # (Bt, Nq, dv)
            return _mab_core(Qp, K3, wkv, bkv, wo, bo, masks, num_heads, scale)

        def mab_batched_q(Q3, K3, grp):
            wq, bq, wkv, bkv, wo, bo = grp
            Bt_, Nq, dq = Q3.shape
            Qp = _proj(Q3.reshape(Bt_ * Nq, dq), wq, bq).reshape(Bt_, Nq, dim_v)
            return _mab_core(Qp, K3, wkv, bkv, wo, bo, masks, num_heads, scale)

        # Encoder: ISAB -> ISAB (all intermediates stay on-chip).
        H1 = mab_shared_q(i1_ref, X, mab_groups[0])   # (Bt, num_inds, dv)
        Z1 = mab_batched_q(X, H1, mab_groups[1])      # (Bt, N, dv)
        H2 = mab_shared_q(i2_ref, Z1, mab_groups[2])  # (Bt, num_inds, dv)
        Z2 = mab_batched_q(Z1, H2, mab_groups[3])     # (Bt, N, dv)

        # Decoder: Dropout (identity at inference) -> PMA -> Dropout -> Linear.
        P = mab_shared_q(s_ref, Z2, mab_groups[4])    # (Bt, num_outputs, dv)
        Bt_, no, _ = P.shape
        out = _proj(P.reshape(Bt_ * no, dim_v), wout_ref, bout_ref)
        o_ref[...] = out.reshape(o_ref.shape)

    return kernel


# ----------------------------------------------------------------------------
# Wrapper: one fused pallas_call gridded over batch tiles.
# ----------------------------------------------------------------------------
def set_transformer_forward(x, params, num_heads, block_b=8):
    B, N, di = x.shape
    mabs = params["mabs"]
    dim_v = mabs[0][0].shape[1]
    num_outputs = params["S"].shape[0]
    dim_output = params["wout"].shape[1]

    # Batch tiling: bt elements per grid step; pad batch to a multiple of bt.
    bt = min(block_b, B)
    n_blocks = -(-B // bt)
    Bp = n_blocks * bt
    xp = x if Bp == B else jnp.pad(x, ((0, Bp - B), (0, 0), (0, 0)))

    flat_params = []
    for grp in mabs:
        flat_params.extend(grp)                        # wq, bq, wkv, bkv, wo, bo
    flat_params += [params["I1"], params["I2"], params["S"],
                    params["wout"], params["bout"]]

    def _const_spec(a):
        nd = a.ndim
        return pl.BlockSpec(a.shape, lambda b, _nd=nd: (0,) * _nd)

    in_specs = [pl.BlockSpec((bt, N, di), lambda b: (b, 0, 0))]
    in_specs += [_const_spec(a) for a in flat_params]

    out = pl.pallas_call(
        _make_fused_kernel(num_heads, dim_v),
        out_shape=jax.ShapeDtypeStruct((Bp, num_outputs, dim_output),
                                       jnp.float32),
        grid=(n_blocks,),
        in_specs=in_specs,
        out_specs=pl.BlockSpec((bt, num_outputs, dim_output),
                               lambda b: (b, 0, 0)),
        compiler_params=pltpu.CompilerParams(
            dimension_semantics=("parallel",)),
    )(xp, *flat_params)

    out = out[:B]
    # Matches the PyTorch module's `.squeeze()` (drops ALL size-1 dims,
    # including batch when B == 1 -- identical torch semantics).
    return jnp.squeeze(out)


# ----------------------------------------------------------------------------
# Deterministic parameter initialization (shapes per module __init__).
# nn.Linear weights are stored pre-transposed as (in, out): kernel computes
# x @ W + b.  K/V projections are pre-packed into a single (dk, 2*dim_V) W.
# ----------------------------------------------------------------------------
def _init_linear(key, din, dout):
    kw, kb = jax.random.split(key)
    bound = 1.0 / math.sqrt(din)
    w = jax.random.uniform(kw, (din, dout), jnp.float32, -bound, bound)
    b = jax.random.uniform(kb, (1, dout), jnp.float32, -bound, bound)
    return w, b


def _init_mab(key, dim_q, dim_k, dim_v):
    ks = jax.random.split(key, 4)
    wq, bq = _init_linear(ks[0], dim_q, dim_v)
    wk, bk = _init_linear(ks[1], dim_k, dim_v)
    wv, bv = _init_linear(ks[2], dim_k, dim_v)
    wo, bo = _init_linear(ks[3], dim_v, dim_v)
    # Fuse K and V projections into one matmul (dk, 2*dim_v).
    wkv = jnp.concatenate([wk, wv], axis=1)
    bkv = jnp.concatenate([bk, bv], axis=1)
    return (wq, bq, wkv, bkv, wo, bo)


def _xavier_uniform(key, shape):
    fan_in, fan_out = shape[-2], shape[-1]
    a = math.sqrt(6.0 / (fan_in + fan_out))
    return jax.random.uniform(key, shape, jnp.float32, -a, a)


def init_set_transformer(key, dim_input, num_outputs, dim_output,
                         num_inds, dim_hidden, num_heads):
    ks = jax.random.split(key, 8)
    mabs = [
        _init_mab(ks[1], dim_hidden, dim_input, dim_hidden),   # isab1.mab0
        _init_mab(ks[2], dim_input, dim_hidden, dim_hidden),   # isab1.mab1
        _init_mab(ks[4], dim_hidden, dim_hidden, dim_hidden),  # isab2.mab0
        _init_mab(ks[5], dim_hidden, dim_hidden, dim_hidden),  # isab2.mab1
        _init_mab(ks[7], dim_hidden, dim_hidden, dim_hidden),  # pma.mab
    ]
    params = {
        "mabs": mabs,
        "I1": _xavier_uniform(ks[0], (num_inds, dim_hidden)),
        "I2": _xavier_uniform(ks[3], (num_inds, dim_hidden)),
        "S": _xavier_uniform(ks[6], (num_outputs, dim_hidden)),
    }
    w, b = _init_linear(jax.random.fold_in(key, 99), dim_hidden, dim_output)
    params["wout"] = w
    params["bout"] = b
    return params


if __name__ == "__main__":
    # Small, forward-consistent shapes.  batch=8 with Btile=4 gives a 2-step
    # parallel grid (can shard across v7x's two TensorCores).
    batch, set_size = 8, 16
    dim_input, num_outputs, dim_output = 4, 1, 3
    num_inds, dim_hidden, num_heads = 8, 32, 4

    key = jax.random.PRNGKey(0)
    kx, kp = jax.random.split(key)
    x = jax.random.normal(kx, (batch, set_size, dim_input), jnp.float32)
    params = init_set_transformer(kp, dim_input, num_outputs, dim_output,
                                  num_inds, dim_hidden, num_heads)

    fwd = jax.jit(functools.partial(set_transformer_forward,
                                    num_heads=num_heads, block_b=4))
    out = fwd(x, params)
    jax.block_until_ready(out)
    assert out.shape == (batch, dim_output), out.shape
    assert bool(jnp.all(jnp.isfinite(out)))
    print("KERNEL_OK")
</pallas_src>

<mosaic_0001>
module attributes {stable_mosaic.version = 11 : i64} {
  func.func @kernel(%arg0: i32, %arg1: memref<4x16x4xf32, #tpu.memory_space<vmem>>, %arg2: memref<32x32xf32, #tpu.memory_space<vmem>>, %arg3: memref<1x32xf32, #tpu.memory_space<vmem>>, %arg4: memref<4x64xf32, #tpu.memory_space<vmem>>, %arg5: memref<1x64xf32, #tpu.memory_space<vmem>>, %arg6: memref<32x32xf32, #tpu.memory_space<vmem>>, %arg7: memref<1x32xf32, #tpu.memory_space<vmem>>, %arg8: memref<4x32xf32, #tpu.memory_space<vmem>>, %arg9: memref<1x32xf32, #tpu.memory_space<vmem>>, %arg10: memref<32x64xf32, #tpu.memory_space<vmem>>, %arg11: memref<1x64xf32, #tpu.memory_space<vmem>>, %arg12: memref<32x32xf32, #tpu.memory_space<vmem>>, %arg13: memref<1x32xf32, #tpu.memory_space<vmem>>, %arg14: memref<32x32xf32, #tpu.memory_space<vmem>>, %arg15: memref<1x32xf32, #tpu.memory_space<vmem>>, %arg16: memref<32x64xf32, #tpu.memory_space<vmem>>, %arg17: memref<1x64xf32, #tpu.memory_space<vmem>>, %arg18: memref<32x32xf32, #tpu.memory_space<vmem>>, %arg19: memref<1x32xf32, #tpu.memory_space<vmem>>, %arg20: memref<32x32xf32, #tpu.memory_space<vmem>>, %arg21: memref<1x32xf32, #tpu.memory_space<vmem>>, %arg22: memref<32x64xf32, #tpu.memory_space<vmem>>, %arg23: memref<1x64xf32, #tpu.memory_space<vmem>>, %arg24: memref<32x32xf32, #tpu.memory_space<vmem>>, %arg25: memref<1x32xf32, #tpu.memory_space<vmem>>, %arg26: memref<32x32xf32, #tpu.memory_space<vmem>>, %arg27: memref<1x32xf32, #tpu.memory_space<vmem>>, %arg28: memref<32x64xf32, #tpu.memory_space<vmem>>, %arg29: memref<1x64xf32, #tpu.memory_space<vmem>>, %arg30: memref<32x32xf32, #tpu.memory_space<vmem>>, %arg31: memref<1x32xf32, #tpu.memory_space<vmem>>, %arg32: memref<8x32xf32, #tpu.memory_space<vmem>>, %arg33: memref<8x32xf32, #tpu.memory_space<vmem>>, %arg34: memref<1x32xf32, #tpu.memory_space<vmem>>, %arg35: memref<32x3xf32, #tpu.memory_space<vmem>>, %arg36: memref<1x3xf32, #tpu.memory_space<vmem>>, %arg37: memref<4x1x3xf32, #tpu.memory_space<vmem>>) attributes {dimension_semantics = [#tpu.dimension_semantics<parallel>], iteration_bounds = array<i64: 2>, scalar_prefetch = 0 : i64, scratch_operands = 0 : i64, tpu.core_type = #tpu.core_type<tc>, window_params = [{transform_indices = @transform_0, window_bounds = array<i64: 4, 16, 4>}, {pipeline_mode = #tpu.pipeline_mode<synchronous>, transform_indices = @transform_1, window_bounds = array<i64: 32, 32>}, {pipeline_mode = #tpu.pipeline_mode<synchronous>, transform_indices = @transform_2, window_bounds = array<i64: 1, 32>}, {pipeline_mode = #tpu.pipeline_mode<synchronous>, transform_indices = @transform_3, window_bounds = array<i64: 4, 64>}, {pipeline_mode = #tpu.pipeline_mode<synchronous>, transform_indices = @transform_4, window_bounds = array<i64: 1, 64>}, {pipeline_mode = #tpu.pipeline_mode<synchronous>, transform_indices = @transform_5, window_bounds = array<i64: 32, 32>}, {pipeline_mode = #tpu.pipeline_mode<synchronous>, transform_indices = @transform_6, window_bounds = array<i64: 1, 32>}, {pipeline_mode = #tpu.pipeline_mode<synchronous>, transform_indices = @transform_7, window_bounds = array<i64: 4, 32>}, {pipeline_mode = #tpu.pipeline_mode<synchronous>, transform_indices = @transform_8, window_bounds = array<i64: 1, 32>}, {pipeline_mode = #tpu.pipeline_mode<synchronous>, transform_indices = @transform_9, window_bounds = array<i64: 32, 64>}, {pipeline_mode = #tpu.pipeline_mode<synchronous>, transform_indices = @transform_10, window_bounds = array<i64: 1, 64>}, {pipeline_mode = #tpu.pipeline_mode<synchronous>, transform_indices = @transform_11, window_bounds = array<i64: 32, 32>}, {pipeline_mode = #tpu.pipeline_mode<synchronous>, transform_indices = @transform_12, window_bounds = array<i64: 1, 32>}, {pipeline_mode = #tpu.pipeline_mode<synchronous>, transform_indices = @transform_13, window_bounds = array<i64: 32, 32>}, {pipeline_mode = #tpu.pipeline_mode<synchronous>, transform_indices = @transform_14, window_bounds = array<i64: 1, 32>}, {pipeline_mode = #tpu.pipeline_mode<synchronous>, transform_indices = @transform_15, window_bounds = array<i64: 32, 64>}, {pipeline_mode = #tpu.pipeline_mode<synchronous>, transform_indices = @transform_16, window_bounds = array<i64: 1, 64>}, {pipeline_mode = #tpu.pipeline_mode<synchronous>, transform_indices = @transform_17, window_bounds = array<i64: 32, 32>}, {pipeline_mode = #tpu.pipeline_mode<synchronous>, transform_indices = @transform_18, window_bounds = array<i64: 1, 32>}, {pipeline_mode = #tpu.pipeline_mode<synchronous>, transform_indices = @transform_19, window_bounds = array<i64: 32, 32>}, {pipeline_mode = #tpu.pipeline_mode<synchronous>, transform_indices = @transform_20, window_bounds = array<i64: 1, 32>}, {pipeline_mode = #tpu.pipeline_mode<synchronous>, transform_indices = @transform_21, window_bounds = array<i64: 32, 64>}, {pipeline_mode = #tpu.pipeline_mode<synchronous>, transform_indices = @transform_22, window_bounds = array<i64: 1, 64>}, {pipeline_mode = #tpu.pipeline_mode<synchronous>, transform_indices = @transform_23, window_bounds = array<i64: 32, 32>}, {pipeline_mode = #tpu.pipeline_mode<synchronous>, transform_indices = @transform_24, window_bounds = array<i64: 1, 32>}, {pipeline_mode = #tpu.pipeline_mode<synchronous>, transform_indices = @transform_25, window_bounds = array<i64: 32, 32>}, {pipeline_mode = #tpu.pipeline_mode<synchronous>, transform_indices = @transform_26, window_bounds = array<i64: 1, 32>}, {pipeline_mode = #tpu.pipeline_mode<synchronous>, transform_indices = @transform_27, window_bounds = array<i64: 32, 64>}, {pipeline_mode = #tpu.pipeline_mode<synchronous>, transform_indices = @transform_28, window_bounds = array<i64: 1, 64>}, {pipeline_mode = #tpu.pipeline_mode<synchronous>, transform_indices = @transform_29, window_bounds = array<i64: 32, 32>}, {pipeline_mode = #tpu.pipeline_mode<synchronous>, transform_indices = @transform_30, window_bounds = array<i64: 1, 32>}, {pipeline_mode = #tpu.pipeline_mode<synchronous>, transform_indices = @transform_31, window_bounds = array<i64: 8, 32>}, {pipeline_mode = #tpu.pipeline_mode<synchronous>, transform_indices = @transform_32, window_bounds = array<i64: 8, 32>}, {pipeline_mode = #tpu.pipeline_mode<synchronous>, transform_indices = @transform_33, window_bounds = array<i64: 1, 32>}, {pipeline_mode = #tpu.pipeline_mode<synchronous>, transform_indices = @transform_34, window_bounds = array<i64: 32, 3>}, {pipeline_mode = #tpu.pipeline_mode<synchronous>, transform_indices = @transform_35, window_bounds = array<i64: 1, 3>}, {transform_indices = @transform_36, window_bounds = array<i64: 4, 1, 3>}]} {
    %c0 = arith.constant 0 : index
    %c0_0 = arith.constant 0 : index
    %c0_1 = arith.constant 0 : index
    %0 = vector.load %arg1[%c0, %c0_0, %c0_1] : memref<4x16x4xf32, #tpu.memory_space<vmem>>, vector<4x16x4xf32>
    %1 = tpu.iota {dimensions = array<i32: 2>} : vector<1x1x32xi32>
    %c0_i32 = arith.constant 0 : i32
    %2 = vector.broadcast %c0_i32 : i32 to vector<1x1x32xi32>
    %3 = arith.cmpi sge, %1, %2 : vector<1x1x32xi32>
    %c8_i32 = arith.constant 8 : i32
    %4 = vector.broadcast %c8_i32 : i32 to vector<1x1x32xi32>
    %5 = arith.cmpi slt, %1, %4 : vector<1x1x32xi32>
    %6 = arith.andi %3, %5 : vector<1x1x32xi1>
    %7 = arith.extui %6 : vector<1x1x32xi1> to vector<1x1x32xi32>
    %8 = arith.sitofp %7 : vector<1x1x32xi32> to vector<1x1x32xf32>
    %c8_i32_2 = arith.constant 8 : i32
    %9 = vector.broadcast %c8_i32_2 : i32 to vector<1x1x32xi32>
    %10 = arith.cmpi sge, %1, %9 : vector<1x1x32xi32>
    %c16_i32 = arith.constant 16 : i32
    %11 = vector.broadcast %c16_i32 : i32 to vector<1x1x32xi32>
    %12 = arith.cmpi slt, %1, %11 : vector<1x1x32xi32>
    %13 = arith.andi %10, %12 : vector<1x1x32xi1>
    %14 = arith.extui %13 : vector<1x1x32xi1> to vector<1x1x32xi32>
    %15 = arith.sitofp %14 : vector<1x1x32xi32> to vector<1x1x32xf32>
    %c16_i32_3 = arith.constant 16 : i32
    %16 = vector.broadcast %c16_i32_3 : i32 to vector<1x1x32xi32>
    %17 = arith.cmpi sge, %1, %16 : vector<1x1x32xi32>
    %c24_i32 = arith.constant 24 : i32
    %18 = vector.broadcast %c24_i32 : i32 to vector<1x1x32xi32>
    %19 = arith.cmpi slt, %1, %18 : vector<1x1x32xi32>
    %20 = arith.andi %17, %19 : vector<1x1x32xi1>
    %21 = arith.extui %20 : vector<1x1x32xi1> to vector<1x1x32xi32>
    %22 = arith.sitofp %21 : vector<1x1x32xi32> to vector<1x1x32xf32>
    %c24_i32_4 = arith.constant 24 : i32
    %23 = vector.broadcast %c24_i32_4 : i32 to vector<1x1x32xi32>
    %24 = arith.cmpi sge, %1, %23 : vector<1x1x32xi32>
    %c32_i32 = arith.constant 32 : i32
    %25 = vector.broadcast %c32_i32 : i32 to vector<1x1x32xi32>
    %26 = arith.cmpi slt, %1, %25 : vector<1x1x32xi32>
    %27 = arith.andi %24, %26 : vector<1x1x32xi1>
    %28 = arith.extui %27 : vector<1x1x32xi1> to vector<1x1x32xi32>
    %29 = arith.sitofp %28 : vector<1x1x32xi32> to vector<1x1x32xf32>
    %c0_5 = arith.constant 0 : index
    %c0_6 = arith.constant 0 : index
    %30 = vector.load %arg32[%c0_5, %c0_6] : memref<8x32xf32, #tpu.memory_space<vmem>>, vector<8x32xf32>
    %c0_7 = arith.constant 0 : index
    %c0_8 = arith.constant 0 : index
    %31 = vector.load %arg2[%c0_7, %c0_8] : memref<32x32xf32, #tpu.memory_space<vmem>>, vector<32x32xf32>
    %cst = arith.constant dense<0.000000e+00> : vector<8x32xf32>
    %32 = tpu.matmul %30, %31, %cst {dimension_numbers = #tpu.dot_dimension_numbers<[1], [0], [0], [1], [0, 0, 1, 1], [], []>} : vector<8x32xf32>, vector<32x32xf32>, vector<8x32xf32> -> vector<8x32xf32>
    %c0_9 = arith.constant 0 : index
    %c0_10 = arith.constant 0 : index
    %33 = vector.load %arg3[%c0_9, %c0_10] : memref<1x32xf32, #tpu.memory_space<vmem>>, vector<1x32xf32>
    %34 = vector.broadcast %33 : vector<1x32xf32> to vector<8x32xf32>
    %35 = arith.addf %32, %34 : vector<8x32xf32>
    %36 = vector.shape_cast %35 : vector<8x32xf32> to vector<1x8x32xf32>
    %37 = vector.shape_cast %36 : vector<1x8x32xf32> to vector<1x8x32xf32>
    %38 = vector.broadcast %37 : vector<1x8x32xf32> to vector<4x8x32xf32>
    %39 = vector.shape_cast %0 : vector<4x16x4xf32> to vector<64x4xf32>
    %c0_11 = arith.constant 0 : index
    %c0_12 = arith.constant 0 : index
    %40 = vector.load %arg4[%c0_11, %c0_12] : memref<4x64xf32, #tpu.memory_space<vmem>>, vector<4x64xf32>
    %cst_13 = arith.constant dense<0.000000e+00> : vector<64x64xf32>
    %41 = tpu.matmul %39, %40, %cst_13 {dimension_numbers = #tpu.dot_dimension_numbers<[1], [0], [0], [1], [0, 0, 1, 1], [], []>} : vector<64x4xf32>, vector<4x64xf32>, vector<64x64xf32> -> vector<64x64xf32>
    %c0_14 = arith.constant 0 : index
    %c0_15 = arith.constant 0 : index
    %42 = vector.load %arg5[%c0_14, %c0_15] : memref<1x64xf32, #tpu.memory_space<vmem>>, vector<1x64xf32>
    %43 = vector.broadcast %42 : vector<1x64xf32> to vector<64x64xf32>
    %44 = arith.addf %41, %43 : vector<64x64xf32>
    %45 = vector.shape_cast %44 : vector<64x64xf32> to vector<4x16x64xf32>
    %46 = vector.extract_strided_slice %45 {offsets = [0, 0, 0], sizes = [4, 16, 32], strides = [1, 1, 1]} : vector<4x16x64xf32> to vector<4x16x32xf32>
    %47 = vector.extract_strided_slice %45 {offsets = [0, 0, 32], sizes = [4, 16, 32], strides = [1, 1, 1]} : vector<4x16x64xf32> to vector<4x16x32xf32>
    %cst_16 = arith.constant 0.000000e+00 : f32
    %48 = vector.broadcast %cst_16 : f32 to vector<4x8x32xf32>
    %49 = vector.extract_strided_slice %38 {offsets = [0, 0, 0], sizes = [4, 8, 8], strides = [1, 1, 1]} : vector<4x8x32xf32> to vector<4x8x8xf32>
    %50 = vector.extract_strided_slice %46 {offsets = [0, 0, 0], sizes = [4, 16, 8], strides = [1, 1, 1]} : vector<4x16x32xf32> to vector<4x16x8xf32>
    "tpu.trace_start"() <{level = 10 : i32, message = "bqd,bkd->bqk"}> : () -> ()
    %cst_17 = arith.constant dense<0.000000e+00> : vector<4x8x16xf32>
    %51 = tpu.matmul %49, %50, %cst_17 {dimension_numbers = #tpu.dot_dimension_numbers<[2], [2], [1], [1], [0, 0, 0, 1, 1, 1], [0], [0]>} : vector<4x8x8xf32>, vector<4x16x8xf32>, vector<4x8x16xf32> -> vector<4x8x16xf32>
    "tpu.trace_stop"() : () -> ()
    %cst_18 = arith.constant 0.176776692 : f32
    %52 = vector.broadcast %cst_18 : f32 to vector<4x8x16xf32>
    %53 = arith.mulf %51, %52 : vector<4x8x16xf32>
    %cst_19 = arith.constant dense<0xFF800000> : vector<4x8xf32>
    %54 = vector.multi_reduction <maximumf>, %53, %cst_19 [2] : vector<4x8x16xf32> to vector<4x8xf32>
    %55 = vector.shape_cast %54 : vector<4x8xf32> to vector<4x8x1xf32>
    %56 = vector.broadcast %55 : vector<4x8x1xf32> to vector<4x8x16xf32>
    %57 = arith.subf %53, %56 : vector<4x8x16xf32>
    %58 = math.exp %57 : vector<4x8x16xf32>
    %cst_20 = arith.constant dense<0.000000e+00> : vector<4x8xf32>
    %59 = vector.multi_reduction <add>, %58, %cst_20 [2] : vector<4x8x16xf32> to vector<4x8xf32>
    %60 = vector.shape_cast %59 : vector<4x8xf32> to vector<4x8x1xf32>
    %61 = tpu.reciprocal %60 {approx = true} : vector<4x8x1xf32> -> vector<4x8x1xf32>
    %62 = vector.broadcast %61 : vector<4x8x1xf32> to vector<4x8x16xf32>
    %63 = arith.mulf %58, %62 : vector<4x8x16xf32>
    %64 = vector.broadcast %8 : vector<1x1x32xf32> to vector<4x16x32xf32>
    %65 = arith.mulf %47, %64 : vector<4x16x32xf32>
    "tpu.trace_start"() <{level = 10 : i32, message = "bqk,bkd->bqd"}> : () -> ()
    %cst_21 = arith.constant dense<0.000000e+00> : vector<4x8x32xf32>
    %66 = tpu.matmul %63, %65, %cst_21 {dimension_numbers = #tpu.dot_dimension_numbers<[2], [1], [1], [2], [0, 0, 0, 1, 1, 2], [0], [0]>} : vector<4x8x16xf32>, vector<4x16x32xf32>, vector<4x8x32xf32> -> vector<4x8x32xf32>
    "tpu.trace_stop"() : () -> ()
    %67 = arith.addf %48, %66 : vector<4x8x32xf32>
    %68 = vector.extract_strided_slice %38 {offsets = [0, 0, 8], sizes = [4, 8, 8], strides = [1, 1, 1]} : vector<4x8x32xf32> to vector<4x8x8xf32>
    %69 = vector.extract_strided_slice %46 {offsets = [0, 0, 8], sizes = [4, 16, 8], strides = [1, 1, 1]} : vector<4x16x32xf32> to vector<4x16x8xf32>
    "tpu.trace_start"() <{level = 10 : i32, message = "bqd,bkd->bqk"}> : () -> ()
    %cst_22 = arith.constant dense<0.000000e+00> : vector<4x8x16xf32>
    %70 = tpu.matmul %68, %69, %cst_22 {dimension_numbers = #tpu.dot_dimension_numbers<[2], [2], [1], [1], [0, 0, 0, 1, 1, 1], [0], [0]>} : vector<4x8x8xf32>, vector<4x16x8xf32>, vector<4x8x16xf32> -> vector<4x8x16xf32>
    "tpu.trace_stop"() : () -> ()
    %cst_23 = arith.constant 0.176776692 : f32
    %71 = vector.broadcast %cst_23 : f32 to vector<4x8x16xf32>
    %72 = arith.mulf %70, %71 : vector<4x8x16xf32>
    %cst_24 = arith.constant dense<0xFF800000> : vector<4x8xf32>
    %73 = vector.multi_reduction <maximumf>, %72, %cst_24 [2] : vector<4x8x16xf32> to vector<4x8xf32>
    %74 = vector.shape_cast %73 : vector<4x8xf32> to vector<4x8x1xf32>
    %75 = vector.broadcast %74 : vector<4x8x1xf32> to vector<4x8x16xf32>
    %76 = arith.subf %72, %75 : vector<4x8x16xf32>
    %77 = math.exp %76 : vector<4x8x16xf32>
    %cst_25 = arith.constant dense<0.000000e+00> : vector<4x8xf32>
    %78 = vector.multi_reduction <add>, %77, %cst_25 [2] : vector<4x8x16xf32> to vector<4x8xf32>
    %79 = vector.shape_cast %78 : vector<4x8xf32> to vector<4x8x1xf32>
    %80 = tpu.reciprocal %79 {approx = true} : vector<4x8x1xf32> -> vector<4x8x1xf32>
    %81 = vector.broadcast %80 : vector<4x8x1xf32> to vector<4x8x16xf32>
    %82 = arith.mulf %77, %81 : vector<4x8x16xf32>
    %83 = vector.broadcast %15 : vector<1x1x32xf32> to vector<4x16x32xf32>
    %84 = arith.mulf %47, %83 : vector<4x16x32xf32>
    "tpu.trace_start"() <{level = 10 : i32, message = "bqk,bkd->bqd"}> : () -> ()
    %cst_26 = arith.constant dense<0.000000e+00> : vector<4x8x32xf32>
    %85 = tpu.matmul %82, %84, %cst_26 {dimension_numbers = #tpu.dot_dimension_numbers<[2], [1], [1], [2], [0, 0, 0, 1, 1, 2], [0], [0]>} : vector<4x8x16xf32>, vector<4x16x32xf32>, vector<4x8x32xf32> -> vector<4x8x32xf32>
    "tpu.trace_stop"() : () -> ()
    %86 = arith.addf %67, %85 : vector<4x8x32xf32>
    %87 = vector.extract_strided_slice %38 {offsets = [0, 0, 16], sizes = [4, 8, 8], strides = [1, 1, 1]} : vector<4x8x32xf32> to vector<4x8x8xf32>
    %88 = vector.extract_strided_slice %46 {offsets = [0, 0, 16], sizes = [4, 16, 8], strides = [1, 1, 1]} : vector<4x16x32xf32> to vector<4x16x8xf32>
    "tpu.trace_start"() <{level = 10 : i32, message = "bqd,bkd->bqk"}> : () -> ()
    %cst_27 = arith.constant dense<0.000000e+00> : vector<4x8x16xf32>
    %89 = tpu.matmul %87, %88, %cst_27 {dimension_numbers = #tpu.dot_dimension_numbers<[2], [2], [1], [1], [0, 0, 0, 1, 1, 1], [0], [0]>} : vector<4x8x8xf32>, vector<4x16x8xf32>, vector<4x8x16xf32> -> vector<4x8x16xf32>
    "tpu.trace_stop"() : () -> ()
    %cst_28 = arith.constant 0.176776692 : f32
    %90 = vector.broadcast %cst_28 : f32 to vector<4x8x16xf32>
    %91 = arith.mulf %89, %90 : vector<4x8x16xf32>
    %cst_29 = arith.constant dense<0xFF800000> : vector<4x8xf32>
    %92 = vector.multi_reduction <maximumf>, %91, %cst_29 [2] : vector<4x8x16xf32> to vector<4x8xf32>
    %93 = vector.shape_cast %92 : vector<4x8xf32> to vector<4x8x1xf32>
    %94 = vector.broadcast %93 : vector<4x8x1xf32> to vector<4x8x16xf32>
    %95 = arith.subf %91, %94 : vector<4x8x16xf32>
    %96 = math.exp %95 : vector<4x8x16xf32>
    %cst_30 = arith.constant dense<0.000000e+00> : vector<4x8xf32>
    %97 = vector.multi_reduction <add>, %96, %cst_30 [2] : vector<4x8x16xf32> to vector<4x8xf32>
    %98 = vector.shape_cast %97 : vector<4x8xf32> to vector<4x8x1xf32>
    %99 = tpu.reciprocal %98 {approx = true} : vector<4x8x1xf32> -> vector<4x8x1xf32>
    %100 = vector.broadcast %99 : vector<4x8x1xf32> to vector<4x8x16xf32>
    %101 = arith.mulf %96, %100 : vector<4x8x16xf32>
    %102 = vector.broadcast %22 : vector<1x1x32xf32> to vector<4x16x32xf32>
    %103 = arith.mulf %47, %102 : vector<4x16x32xf32>
    "tpu.trace_start"() <{level = 10 : i32, message = "bqk,bkd->bqd"}> : () -> ()
    %cst_31 = arith.constant dense<0.000000e+00> : vector<4x8x32xf32>
    %104 = tpu.matmul %101, %103, %cst_31 {dimension_numbers = #tpu.dot_dimension_numbers<[2], [1], [1], [2], [0, 0, 0, 1, 1, 2], [0], [0]>} : vector<4x8x16xf32>, vector<4x16x32xf32>, vector<4x8x32xf32> -> vector<4x8x32xf32>
    "tpu.trace_stop"() : () -> ()
    %105 = arith.addf %86, %104 : vector<4x8x32xf32>
    %106 = vector.extract_strided_slice %38 {offsets = [0, 0, 24], sizes = [4, 8, 8], strides = [1, 1, 1]} : vector<4x8x32xf32> to vector<4x8x8xf32>
    %107 = vector.extract_strided_slice %46 {offsets = [0, 0, 24], sizes = [4, 16, 8], strides = [1, 1, 1]} : vector<4x16x32xf32> to vector<4x16x8xf32>
    "tpu.trace_start"() <{level = 10 : i32, message = "bqd,bkd->bqk"}> : () -> ()
    %cst_32 = arith.constant dense<0.000000e+00> : vector<4x8x16xf32>
    %108 = tpu.matmul %106, %107, %cst_32 {dimension_numbers = #tpu.dot_dimension_numbers<[2], [2], [1], [1], [0, 0, 0, 1, 1, 1], [0], [0]>} : vector<4x8x8xf32>, vector<4x16x8xf32>, vector<4x8x16xf32> -> vector<4x8x16xf32>
    "tpu.trace_stop"() : () -> ()
    %cst_33 = arith.constant 0.176776692 : f32
    %109 = vector.broadcast %cst_33 : f32 to vector<4x8x16xf32>
    %110 = arith.mulf %108, %109 : vector<4x8x16xf32>
    %cst_34 = arith.constant dense<0xFF800000> : vector<4x8xf32>
    %111 = vector.multi_reduction <maximumf>, %110, %cst_34 [2] : vector<4x8x16xf32> to vector<4x8xf32>
    %112 = vector.shape_cast %111 : vector<4x8xf32> to vector<4x8x1xf32>
    %113 = vector.broadcast %112 : vector<4x8x1xf32> to vector<4x8x16xf32>
    %114 = arith.subf %110, %113 : vector<4x8x16xf32>
    %115 = math.exp %114 : vector<4x8x16xf32>
    %cst_35 = arith.constant dense<0.000000e+00> : vector<4x8xf32>
    %116 = vector.multi_reduction <add>, %115, %cst_35 [2] : vector<4x8x16xf32> to vector<4x8xf32>
    %117 = vector.shape_cast %116 : vector<4x8xf32> to vector<4x8x1xf32>
    %118 = tpu.reciprocal %117 {approx = true} : vector<4x8x1xf32> -> vector<4x8x1xf32>
    %119 = vector.broadcast %118 : vector<4x8x1xf32> to vector<4x8x16xf32>
    %120 = arith.mulf %115, %119 : vector<4x8x16xf32>
    %121 = vector.broadcast %29 : vector<1x1x32xf32> to vector<4x16x32xf32>
    %122 = arith.mulf %47, %121 : vector<4x16x32xf32>
    "tpu.trace_start"() <{level = 10 : i32, message = "bqk,bkd->bqd"}> : () -> ()
    %cst_36 = arith.constant dense<0.000000e+00> : vector<4x8x32xf32>
    %123 = tpu.matmul %120, %122, %cst_36 {dimension_numbers = #tpu.dot_dimension_numbers<[2], [1], [1], [2], [0, 0, 0, 1, 1, 2], [0], [0]>} : vector<4x8x16xf32>, vector<4x16x32xf32>, vector<4x8x32xf32> -> vector<4x8x32xf32>
    "tpu.trace_stop"() : () -> ()
    %124 = arith.addf %105, %123 : vector<4x8x32xf32>
    %125 = arith.addf %38, %124 : vector<4x8x32xf32>
    %126 = vector.shape_cast %125 : vector<4x8x32xf32> to vector<32x32xf32>
    %c0_37 = arith.constant 0 : index
    %c0_38 = arith.constant 0 : index
    %127 = vector.load %arg6[%c0_37, %c0_38] : memref<32x32xf32, #tpu.memory_space<vmem>>, vector<32x32xf32>
    %cst_39 = arith.constant dense<0.000000e+00> : vector<32x32xf32>
    %128 = tpu.matmul %126, %127, %cst_39 {dimension_numbers = #tpu.dot_dimension_numbers<[1], [0], [0], [1], [0, 0, 1, 1], [], []>} : vector<32x32xf32>, vector<32x32xf32>, vector<32x32xf32> -> vector<32x32xf32>
    %c0_40 = arith.constant 0 : index
    %c0_41 = arith.constant 0 : index
    %129 = vector.load %arg7[%c0_40, %c0_41] : memref<1x32xf32, #tpu.memory_space<vmem>>, vector<1x32xf32>
    %130 = vector.broadcast %129 : vector<1x32xf32> to vector<32x32xf32>
    %131 = arith.addf %128, %130 : vector<32x32xf32>
    %cst_42 = arith.constant 0.000000e+00 : f32
    %132 = vector.broadcast %cst_42 : f32 to vector<32x32xf32>
    %133 = arith.maximumf %131, %132 : vector<32x32xf32>
    %134 = arith.addf %126, %133 : vector<32x32xf32>
    %135 = vector.shape_cast %134 : vector<32x32xf32> to vector<4x8x32xf32>
    %136 = vector.shape_cast %0 : vector<4x16x4xf32> to vector<64x4xf32>
    %c0_43 = arith.constant 0 : index
    %c0_44 = arith.constant 0 : index
    %137 = vector.load %arg8[%c0_43, %c0_44] : memref<4x32xf32, #tpu.memory_space<vmem>>, vector<4x32xf32>
    %cst_45 = arith.constant dense<0.000000e+00> : vector<64x32xf32>
    %138 = tpu.matmul %136, %137, %cst_45 {dimension_numbers = #tpu.dot_dimension_numbers<[1], [0], [0], [1], [0, 0, 1, 1], [], []>} : vector<64x4xf32>, vector<4x32xf32>, vector<64x32xf32> -> vector<64x32xf32>
    %c0_46 = arith.constant 0 : index
    %c0_47 = arith.constant 0 : index
    %139 = vector.load %arg9[%c0_46, %c0_47] : memref<1x32xf32, #tpu.memory_space<vmem>>, vector<1x32xf32>
    %140 = vector.broadcast %139 : vector<1x32xf32> to vector<64x32xf32>
    %141 = arith.addf %138, %140 : vector<64x32xf32>
    %142 = vector.shape_cast %141 : vector<64x32xf32> to vector<4x16x32xf32>
    %143 = vector.shape_cast %135 : vector<4x8x32xf32> to vector<32x32xf32>
    %c0_48 = arith.constant 0 : index
    %c0_49 = arith.constant 0 : index
    %144 = vector.load %arg10[%c0_48, %c0_49] : memref<32x64xf32, #tpu.memory_space<vmem>>, vector<32x64xf32>
    %cst_50 = arith.constant dense<0.000000e+00> : vector<32x64xf32>
    %145 = tpu.matmul %143, %144, %cst_50 {dimension_numbers = #tpu.dot_dimension_numbers<[1], [0], [0], [1], [0, 0, 1, 1], [], []>} : vector<32x32xf32>, vector<32x64xf32>, vector<32x64xf32> -> vector<32x64xf32>
    %c0_51 = arith.constant 0 : index
    %c0_52 = arith.constant 0 : index
    %146 = vector.load %arg11[%c0_51, %c0_52] : memref<1x64xf32, #tpu.memory_space<vmem>>, vector<1x64xf32>
    %147 = vector.broadcast %146 : vector<1x64xf32> to vector<32x64xf32>
    %148 = arith.addf %145, %147 : vector<32x64xf32>
    %149 = vector.shape_cast %148 : vector<32x64xf32> to vector<4x8x64xf32>
    %150 = vector.extract_strided_slice %149 {offsets = [0, 0, 0], sizes = [4, 8, 32], strides = [1, 1, 1]} : vector<4x8x64xf32> to vector<4x8x32xf32>
    %151 = vector.extract_strided_slice %149 {offsets = [0, 0, 32], sizes = [4, 8, 32], strides = [1, 1, 1]} : vector<4x8x64xf32> to vector<4x8x32xf32>
    %cst_53 = arith.constant 0.000000e+00 : f32
    %152 = vector.broadcast %cst_53 : f32 to vector<4x16x32xf32>
    %153 = vector.extract_strided_slice %142 {offsets = [0, 0, 0], sizes = [4, 16, 8], strides = [1, 1, 1]} : vector<4x16x32xf32> to vector<4x16x8xf32>
    %154 = vector.extract_strided_slice %150 {offsets = [0, 0, 0], sizes = [4, 8, 8], strides = [1, 1, 1]} : vector<4x8x32xf32> to vector<4x8x8xf32>
    "tpu.trace_start"() <{level = 10 : i32, message = "bqd,bkd->bqk"}> : () -> ()
    %cst_54 = arith.constant dense<0.000000e+00> : vector<4x16x8xf32>
    %155 = tpu.matmul %153, %154, %cst_54 {dimension_numbers = #tpu.dot_dimension_numbers<[2], [2], [1], [1], [0, 0, 0, 1, 1, 1], [0], [0]>} : vector<4x16x8xf32>, vector<4x8x8xf32>, vector<4x16x8xf32> -> vector<4x16x8xf32>
    "tpu.trace_stop"() : () -> ()
    %cst_55 = arith.constant 0.176776692 : f32
    %156 = vector.broadcast %cst_55 : f32 to vector<4x16x8xf32>
    %157 = arith.mulf %155, %156 : vector<4x16x8xf32>
    %cst_56 = arith.constant dense<0xFF800000> : vector<4x16xf32>
    %158 = vector.multi_reduction <maximumf>, %157, %cst_56 [2] : vector<4x16x8xf32> to vector<4x16xf32>
    %159 = vector.shape_cast %158 : vector<4x16xf32> to vector<4x16x1xf32>
    %160 = vector.broadcast %159 : vector<4x16x1xf32> to vector<4x16x8xf32>
    %161 = arith.subf %157, %160 : vector<4x16x8xf32>
    %162 = math.exp %161 : vector<4x16x8xf32>
    %cst_57 = arith.constant dense<0.000000e+00> : vector<4x16xf32>
    %163 = vector.multi_reduction <add>, %162, %cst_57 [2] : vector<4x16x8xf32> to vector<4x16xf32>
    %164 = vector.shape_cast %163 : vector<4x16xf32> to vector<4x16x1xf32>
    %165 = tpu.reciprocal %164 {approx = true} : vector<4x16x1xf32> -> vector<4x16x1xf32>
    %166 = vector.broadcast %165 : vector<4x16x1xf32> to vector<4x16x8xf32>
    %167 = arith.mulf %162, %166 : vector<4x16x8xf32>
    %168 = vector.broadcast %8 : vector<1x1x32xf32> to vector<4x8x32xf32>
    %169 = arith.mulf %151, %168 : vector<4x8x32xf32>
    "tpu.trace_start"() <{level = 10 : i32, message = "bqk,bkd->bqd"}> : () -> ()
    %cst_58 = arith.constant dense<0.000000e+00> : vector<4x16x32xf32>
    %170 = tpu.matmul %167, %169, %cst_58 {dimension_numbers = #tpu.dot_dimension_numbers<[2], [1], [1], [2], [0, 0, 0, 1, 1, 2], [0], [0]>} : vector<4x16x8xf32>, vector<4x8x32xf32>, vector<4x16x32xf32> -> vector<4x16x32xf32>
    "tpu.trace_stop"() : () -> ()
    %171 = arith.addf %152, %170 : vector<4x16x32xf32>
    %172 = vector.extract_strided_slice %142 {offsets = [0, 0, 8], sizes = [4, 16, 8], strides = [1, 1, 1]} : vector<4x16x32xf32> to vector<4x16x8xf32>
    %173 = vector.extract_strided_slice %150 {offsets = [0, 0, 8], sizes = [4, 8, 8], strides = [1, 1, 1]} : vector<4x8x32xf32> to vector<4x8x8xf32>
    "tpu.trace_start"() <{level = 10 : i32, message = "bqd,bkd->bqk"}> : () -> ()
    %cst_59 = arith.constant dense<0.000000e+00> : vector<4x16x8xf32>
    %174 = tpu.matmul %172, %173, %cst_59 {dimension_numbers = #tpu.dot_dimension_numbers<[2], [2], [1], [1], [0, 0, 0, 1, 1, 1], [0], [0]>} : vector<4x16x8xf32>, vector<4x8x8xf32>, vector<4x16x8xf32> -> vector<4x16x8xf32>
    "tpu.trace_stop"() : () -> ()
    %cst_60 = arith.constant 0.176776692 : f32
    %175 = vector.broadcast %cst_60 : f32 to vector<4x16x8xf32>
    %176 = arith.mulf %174, %175 : vector<4x16x8xf32>
    %cst_61 = arith.constant dense<0xFF800000> : vector<4x16xf32>
    %177 = vector.multi_reduction <maximumf>, %176, %cst_61 [2] : vector<4x16x8xf32> to vector<4x16xf32>
    %178 = vector.shape_cast %177 : vector<4x16xf32> to vector<4x16x1xf32>
    %179 = vector.broadcast %178 : vector<4x16x1xf32> to vector<4x16x8xf32>
    %180 = arith.subf %176, %179 : vector<4x16x8xf32>
    %181 = math.exp %180 : vector<4x16x8xf32>
    %cst_62 = arith.constant dense<0.000000e+00> : vector<4x16xf32>
    %182 = vector.multi_reduction <add>, %181, %cst_62 [2] : vector<4x16x8xf32> to vector<4x16xf32>
    %183 = vector.shape_cast %182 : vector<4x16xf32> to vector<4x16x1xf32>
    %184 = tpu.reciprocal %183 {approx = true} : vector<4x16x1xf32> -> vector<4x16x1xf32>
    %185 = vector.broadcast %184 : vector<4x16x1xf32> to vector<4x16x8xf32>
    %186 = arith.mulf %181, %185 : vector<4x16x8xf32>
    %187 = vector.broadcast %15 : vector<1x1x32xf32> to vector<4x8x32xf32>
    %188 = arith.mulf %151, %187 : vector<4x8x32xf32>
    "tpu.trace_start"() <{level = 10 : i32, message = "bqk,bkd->bqd"}> : () -> ()
    %cst_63 = arith.constant dense<0.000000e+00> : vector<4x16x32xf32>
    %189 = tpu.matmul %186, %188, %cst_63 {dimension_numbers = #tpu.dot_dimension_numbers<[2], [1], [1], [2], [0, 0, 0, 1, 1, 2], [0], [0]>} : vector<4x16x8xf32>, vector<4x8x32xf32>, vector<4x16x32xf32> -> vector<4x16x32xf32>
    "tpu.trace_stop"() : () -> ()
    %190 = arith.addf %171, %189 : vector<4x16x32xf32>
    %191 = vector.extract_strided_slice %142 {offsets = [0, 0, 16], sizes = [4, 16, 8], strides = [1, 1, 1]} : vector<4x16x32xf32> to vector<4x16x8xf32>
    %192 = vector.extract_strided_slice %150 {offsets = [0, 0, 16], sizes = [4, 8, 8], strides = [1, 1, 1]} : vector<4x8x32xf32> to vector<4x8x8xf32>
    "tpu.trace_start"() <{level = 10 : i32, message = "bqd,bkd->bqk"}> : () -> ()
    %cst_64 = arith.constant dense<0.000000e+00> : vector<4x16x8xf32>
    %193 = tpu.matmul %191, %192, %cst_64 {dimension_numbers = #tpu.dot_dimension_numbers<[2], [2], [1], [1], [0, 0, 0, 1, 1, 1], [0], [0]>} : vector<4x16x8xf32>, vector<4x8x8xf32>, vector<4x16x8xf32> -> vector<4x16x8xf32>
    "tpu.trace_stop"() : () -> ()
    %cst_65 = arith.constant 0.176776692 : f32
    %194 = vector.broadcast %cst_65 : f32 to vector<4x16x8xf32>
    %195 = arith.mulf %193, %194 : vector<4x16x8xf32>
    %cst_66 = arith.constant dense<0xFF800000> : vector<4x16xf32>
    %196 = vector.multi_reduction <maximumf>, %195, %cst_66 [2] : vector<4x16x8xf32> to vector<4x16xf32>
    %197 = vector.shape_cast %196 : vector<4x16xf32> to vector<4x16x1xf32>
    %198 = vector.broadcast %197 : vector<4x16x1xf32> to vector<4x16x8xf32>
    %199 = arith.subf %195, %198 : vector<4x16x8xf32>
    %200 = math.exp %199 : vector<4x16x8xf32>
    %cst_67 = arith.constant dense<0.000000e+00> : vector<4x16xf32>
    %201 = vector.multi_reduction <add>, %200, %cst_67 [2] : vector<4x16x8xf32> to vector<4x16xf32>
    %202 = vector.shape_cast %201 : vector<4x16xf32> to vector<4x16x1xf32>
    %203 = tpu.reciprocal %202 {approx = true} : vector<4x16x1xf32> -> vector<4x16x1xf32>
    %204 = vector.broadcast %203 : vector<4x16x1xf32> to vector<4x16x8xf32>
    %205 = arith.mulf %200, %204 : vector<4x16x8xf32>
    %206 = vector.broadcast %22 : vector<1x1x32xf32> to vector<4x8x32xf32>
    %207 = arith.mulf %151, %206 : vector<4x8x32xf32>
    "tpu.trace_start"() <{level = 10 : i32, message = "bqk,bkd->bqd"}> : () -> ()
    %cst_68 = arith.constant dense<0.000000e+00> : vector<4x16x32xf32>
    %208 = tpu.matmul %205, %207, %cst_68 {dimension_numbers = #tpu.dot_dimension_numbers<[2], [1], [1], [2], [0, 0, 0, 1, 1, 2], [0], [0]>} : vector<4x16x8xf32>, vector<4x8x32xf32>, vector<4x16x32xf32> -> vector<4x16x32xf32>
    "tpu.trace_stop"() : () -> ()
    %209 = arith.addf %190, %208 : vector<4x16x32xf32>
    %210 = vector.extract_strided_slice %142 {offsets = [0, 0, 24], sizes = [4, 16, 8], strides = [1, 1, 1]} : vector<4x16x32xf32> to vector<4x16x8xf32>
    %211 = vector.extract_strided_slice %150 {offsets = [0, 0, 24], sizes = [4, 8, 8], strides = [1, 1, 1]} : vector<4x8x32xf32> to vector<4x8x8xf32>
    "tpu.trace_start"() <{level = 10 : i32, message = "bqd,bkd->bqk"}> : () -> ()
    %cst_69 = arith.constant dense<0.000000e+00> : vector<4x16x8xf32>
    %212 = tpu.matmul %210, %211, %cst_69 {dimension_numbers = #tpu.dot_dimension_numbers<[2], [2], [1], [1], [0, 0, 0, 1, 1, 1], [0], [0]>} : vector<4x16x8xf32>, vector<4x8x8xf32>, vector<4x16x8xf32> -> vector<4x16x8xf32>
    "tpu.trace_stop"() : () -> ()
    %cst_70 = arith.constant 0.176776692 : f32
    %213 = vector.broadcast %cst_70 : f32 to vector<4x16x8xf32>
    %214 = arith.mulf %212, %213 : vector<4x16x8xf32>
    %cst_71 = arith.constant dense<0xFF800000> : vector<4x16xf32>
    %215 = vector.multi_reduction <maximumf>, %214, %cst_71 [2] : vector<4x16x8xf32> to vector<4x16xf32>
    %216 = vector.shape_cast %215 : vector<4x16xf32> to vector<4x16x1xf32>
    %217 = vector.broadcast %216 : vector<4x16x1xf32> to vector<4x16x8xf32>
    %218 = arith.subf %214, %217 : vector<4x16x8xf32>
    %219 = math.exp %218 : vector<4x16x8xf32>
    %cst_72 = arith.constant dense<0.000000e+00> : vector<4x16xf32>
    %220 = vector.multi_reduction <add>, %219, %cst_72 [2] : vector<4x16x8xf32> to vector<4x16xf32>
    %221 = vector.shape_cast %220 : vector<4x16xf32> to vector<4x16x1xf32>
    %222 = tpu.reciprocal %221 {approx = true} : vector<4x16x1xf32> -> vector<4x16x1xf32>
    %223 = vector.broadcast %222 : vector<4x16x1xf32> to vector<4x16x8xf32>
    %224 = arith.mulf %219, %223 : vector<4x16x8xf32>
    %225 = vector.broadcast %29 : vector<1x1x32xf32> to vector<4x8x32xf32>
    %226 = arith.mulf %151, %225 : vector<4x8x32xf32>
    "tpu.trace_start"() <{level = 10 : i32, message = "bqk,bkd->bqd"}> : () -> ()
    %cst_73 = arith.constant dense<0.000000e+00> : vector<4x16x32xf32>
    %227 = tpu.matmul %224, %226, %cst_73 {dimension_numbers = #tpu.dot_dimension_numbers<[2], [1], [1], [2], [0, 0, 0, 1, 1, 2], [0], [0]>} : vector<4x16x8xf32>, vector<4x8x32xf32>, vector<4x16x32xf32> -> vector<4x16x32xf32>
    "tpu.trace_stop"() : () -> ()
    %228 = arith.addf %209, %227 : vector<4x16x32xf32>
    %229 = arith.addf %142, %228 : vector<4x16x32xf32>
    %230 = vector.shape_cast %229 : vector<4x16x32xf32> to vector<64x32xf32>
    %c0_74 = arith.constant 0 : index
    %c0_75 = arith.constant 0 : index
    %231 = vector.load %arg12[%c0_74, %c0_75] : memref<32x32xf32, #tpu.memory_space<vmem>>, vector<32x32xf32>
    %cst_76 = arith.constant dense<0.000000e+00> : vector<64x32xf32>
    %232 = tpu.matmul %230, %231, %cst_76 {dimension_numbers = #tpu.dot_dimension_numbers<[1], [0], [0], [1], [0, 0, 1, 1], [], []>} : vector<64x32xf32>, vector<32x32xf32>, vector<64x32xf32> -> vector<64x32xf32>
    %c0_77 = arith.constant 0 : index
    %c0_78 = arith.constant 0 : index
    %233 = vector.load %arg13[%c0_77, %c0_78] : memref<1x32xf32, #tpu.memory_space<vmem>>, vector<1x32xf32>
    %234 = vector.broadcast %233 : vector<1x32xf32> to vector<64x32xf32>
    %235 = arith.addf %232, %234 : vector<64x32xf32>
    %cst_79 = arith.constant 0.000000e+00 : f32
    %236 = vector.broadcast %cst_79 : f32 to vector<64x32xf32>
    %237 = arith.maximumf %235, %236 : vector<64x32xf32>
    %238 = arith.addf %230, %237 : vector<64x32xf32>
    %239 = vector.shape_cast %238 : vector<64x32xf32> to vector<4x16x32xf32>
    %c0_80 = arith.constant 0 : index
    %c0_81 = arith.constant 0 : index
    %240 = vector.load %arg33[%c0_80, %c0_81] : memref<8x32xf32, #tpu.memory_space<vmem>>, vector<8x32xf32>
    %c0_82 = arith.constant 0 : index
    %c0_83 = arith.constant 0 : index
    %241 = vector.load %arg14[%c0_82, %c0_83] : memref<32x32xf32, #tpu.memory_space<vmem>>, vector<32x32xf32>
    %cst_84 = arith.constant dense<0.000000e+00> : vector<8x32xf32>
    %242 = tpu.matmul %240, %241, %cst_84 {dimension_numbers = #tpu.dot_dimension_numbers<[1], [0], [0], [1], [0, 0, 1, 1], [], []>} : vector<8x32xf32>, vector<32x32xf32>, vector<8x32xf32> -> vector<8x32xf32>
    %c0_85 = arith.constant 0 : index
    %c0_86 = arith.constant 0 : index
    %243 = vector.load %arg15[%c0_85, %c0_86] : memref<1x32xf32, #tpu.memory_space<vmem>>, vector<1x32xf32>
    %244 = vector.broadcast %243 : vector<1x32xf32> to vector<8x32xf32>
    %245 = arith.addf %242, %244 : vector<8x32xf32>
    %246 = vector.shape_cast %245 : vector<8x32xf32> to vector<1x8x32xf32>
    %247 = vector.shape_cast %246 : vector<1x8x32xf32> to vector<1x8x32xf32>
    %248 = vector.broadcast %247 : vector<1x8x32xf32> to vector<4x8x32xf32>
    %249 = vector.shape_cast %239 : vector<4x16x32xf32> to vector<64x32xf32>
    %c0_87 = arith.constant 0 : index
    %c0_88 = arith.constant 0 : index
    %250 = vector.load %arg16[%c0_87, %c0_88] : memref<32x64xf32, #tpu.memory_space<vmem>>, vector<32x64xf32>
    %cst_89 = arith.constant dense<0.000000e+00> : vector<64x64xf32>
    %251 = tpu.matmul %249, %250, %cst_89 {dimension_numbers = #tpu.dot_dimension_numbers<[1], [0], [0], [1], [0, 0, 1, 1], [], []>} : vector<64x32xf32>, vector<32x64xf32>, vector<64x64xf32> -> vector<64x64xf32>
    %c0_90 = arith.constant 0 : index
    %c0_91 = arith.constant 0 : index
    %252 = vector.load %arg17[%c0_90, %c0_91] : memref<1x64xf32, #tpu.memory_space<vmem>>, vector<1x64xf32>
    %253 = vector.broadcast %252 : vector<1x64xf32> to vector<64x64xf32>
    %254 = arith.addf %251, %253 : vector<64x64xf32>
    %255 = vector.shape_cast %254 : vector<64x64xf32> to vector<4x16x64xf32>
    %256 = vector.extract_strided_slice %255 {offsets = [0, 0, 0], sizes = [4, 16, 32], strides = [1, 1, 1]} : vector<4x16x64xf32> to vector<4x16x32xf32>
    %257 = vector.extract_strided_slice %255 {offsets = [0, 0, 32], sizes = [4, 16, 32], strides = [1, 1, 1]} : vector<4x16x64xf32> to vector<4x16x32xf32>
    %cst_92 = arith.constant 0.000000e+00 : f32
    %258 = vector.broadcast %cst_92 : f32 to vector<4x8x32xf32>
    %259 = vector.extract_strided_slice %248 {offsets = [0, 0, 0], sizes = [4, 8, 8], strides = [1, 1, 1]} : vector<4x8x32xf32> to vector<4x8x8xf32>
    %260 = vector.extract_strided_slice %256 {offsets = [0, 0, 0], sizes = [4, 16, 8], strides = [1, 1, 1]} : vector<4x16x32xf32> to vector<4x16x8xf32>
    "tpu.trace_start"() <{level = 10 : i32, message = "bqd,bkd->bqk"}> : () -> ()
    %cst_93 = arith.constant dense<0.000000e+00> : vector<4x8x16xf32>
    %261 = tpu.matmul %259, %260, %cst_93 {dimension_numbers = #tpu.dot_dimension_numbers<[2], [2], [1], [1], [0, 0, 0, 1, 1, 1], [0], [0]>} : vector<4x8x8xf32>, vector<4x16x8xf32>, vector<4x8x16xf32> -> vector<4x8x16xf32>
    "tpu.trace_stop"() : () -> ()
    %cst_94 = arith.constant 0.176776692 : f32
    %262 = vector.broadcast %cst_94 : f32 to vector<4x8x16xf32>
    %263 = arith.mulf %261, %262 : vector<4x8x16xf32>
    %cst_95 = arith.constant dense<0xFF800000> : vector<4x8xf32>
    %264 = vector.multi_reduction <maximumf>, %263, %cst_95 [2] : vector<4x8x16xf32> to vector<4x8xf32>
    %265 = vector.shape_cast %264 : vector<4x8xf32> to vector<4x8x1xf32>
    %266 = vector.broadcast %265 : vector<4x8x1xf32> to vector<4x8x16xf32>
    %267 = arith.subf %263, %266 : vector<4x8x16xf32>
    %268 = math.exp %267 : vector<4x8x16xf32>
    %cst_96 = arith.constant dense<0.000000e+00> : vector<4x8xf32>
    %269 = vector.multi_reduction <add>, %268, %cst_96 [2] : vector<4x8x16xf32> to vector<4x8xf32>
    %270 = vector.shape_cast %269 : vector<4x8xf32> to vector<4x8x1xf32>
    %271 = tpu.reciprocal %270 {approx = true} : vector<4x8x1xf32> -> vector<4x8x1xf32>
    %272 = vector.broadcast %271 : vector<4x8x1xf32> to vector<4x8x16xf32>
    %273 = arith.mulf %268, %272 : vector<4x8x16xf32>
    %274 = vector.broadcast %8 : vector<1x1x32xf32> to vector<4x16x32xf32>
    %275 = arith.mulf %257, %274 : vector<4x16x32xf32>
    "tpu.trace_start"() <{level = 10 : i32, message = "bqk,bkd->bqd"}> : () -> ()
    %cst_97 = arith.constant dense<0.000000e+00> : vector<4x8x32xf32>
    %276 = tpu.matmul %273, %275, %cst_97 {dimension_numbers = #tpu.dot_dimension_numbers<[2], [1], [1], [2], [0, 0, 0, 1, 1, 2], [0], [0]>} : vector<4x8x16xf32>, vector<4x16x32xf32>, vector<4x8x32xf32> -> vector<4x8x32xf32>
    "tpu.trace_stop"() : () -> ()
    %277 = arith.addf %258, %276 : vector<4x8x32xf32>
    %278 = vector.extract_strided_slice %248 {offsets = [0, 0, 8], sizes = [4, 8, 8], strides = [1, 1, 1]} : vector<4x8x32xf32> to vector<4x8x8xf32>
    %279 = vector.extract_strided_slice %256 {offsets = [0, 0, 8], sizes = [4, 16, 8], strides = [1, 1, 1]} : vector<4x16x32xf32> to vector<4x16x8xf32>
    "tpu.trace_start"() <{level = 10 : i32, message = "bqd,bkd->bqk"}> : () -> ()
    %cst_98 = arith.constant dense<0.000000e+00> : vector<4x8x16xf32>
    %280 = tpu.matmul %278, %279, %cst_98 {dimension_numbers = #tpu.dot_dimension_numbers<[2], [2], [1], [1], [0, 0, 0, 1, 1, 1], [0], [0]>} : vector<4x8x8xf32>, vector<4x16x8xf32>, vector<4x8x16xf32> -> vector<4x8x16xf32>
    "tpu.trace_stop"() : () -> ()
    %cst_99 = arith.constant 0.176776692 : f32
    %281 = vector.broadcast %cst_99 : f32 to vector<4x8x16xf32>
    %282 = arith.mulf %280, %281 : vector<4x8x16xf32>
    %cst_100 = arith.constant dense<0xFF800000> : vector<4x8xf32>
    %283 = vector.multi_reduction <maximumf>, %282, %cst_100 [2] : vector<4x8x16xf32> to vector<4x8xf32>
    %284 = vector.shape_cast %283 : vector<4x8xf32> to vector<4x8x1xf32>
    %285 = vector.broadcast %284 : vector<4x8x1xf32> to vector<4x8x16xf32>
    %286 = arith.subf %282, %285 : vector<4x8x16xf32>
    %287 = math.exp %286 : vector<4x8x16xf32>
    %cst_101 = arith.constant dense<0.000000e+00> : vector<4x8xf32>
    %288 = vector.multi_reduction <add>, %287, %cst_101 [2] : vector<4x8x16xf32> to vector<4x8xf32>
    %289 = vector.shape_cast %288 : vector<4x8xf32> to vector<4x8x1xf32>
    %290 = tpu.reciprocal %289 {approx = true} : vector<4x8x1xf32> -> vector<4x8x1xf32>
    %291 = vector.broadcast %290 : vector<4x8x1xf32> to vector<4x8x16xf32>
    %292 = arith.mulf %287, %291 : vector<4x8x16xf32>
    %293 = vector.broadcast %15 : vector<1x1x32xf32> to vector<4x16x32xf32>
    %294 = arith.mulf %257, %293 : vector<4x16x32xf32>
    "tpu.trace_start"() <{level = 10 : i32, message = "bqk,bkd->bqd"}> : () -> ()
    %cst_102 = arith.constant dense<0.000000e+00> : vector<4x8x32xf32>
    %295 = tpu.matmul %292, %294, %cst_102 {dimension_numbers = #tpu.dot_dimension_numbers<[2], [1], [1], [2], [0, 0, 0, 1, 1, 2], [0], [0]>} : vector<4x8x16xf32>, vector<4x16x32xf32>, vector<4x8x32xf32> -> vector<4x8x32xf32>
    "tpu.trace_stop"() : () -> ()
    %296 = arith.addf %277, %295 : vector<4x8x32xf32>
    %297 = vector.extract_strided_slice %248 {offsets = [0, 0, 16], sizes = [4, 8, 8], strides = [1, 1, 1]} : vector<4x8x32xf32> to vector<4x8x8xf32>
    %298 = vector.extract_strided_slice %256 {offsets = [0, 0, 16], sizes = [4, 16, 8], strides = [1, 1, 1]} : vector<4x16x32xf32> to vector<4x16x8xf32>
    "tpu.trace_start"() <{level = 10 : i32, message = "bqd,bkd->bqk"}> : () -> ()
    %cst_103 = arith.constant dense<0.000000e+00> : vector<4x8x16xf32>
    %299 = tpu.matmul %297, %298, %cst_103 {dimension_numbers = #tpu.dot_dimension_numbers<[2], [2], [1], [1], [0, 0, 0, 1, 1, 1], [0], [0]>} : vector<4x8x8xf32>, vector<4x16x8xf32>, vector<4x8x16xf32> -> vector<4x8x16xf32>
    "tpu.trace_stop"() : () -> ()
    %cst_104 = arith.constant 0.176776692 : f32
    %300 = vector.broadcast %cst_104 : f32 to vector<4x8x16xf32>
    %301 = arith.mulf %299, %300 : vector<4x8x16xf32>
    %cst_105 = arith.constant dense<0xFF800000> : vector<4x8xf32>
    %302 = vector.multi_reduction <maximumf>, %301, %cst_105 [2] : vector<4x8x16xf32> to vector<4x8xf32>
    %303 = vector.shape_cast %302 : vector<4x8xf32> to vector<4x8x1xf32>
    %304 = vector.broadcast %303 : vector<4x8x1xf32> to vector<4x8x16xf32>
    %305 = arith.subf %301, %304 : vector<4x8x16xf32>
    %306 = math.exp %305 : vector<4x8x16xf32>
    %cst_106 = arith.constant dense<0.000000e+00> : vector<4x8xf32>
    %307 = vector.multi_reduction <add>, %306, %cst_106 [2] : vector<4x8x16xf32> to vector<4x8xf32>
    %308 = vector.shape_cast %307 : vector<4x8xf32> to vector<4x8x1xf32>
    %309 = tpu.reciprocal %308 {approx = true} : vector<4x8x1xf32> -> vector<4x8x1xf32>
    %310 = vector.broadcast %309 : vector<4x8x1xf32> to vector<4x8x16xf32>
    %311 = arith.mulf %306, %310 : vector<4x8x16xf32>
    %312 = vector.broadcast %22 : vector<1x1x32xf32> to vector<4x16x32xf32>
    %313 = arith.mulf %257, %312 : vector<4x16x32xf32>
    "tpu.trace_start"() <{level = 10 : i32, message = "bqk,bkd->bqd"}> : () -> ()
    %cst_107 = arith.constant dense<0.000000e+00> : vector<4x8x32xf32>
    %314 = tpu.matmul %311, %313, %cst_107 {dimension_numbers = #tpu.dot_dimension_numbers<[2], [1], [1], [2], [0, 0, 0, 1, 1, 2], [0], [0]>} : vector<4x8x16xf32>, vector<4x16x32xf32>, vector<4x8x32xf32> -> vector<4x8x32xf32>
    "tpu.trace_stop"() : () -> ()
    %315 = arith.addf %296, %314 : vector<4x8x32xf32>
    %316 = vector.extract_strided_slice %248 {offsets = [0, 0, 24], sizes = [4, 8, 8], strides = [1, 1, 1]} : vector<4x8x32xf32> to vector<4x8x8xf32>
    %317 = vector.extract_strided_slice %256 {offsets = [0, 0, 24], sizes = [4, 16, 8], strides = [1, 1, 1]} : vector<4x16x32xf32> to vector<4x16x8xf32>
    "tpu.trace_start"() <{level = 10 : i32, message = "bqd,bkd->bqk"}> : () -> ()
    %cst_108 = arith.constant dense<0.000000e+00> : vector<4x8x16xf32>
    %318 = tpu.matmul %316, %317, %cst_108 {dimension_numbers = #tpu.dot_dimension_numbers<[2], [2], [1], [1], [0, 0, 0, 1, 1, 1], [0], [0]>} : vector<4x8x8xf32>, vector<4x16x8xf32>, vector<4x8x16xf32> -> vector<4x8x16xf32>
    "tpu.trace_stop"() : () -> ()
    %cst_109 = arith.constant 0.176776692 : f32
    %319 = vector.broadcast %cst_109 : f32 to vector<4x8x16xf32>
    %320 = arith.mulf %318, %319 : vector<4x8x16xf32>
    %cst_110 = arith.constant dense<0xFF800000> : vector<4x8xf32>
    %321 = vector.multi_reduction <maximumf>, %320, %cst_110 [2] : vector<4x8x16xf32> to vector<4x8xf32>
    %322 = vector.shape_cast %321 : vector<4x8xf32> to vector<4x8x1xf32>
    %323 = vector.broadcast %322 : vector<4x8x1xf32> to vector<4x8x16xf32>
    %324 = arith.subf %320, %323 : vector<4x8x16xf32>
    %325 = math.exp %324 : vector<4x8x16xf32>
    %cst_111 = arith.constant dense<0.000000e+00> : vector<4x8xf32>
    %326 = vector.multi_reduction <add>, %325, %cst_111 [2] : vector<4x8x16xf32> to vector<4x8xf32>
    %327 = vector.shape_cast %326 : vector<4x8xf32> to vector<4x8x1xf32>
    %328 = tpu.reciprocal %327 {approx = true} : vector<4x8x1xf32> -> vector<4x8x1xf32>
    %329 = vector.broadcast %328 : vector<4x8x1xf32> to vector<4x8x16xf32>
    %330 = arith.mulf %325, %329 : vector<4x8x16xf32>
    %331 = vector.broadcast %29 : vector<1x1x32xf32> to vector<4x16x32xf32>
    %332 = arith.mulf %257, %331 : vector<4x16x32xf32>
    "tpu.trace_start"() <{level = 10 : i32, message = "bqk,bkd->bqd"}> : () -> ()
    %cst_112 = arith.constant dense<0.000000e+00> : vector<4x8x32xf32>
    %333 = tpu.matmul %330, %332, %cst_112 {dimension_numbers = #tpu.dot_dimension_numbers<[2], [1], [1], [2], [0, 0, 0, 1, 1, 2], [0], [0]>} : vector<4x8x16xf32>, vector<4x16x32xf32>, vector<4x8x32xf32> -> vector<4x8x32xf32>
    "tpu.trace_stop"() : () -> ()
    %334 = arith.addf %315, %333 : vector<4x8x32xf32>
    %335 = arith.addf %248, %334 : vector<4x8x32xf32>
    %336 = vector.shape_cast %335 : vector<4x8x32xf32> to vector<32x32xf32>
    %c0_113 = arith.constant 0 : index
    %c0_114 = arith.constant 0 : index
    %337 = vector.load %arg18[%c0_113, %c0_114] : memref<32x32xf32, #tpu.memory_space<vmem>>, vector<32x32xf32>
    %cst_115 = arith.constant dense<0.000000e+00> : vector<32x32xf32>
    %338 = tpu.matmul %336, %337, %cst_115 {dimension_numbers = #tpu.dot_dimension_numbers<[1], [0], [0], [1], [0, 0, 1, 1], [], []>} : vector<32x32xf32>, vector<32x32xf32>, vector<32x32xf32> -> vector<32x32xf32>
    %c0_116 = arith.constant 0 : index
    %c0_117 = arith.constant 0 : index
    %339 = vector.load %arg19[%c0_116, %c0_117] : memref<1x32xf32, #tpu.memory_space<vmem>>, vector<1x32xf32>
    %340 = vector.broadcast %339 : vector<1x32xf32> to vector<32x32xf32>
    %341 = arith.addf %338, %340 : vector<32x32xf32>
    %cst_118 = arith.constant 0.000000e+00 : f32
    %342 = vector.broadcast %cst_118 : f32 to vector<32x32xf32>
    %343 = arith.maximumf %341, %342 : vector<32x32xf32>
    %344 = arith.addf %336, %343 : vector<32x32xf32>
    %345 = vector.shape_cast %344 : vector<32x32xf32> to vector<4x8x32xf32>
    %346 = vector.shape_cast %239 : vector<4x16x32xf32> to vector<64x32xf32>
    %c0_119 = arith.constant 0 : index
    %c0_120 = arith.constant 0 : index
    %347 = vector.load %arg20[%c0_119, %c0_120] : memref<32x32xf32, #tpu.memory_space<vmem>>, vector<32x32xf32>
    %cst_121 = arith.constant dense<0.000000e+00> : vector<64x32xf32>
    %348 = tpu.matmul %346, %347, %cst_121 {dimension_numbers = #tpu.dot_dimension_numbers<[1], [0], [0], [1], [0, 0, 1, 1], [], []>} : vector<64x32xf32>, vector<32x32xf32>, vector<64x32xf32> -> vector<64x32xf32>
    %c0_122 = arith.constant 0 : index
    %c0_123 = arith.constant 0 : index
    %349 = vector.load %arg21[%c0_122, %c0_123] : memref<1x32xf32, #tpu.memory_space<vmem>>, vector<1x32xf32>
    %350 = vector.broadcast %349 : vector<1x32xf32> to vector<64x32xf32>
    %351 = arith.addf %348, %350 : vector<64x32xf32>
    %352 = vector.shape_cast %351 : vector<64x32xf32> to vector<4x16x32xf32>
    %353 = vector.shape_cast %345 : vector<4x8x32xf32> to vector<32x32xf32>
    %c0_124 = arith.constant 0 : index
    %c0_125 = arith.constant 0 : index
    %354 = vector.load %arg22[%c0_124, %c0_125] : memref<32x64xf32, #tpu.memory_space<vmem>>, vector<32x64xf32>
    %cst_126 = arith.constant dense<0.000000e+00> : vector<32x64xf32>
    %355 = tpu.matmul %353, %354, %cst_126 {dimension_numbers = #tpu.dot_dimension_numbers<[1], [0], [0], [1], [0, 0, 1, 1], [], []>} : vector<32x32xf32>, vector<32x64xf32>, vector<32x64xf32> -> vector<32x64xf32>
    %c0_127 = arith.constant 0 : index
    %c0_128 = arith.constant 0 : index
    %356 = vector.load %arg23[%c0_127, %c0_128] : memref<1x64xf32, #tpu.memory_space<vmem>>, vector<1x64xf32>
    %357 = vector.broadcast %356 : vector<1x64xf32> to vector<32x64xf32>
    %358 = arith.addf %355, %357 : vector<32x64xf32>
    %359 = vector.shape_cast %358 : vector<32x64xf32> to vector<4x8x64xf32>
    %360 = vector.extract_strided_slice %359 {offsets = [0, 0, 0], sizes = [4, 8, 32], strides = [1, 1, 1]} : vector<4x8x64xf32> to vector<4x8x32xf32>
    %361 = vector.extract_strided_slice %359 {offsets = [0, 0, 32], sizes = [4, 8, 32], strides = [1, 1, 1]} : vector<4x8x64xf32> to vector<4x8x32xf32>
    %cst_129 = arith.constant 0.000000e+00 : f32
    %362 = vector.broadcast %cst_129 : f32 to vector<4x16x32xf32>
    %363 = vector.extract_strided_slice %352 {offsets = [0, 0, 0], sizes = [4, 16, 8], strides = [1, 1, 1]} : vector<4x16x32xf32> to vector<4x16x8xf32>
    %364 = vector.extract_strided_slice %360 {offsets = [0, 0, 0], sizes = [4, 8, 8], strides = [1, 1, 1]} : vector<4x8x32xf32> to vector<4x8x8xf32>
    "tpu.trace_start"() <{level = 10 : i32, message = "bqd,bkd->bqk"}> : () -> ()
    %cst_130 = arith.constant dense<0.000000e+00> : vector<4x16x8xf32>
    %365 = tpu.matmul %363, %364, %cst_130 {dimension_numbers = #tpu.dot_dimension_numbers<[2], [2], [1], [1], [0, 0, 0, 1, 1, 1], [0], [0]>} : vector<4x16x8xf32>, vector<4x8x8xf32>, vector<4x16x8xf32> -> vector<4x16x8xf32>
    "tpu.trace_stop"() : () -> ()
    %cst_131 = arith.constant 0.176776692 : f32
    %366 = vector.broadcast %cst_131 : f32 to vector<4x16x8xf32>
    %367 = arith.mulf %365, %366 : vector<4x16x8xf32>
    %cst_132 = arith.constant dense<0xFF800000> : vector<4x16xf32>
    %368 = vector.multi_reduction <maximumf>, %367, %cst_132 [2] : vector<4x16x8xf32> to vector<4x16xf32>
    %369 = vector.shape_cast %368 : vector<4x16xf32> to vector<4x16x1xf32>
    %370 = vector.broadcast %369 : vector<4x16x1xf32> to vector<4x16x8xf32>
    %371 = arith.subf %367, %370 : vector<4x16x8xf32>
    %372 = math.exp %371 : vector<4x16x8xf32>
    %cst_133 = arith.constant dense<0.000000e+00> : vector<4x16xf32>
    %373 = vector.multi_reduction <add>, %372, %cst_133 [2] : vector<4x16x8xf32> to vector<4x16xf32>
    %374 = vector.shape_cast %373 : vector<4x16xf32> to vector<4x16x1xf32>
    %375 = tpu.reciprocal %374 {approx = true} : vector<4x16x1xf32> -> vector<4x16x1xf32>
    %376 = vector.broadcast %375 : vector<4x16x1xf32> to vector<4x16x8xf32>
    %377 = arith.mulf %372, %376 : vector<4x16x8xf32>
    %378 = vector.broadcast %8 : vector<1x1x32xf32> to vector<4x8x32xf32>
    %379 = arith.mulf %361, %378 : vector<4x8x32xf32>
    "tpu.trace_start"() <{level = 10 : i32, message = "bqk,bkd->bqd"}> : () -> ()
    %cst_134 = arith.constant dense<0.000000e+00> : vector<4x16x32xf32>
    %380 = tpu.matmul %377, %379, %cst_134 {dimension_numbers = #tpu.dot_dimension_numbers<[2], [1], [1], [2], [0, 0, 0, 1, 1, 2], [0], [0]>} : vector<4x16x8xf32>, vector<4x8x32xf32>, vector<4x16x32xf32> -> vector<4x16x32xf32>
    "tpu.trace_stop"() : () -> ()
    %381 = arith.addf %362, %380 : vector<4x16x32xf32>
    %382 = vector.extract_strided_slice %352 {offsets = [0, 0, 8], sizes = [4, 16, 8], strides = [1, 1, 1]} : vector<4x16x32xf32> to vector<4x16x8xf32>
    %383 = vector.extract_strided_slice %360 {offsets = [0, 0, 8], sizes = [4, 8, 8], strides = [1, 1, 1]} : vector<4x8x32xf32> to vector<4x8x8xf32>
    "tpu.trace_start"() <{level = 10 : i32, message = "bqd,bkd->bqk"}> : () -> ()
    %cst_135 = arith.constant dense<0.000000e+00> : vector<4x16x8xf32>
    %384 = tpu.matmul %382, %383, %cst_135 {dimension_numbers = #tpu.dot_dimension_numbers<[2], [2], [1], [1], [0, 0, 0, 1, 1, 1], [0], [0]>} : vector<4x16x8xf32>, vector<4x8x8xf32>, vector<4x16x8xf32> -> vector<4x16x8xf32>
    "tpu.trace_stop"() : () -> ()
    %cst_136 = arith.constant 0.176776692 : f32
    %385 = vector.broadcast %cst_136 : f32 to vector<4x16x8xf32>
    %386 = arith.mulf %384, %385 : vector<4x16x8xf32>
    %cst_137 = arith.constant dense<0xFF800000> : vector<4x16xf32>
    %387 = vector.multi_reduction <maximumf>, %386, %cst_137 [2] : vector<4x16x8xf32> to vector<4x16xf32>
    %388 = vector.shape_cast %387 : vector<4x16xf32> to vector<4x16x1xf32>
    %389 = vector.broadcast %388 : vector<4x16x1xf32> to vector<4x16x8xf32>
    %390 = arith.subf %386, %389 : vector<4x16x8xf32>
    %391 = math.exp %390 : vector<4x16x8xf32>
    %cst_138 = arith.constant dense<0.000000e+00> : vector<4x16xf32>
    %392 = vector.multi_reduction <add>, %391, %cst_138 [2] : vector<4x16x8xf32> to vector<4x16xf32>
    %393 = vector.shape_cast %392 : vector<4x16xf32> to vector<4x16x1xf32>
    %394 = tpu.reciprocal %393 {approx = true} : vector<4x16x1xf32> -> vector<4x16x1xf32>
    %395 = vector.broadcast %394 : vector<4x16x1xf32> to vector<4x16x8xf32>
    %396 = arith.mulf %391, %395 : vector<4x16x8xf32>
    %397 = vector.broadcast %15 : vector<1x1x32xf32> to vector<4x8x32xf32>
    %398 = arith.mulf %361, %397 : vector<4x8x32xf32>
    "tpu.trace_start"() <{level = 10 : i32, message = "bqk,bkd->bqd"}> : () -> ()
    %cst_139 = arith.constant dense<0.000000e+00> : vector<4x16x32xf32>
    %399 = tpu.matmul %396, %398, %cst_139 {dimension_numbers = #tpu.dot_dimension_numbers<[2], [1], [1], [2], [0, 0, 0, 1, 1, 2], [0], [0]>} : vector<4x16x8xf32>, vector<4x8x32xf32>, vector<4x16x32xf32> -> vector<4x16x32xf32>
    "tpu.trace_stop"() : () -> ()
    %400 = arith.addf %381, %399 : vector<4x16x32xf32>
    %401 = vector.extract_strided_slice %352 {offsets = [0, 0, 16], sizes = [4, 16, 8], strides = [1, 1, 1]} : vector<4x16x32xf32> to vector<4x16x8xf32>
    %402 = vector.extract_strided_slice %360 {offsets = [0, 0, 16], sizes = [4, 8, 8], strides = [1, 1, 1]} : vector<4x8x32xf32> to vector<4x8x8xf32>
    "tpu.trace_start"() <{level = 10 : i32, message = "bqd,bkd->bqk"}> : () -> ()
    %cst_140 = arith.constant dense<0.000000e+00> : vector<4x16x8xf32>
    %403 = tpu.matmul %401, %402, %cst_140 {dimension_numbers = #tpu.dot_dimension_numbers<[2], [2], [1], [1], [0, 0, 0, 1, 1, 1], [0], [0]>} : vector<4x16x8xf32>, vector<4x8x8xf32>, vector<4x16x8xf32> -> vector<4x16x8xf32>
    "tpu.trace_stop"() : () -> ()
    %cst_141 = arith.constant 0.176776692 : f32
    %404 = vector.broadcast %cst_141 : f32 to vector<4x16x8xf32>
    %405 = arith.mulf %403, %404 : vector<4x16x8xf32>
    %cst_142 = arith.constant dense<0xFF800000> : vector<4x16xf32>
    %406 = vector.multi_reduction <maximumf>, %405, %cst_142 [2] : vector<4x16x8xf32> to vector<4x16xf32>
    %407 = vector.shape_cast %406 : vector<4x16xf32> to vector<4x16x1xf32>
    %408 = vector.broadcast %407 : vector<4x16x1xf32> to vector<4x16x8xf32>
    %409 = arith.subf %405, %408 : vector<4x16x8xf32>
    %410 = math.exp %409 : vector<4x16x8xf32>
    %cst_143 = arith.constant dense<0.000000e+00> : vector<4x16xf32>
    %411 = vector.multi_reduction <add>, %410, %cst_143 [2] : vector<4x16x8xf32> to vector<4x16xf32>
    %412 = vector.shape_cast %411 : vector<4x16xf32> to vector<4x16x1xf32>
    %413 = tpu.reciprocal %412 {approx = true} : vector<4x16x1xf32> -> vector<4x16x1xf32>
    %414 = vector.broadcast %413 : vector<4x16x1xf32> to vector<4x16x8xf32>
    %415 = arith.mulf %410, %414 : vector<4x16x8xf32>
    %416 = vector.broadcast %22 : vector<1x1x32xf32> to vector<4x8x32xf32>
    %417 = arith.mulf %361, %416 : vector<4x8x32xf32>
    "tpu.trace_start"() <{level = 10 : i32, message = "bqk,bkd->bqd"}> : () -> ()
    %cst_144 = arith.constant dense<0.000000e+00> : vector<4x16x32xf32>
    %418 = tpu.matmul %415, %417, %cst_144 {dimension_numbers = #tpu.dot_dimension_numbers<[2], [1], [1], [2], [0, 0, 0, 1, 1, 2], [0], [0]>} : vector<4x16x8xf32>, vector<4x8x32xf32>, vector<4x16x32xf32> -> vector<4x16x32xf32>
    "tpu.trace_stop"() : () -> ()
    %419 = arith.addf %400, %418 : vector<4x16x32xf32>
    %420 = vector.extract_strided_slice %352 {offsets = [0, 0, 24], sizes = [4, 16, 8], strides = [1, 1, 1]} : vector<4x16x32xf32> to vector<4x16x8xf32>
    %421 = vector.extract_strided_slice %360 {offsets = [0, 0, 24], sizes = [4, 8, 8], strides = [1, 1, 1]} : vector<4x8x32xf32> to vector<4x8x8xf32>
    "tpu.trace_start"() <{level = 10 : i32, message = "bqd,bkd->bqk"}> : () -> ()
    %cst_145 = arith.constant dense<0.000000e+00> : vector<4x16x8xf32>
    %422 = tpu.matmul %420, %421, %cst_145 {dimension_numbers = #tpu.dot_dimension_numbers<[2], [2], [1], [1], [0, 0, 0, 1, 1, 1], [0], [0]>} : vector<4x16x8xf32>, vector<4x8x8xf32>, vector<4x16x8xf32> -> vector<4x16x8xf32>
    "tpu.trace_stop"() : () -> ()
    %cst_146 = arith.constant 0.176776692 : f32
    %423 = vector.broadcast %cst_146 : f32 to vector<4x16x8xf32>
    %424 = arith.mulf %422, %423 : vector<4x16x8xf32>
    %cst_147 = arith.constant dense<0xFF800000> : vector<4x16xf32>
    %425 = vector.multi_reduction <maximumf>, %424, %cst_147 [2] : vector<4x16x8xf32> to vector<4x16xf32>
    %426 = vector.shape_cast %425 : vector<4x16xf32> to vector<4x16x1xf32>
    %427 = vector.broadcast %426 : vector<4x16x1xf32> to vector<4x16x8xf32>
    %428 = arith.subf %424, %427 : vector<4x16x8xf32>
    %429 = math.exp %428 : vector<4x16x8xf32>
    %cst_148 = arith.constant dense<0.000000e+00> : vector<4x16xf32>
    %430 = vector.multi_reduction <add>, %429, %cst_148 [2] : vector<4x16x8xf32> to vector<4x16xf32>
    %431 = vector.shape_cast %430 : vector<4x16xf32> to vector<4x16x1xf32>
    %432 = tpu.reciprocal %431 {approx = true} : vector<4x16x1xf32> -> vector<4x16x1xf32>
    %433 = vector.broadcast %432 : vector<4x16x1xf32> to vector<4x16x8xf32>
    %434 = arith.mulf %429, %433 : vector<4x16x8xf32>
    %435 = vector.broadcast %29 : vector<1x1x32xf32> to vector<4x8x32xf32>
    %436 = arith.mulf %361, %435 : vector<4x8x32xf32>
    "tpu.trace_start"() <{level = 10 : i32, message = "bqk,bkd->bqd"}> : () -> ()
    %cst_149 = arith.constant dense<0.000000e+00> : vector<4x16x32xf32>
    %437 = tpu.matmul %434, %436, %cst_149 {dimension_numbers = #tpu.dot_dimension_numbers<[2], [1], [1], [2], [0, 0, 0, 1, 1, 2], [0], [0]>} : vector<4x16x8xf32>, vector<4x8x32xf32>, vector<4x16x32xf32> -> vector<4x16x32xf32>
    "tpu.trace_stop"() : () -> ()
    %438 = arith.addf %419, %437 : vector<4x16x32xf32>
    %439 = arith.addf %352, %438 : vector<4x16x32xf32>
    %440 = vector.shape_cast %439 : vector<4x16x32xf32> to vector<64x32xf32>
    %c0_150 = arith.constant 0 : index
    %c0_151 = arith.constant 0 : index
    %441 = vector.load %arg24[%c0_150, %c0_151] : memref<32x32xf32, #tpu.memory_space<vmem>>, vector<32x32xf32>
    %cst_152 = arith.constant dense<0.000000e+00> : vector<64x32xf32>
    %442 = tpu.matmul %440, %441, %cst_152 {dimension_numbers = #tpu.dot_dimension_numbers<[1], [0], [0], [1], [0, 0, 1, 1], [], []>} : vector<64x32xf32>, vector<32x32xf32>, vector<64x32xf32> -> vector<64x32xf32>
    %c0_153 = arith.constant 0 : index
    %c0_154 = arith.constant 0 : index
    %443 = vector.load %arg25[%c0_153, %c0_154] : memref<1x32xf32, #tpu.memory_space<vmem>>, vector<1x32xf32>
    %444 = vector.broadcast %443 : vector<1x32xf32> to vector<64x32xf32>
    %445 = arith.addf %442, %444 : vector<64x32xf32>
    %cst_155 = arith.constant 0.000000e+00 : f32
    %446 = vector.broadcast %cst_155 : f32 to vector<64x32xf32>
    %447 = arith.maximumf %445, %446 : vector<64x32xf32>
    %448 = arith.addf %440, %447 : vector<64x32xf32>
    %449 = vector.shape_cast %448 : vector<64x32xf32> to vector<4x16x32xf32>
    %c0_156 = arith.constant 0 : index
    %c0_157 = arith.constant 0 : index
    %450 = vector.load %arg34[%c0_156, %c0_157] : memref<1x32xf32, #tpu.memory_space<vmem>>, vector<1x32xf32>
    %c0_158 = arith.constant 0 : index
    %c0_159 = arith.constant 0 : index
    %451 = vector.load %arg26[%c0_158, %c0_159] : memref<32x32xf32, #tpu.memory_space<vmem>>, vector<32x32xf32>
    %cst_160 = arith.constant dense<0.000000e+00> : vector<1x32xf32>
    %452 = tpu.matmul %450, %451, %cst_160 {dimension_numbers = #tpu.dot_dimension_numbers<[1], [0], [0], [1], [0, 0, 1, 1], [], []>} : vector<1x32xf32>, vector<32x32xf32>, vector<1x32xf32> -> vector<1x32xf32>
    %c0_161 = arith.constant 0 : index
    %c0_162 = arith.constant 0 : index
    %453 = vector.load %arg27[%c0_161, %c0_162] : memref<1x32xf32, #tpu.memory_space<vmem>>, vector<1x32xf32>
    %454 = arith.addf %452, %453 : vector<1x32xf32>
    %455 = vector.shape_cast %454 : vector<1x32xf32> to vector<1x1x32xf32>
    %456 = vector.shape_cast %455 : vector<1x1x32xf32> to vector<1x1x32xf32>
    %457 = vector.broadcast %456 : vector<1x1x32xf32> to vector<4x1x32xf32>
    %458 = vector.shape_cast %449 : vector<4x16x32xf32> to vector<64x32xf32>
    %c0_163 = arith.constant 0 : index
    %c0_164 = arith.constant 0 : index
    %459 = vector.load %arg28[%c0_163, %c0_164] : memref<32x64xf32, #tpu.memory_space<vmem>>, vector<32x64xf32>
    %cst_165 = arith.constant dense<0.000000e+00> : vector<64x64xf32>
    %460 = tpu.matmul %458, %459, %cst_165 {dimension_numbers = #tpu.dot_dimension_numbers<[1], [0], [0], [1], [0, 0, 1, 1], [], []>} : vector<64x32xf32>, vector<32x64xf32>, vector<64x64xf32> -> vector<64x64xf32>
    %c0_166 = arith.constant 0 : index
    %c0_167 = arith.constant 0 : index
    %461 = vector.load %arg29[%c0_166, %c0_167] : memref<1x64xf32, #tpu.memory_space<vmem>>, vector<1x64xf32>
    %462 = vector.broadcast %461 : vector<1x64xf32> to vector<64x64xf32>
    %463 = arith.addf %460, %462 : vector<64x64xf32>
    %464 = vector.shape_cast %463 : vector<64x64xf32> to vector<4x16x64xf32>
    %465 = vector.extract_strided_slice %464 {offsets = [0, 0, 0], sizes = [4, 16, 32], strides = [1, 1, 1]} : vector<4x16x64xf32> to vector<4x16x32xf32>
    %466 = vector.extract_strided_slice %464 {offsets = [0, 0, 32], sizes = [4, 16, 32], strides = [1, 1, 1]} : vector<4x16x64xf32> to vector<4x16x32xf32>
    %cst_168 = arith.constant 0.000000e+00 : f32
    %467 = vector.broadcast %cst_168 : f32 to vector<4x1x32xf32>
    %468 = vector.extract_strided_slice %457 {offsets = [0, 0, 0], sizes = [4, 1, 8], strides = [1, 1, 1]} : vector<4x1x32xf32> to vector<4x1x8xf32>
    %469 = vector.extract_strided_slice %465 {offsets = [0, 0, 0], sizes = [4, 16, 8], strides = [1, 1, 1]} : vector<4x16x32xf32> to vector<4x16x8xf32>
    "tpu.trace_start"() <{level = 10 : i32, message = "bqd,bkd->bqk"}> : () -> ()
    %cst_169 = arith.constant dense<0.000000e+00> : vector<4x1x16xf32>
    %470 = tpu.matmul %468, %469, %cst_169 {dimension_numbers = #tpu.dot_dimension_numbers<[2], [2], [1], [1], [0, 0, 0, 1, 1, 1], [0], [0]>} : vector<4x1x8xf32>, vector<4x16x8xf32>, vector<4x1x16xf32> -> vector<4x1x16xf32>
    "tpu.trace_stop"() : () -> ()
    %cst_170 = arith.constant 0.176776692 : f32
    %471 = vector.broadcast %cst_170 : f32 to vector<4x1x16xf32>
    %472 = arith.mulf %470, %471 : vector<4x1x16xf32>
    %cst_171 = arith.constant dense<0xFF800000> : vector<4x1xf32>
    %473 = vector.multi_reduction <maximumf>, %472, %cst_171 [2] : vector<4x1x16xf32> to vector<4x1xf32>
    %474 = vector.shape_cast %473 : vector<4x1xf32> to vector<4x1x1xf32>
    %475 = vector.broadcast %474 : vector<4x1x1xf32> to vector<4x1x16xf32>
    %476 = arith.subf %472, %475 : vector<4x1x16xf32>
    %477 = math.exp %476 : vector<4x1x16xf32>
    %cst_172 = arith.constant dense<0.000000e+00> : vector<4x1xf32>
    %478 = vector.multi_reduction <add>, %477, %cst_172 [2] : vector<4x1x16xf32> to vector<4x1xf32>
    %479 = vector.shape_cast %478 : vector<4x1xf32> to vector<4x1x1xf32>
    %480 = tpu.reciprocal %479 {approx = true} : vector<4x1x1xf32> -> vector<4x1x1xf32>
    %481 = vector.broadcast %480 : vector<4x1x1xf32> to vector<4x1x16xf32>
    %482 = arith.mulf %477, %481 : vector<4x1x16xf32>
    %483 = vector.broadcast %8 : vector<1x1x32xf32> to vector<4x16x32xf32>
    %484 = arith.mulf %466, %483 : vector<4x16x32xf32>
    "tpu.trace_start"() <{level = 10 : i32, message = "bqk,bkd->bqd"}> : () -> ()
    %cst_173 = arith.constant dense<0.000000e+00> : vector<4x1x32xf32>
    %485 = tpu.matmul %482, %484, %cst_173 {dimension_numbers = #tpu.dot_dimension_numbers<[2], [1], [1], [2], [0, 0, 0, 1, 1, 2], [0], [0]>} : vector<4x1x16xf32>, vector<4x16x32xf32>, vector<4x1x32xf32> -> vector<4x1x32xf32>
    "tpu.trace_stop"() : () -> ()
    %486 = arith.addf %467, %485 : vector<4x1x32xf32>
    %487 = vector.extract_strided_slice %457 {offsets = [0, 0, 8], sizes = [4, 1, 8], strides = [1, 1, 1]} : vector<4x1x32xf32> to vector<4x1x8xf32>
    %488 = vector.extract_strided_slice %465 {offsets = [0, 0, 8], sizes = [4, 16, 8], strides = [1, 1, 1]} : vector<4x16x32xf32> to vector<4x16x8xf32>
    "tpu.trace_start"() <{level = 10 : i32, message = "bqd,bkd->bqk"}> : () -> ()
    %cst_174 = arith.constant dense<0.000000e+00> : vector<4x1x16xf32>
    %489 = tpu.matmul %487, %488, %cst_174 {dimension_numbers = #tpu.dot_dimension_numbers<[2], [2], [1], [1], [0, 0, 0, 1, 1, 1], [0], [0]>} : vector<4x1x8xf32>, vector<4x16x8xf32>, vector<4x1x16xf32> -> vector<4x1x16xf32>
    "tpu.trace_stop"() : () -> ()
    %cst_175 = arith.constant 0.176776692 : f32
    %490 = vector.broadcast %cst_175 : f32 to vector<4x1x16xf32>
    %491 = arith.mulf %489, %490 : vector<4x1x16xf32>
    %cst_176 = arith.constant dense<0xFF800000> : vector<4x1xf32>
    %492 = vector.multi_reduction <maximumf>, %491, %cst_176 [2] : vector<4x1x16xf32> to vector<4x1xf32>
    %493 = vector.shape_cast %492 : vector<4x1xf32> to vector<4x1x1xf32>
    %494 = vector.broadcast %493 : vector<4x1x1xf32> to vector<4x1x16xf32>
    %495 = arith.subf %491, %494 : vector<4x1x16xf32>
    %496 = math.exp %495 : vector<4x1x16xf32>
    %cst_177 = arith.constant dense<0.000000e+00> : vector<4x1xf32>
    %497 = vector.multi_reduction <add>, %496, %cst_177 [2] : vector<4x1x16xf32> to vector<4x1xf32>
    %498 = vector.shape_cast %497 : vector<4x1xf32> to vector<4x1x1xf32>
    %499 = tpu.reciprocal %498 {approx = true} : vector<4x1x1xf32> -> vector<4x1x1xf32>
    %500 = vector.broadcast %499 : vector<4x1x1xf32> to vector<4x1x16xf32>
    %501 = arith.mulf %496, %500 : vector<4x1x16xf32>
    %502 = vector.broadcast %15 : vector<1x1x32xf32> to vector<4x16x32xf32>
    %503 = arith.mulf %466, %502 : vector<4x16x32xf32>
    "tpu.trace_start"() <{level = 10 : i32, message = "bqk,bkd->bqd"}> : () -> ()
    %cst_178 = arith.constant dense<0.000000e+00> : vector<4x1x32xf32>
    %504 = tpu.matmul %501, %503, %cst_178 {dimension_numbers = #tpu.dot_dimension_numbers<[2], [1], [1], [2], [0, 0, 0, 1, 1, 2], [0], [0]>} : vector<4x1x16xf32>, vector<4x16x32xf32>, vector<4x1x32xf32> -> vector<4x1x32xf32>
    "tpu.trace_stop"() : () -> ()
    %505 = arith.addf %486, %504 : vector<4x1x32xf32>
    %506 = vector.extract_strided_slice %457 {offsets = [0, 0, 16], sizes = [4, 1, 8], strides = [1, 1, 1]} : vector<4x1x32xf32> to vector<4x1x8xf32>
    %507 = vector.extract_strided_slice %465 {offsets = [0, 0, 16], sizes = [4, 16, 8], strides = [1, 1, 1]} : vector<4x16x32xf32> to vector<4x16x8xf32>
    "tpu.trace_start"() <{level = 10 : i32, message = "bqd,bkd->bqk"}> : () -> ()
    %cst_179 = arith.constant dense<0.000000e+00> : vector<4x1x16xf32>
    %508 = tpu.matmul %506, %507, %cst_179 {dimension_numbers = #tpu.dot_dimension_numbers<[2], [2], [1], [1], [0, 0, 0, 1, 1, 1], [0], [0]>} : vector<4x1x8xf32>, vector<4x16x8xf32>, vector<4x1x16xf32> -> vector<4x1x16xf32>
    "tpu.trace_stop"() : () -> ()
    %cst_180 = arith.constant 0.176776692 : f32
    %509 = vector.broadcast %cst_180 : f32 to vector<4x1x16xf32>
    %510 = arith.mulf %508, %509 : vector<4x1x16xf32>
    %cst_181 = arith.constant dense<0xFF800000> : vector<4x1xf32>
    %511 = vector.multi_reduction <maximumf>, %510, %cst_181 [2] : vector<4x1x16xf32> to vector<4x1xf32>
    %512 = vector.shape_cast %511 : vector<4x1xf32> to vector<4x1x1xf32>
    %513 = vector.broadcast %512 : vector<4x1x1xf32> to vector<4x1x16xf32>
    %514 = arith.subf %510, %513 : vector<4x1x16xf32>
    %515 = math.exp %514 : vector<4x1x16xf32>
    %cst_182 = arith.constant dense<0.000000e+00> : vector<4x1xf32>
    %516 = vector.multi_reduction <add>, %515, %cst_182 [2] : vector<4x1x16xf32> to vector<4x1xf32>
    %517 = vector.shape_cast %516 : vector<4x1xf32> to vector<4x1x1xf32>
    %518 = tpu.reciprocal %517 {approx = true} : vector<4x1x1xf32> -> vector<4x1x1xf32>
    %519 = vector.broadcast %518 : vector<4x1x1xf32> to vector<4x1x16xf32>
    %520 = arith.mulf %515, %519 : vector<4x1x16xf32>
    %521 = vector.broadcast %22 : vector<1x1x32xf32> to vector<4x16x32xf32>
    %522 = arith.mulf %466, %521 : vector<4x16x32xf32>
    "tpu.trace_start"() <{level = 10 : i32, message = "bqk,bkd->bqd"}> : () -> ()
    %cst_183 = arith.constant dense<0.000000e+00> : vector<4x1x32xf32>
    %523 = tpu.matmul %520, %522, %cst_183 {dimension_numbers = #tpu.dot_dimension_numbers<[2], [1], [1], [2], [0, 0, 0, 1, 1, 2], [0], [0]>} : vector<4x1x16xf32>, vector<4x16x32xf32>, vector<4x1x32xf32> -> vector<4x1x32xf32>
    "tpu.trace_stop"() : () -> ()
    %524 = arith.addf %505, %523 : vector<4x1x32xf32>
    %525 = vector.extract_strided_slice %457 {offsets = [0, 0, 24], sizes = [4, 1, 8], strides = [1, 1, 1]} : vector<4x1x32xf32> to vector<4x1x8xf32>
    %526 = vector.extract_strided_slice %465 {offsets = [0, 0, 24], sizes = [4, 16, 8], strides = [1, 1, 1]} : vector<4x16x32xf32> to vector<4x16x8xf32>
    "tpu.trace_start"() <{level = 10 : i32, message = "bqd,bkd->bqk"}> : () -> ()
    %cst_184 = arith.constant dense<0.000000e+00> : vector<4x1x16xf32>
    %527 = tpu.matmul %525, %526, %cst_184 {dimension_numbers = #tpu.dot_dimension_numbers<[2], [2], [1], [1], [0, 0, 0, 1, 1, 1], [0], [0]>} : vector<4x1x8xf32>, vector<4x16x8xf32>, vector<4x1x16xf32> -> vector<4x1x16xf32>
    "tpu.trace_stop"() : () -> ()
    %cst_185 = arith.constant 0.176776692 : f32
    %528 = vector.broadcast %cst_185 : f32 to vector<4x1x16xf32>
    %529 = arith.mulf %527, %528 : vector<4x1x16xf32>
    %cst_186 = arith.constant dense<0xFF800000> : vector<4x1xf32>
    %530 = vector.multi_reduction <maximumf>, %529, %cst_186 [2] : vector<4x1x16xf32> to vector<4x1xf32>
    %531 = vector.shape_cast %530 : vector<4x1xf32> to vector<4x1x1xf32>
    %532 = vector.broadcast %531 : vector<4x1x1xf32> to vector<4x1x16xf32>
    %533 = arith.subf %529, %532 : vector<4x1x16xf32>
    %534 = math.exp %533 : vector<4x1x16xf32>
    %cst_187 = arith.constant dense<0.000000e+00> : vector<4x1xf32>
    %535 = vector.multi_reduction <add>, %534, %cst_187 [2] : vector<4x1x16xf32> to vector<4x1xf32>
    %536 = vector.shape_cast %535 : vector<4x1xf32> to vector<4x1x1xf32>
    %537 = tpu.reciprocal %536 {approx = true} : vector<4x1x1xf32> -> vector<4x1x1xf32>
    %538 = vector.broadcast %537 : vector<4x1x1xf32> to vector<4x1x16xf32>
    %539 = arith.mulf %534, %538 : vector<4x1x16xf32>
    %540 = vector.broadcast %29 : vector<1x1x32xf32> to vector<4x16x32xf32>
    %541 = arith.mulf %466, %540 : vector<4x16x32xf32>
    "tpu.trace_start"() <{level = 10 : i32, message = "bqk,bkd->bqd"}> : () -> ()
    %cst_188 = arith.constant dense<0.000000e+00> : vector<4x1x32xf32>
    %542 = tpu.matmul %539, %541, %cst_188 {dimension_numbers = #tpu.dot_dimension_numbers<[2], [1], [1], [2], [0, 0, 0, 1, 1, 2], [0], [0]>} : vector<4x1x16xf32>, vector<4x16x32xf32>, vector<4x1x32xf32> -> vector<4x1x32xf32>
    "tpu.trace_stop"() : () -> ()
    %543 = arith.addf %524, %542 : vector<4x1x32xf32>
    %544 = arith.addf %457, %543 : vector<4x1x32xf32>
    %545 = vector.shape_cast %544 : vector<4x1x32xf32> to vector<4x32xf32>
    %c0_189 = arith.constant 0 : index
    %c0_190 = arith.constant 0 : index
    %546 = vector.load %arg30[%c0_189, %c0_190] : memref<32x32xf32, #tpu.memory_space<vmem>>, vector<32x32xf32>
    %cst_191 = arith.constant dense<0.000000e+00> : vector<4x32xf32>
    %547 = tpu.matmul %545, %546, %cst_191 {dimension_numbers = #tpu.dot_dimension_numbers<[1], [0], [0], [1], [0, 0, 1, 1], [], []>} : vector<4x32xf32>, vector<32x32xf32>, vector<4x32xf32> -> vector<4x32xf32>
    %c0_192 = arith.constant 0 : index
    %c0_193 = arith.constant 0 : index
    %548 = vector.load %arg31[%c0_192, %c0_193] : memref<1x32xf32, #tpu.memory_space<vmem>>, vector<1x32xf32>
    %549 = vector.broadcast %548 : vector<1x32xf32> to vector<4x32xf32>
    %550 = arith.addf %547, %549 : vector<4x32xf32>
    %cst_194 = arith.constant 0.000000e+00 : f32
    %551 = vector.broadcast %cst_194 : f32 to vector<4x32xf32>
    %552 = arith.maximumf %550, %551 : vector<4x32xf32>
    %553 = arith.addf %545, %552 : vector<4x32xf32>
    %554 = vector.shape_cast %553 : vector<4x32xf32> to vector<4x1x32xf32>
    %555 = vector.shape_cast %554 : vector<4x1x32xf32> to vector<4x32xf32>
    %c0_195 = arith.constant 0 : index
    %c0_196 = arith.constant 0 : index
    %556 = vector.load %arg35[%c0_195, %c0_196] : memref<32x3xf32, #tpu.memory_space<vmem>>, vector<32x3xf32>
    %cst_197 = arith.constant dense<0.000000e+00> : vector<4x3xf32>
    %557 = tpu.matmul %555, %556, %cst_197 {dimension_numbers = #tpu.dot_dimension_numbers<[1], [0], [0], [1], [0, 0, 1, 1], [], []>} : vector<4x32xf32>, vector<32x3xf32>, vector<4x3xf32> -> vector<4x3xf32>
    %c0_198 = arith.constant 0 : index
    %c0_199 = arith.constant 0 : index
    %558 = vector.load %arg36[%c0_198, %c0_199] : memref<1x3xf32, #tpu.memory_space<vmem>>, vector<1x3xf32>
    %559 = vector.broadcast %558 : vector<1x3xf32> to vector<4x3xf32>
    %560 = arith.addf %557, %559 : vector<4x3xf32>
    %561 = vector.shape_cast %560 : vector<4x3xf32> to vector<4x1x3xf32>
    %c0_200 = arith.constant 0 : index
    %c0_201 = arith.constant 0 : index
    %c0_202 = arith.constant 0 : index
    %562 = vector.load %arg37[%c0_200, %c0_201, %c0_202] : memref<4x1x3xf32, #tpu.memory_space<vmem>>, vector<4x1x3xf32>
    tpu.vector_store %arg37[%c0_200, %c0_201, %c0_202], %561 {strides = array<i32>} : memref<4x1x3xf32, #tpu.memory_space<vmem>>, vector<4x1x3xf32>,
    return
  }
  func.func @transform_0(%arg0: i32) -> (i32, i32, i32) {
    %c0_i32 = arith.constant 0 : i32
    %c0_i32_0 = arith.constant 0 : i32
    %c0_i32_1 = arith.constant 0 : i32
    return %arg0, %c0_i32, %c0_i32_0 : i32, i32, i32
  }
  func.func @transform_1(%arg0: i32) -> (i32, i32) {
    %c0_i32 = arith.constant 0 : i32
    %c0_i32_0 = arith.constant 0 : i32
    %c0_i32_1 = arith.constant 0 : i32
    return %c0_i32, %c0_i32_0 : i32, i32
  }
  func.func @transform_2(%arg0: i32) -> (i32, i32) {
    %c0_i32 = arith.constant 0 : i32
    %c0_i32_0 = arith.constant 0 : i32
    %c0_i32_1 = arith.constant 0 : i32
    return %c0_i32, %c0_i32_0 : i32, i32
  }
  func.func @transform_3(%arg0: i32) -> (i32, i32) {
    %c0_i32 = arith.constant 0 : i32
    %c0_i32_0 = arith.constant 0 : i32
    %c0_i32_1 = arith.constant 0 : i32
    return %c0_i32, %c0_i32_0 : i32, i32
  }
  func.func @transform_4(%arg0: i32) -> (i32, i32) {
    %c0_i32 = arith.constant 0 : i32
    %c0_i32_0 = arith.constant 0 : i32
    %c0_i32_1 = arith.constant 0 : i32
    return %c0_i32, %c0_i32_0 : i32, i32
  }
  func.func @transform_5(%arg0: i32) -> (i32, i32) {
    %c0_i32 = arith.constant 0 : i32
    %c0_i32_0 = arith.constant 0 : i32
    %c0_i32_1 = arith.constant 0 : i32
    return %c0_i32, %c0_i32_0 : i32, i32
  }
  func.func @transform_6(%arg0: i32) -> (i32, i32) {
    %c0_i32 = arith.constant 0 : i32
    %c0_i32_0 = arith.constant 0 : i32
    %c0_i32_1 = arith.constant 0 : i32
    return %c0_i32, %c0_i32_0 : i32, i32
  }
  func.func @transform_7(%arg0: i32) -> (i32, i32) {
    %c0_i32 = arith.constant 0 : i32
    %c0_i32_0 = arith.constant 0 : i32
    %c0_i32_1 = arith.constant 0 : i32
    return %c0_i32, %c0_i32_0 : i32, i32
  }
  func.func @transform_8(%arg0: i32) -> (i32, i32) {
    %c0_i32 = arith.constant 0 : i32
    %c0_i32_0 = arith.constant 0 : i32
    %c0_i32_1 = arith.constant 0 : i32
    return %c0_i32, %c0_i32_0 : i32, i32
  }
  func.func @transform_9(%arg0: i32) -> (i32, i32) {
    %c0_i32 = arith.constant 0 : i32
    %c0_i32_0 = arith.constant 0 : i32
    %c0_i32_1 = arith.constant 0 : i32
    return %c0_i32, %c0_i32_0 : i32, i32
  }
  func.func @transform_10(%arg0: i32) -> (i32, i32) {
    %c0_i32 = arith.constant 0 : i32
    %c0_i32_0 = arith.constant 0 : i32
    %c0_i32_1 = arith.constant 0 : i32
    return %c0_i32, %c0_i32_0 : i32, i32
  }
  func.func @transform_11(%arg0: i32) -> (i32, i32) {
    %c0_i32 = arith.constant 0 : i32
    %c0_i32_0 = arith.constant 0 : i32
    %c0_i32_1 = arith.constant 0 : i32
    return %c0_i32, %c0_i32_0 : i32, i32
  }
  func.func @transform_12(%arg0: i32) -> (i32, i32) {
    %c0_i32 = arith.constant 0 : i32
    %c0_i32_0 = arith.constant 0 : i32
    %c0_i32_1 = arith.constant 0 : i32
    return %c0_i32, %c0_i32_0 : i32, i32
  }
  func.func @transform_13(%arg0: i32) -> (i32, i32) {
    %c0_i32 = arith.constant 0 : i32
    %c0_i32_0 = arith.constant 0 : i32
    %c0_i32_1 = arith.constant 0 : i32
    return %c0_i32, %c0_i32_0 : i32, i32
  }
  func.func @transform_14(%arg0: i32) -> (i32, i32) {
    %c0_i32 = arith.constant 0 : i32
    %c0_i32_0 = arith.constant 0 : i32
    %c0_i32_1 = arith.constant 0 : i32
    return %c0_i32, %c0_i32_0 : i32, i32
  }
  func.func @transform_15(%arg0: i32) -> (i32, i32) {
    %c0_i32 = arith.constant 0 : i32
    %c0_i32_0 = arith.constant 0 : i32
    %c0_i32_1 = arith.constant 0 : i32
    return %c0_i32, %c0_i32_0 : i32, i32
  }
  func.func @transform_16(%arg0: i32) -> (i32, i32) {
    %c0_i32 = arith.constant 0 : i32
    %c0_i32_0 = arith.constant 0 : i32
    %c0_i32_1 = arith.constant 0 : i32
    return %c0_i32, %c0_i32_0 : i32, i32
  }
  func.func @transform_17(%arg0: i32) -> (i32, i32) {
    %c0_i32 = arith.constant 0 : i32
    %c0_i32_0 = arith.constant 0 : i32
    %c0_i32_1 = arith.constant 0 : i32
    return %c0_i32, %c0_i32_0 : i32, i32
  }
  func.func @transform_18(%arg0: i32) -> (i32, i32) {
    %c0_i32 = arith.constant 0 : i32
    %c0_i32_0 = arith.constant 0 : i32
    %c0_i32_1 = arith.constant 0 : i32
    return %c0_i32, %c0_i32_0 : i32, i32
  }
  func.func @transform_19(%arg0: i32) -> (i32, i32) {
    %c0_i32 = arith.constant 0 : i32
    %c0_i32_0 = arith.constant 0 : i32
    %c0_i32_1 = arith.constant 0 : i32
    return %c0_i32, %c0_i32_0 : i32, i32
  }
  func.func @transform_20(%arg0: i32) -> (i32, i32) {
    %c0_i32 = arith.constant 0 : i32
    %c0_i32_0 = arith.constant 0 : i32
    %c0_i32_1 = arith.constant 0 : i32
    return %c0_i32, %c0_i32_0 : i32, i32
  }
  func.func @transform_21(%arg0: i32) -> (i32, i32) {
    %c0_i32 = arith.constant 0 : i32
    %c0_i32_0 = arith.constant 0 : i32
    %c0_i32_1 = arith.constant 0 : i32
    return %c0_i32, %c0_i32_0 : i32, i32
  }
  func.func @transform_22(%arg0: i32) -> (i32, i32) {
    %c0_i32 = arith.constant 0 : i32
    %c0_i32_0 = arith.constant 0 : i32
    %c0_i32_1 = arith.constant 0 : i32
    return %c0_i32, %c0_i32_0 : i32, i32
  }
  func.func @transform_23(%arg0: i32) -> (i32, i32) {
    %c0_i32 = arith.constant 0 : i32
    %c0_i32_0 = arith.constant 0 : i32
    %c0_i32_1 = arith.constant 0 : i32
    return %c0_i32, %c0_i32_0 : i32, i32
  }
  func.func @transform_24(%arg0: i32) -> (i32, i32) {
    %c0_i32 = arith.constant 0 : i32
    %c0_i32_0 = arith.constant 0 : i32
    %c0_i32_1 = arith.constant 0 : i32
    return %c0_i32, %c0_i32_0 : i32, i32
  }
  func.func @transform_25(%arg0: i32) -> (i32, i32) {
    %c0_i32 = arith.constant 0 : i32
    %c0_i32_0 = arith.constant 0 : i32
    %c0_i32_1 = arith.constant 0 : i32
    return %c0_i32, %c0_i32_0 : i32, i32
  }
  func.func @transform_26(%arg0: i32) -> (i32, i32) {
    %c0_i32 = arith.constant 0 : i32
    %c0_i32_0 = arith.constant 0 : i32
    %c0_i32_1 = arith.constant 0 : i32
    return %c0_i32, %c0_i32_0 : i32, i32
  }
  func.func @transform_27(%arg0: i32) -> (i32, i32) {
    %c0_i32 = arith.constant 0 : i32
    %c0_i32_0 = arith.constant 0 : i32
    %c0_i32_1 = arith.constant 0 : i32
    return %c0_i32, %c0_i32_0 : i32, i32
  }
  func.func @transform_28(%arg0: i32) -> (i32, i32) {
    %c0_i32 = arith.constant 0 : i32
    %c0_i32_0 = arith.constant 0 : i32
    %c0_i32_1 = arith.constant 0 : i32
    return %c0_i32, %c0_i32_0 : i32, i32
  }
  func.func @transform_29(%arg0: i32) -> (i32, i32) {
    %c0_i32 = arith.constant 0 : i32
    %c0_i32_0 = arith.constant 0 : i32
    %c0_i32_1 = arith.constant 0 : i32
    return %c0_i32, %c0_i32_0 : i32, i32
  }
  func.func @transform_30(%arg0: i32) -> (i32, i32) {
    %c0_i32 = arith.constant 0 : i32
    %c0_i32_0 = arith.constant 0 : i32
    %c0_i32_1 = arith.constant 0 : i32
    return %c0_i32, %c0_i32_0 : i32, i32
  }
  func.func @transform_31(%arg0: i32) -> (i32, i32) {
    %c0_i32 = arith.constant 0 : i32
    %c0_i32_0 = arith.constant 0 : i32
    %c0_i32_1 = arith.constant 0 : i32
    return %c0_i32, %c0_i32_0 : i32, i32
  }
  func.func @transform_32(%arg0: i32) -> (i32, i32) {
    %c0_i32 = arith.constant 0 : i32
    %c0_i32_0 = arith.constant 0 : i32
    %c0_i32_1 = arith.constant 0 : i32
    return %c0_i32, %c0_i32_0 : i32, i32
  }
  func.func @transform_33(%arg0: i32) -> (i32, i32) {
    %c0_i32 = arith.constant 0 : i32
    %c0_i32_0 = arith.constant 0 : i32
    %c0_i32_1 = arith.constant 0 : i32
    return %c0_i32, %c0_i32_0 : i32, i32
  }
  func.func @transform_34(%arg0: i32) -> (i32, i32) {
    %c0_i32 = arith.constant 0 : i32
    %c0_i32_0 = arith.constant 0 : i32
    %c0_i32_1 = arith.constant 0 : i32
    return %c0_i32, %c0_i32_0 : i32, i32
  }
  func.func @transform_35(%arg0: i32) -> (i32, i32) {
    %c0_i32 = arith.constant 0 : i32
    %c0_i32_0 = arith.constant 0 : i32
    %c0_i32_1 = arith.constant 0 : i32
    return %c0_i32, %c0_i32_0 : i32, i32
  }
  func.func @transform_36(%arg0: i32) -> (i32, i32, i32) {
    %c0_i32 = arith.constant 0 : i32
    %c0_i32_0 = arith.constant 0 : i32
    %c0_i32_1 = arith.constant 0 : i32
    return %arg0, %c0_i32, %c0_i32_0 : i32, i32, i32
  }
}

</mosaic_0001>

<bundles_post_ra>
// kernel: set_transformer_forward.1
= control target key start
LH: loop header
LB: loop body
LE: loop exit
PB: predicated region body
PF: predicated region fallthrough
CT: control target
= control target key end

     0   :  { %s23174_s6 = smov 1   ;;  %s23175_s10 = smov 2   ;;  %s26532_s0 = inlined_call_operand.smem [shape: u32[37], index: -1, kind: input, shape index: {}] }
   0x1   :  { %s23254_s5 = sld [smem:[%s26532_s0]]   ;;  %s23176_s14 = smov 3  }
   0x2   :  { %s23259_s9 = sld [smem:[%s26532_s0 + %s23174_s6]]   ;;  %s23177_s18 = smov 4  }
   0x3   :  { %s23264_s13 = sld [smem:[%s26532_s0 + %s23175_s10]]   ;;  %s23178_s22 = smov 5  }
   0x4   :  { %s23269_s17 = sld [smem:[%s26532_s0 + %s23176_s14]]   ;;  %s23179_s26 = smov 6  }
   0x5   :  { %s23274_s21 = sld [smem:[%s26532_s0 + %s23177_s18]]   ;;  %s23180_s30 = smov 7  }
   0x6   :  { %s23279_s25 = sld [smem:[%s26532_s0 + %s23178_s22]]   ;;  %s23181_s4 = smov 8  }
   0x7   :  { %26586 = sst [smem:[#allocation53_spill]] %s23254_s5  ;;  %s23182_s10 = smov 9  }
   0x8   :  { %26587 = sst [smem:[#allocation54_spill]] %s23259_s9  ;;  %s23183_s15 = smov 10  }
   0x9   :  { %26588 = sst [smem:[#allocation55_spill]] %s23264_s13  ;;  %s23184_s20 = smov 11  }
   0xa   :  { %s23284_s29 = sld [smem:[%s26532_s0 + %s23179_s26]]   ;;  %s23185_s26 = smov 12  }
   0xb   :  { %s23289_s3 = sld [smem:[%s26532_s0 + %s23180_s30]]   ;;  %s23186_s1 = smov 13  }
   0xc   :  { %26589 = sst [smem:[#allocation56_spill]] %s23279_s25  ;;  %s23187_s7 = smov 14  }
   0xd   :  { %s23294_s8 = sld [smem:[%s26532_s0 + %s23181_s4]]   ;;  %s23189_s22 = smov 16  }
   0xe   :  { %s23299_s14 = sld [smem:[%s26532_s0 + %s23182_s10]]   ;;  %s23190_s28 = smov 17  }
   0xf   :  { %s23304_s19 = sld [smem:[%s26532_s0 + %s23183_s15]]   ;;  %s23188_s15 = smov 15  }
  0x10   :  { %s23309_s24 = sld [smem:[%s26532_s0 + %s23184_s20]]  }
  0x11   :  { %26590 = sst [smem:[#allocation57_spill]] %s23289_s3 }
  0x12   :  { %s23314_s30 = sld [smem:[%s26532_s0 + %s23185_s26]]  }
  0x13   :  { %26591 = sst [smem:[#allocation58_spill]] %s23294_s8 }
  0x14   :  { %26592 = sst [smem:[#allocation59_spill]] %s23299_s14 }
  0x15   :  { %26593 = sst [smem:[#allocation60_spill]] %s23304_s19 }
  0x16   :  { %26594 = sst [smem:[#allocation61_spill]] %s23309_s24 }
  0x17   :  { %s23319_s6 = sld [smem:[%s26532_s0 + %s23186_s1]]  }
  0x18   :  { %s23324_s12 = sld [smem:[%s26532_s0 + %s23187_s7]]   ;;  %s23191_s7 = smov 18  }
  0x19   :  { %s23329_s20 = sld [smem:[%s26532_s0 + %s23188_s15]]   ;;  %s23192_s15 = smov 19  }
  0x1a   :  { %s23334_s27 = sld [smem:[%s26532_s0 + %s23189_s22]]   ;;  %s23193_s22 = smov 20  }
  0x1b   :  { %s23339_s4 = sld [smem:[%s26532_s0 + %s23190_s28]]   ;;  %s23194_s28 = smov 21  }
  0x1c   :  { %s23354_s24 = sld [smem:[%s26532_s0 + %s23193_s22]]   ;;  %s23197_s22 = smov 24  }
  0x1d   :  { %26595 = sst [smem:[#allocation62_spill]] %s23319_s6 }
  0x1e   :  { %26596 = sst [smem:[#allocation63_spill]] %s23324_s12 }
  0x1f   :  { %26597 = sst [smem:[#allocation64_spill]] %s23329_s20 }
  0x20   :  { %s23344_s6 = sld [smem:[%s26532_s0 + %s23191_s7]]   ;;  %s23195_s7 = smov 22  }
  0x21   :  { %26598 = sst [smem:[#allocation65_spill]] %s23339_s4 }
  0x22   :  { %s23349_s20 = sld [smem:[%s26532_s0 + %s23192_s15]]   ;;  %s23196_s15 = smov 23  }
  0x23   :  { %26600 = sst [smem:[#allocation67_spill]] %s23354_s24 }
  0x24   :  { %s23359_s4 = sld [smem:[%s26532_s0 + %s23194_s28]]   ;;  %s23198_s28 = smov 25  }
  0x25   :  { %s23364_s14 = sld [smem:[%s26532_s0 + %s23195_s7]]   ;;  %s23199_s7 = smov 26  }
  0x26   :  { %26599 = sst [smem:[#allocation66_spill]] %s23344_s6 }
  0x27   :  { %s23369_s25 = sld [smem:[%s26532_s0 + %s23196_s15]]   ;;  %s23200_s15 = smov 27  }
  0x28   :  { %s23374_s9 = sld [smem:[%s26532_s0 + %s23197_s22]]   ;;  %s23201_s22 = smov 28  }
  0x29   :  { %s23384_s5 = sld [smem:[%s26532_s0 + %s23199_s7]]   ;;  %s23203_s7 = smov 30  }
  0x2a   :  { %26601 = sst [smem:[#allocation68_spill]] %s23359_s4 }
  0x2b   :  { %26602 = sst [smem:[#allocation69_spill]] %s23364_s14 }
  0x2c   :  { %s23379_s4 = sld [smem:[%s26532_s0 + %s23198_s28]]   ;;  %s23202_s28 = smov 29  }
  0x2d   :  { %26603 = sst [smem:[#allocation70_spill]] %s23369_s25 }
  0x2e   :  { %26604 = sst [smem:[#allocation71_spill]] %s23374_s9 }
  0x2f   :  { %26606 = sst [smem:[#allocation73_spill]] %s23384_s5 }
  0x30   :  { %s23389_s25 = sld [smem:[%s26532_s0 + %s23200_s15]]   ;;  %s23204_s15 = smov 31  }
  0x31   :  { %s23394_s24 = sld [smem:[%s26532_s0 + %s23201_s22]]   ;;  %s23205_s22 = smov 32  }
  0x32   :  { %26605 = sst [smem:[#allocation72_spill]] %s23379_s4 }
  0x33   :  { %s23399_s4 = sld [smem:[%s26532_s0 + %s23202_s28]]   ;;  %s23206_s28 = smov 33  }
  0x34   :  { %s23404_s6 = sld [smem:[%s26532_s0 + %s23203_s7]]   ;;  %s23207_s7 = smov 34  }
  0x35   :  { %s23414_s12 = sld [smem:[%s26532_s0 + %s23205_s22]]   ;;  %s23209_s22 = smov 36  }
  0x36   :  { %26607 = sst [smem:[#allocation74_spill]] %s23389_s25 }
  0x37   :  { %s23409_s25 = sld [smem:[%s26532_s0 + %s23204_s15]]   ;;  %s23208_s15 = smov 35  }
  0x38   :  { %s23429_s19 = sld [smem:[%s26532_s0 + %s23208_s15]]  }
  0x39   :  { %26608 = sst [smem:[#allocation75_spill]] %s23399_s4 }
  0x3a   :  { %26609 = sst [smem:[#allocation76_spill]] %s23404_s6 }
  0x3b   :  { %26610 = sst [smem:[#allocation77_spill]] %s23414_s12 }
  0x3c   :  { %s23419_s4 = sld [smem:[%s26532_s0 + %s23206_s28]]  }
  0x3d   :  { %s23424_s6 = sld [smem:[%s26532_s0 + %s23207_s7]]  }
  0x3e   :  { %s23434_s12 = sld [smem:[%s26532_s0 + %s23209_s22]]  }
  0x42   :  { %26611 = sst [smem:[#allocation78_spill]] %s23419_s4 }
  0x43   :  { %78 = vsyncpa [#allocation3], 0 }
  0x44   :  { %79 = vsyncpa [#allocation5], 0 }
  0x45   :  { %80 = vsyncpa [#allocation8], 0 }
  0x46   :  { %81 = vsyncpa [#allocation11], 0 }
  0x47   :  { %82 = vsyncpa [#allocation14], 0 }
  0x48   :  { %83 = vsyncpa [#allocation17], 0 }
  0x49   :  { %84 = vsyncpa [#allocation20], 0 }
  0x4a   :  { %85 = vsyncpa [#allocation23], 0 }
  0x4b   :  { %86 = vsyncpa [#allocation26], 0 }
  0x4c   :  { %87 = vsyncpa [#allocation29], 0 }
  0x4d   :  { %88 = vsyncpa [#allocation32], 0 }
  0x4e   :  { %89 = vsyncpa [#allocation35], 0 }
  0x4f   :  { %90 = vsyncpa [#allocation38], 0  ;;  %s23436_s28 = smov 0  }
  0x50 LB: > { %s26612_s14 = sld [smem:[#allocation69_spill]]  ;;  %s26613_s13 = sld [smem:[#allocation55_spill]]  ;;  %s23172_s28 = sphi %s23436_s28, %s96_s28  }
  0x51   : > { %s26614_s9 = sld [smem:[#allocation71_spill]]  ;;  %s26615_s5 = sld [smem:[#allocation73_spill]] }
  0x52   : > { %s26616_s4 = sld [smem:[#allocation78_spill]]  ;;  %s26617_s3 = sld [smem:[#allocation57_spill]] }
  0x53   : > { %s26618_s8 = sld [smem:[#allocation58_spill]]  ;;  %s23210_s0 = smov [#allocation4]  }
  0x54   : > { %s915_s1 = sshll.u32 %s23210_s0, 4  ;;  %s26554_s2 = sadd.s32 4294967295, %s23172_s28   ;;  %s23450_s1 = int_to_ptr.vmem [resolvable:$true] %s915_s1 }
  0x55   : > { %p18390_p0 = scmp.ge.s32.totalorder %s23172_s28, 1  ;;  %p888_p1 = scmp.lt.s32.totalorder %s23172_s28, 3 }
  0x56   : > { %p23446_p2 = scmp.eq.s32.totalorder %s26554_s2, 0  ;;  %s23211_s11 = smov [#allocation7]  }
  0x57   : > { %p23452_p3 = pnand %p18390_p0, %p888_p1  ;;  %s940_s15 = sshll.u32 %s23211_s11, 4  ;;  %s23458_s15 = int_to_ptr.vmem [resolvable:$true] %s940_s15 }
  0x58   : > { %s26619_s7 = scalar_select %p23446_p2, 1, 0 }
  0x59   : > { %s26620_s10 = scalar_select %p23452_p3, 1, 0 }
  0x5a   : > { %p21332_p4 = pneg %p23452_p3  ;;  %s23212_s16 = smov [#allocation10]  }
  0x5b   : > { %s962_s18 = sshll.u32 %s23212_s16, 4  ;;  %s23213_s23 = smov [#allocation13]   ;;  %s23466_s18 = int_to_ptr.vmem [resolvable:$true] %s962_s18 }
  0x5c   : > { %p23462_p5 = pnand %p23446_p2, %p21332_p4  ;;  %s990_s26 = sshll.u32 %s23213_s23, 4  ;;  %s23468_s26 = int_to_ptr.vmem [resolvable:$true] %s990_s26 }
  0x5d   : > { %s22414_s0 = scalar_lea.hbm %s23269_s17, 64 }
  0x5e   : > { %p22415_p6 = scmp.ne.s32.totalorder %s23269_s17, %s22414_s0  ;;  %p23474_p7 = pneg %p23462_p5 }
  0x5f   : > { %p22421_p10 = scmp.lt.u32.totalorder %s22414_s0, %s23269_s17 }
  0x60   : > { %p22417_p8 = pnand %p23474_p7, %p22415_p6 }
  0x62   : > { %p22418_p9 = pneg %p22417_p8 }
  0x64   : > { %p22423_p11 = pnand %p22421_p10, %p22418_p9 }
  0x66   : > { %22426 = shalt.err (!%p22423_p11)
}
  0x67   : > { %s22427_s16 = scalar_lea.vmem %s23450_s1, 64  ;;  %p22435_p1 = scmp.lt.s32.totalorder %s23450_s1, %s23450_s1 }
  0x68   : > { %p22428_p12 = scmp.ne.s32.totalorder %s23450_s1, %s22427_s16  ;;  %p22436_p4 = scmp.lt.s32.totalorder %s22427_s16, %s22427_s16 }
  0x6a   : > { %p22430_p13 = pnand %p22428_p12, %p23474_p7  ;;  %p22437_p2 = por %p22436_p4, %p22435_p1 }
  0x6c   : > { %p22431_p0 = pneg %p22430_p13 }
  0x6e   : > { %p22438_p3 = pnand %p22437_p2, %p22431_p0 }
  0x70   : > { %22441 = shalt.err (!%p22438_p3)
}
  0x71   : > { %21338 = dma.hbm_to_vmem [thread:$0]  (!%p23462_p5), %s23269_s17, 64, %s23450_s1, [#allocation5]  }
  0x72   : > { %s22442_s23 = scalar_lea.hbm %s23284_s29, 16 }
  0x73   : > { %p22443_p6 = scmp.ne.s32.totalorder %s23284_s29, %s22442_s23  ;;  %p22449_p10 = scmp.lt.u32.totalorder %s22442_s23, %s23284_s29 }
  0x75   : > { %p22445_p8 = pnand %p22443_p6, %p23474_p7 }
  0x77   : > { %p22446_p9 = pneg %p22445_p8 }
  0x79   : > { %p22451_p11 = pnand %p22449_p10, %p22446_p9 }
  0x7b   : > { %22454 = shalt.err (!%p22451_p11)
}
  0x7c   : > { %s22455_s0 = scalar_lea.vmem %s23458_s15, 16  ;;  %s22462_s16 = scalar_lea.vmem %s23458_s15, 32 }
  0x7d   : > { %p22456_p2 = scmp.ne.s32.totalorder %s23458_s15, %s22455_s0  ;;  %p22463_p13 = scmp.lt.s32.totalorder %s23458_s15, %s23458_s15 }
  0x7e   : > { %p22464_p0 = scmp.lt.s32.totalorder %s22462_s16, %s22455_s0 }
  0x7f   : > { %p22458_p3 = pnand %p22456_p2, %p23474_p7 }
  0x80   : > { %p22465_p1 = por %p22464_p0, %p22463_p13 }
  0x81   : > { %p22459_p12 = pneg %p22458_p3 }
  0x83   : > { %p22466_p4 = pnand %p22465_p1, %p22459_p12 }
  0x85   : > { %22469 = shalt.err (!%p22466_p4)
}
  0x86   : > { %21344 = dma.hbm_to_vmem [thread:$0]  (!%p23462_p5), %s23284_s29, 16, %s23458_s15, [#allocation8]  }
  0x87   : > { %s22470_s1 = scalar_lea.hbm %s26618_s8, 16 }
  0x88   : > { %p22471_p6 = scmp.ne.s32.totalorder %s26618_s8, %s22470_s1  ;;  %p22477_p10 = scmp.lt.u32.totalorder %s22470_s1, %s26618_s8 }
  0x8a   : > { %p22473_p8 = pnand %p22471_p6, %p23474_p7 }
  0x8c   : > { %p22474_p9 = pneg %p22473_p8 }
  0x8e   : > { %p22479_p11 = pnand %p22477_p10, %p22474_p9 }
  0x90   : > { %22482 = shalt.err (!%p22479_p11)
}
  0x91   : > { %s22483_s23 = scalar_lea.vmem %s23466_s18, 16  ;;  %s22490_s0 = scalar_lea.vmem %s23466_s18, 32 }
  0x92   : > { %p22484_p2 = scmp.ne.s32.totalorder %s23466_s18, %s22483_s23  ;;  %p22491_p13 = scmp.lt.s32.totalorder %s23466_s18, %s23466_s18 }
  0x93   : > { %p22492_p0 = scmp.lt.s32.totalorder %s22490_s0, %s22483_s23 }
  0x94   : > { %p22486_p3 = pnand %p22484_p2, %p23474_p7 }
  0x95   : > { %p22493_p1 = por %p22492_p0, %p22491_p13 }
  0x96   : > { %p22487_p12 = pneg %p22486_p3 }
  0x98   : > { %p22494_p4 = pnand %p22493_p1, %p22487_p12 }
  0x9a   : > { %22497 = shalt.err (!%p22494_p4)
}
  0x9b   : > { %21350 = dma.hbm_to_vmem [thread:$0]  (!%p23462_p5), %s26618_s8, 16, %s23466_s18, [#allocation11]  }
  0x9c   : > { %s22498_s15 = scalar_lea.hbm %s23314_s30, 16 }
  0x9d   : > { %p22499_p6 = scmp.ne.s32.totalorder %s23314_s30, %s22498_s15  ;;  %p22505_p10 = scmp.lt.u32.totalorder %s22498_s15, %s23314_s30 }
  0x9f   : > { %p22501_p8 = pnand %p22499_p6, %p23474_p7 }
  0xa1   : > { %p22502_p9 = pneg %p22501_p8 }
  0xa3   : > { %p22507_p11 = pnand %p22505_p10, %p22502_p9 }
  0xa5   : > { %22510 = shalt.err (!%p22507_p11)
}
  0xa6   : > { %s22511_s16 = scalar_lea.vmem %s23468_s26, 16  ;;  %s22518_s1 = scalar_lea.vmem %s23468_s26, 32 }
  0xa7   : > { %p22512_p2 = scmp.ne.s32.totalorder %s23468_s26, %s22511_s16  ;;  %p22519_p13 = scmp.lt.s32.totalorder %s23468_s26, %s23468_s26 }
  0xa8   : > { %p22520_p0 = scmp.lt.s32.totalorder %s22518_s1, %s22511_s16 }
  0xa9   : > { %p22514_p3 = pnand %p22512_p2, %p23474_p7 }
  0xaa   : > { %p22521_p1 = por %p22520_p0, %p22519_p13 }
  0xab   : > { %p22515_p12 = pneg %p22514_p3 }
  0xad   : > { %p22522_p4 = pnand %p22521_p1, %p22515_p12 }
  0xaf   : > { %22525 = shalt.err (!%p22522_p4)
}
  0xb0   : > { %21356 = dma.hbm_to_vmem [thread:$0]  (!%p23462_p5), %s23314_s30, 16, %s23468_s26, [#allocation14]  }
  0xb1   : > { %s23214_s18 = smov [#allocation16]   ;;  %s23215_s0 = smov [#allocation19]  }
  0xb2   : > { %s1018_s23 = sshll.u32 %s23214_s18, 4  ;;  %s1042_s15 = sshll.u32 %s23215_s0, 4  ;;  %s1019_s23 = int_to_ptr.vmem [resolvable:$true] %s1018_s23  ;;  %s1043_s15 = int_to_ptr.vmem [resolvable:$true] %s1042_s15 }
  0xb3   : > { %s22526_s2 = scalar_lea.hbm %s23334_s27, 16 }
  0xb4   : > { %p22527_p6 = scmp.ne.s32.totalorder %s23334_s27, %s22526_s2  ;;  %p22533_p10 = scmp.lt.u32.totalorder %s22526_s2, %s23334_s27 }
  0xb6   : > { %p22529_p8 = pnand %p22527_p6, %p23474_p7 }
  0xb8   : > { %p22530_p9 = pneg %p22529_p8 }
  0xba   : > { %p22535_p11 = pnand %p22533_p10, %p22530_p9 }
  0xbc   : > { %22538 = shalt.err (!%p22535_p11)
}
  0xbd   : > { %s22539_s16 = scalar_lea.vmem %s1019_s23, 16  ;;  %s22546_s26 = scalar_lea.vmem %s1019_s23, 32 }
  0xbe   : > { %p22540_p2 = scmp.ne.s32.totalorder %s1019_s23, %s22539_s16  ;;  %p22547_p13 = scmp.lt.s32.totalorder %s1019_s23, %s1019_s23 }
  0xbf   : > { %p22548_p0 = scmp.lt.s32.totalorder %s22546_s26, %s22539_s16 }
  0xc0   : > { %p22542_p3 = pnand %p22540_p2, %p23474_p7 }
  0xc1   : > { %p22549_p1 = por %p22548_p0, %p22547_p13 }
  0xc2   : > { %p22543_p12 = pneg %p22542_p3 }
  0xc4   : > { %p22550_p4 = pnand %p22549_p1, %p22543_p12 }
  0xc6   : > { %22553 = shalt.err (!%p22550_p4)
}
  0xc7   : > { %21362 = dma.hbm_to_vmem [thread:$0]  (!%p23462_p5), %s23334_s27, 16, %s1019_s23, [#allocation17]  }
  0xc8   : > { %s22554_s2 = scalar_lea.hbm %s23349_s20, 512 }
  0xc9   : > { %p22555_p6 = scmp.ne.s32.totalorder %s23349_s20, %s22554_s2  ;;  %p22561_p10 = scmp.lt.u32.totalorder %s22554_s2, %s23349_s20 }
  0xcb   : > { %p22557_p8 = pnand %p22555_p6, %p23474_p7 }
  0xcd   : > { %p22558_p9 = pneg %p22557_p8 }
  0xcf   : > { %p22563_p11 = pnand %p22561_p10, %p22558_p9 }
  0xd1   : > { %22566 = shalt.err (!%p22563_p11)
}
  0xd2   : > { %s22567_s1 = scalar_lea.vmem %s1043_s15, 512  ;;  %p22575_p13 = scmp.lt.s32.totalorder %s1043_s15, %s1043_s15 }
  0xd3   : > { %p22568_p2 = scmp.ne.s32.totalorder %s1043_s15, %s22567_s1  ;;  %p22576_p0 = scmp.lt.s32.totalorder %s22567_s1, %s22567_s1 }
  0xd5   : > { %p22570_p3 = pnand %p22568_p2, %p23474_p7  ;;  %p22577_p1 = por %p22576_p0, %p22575_p13 }
  0xd7   : > { %p22571_p12 = pneg %p22570_p3 }
  0xd9   : > { %p22578_p4 = pnand %p22577_p1, %p22571_p12 }
  0xdb   : > { %22581 = shalt.err (!%p22578_p4)
}
  0xdc   : > { %s26556_s18 = smov 128   ;;  %s26558_s23 = smov 8  }
  0xdd   : > { %21368 = dma.hbm_to_vmem [thread:$0]  (!%p23462_p5), %s23349_s20, 512, %s1043_s15, [#allocation20], %s26556_s18, %s26556_s18, %s26558_s23  }
  0xde   : > { %s23218_s0 = smov [#allocation22]   ;;  %s23219_s26 = smov [#allocation25]  }
  0xdf   : > { %s1070_s16 = sshll.u32 %s23218_s0, 4  ;;  %s1094_s2 = sshll.u32 %s23219_s26, 4  ;;  %s1071_s16 = int_to_ptr.vmem [resolvable:$true] %s1070_s16  ;;  %s1095_s2 = int_to_ptr.vmem [resolvable:$true] %s1094_s2 }
  0xe0   : > { %s22582_s1 = scalar_lea.hbm %s26612_s14, 16 }
  0xe1   : > { %p22583_p6 = scmp.ne.s32.totalorder %s26612_s14, %s22582_s1  ;;  %p22589_p10 = scmp.lt.u32.totalorder %s22582_s1, %s26612_s14 }
  0xe3   : > { %p22585_p8 = pnand %p22583_p6, %p23474_p7 }
  0xe5   : > { %p22586_p9 = pneg %p22585_p8 }
  0xe7   : > { %p22591_p11 = pnand %p22589_p10, %p22586_p9 }
  0xe9   : > { %22594 = shalt.err (!%p22591_p11)
}
  0xea   : > { %s22595_s8 = scalar_lea.vmem %s1071_s16, 16  ;;  %s22602_s15 = scalar_lea.vmem %s1071_s16, 32 }
  0xeb   : > { %p22596_p2 = scmp.ne.s32.totalorder %s1071_s16, %s22595_s8  ;;  %p22603_p13 = scmp.lt.s32.totalorder %s1071_s16, %s1071_s16 }
  0xec   : > { %p22604_p0 = scmp.lt.s32.totalorder %s22602_s15, %s22595_s8 }
  0xed   : > { %p22598_p3 = pnand %p22596_p2, %p23474_p7 }
  0xee   : > { %p22605_p1 = por %p22604_p0, %p22603_p13 }
  0xef   : > { %p22599_p12 = pneg %p22598_p3 }
  0xf1   : > { %p22606_p4 = pnand %p22605_p1, %p22599_p12 }
  0xf3   : > { %22609 = shalt.err (!%p22606_p4)
}
  0xf4   : > { %21374 = dma.hbm_to_vmem [thread:$0]  (!%p23462_p5), %s26612_s14, 16, %s1071_s16, [#allocation23]  }
  0xf5   : > { %s22610_s0 = scalar_lea.hbm %s26614_s9, 16 }
  0xf6   : > { %p22611_p6 = scmp.ne.s32.totalorder %s26614_s9, %s22610_s0  ;;  %p22617_p10 = scmp.lt.u32.totalorder %s22610_s0, %s26614_s9 }
  0xf8   : > { %p22613_p8 = pnand %p22611_p6, %p23474_p7 }
  0xfa   : > { %p22614_p9 = pneg %p22613_p8 }
  0xfc   : > { %p22619_p11 = pnand %p22617_p10, %p22614_p9 }
  0xfe   : > { %22622 = shalt.err (!%p22619_p11)
}
  0xff   : > { %s22623_s8 = scalar_lea.vmem %s1095_s2, 16  ;;  %s22630_s26 = scalar_lea.vmem %s1095_s2, 32 }
 0x100   : > { %p22624_p2 = scmp.ne.s32.totalorder %s1095_s2, %s22623_s8  ;;  %p22631_p13 = scmp.lt.s32.totalorder %s1095_s2, %s1095_s2 }
 0x101   : > { %p22632_p0 = scmp.lt.s32.totalorder %s22630_s26, %s22623_s8 }
 0x102   : > { %p22626_p3 = pnand %p22624_p2, %p23474_p7 }
 0x103   : > { %p22633_p1 = por %p22632_p0, %p22631_p13 }
 0x104   : > { %p22627_p12 = pneg %p22626_p3 }
 0x106   : > { %p22634_p4 = pnand %p22633_p1, %p22627_p12 }
 0x108   : > { %22637 = shalt.err (!%p22634_p4)
}
 0x109   : > { %21380 = dma.hbm_to_vmem [thread:$0]  (!%p23462_p5), %s26614_s9, 16, %s1095_s2, [#allocation26]  }
 0x10a   : > { %s23220_s16 = smov [#allocation28]   ;;  %s23221_s15 = smov [#allocation31]  }
 0x10b   : > { %s1118_s1 = sshll.u32 %s23220_s16, 4  ;;  %s1142_s0 = sshll.u32 %s23221_s15, 4  ;;  %s1119_s1 = int_to_ptr.vmem [resolvable:$true] %s1118_s1  ;;  %s1143_s0 = int_to_ptr.vmem [resolvable:$true] %s1142_s0 }
 0x10c   : > { %s22638_s18 = scalar_lea.hbm %s26615_s5, 16 }
 0x10d   : > { %p22639_p6 = scmp.ne.s32.totalorder %s26615_s5, %s22638_s18  ;;  %p22645_p10 = scmp.lt.u32.totalorder %s22638_s18, %s26615_s5 }
 0x10f   : > { %p22641_p8 = pnand %p22639_p6, %p23474_p7 }
 0x111   : > { %p22642_p9 = pneg %p22641_p8 }
 0x113   : > { %p22647_p11 = pnand %p22645_p10, %p22642_p9 }
 0x115   : > { %22650 = shalt.err (!%p22647_p11)
}
 0x116   : > { %s22651_s8 = scalar_lea.vmem %s1119_s1, 16  ;;  %s22658_s2 = scalar_lea.vmem %s1119_s1, 32 }
 0x117   : > { %p22652_p2 = scmp.ne.s32.totalorder %s1119_s1, %s22651_s8  ;;  %p22659_p13 = scmp.lt.s32.totalorder %s1119_s1, %s1119_s1 }
 0x118   : > { %p22660_p0 = scmp.lt.s32.totalorder %s22658_s2, %s22651_s8 }
 0x119   : > { %p22654_p3 = pnand %p22652_p2, %p23474_p7 }
 0x11a   : > { %p22661_p1 = por %p22660_p0, %p22659_p13 }
 0x11b   : > { %p22655_p12 = pneg %p22654_p3 }
 0x11d   : > { %p22662_p4 = pnand %p22661_p1, %p22655_p12 }
 0x11f   : > { %22665 = shalt.err (!%p22662_p4)
}
 0x120   : > { %21386 = dma.hbm_to_vmem [thread:$0]  (!%p23462_p5), %s26615_s5, 16, %s1119_s1, [#allocation29]  }
 0x121   : > { %s22666_s18 = scalar_lea.hbm %s23394_s24, 16 }
 0x122   : > { %p22667_p6 = scmp.ne.s32.totalorder %s23394_s24, %s22666_s18  ;;  %p22673_p10 = scmp.lt.u32.totalorder %s22666_s18, %s23394_s24 }
 0x124   : > { %p22669_p8 = pnand %p22667_p6, %p23474_p7 }
 0x126   : > { %p22670_p9 = pneg %p22669_p8 }
 0x128   : > { %p22675_p11 = pnand %p22673_p10, %p22670_p9 }
 0x12a   : > { %22678 = shalt.err (!%p22675_p11)
}
 0x12b   : > { %s22679_s26 = scalar_lea.vmem %s1143_s0, 16  ;;  %s22686_s16 = scalar_lea.vmem %s1143_s0, 32 }
 0x12c   : > { %p22680_p2 = scmp.ne.s32.totalorder %s1143_s0, %s22679_s26  ;;  %p22687_p13 = scmp.lt.s32.totalorder %s1143_s0, %s1143_s0 }
 0x12d   : > { %p22688_p0 = scmp.lt.s32.totalorder %s22686_s16, %s22679_s26 }
 0x12e   : > { %p22682_p3 = pnand %p22680_p2, %p23474_p7 }
 0x12f   : > { %p22689_p1 = por %p22688_p0, %p22687_p13 }
 0x130   : > { %p22683_p12 = pneg %p22682_p3 }
 0x132   : > { %p22690_p4 = pnand %p22689_p1, %p22683_p12 }
 0x134   : > { %22693 = shalt.err (!%p22690_p4)
}
 0x135   : > { %21392 = dma.hbm_to_vmem [thread:$0]  (!%p23462_p5), %s23394_s24, 16, %s1143_s0, [#allocation32]  }
 0x136   : > { %s23222_s1 = smov [#allocation34]   ;;  %s23223_s8 = smov [#allocation37]  }
 0x137   : > { %s1167_s15 = sshll.u32 %s23222_s1, 4  ;;  %s1189_s2 = sshll.u32 %s23223_s8, 4  ;;  %s1168_s15 = int_to_ptr.vmem [resolvable:$true] %s1167_s15  ;;  %s1190_s2 = int_to_ptr.vmem [resolvable:$true] %s1189_s2 }
 0x138   : > { %s22694_s18 = scalar_lea.hbm %s23409_s25, 128 }
 0x139   : > { %p22695_p6 = scmp.ne.s32.totalorder %s23409_s25, %s22694_s18  ;;  %p22701_p10 = scmp.lt.u32.totalorder %s22694_s18, %s23409_s25 }
 0x13b   : > { %p22697_p8 = pnand %p22695_p6, %p23474_p7 }
 0x13d   : > { %p22698_p9 = pneg %p22697_p8 }
 0x13f   : > { %p22703_p11 = pnand %p22701_p10, %p22698_p9 }
 0x141   : > { %22706 = shalt.err (!%p22703_p11)
}
 0x142   : > { %s22707_s26 = scalar_lea.vmem %s1168_s15, 128  ;;  %p22715_p13 = scmp.lt.s32.totalorder %s1168_s15, %s1168_s15 }
 0x143   : > { %p22708_p2 = scmp.ne.s32.totalorder %s1168_s15, %s22707_s26  ;;  %p22716_p0 = scmp.lt.s32.totalorder %s22707_s26, %s22707_s26 }
 0x145   : > { %p22710_p3 = pnand %p22708_p2, %p23474_p7  ;;  %p22717_p1 = por %p22716_p0, %p22715_p13 }
 0x147   : > { %p22711_p12 = pneg %p22710_p3 }
 0x149   : > { %p22718_p4 = pnand %p22717_p1, %p22711_p12 }
 0x14b   : > { %22721 = shalt.err (!%p22718_p4)
}
 0x14c   : > { %21398 = dma.hbm_to_vmem [thread:$0]  (!%p23462_p5), %s23409_s25, 128, %s1168_s15, [#allocation35]  }
 0x14d   : > { %s22722_s0 = scalar_lea.hbm %s26616_s4, 16 }
 0x14e   : > { %p22723_p6 = scmp.ne.s32.totalorder %s26616_s4, %s22722_s0  ;;  %p22729_p10 = scmp.lt.u32.totalorder %s22722_s0, %s26616_s4 }
 0x150   : > { %p22725_p8 = pnand %p22723_p6, %p23474_p7 }
 0x152   : > { %p22726_p9 = pneg %p22725_p8 }
 0x154   : > { %p22731_p11 = pnand %p22729_p10, %p22726_p9 }
 0x156   : > { %22734 = shalt.err (!%p22731_p11)
}
 0x157   : > { %s22735_s16 = scalar_lea.vmem %s1190_s2, 16  ;;  %s22742_s1 = scalar_lea.vmem %s1190_s2, 32 }
 0x158   : > { %p22736_p2 = scmp.ne.s32.totalorder %s1190_s2, %s22735_s16  ;;  %p22743_p13 = scmp.lt.s32.totalorder %s1190_s2, %s1190_s2 }
 0x159   : > { %p22744_p0 = scmp.lt.s32.totalorder %s22742_s1, %s22735_s16 }
 0x15a   : > { %p22738_p3 = pnand %p22736_p2, %p23474_p7 }
 0x15b   : > { %p22745_p1 = por %p22744_p0, %p22743_p13 }
 0x15c   : > { %p22739_p12 = pneg %p22738_p3 }
 0x15e   : > { %p22746_p4 = pnand %p22745_p1, %p22739_p12 }
 0x160   : > { %22749 = shalt.err (!%p22746_p4)
}
 0x161   : > { %21404 = dma.hbm_to_vmem [thread:$0]  (!%p23462_p5), %s26616_s4, 16, %s1190_s2, [#allocation38]  }
 0x162   : > { %s23224_s15 = smov [#allocation2]   ;;  %s23225_s18 = smov [#allocation6]  }
 0x163   : > { %s904_s8 = sshll.u32 %s23224_s15, 4  ;;  %s926_s26 = sshll.u32 %s23225_s18, 4  ;;  %s905_s8 = int_to_ptr.vmem [resolvable:$true] %s904_s8  ;;  %s927_s26 = int_to_ptr.vmem [resolvable:$true] %s926_s26 }
 0x164   : > { %s22750_s0 = scalar_lea.hbm %s26613_s13, 16 }
 0x165   : > { %p22751_p6 = scmp.ne.s32.totalorder %s26613_s13, %s22750_s0  ;;  %p22757_p10 = scmp.lt.u32.totalorder %s22750_s0, %s26613_s13 }
 0x167   : > { %p22753_p8 = pnand %p22751_p6, %p23474_p7 }
 0x169   : > { %p22754_p9 = pneg %p22753_p8 }
 0x16b   : > { %p22759_p11 = pnand %p22757_p10, %p22754_p9 }
 0x16d   : > { %22762 = shalt.err (!%p22759_p11)
}
 0x16e   : > { %s22763_s16 = scalar_lea.vmem %s905_s8, 16  ;;  %s22770_s2 = scalar_lea.vmem %s905_s8, 32 }
 0x16f   : > { %p22764_p2 = scmp.ne.s32.totalorder %s905_s8, %s22763_s16  ;;  %p22771_p13 = scmp.lt.s32.totalorder %s905_s8, %s905_s8 }
 0x170   : > { %p22772_p0 = scmp.lt.s32.totalorder %s22770_s2, %s22763_s16 }
 0x171   : > { %p22766_p3 = pnand %p22764_p2, %p23474_p7 }
 0x172   : > { %p22773_p1 = por %p22772_p0, %p22771_p13 }
 0x173   : > { %p22767_p12 = pneg %p22766_p3 }
 0x175   : > { %p22774_p4 = pnand %p22773_p1, %p22767_p12 }
 0x177   : > { %22777 = shalt.err (!%p22774_p4)
}
 0x178   : > { %21335 = dma.hbm_to_vmem [thread:$0]  (!%p23462_p5), %s26613_s13, 16, %s905_s8, [#allocation3]  }
 0x179   : > { %s22778_s1 = scalar_lea.hbm %s23274_s21, 16 }
 0x17a   : > { %p22779_p6 = scmp.ne.s32.totalorder %s23274_s21, %s22778_s1  ;;  %p22785_p10 = scmp.lt.u32.totalorder %s22778_s1, %s23274_s21 }
 0x17c   : > { %p22781_p8 = pnand %p22779_p6, %p23474_p7 }
 0x17e   : > { %p22782_p9 = pneg %p22781_p8 }
 0x180   : > { %p22787_p11 = pnand %p22785_p10, %p22782_p9 }
 0x182   : > { %22790 = shalt.err (!%p22787_p11)
}
 0x183   : > { %s22791_s15 = scalar_lea.vmem %s927_s26, 16  ;;  %s22798_s18 = scalar_lea.vmem %s927_s26, 32 }
 0x184   : > { %p22792_p2 = scmp.ne.s32.totalorder %s927_s26, %s22791_s15  ;;  %p22799_p13 = scmp.lt.s32.totalorder %s927_s26, %s927_s26 }
 0x185   : > { %p22800_p0 = scmp.lt.s32.totalorder %s22798_s18, %s22791_s15 }
 0x186   : > { %p22794_p3 = pnand %p22792_p2, %p23474_p7 }
 0x187   : > { %p22801_p1 = por %p22800_p0, %p22799_p13 }
 0x188   : > { %p22795_p12 = pneg %p22794_p3 }
 0x18a   : > { %p22802_p4 = pnand %p22801_p1, %p22795_p12 }
 0x18c   : > { %22805 = shalt.err (!%p22802_p4)
}
 0x18d   : > { %21341 = dma.hbm_to_vmem [thread:$0]  (!%p23462_p5), %s23274_s21, 16, %s927_s26, [#allocation5]  }
 0x18e   : > { %s23226_s8 = smov [#allocation9]   ;;  %s23227_s16 = smov [#allocation12]  }
 0x18f   : > { %s951_s0 = sshll.u32 %s23226_s8, 4  ;;  %s976_s2 = sshll.u32 %s23227_s16, 4  ;;  %s952_s0 = int_to_ptr.vmem [resolvable:$true] %s951_s0  ;;  %s977_s2 = int_to_ptr.vmem [resolvable:$true] %s976_s2 }
 0x190   : > { %s22806_s1 = scalar_lea.hbm %s26617_s3, 64 }
 0x191   : > { %p22807_p6 = scmp.ne.s32.totalorder %s26617_s3, %s22806_s1  ;;  %p22813_p10 = scmp.lt.u32.totalorder %s22806_s1, %s26617_s3 }
 0x193   : > { %p22809_p8 = pnand %p22807_p6, %p23474_p7 }
 0x195   : > { %p22810_p9 = pneg %p22809_p8 }
 0x197   : > { %p22815_p11 = pnand %p22813_p10, %p22810_p9 }
 0x199   : > { %22818 = shalt.err (!%p22815_p11)
}
 0x19a   : > { %s22819_s15 = scalar_lea.vmem %s952_s0, 64  ;;  %p22827_p13 = scmp.lt.s32.totalorder %s952_s0, %s952_s0 }
 0x19b   : > { %p22820_p2 = scmp.ne.s32.totalorder %s952_s0, %s22819_s15  ;;  %p22828_p0 = scmp.lt.s32.totalorder %s22819_s15, %s22819_s15 }
 0x19d   : > { %p22822_p3 = pnand %p22820_p2, %p23474_p7  ;;  %p22829_p1 = por %p22828_p0, %p22827_p13 }
 0x19f   : > { %p22823_p12 = pneg %p22822_p3 }
 0x1a1   : > { %p22830_p4 = pnand %p22829_p1, %p22823_p12 }
 0x1a3   : > { %22833 = shalt.err (!%p22830_p4)
}
 0x1a4   : > { %s26623_s26 = sld [smem:[#allocation60_spill]] }
 0x1a5   : > { %21347 = dma.hbm_to_vmem [thread:$0]  (!%p23462_p5), %s26617_s3, 64, %s952_s0, [#allocation8]  }
 0x1aa   : > { %s22834_s18 = scalar_lea.hbm %s26623_s26, 16 }
 0x1ab   : > { %p22835_p6 = scmp.ne.s32.totalorder %s26623_s26, %s22834_s18  ;;  %p22841_p10 = scmp.lt.u32.totalorder %s22834_s18, %s26623_s26 }
 0x1ad   : > { %p22837_p8 = pnand %p22835_p6, %p23474_p7 }
 0x1af   : > { %p22838_p9 = pneg %p22837_p8 }
 0x1b1   : > { %p22843_p11 = pnand %p22841_p10, %p22838_p9 }
 0x1b3   : > { %22846 = shalt.err (!%p22843_p11)
}
 0x1b4   : > { %s22847_s8 = scalar_lea.vmem %s977_s2, 16  ;;  %s22854_s16 = scalar_lea.vmem %s977_s2, 32 }
 0x1b5   : > { %p22848_p2 = scmp.ne.s32.totalorder %s977_s2, %s22847_s8  ;;  %p22855_p13 = scmp.lt.s32.totalorder %s977_s2, %s977_s2 }
 0x1b6   : > { %p22856_p0 = scmp.lt.s32.totalorder %s22854_s16, %s22847_s8 }
 0x1b7   : > { %p22850_p3 = pnand %p22848_p2, %p23474_p7 }
 0x1b8   : > { %p22857_p1 = por %p22856_p0, %p22855_p13 }
 0x1b9   : > { %p22851_p12 = pneg %p22850_p3 }
 0x1bb   : > { %p22858_p4 = pnand %p22857_p1, %p22851_p12 }
 0x1bd   : > { %22861 = shalt.err (!%p22858_p4)
}
 0x1be   : > { %s26624_s0 = sld [smem:[#allocation63_spill]]  ;;  %s23228_s1 = smov [#allocation15]  }
 0x1bf   : > { %21353 = dma.hbm_to_vmem [thread:$0]  (!%p23462_p5), %s26623_s26, 16, %s977_s2, [#allocation11]  }
 0x1c0   : > { %s1004_s15 = sshll.u32 %s23228_s1, 4  ;;  %s23229_s18 = smov [#allocation18]   ;;  %s1005_s15 = int_to_ptr.vmem [resolvable:$true] %s1004_s15 }
 0x1c1   : > { %s1032_s23 = sshll.u32 %s23229_s18, 4  ;;  %s1033_s23 = int_to_ptr.vmem [resolvable:$true] %s1032_s23 }
 0x1c4   : > { %s22862_s3 = scalar_lea.hbm %s26624_s0, 16 }
 0x1c5   : > { %p22863_p6 = scmp.ne.s32.totalorder %s26624_s0, %s22862_s3  ;;  %p22869_p10 = scmp.lt.u32.totalorder %s22862_s3, %s26624_s0 }
 0x1c7   : > { %p22865_p8 = pnand %p22863_p6, %p23474_p7 }
 0x1c9   : > { %p22866_p9 = pneg %p22865_p8 }
 0x1cb   : > { %p22871_p11 = pnand %p22869_p10, %p22866_p9 }
 0x1cd   : > { %22874 = shalt.err (!%p22871_p11)
}
 0x1ce   : > { %s22875_s8 = scalar_lea.vmem %s1005_s15, 16  ;;  %s22882_s2 = scalar_lea.vmem %s1005_s15, 32 }
 0x1cf   : > { %p22876_p2 = scmp.ne.s32.totalorder %s1005_s15, %s22875_s8  ;;  %p22883_p13 = scmp.lt.s32.totalorder %s1005_s15, %s1005_s15 }
 0x1d0   : > { %p22884_p0 = scmp.lt.s32.totalorder %s22882_s2, %s22875_s8 }
 0x1d1   : > { %p22878_p3 = pnand %p22876_p2, %p23474_p7 }
 0x1d2   : > { %p22885_p1 = por %p22884_p0, %p22883_p13 }
 0x1d3   : > { %p22879_p12 = pneg %p22878_p3 }
 0x1d5   : > { %p22886_p4 = pnand %p22885_p1, %p22879_p12 }
 0x1d7   : > { %22889 = shalt.err (!%p22886_p4)
}
 0x1d8   : > { %s26625_s16 = sld [smem:[#allocation66_spill]] }
 0x1d9   : > { %21359 = dma.hbm_to_vmem [thread:$0]  (!%p23462_p5), %s26624_s0, 16, %s1005_s15, [#allocation14]  }
 0x1de   : > { %s22890_s3 = scalar_lea.hbm %s26625_s16, 16 }
 0x1df   : > { %p22891_p6 = scmp.ne.s32.totalorder %s26625_s16, %s22890_s3  ;;  %p22897_p10 = scmp.lt.u32.totalorder %s22890_s3, %s26625_s16 }
 0x1e1   : > { %p22893_p8 = pnand %p22891_p6, %p23474_p7 }
 0x1e3   : > { %p22894_p9 = pneg %p22893_p8 }
 0x1e5   : > { %p22899_p11 = pnand %p22897_p10, %p22894_p9 }
 0x1e7   : > { %22902 = shalt.err (!%p22899_p11)
}
 0x1e8   : > { %s22903_s1 = scalar_lea.vmem %s1033_s23, 16  ;;  %s22910_s18 = scalar_lea.vmem %s1033_s23, 32 }
 0x1e9   : > { %p22904_p2 = scmp.ne.s32.totalorder %s1033_s23, %s22903_s1  ;;  %p22911_p13 = scmp.lt.s32.totalorder %s1033_s23, %s1033_s23 }
 0x1ea   : > { %p22912_p0 = scmp.lt.s32.totalorder %s22910_s18, %s22903_s1 }
 0x1eb   : > { %p22906_p3 = pnand %p22904_p2, %p23474_p7 }
 0x1ec   : > { %p22913_p1 = por %p22912_p0, %p22911_p13 }
 0x1ed   : > { %p22907_p12 = pneg %p22906_p3 }
 0x1ef   : > { %p22914_p4 = pnand %p22913_p1, %p22907_p12 }
 0x1f1   : > { %22917 = shalt.err (!%p22914_p4)
}
 0x1f2   : > { %s26626_s15 = sld [smem:[#allocation67_spill]]  ;;  %s23230_s8 = smov [#allocation21]  }
 0x1f3   : > { %21365 = dma.hbm_to_vmem [thread:$0]  (!%p23462_p5), %s26625_s16, 16, %s1033_s23, [#allocation17]  }
 0x1f4   : > { %s1056_s2 = sshll.u32 %s23230_s8, 4  ;;  %s23231_s3 = smov [#allocation24]   ;;  %s1057_s2 = int_to_ptr.vmem [resolvable:$true] %s1056_s2 }
 0x1f5   : > { %s1080_s0 = sshll.u32 %s23231_s3, 4  ;;  %s1081_s0 = int_to_ptr.vmem [resolvable:$true] %s1080_s0 }
 0x1f8   : > { %s22918_s4 = scalar_lea.hbm %s26626_s15, 16 }
 0x1f9   : > { %p22919_p6 = scmp.ne.s32.totalorder %s26626_s15, %s22918_s4  ;;  %p22925_p10 = scmp.lt.u32.totalorder %s22918_s4, %s26626_s15 }
 0x1fb   : > { %p22921_p8 = pnand %p22919_p6, %p23474_p7 }
 0x1fd   : > { %p22922_p9 = pneg %p22921_p8 }
 0x1ff   : > { %p22927_p11 = pnand %p22925_p10, %p22922_p9 }
 0x201   : > { %22930 = shalt.err (!%p22927_p11)
}
 0x202   : > { %s22931_s1 = scalar_lea.vmem %s1057_s2, 16  ;;  %s22938_s23 = scalar_lea.vmem %s1057_s2, 32 }
 0x203   : > { %p22932_p2 = scmp.ne.s32.totalorder %s1057_s2, %s22931_s1  ;;  %p22939_p13 = scmp.lt.s32.totalorder %s1057_s2, %s1057_s2 }
 0x204   : > { %p22940_p0 = scmp.lt.s32.totalorder %s22938_s23, %s22931_s1 }
 0x205   : > { %p22934_p3 = pnand %p22932_p2, %p23474_p7 }
 0x206   : > { %p22941_p1 = por %p22940_p0, %p22939_p13 }
 0x207   : > { %p22935_p12 = pneg %p22934_p3 }
 0x209   : > { %p22942_p4 = pnand %p22941_p1, %p22935_p12 }
 0x20b   : > { %22945 = shalt.err (!%p22942_p4)
}
 0x20c   : > { %s26627_s18 = sld [smem:[#allocation70_spill]] }
 0x20d   : > { %21371 = dma.hbm_to_vmem [thread:$0]  (!%p23462_p5), %s26626_s15, 16, %s1057_s2, [#allocation20]  }
 0x212   : > { %s22946_s4 = scalar_lea.hbm %s26627_s18, 512 }
 0x213   : > { %p22947_p6 = scmp.ne.s32.totalorder %s26627_s18, %s22946_s4  ;;  %p22953_p10 = scmp.lt.u32.totalorder %s22946_s4, %s26627_s18 }
 0x215   : > { %p22949_p8 = pnand %p22947_p6, %p23474_p7 }
 0x217   : > { %p22950_p9 = pneg %p22949_p8 }
 0x219   : > { %p22955_p11 = pnand %p22953_p10, %p22950_p9 }
 0x21b   : > { %22958 = shalt.err (!%p22955_p11)
}
 0x21c   : > { %s22959_s8 = scalar_lea.vmem %s1081_s0, 512  ;;  %p22967_p13 = scmp.lt.s32.totalorder %s1081_s0, %s1081_s0 }
 0x21d   : > { %p22960_p2 = scmp.ne.s32.totalorder %s1081_s0, %s22959_s8  ;;  %p22968_p0 = scmp.lt.s32.totalorder %s22959_s8, %s22959_s8 }
 0x21f   : > { %p22962_p3 = pnand %p22960_p2, %p23474_p7  ;;  %p22969_p1 = por %p22968_p0, %p22967_p13 }
 0x221   : > { %p22963_p12 = pneg %p22962_p3 }
 0x223   : > { %p22970_p4 = pnand %p22969_p1, %p22963_p12 }
 0x225   : > { %22973 = shalt.err (!%p22970_p4)
}
 0x226   : > { %s26628_s2 = smov 8   ;;  %s26629_s3 = smov 128  }
 0x227   : > { %s26630_s1 = sld [smem:[#allocation72_spill]]  ;;  %s23232_s23 = smov [#allocation27]  }
 0x228   : > { %21377 = dma.hbm_to_vmem [thread:$0]  (!%p23462_p5), %s26627_s18, 512, %s1081_s0, [#allocation23], %s26629_s3, %s26629_s3, %s26628_s2  }
 0x229   : > { %s1104_s4 = sshll.u32 %s23232_s23, 4  ;;  %s23233_s5 = smov [#allocation30]   ;;  %s1105_s4 = int_to_ptr.vmem [resolvable:$true] %s1104_s4 }
 0x22a   : > { %s1128_s9 = sshll.u32 %s23233_s5, 4  ;;  %s1129_s9 = int_to_ptr.vmem [resolvable:$true] %s1128_s9 }
 0x22d   : > { %s22974_s8 = scalar_lea.hbm %s26630_s1, 512 }
 0x22e   : > { %p22975_p6 = scmp.ne.s32.totalorder %s26630_s1, %s22974_s8  ;;  %p22981_p10 = scmp.lt.u32.totalorder %s22974_s8, %s26630_s1 }
 0x230   : > { %p22977_p8 = pnand %p22975_p6, %p23474_p7 }
 0x232   : > { %p22978_p9 = pneg %p22977_p8 }
 0x234   : > { %p22983_p11 = pnand %p22981_p10, %p22978_p9 }
 0x236   : > { %22986 = shalt.err (!%p22983_p11)
}
 0x237   : > { %s22987_s13 = scalar_lea.vmem %s1105_s4, 512  ;;  %p22995_p13 = scmp.lt.s32.totalorder %s1105_s4, %s1105_s4 }
 0x238   : > { %p22988_p2 = scmp.ne.s32.totalorder %s1105_s4, %s22987_s13  ;;  %p22996_p0 = scmp.lt.s32.totalorder %s22987_s13, %s22987_s13 }
 0x23a   : > { %p22990_p3 = pnand %p22988_p2, %p23474_p7  ;;  %p22997_p1 = por %p22996_p0, %p22995_p13 }
 0x23c   : > { %p22991_p12 = pneg %p22990_p3 }
 0x23e   : > { %p22998_p4 = pnand %p22997_p1, %p22991_p12 }
 0x240   : > { %23001 = shalt.err (!%p22998_p4)
}
 0x241   : > { %s26631_s5 = sld [smem:[#allocation74_spill]] }
 0x242   : > { %21383 = dma.hbm_to_vmem [thread:$0]  (!%p23462_p5), %s26630_s1, 512, %s1105_s4, [#allocation26], %s26629_s3, %s26629_s3, %s26628_s2  }
 0x247   : > { %s23002_s0 = scalar_lea.hbm %s26631_s5, 512 }
 0x248   : > { %p23003_p6 = scmp.ne.s32.totalorder %s26631_s5, %s23002_s0  ;;  %p23009_p10 = scmp.lt.u32.totalorder %s23002_s0, %s26631_s5 }
 0x24a   : > { %p23005_p8 = pnand %p23003_p6, %p23474_p7 }
 0x24c   : > { %p23006_p9 = pneg %p23005_p8 }
 0x24e   : > { %p23011_p11 = pnand %p23009_p10, %p23006_p9 }
 0x250   : > { %23014 = shalt.err (!%p23011_p11)
}
 0x251   : > { %s23015_s13 = scalar_lea.vmem %s1129_s9, 512  ;;  %p23023_p13 = scmp.lt.s32.totalorder %s1129_s9, %s1129_s9 }
 0x252   : > { %p23016_p2 = scmp.ne.s32.totalorder %s1129_s9, %s23015_s13  ;;  %p23024_p0 = scmp.lt.s32.totalorder %s23015_s13, %s23015_s13 }
 0x254   : > { %p23018_p3 = pnand %p23016_p2, %p23474_p7  ;;  %p23025_p1 = por %p23024_p0, %p23023_p13 }
 0x256   : > { %p23019_p12 = pneg %p23018_p3 }
 0x258   : > { %p23026_p4 = pnand %p23025_p1, %p23019_p12 }
 0x25a   : > { %23029 = shalt.err (!%p23026_p4)
}
 0x25b   : > { %s26632_s23 = sld [smem:[#allocation76_spill]]  ;;  %s23234_s4 = smov [#allocation33]  }
 0x25c   : > { %21389 = dma.hbm_to_vmem [thread:$0]  (!%p23462_p5), %s26631_s5, 512, %s1129_s9, [#allocation29], %s26629_s3, %s26629_s3, %s26628_s2  }
 0x25d   : > { %s1156_s8 = sshll.u32 %s23234_s4, 4  ;;  %s23235_s0 = smov [#allocation36]   ;;  %s1157_s8 = int_to_ptr.vmem [resolvable:$true] %s1156_s8 }
 0x25e   : > { %s1178_s1 = sshll.u32 %s23235_s0, 4  ;;  %s1179_s1 = int_to_ptr.vmem [resolvable:$true] %s1178_s1 }
 0x261   : > { %s23030_s13 = scalar_lea.hbm %s26632_s23, 16 }
 0x262   : > { %p23031_p6 = scmp.ne.s32.totalorder %s26632_s23, %s23030_s13  ;;  %p23037_p10 = scmp.lt.u32.totalorder %s23030_s13, %s26632_s23 }
 0x264   : > { %p23033_p8 = pnand %p23031_p6, %p23474_p7 }
 0x266   : > { %p23034_p9 = pneg %p23033_p8 }
 0x268   : > { %p23039_p11 = pnand %p23037_p10, %p23034_p9 }
 0x26a   : > { %23042 = shalt.err (!%p23039_p11)
}
 0x26b   : > { %s23043_s14 = scalar_lea.vmem %s1157_s8, 16  ;;  %s23050_s9 = scalar_lea.vmem %s1157_s8, 32 }
 0x26c   : > { %p23044_p2 = scmp.ne.s32.totalorder %s1157_s8, %s23043_s14  ;;  %p23051_p13 = scmp.lt.s32.totalorder %s1157_s8, %s1157_s8 }
 0x26d   : > { %p23052_p0 = scmp.lt.s32.totalorder %s23050_s9, %s23043_s14 }
 0x26e   : > { %p23046_p3 = pnand %p23044_p2, %p23474_p7 }
 0x26f   : > { %p23053_p1 = por %p23052_p0, %p23051_p13 }
 0x270   : > { %p23047_p12 = pneg %p23046_p3 }
 0x272   : > { %p23054_p4 = pnand %p23053_p1, %p23047_p12 }
 0x274   : > { %23057 = shalt.err (!%p23054_p4)
}
 0x275   : > { %s26633_s2 = sld [smem:[#allocation77_spill]] }
 0x276   : > { %21395 = dma.hbm_to_vmem [thread:$0]  (!%p23462_p5), %s26632_s23, 16, %s1157_s8, [#allocation32]  }
 0x27b   : > { %s23058_s3 = scalar_lea.hbm %s26633_s2, 128 }
 0x27c   : > { %p23059_p6 = scmp.ne.s32.totalorder %s26633_s2, %s23058_s3  ;;  %p23065_p10 = scmp.lt.u32.totalorder %s23058_s3, %s26633_s2 }
 0x27e   : > { %p23061_p8 = pnand %p23059_p6, %p23474_p7 }
 0x280   : > { %p23062_p9 = pneg %p23061_p8 }
 0x282   : > { %p23067_p11 = pnand %p23065_p10, %p23062_p9 }
 0x284   : > { %23070 = shalt.err (!%p23067_p11)
}
 0x285   : > { %s23071_s14 = scalar_lea.vmem %s1179_s1, 128  ;;  %p23079_p13 = scmp.lt.s32.totalorder %s1179_s1, %s1179_s1 }
 0x286   : > { %p23072_p2 = scmp.ne.s32.totalorder %s1179_s1, %s23071_s14  ;;  %p23080_p0 = scmp.lt.s32.totalorder %s23071_s14, %s23071_s14 }
 0x288   : > { %p23074_p3 = pnand %p23072_p2, %p23474_p7  ;;  %p23081_p1 = por %p23080_p0, %p23079_p13 }
 0x28a   : > { %p23075_p12 = pneg %p23074_p3 }
 0x28c   : > { %p23082_p4 = pnand %p23081_p1, %p23075_p12 }
 0x28e   : > { %23085 = shalt.err (!%p23082_p4)
}
 0x28f   : > { %21401 = dma.hbm_to_vmem [thread:$0]  (!%p23462_p5), %s26633_s2, 128, %s1179_s1, [#allocation35]  }
 0x290   : > { %s23236_s4 = smov [#allocation39]   ;;  %s23086_s0 = scalar_lea.hbm %s23429_s19, 16 }
 0x291   : > { %s1203_s8 = sshll.u32 %s23236_s4, 4  ;;  %p23087_p6 = scmp.ne.s32.totalorder %s23429_s19, %s23086_s0  ;;  %s1204_s8 = int_to_ptr.vmem [resolvable:$true] %s1203_s8 }
 0x292   : > { %p23093_p10 = scmp.lt.u32.totalorder %s23086_s0, %s23429_s19 }
 0x293   : > { %p23089_p8 = pnand %p23087_p6, %p23474_p7 }
 0x295   : > { %p23090_p9 = pneg %p23089_p8 }
 0x297   : > { %p23095_p11 = pnand %p23093_p10, %p23090_p9 }
 0x299   : > { %23098 = shalt.err (!%p23095_p11)
}
 0x29a   : > { %s23099_s13 = scalar_lea.vmem %s1204_s8, 16  ;;  %s23106_s9 = scalar_lea.vmem %s1204_s8, 32 }
 0x29b   : > { %p23100_p2 = scmp.ne.s32.totalorder %s1204_s8, %s23099_s13  ;;  %p23107_p13 = scmp.lt.s32.totalorder %s1204_s8, %s1204_s8 }
 0x29c   : > { %p23108_p0 = scmp.lt.s32.totalorder %s23106_s9, %s23099_s13 }
 0x29d   : > { %p23102_p3 = pnand %p23100_p2, %p23474_p7 }
 0x29e   : > { %p23109_p1 = por %p23108_p0, %p23107_p13 }
 0x29f   : > { %p23103_p12 = pneg %p23102_p3 }
 0x2a1   : > { %p23110_p4 = pnand %p23109_p1, %p23103_p12 }
 0x2a3   : > { %23113 = shalt.err (!%p23110_p4)
}
 0x2a4   : > { %21407 = dma.hbm_to_vmem [thread:$0]  (!%p23462_p5), %s23429_s19, 16, %s1204_s8, [#allocation38]  }
 0x2a5   : > { %p26634_p6 = scmp.ne.s32.totalorder %s26620_s10, 0 }
 0x2a7   : > { %1226 = sbr.rel (%p26634_p6) target bundleno = 13437 (0x347d), region = 164 }
 0x2ae   : > { %p26635_p8 = scmp.ne.s32.totalorder %s26619_s7, 0 }
 0x2b0   : > { %23119 = dma.done.wait (%p26635_p8), [#allocation3], 16  }
 0x2b1   : > { %23121 = vsyncadd (%p26635_p8), [#allocation3], 4294967280 }
 0x2b2   : > { %23123 = dma.done.wait (%p26635_p8), [#allocation5], 80  }
 0x2b3   : > { %23125 = vsyncadd (%p26635_p8), [#allocation5], 4294967216 }
 0x2b4   : > { %23127 = dma.done.wait (%p26635_p8), [#allocation8], 80  }
 0x2b5   : > { %23129 = vsyncadd (%p26635_p8), [#allocation8], 4294967216 }
 0x2b6   : > { %23131 = dma.done.wait (%p26635_p8), [#allocation11], 32  }
 0x2b7   : > { %23133 = vsyncadd (%p26635_p8), [#allocation11], 4294967264 }
 0x2b8   : > { %23135 = dma.done.wait (%p26635_p8), [#allocation14], 32  }
 0x2b9   : > { %23137 = vsyncadd (%p26635_p8), [#allocation14], 4294967264 }
 0x2ba   : > { %23139 = dma.done.wait (%p26635_p8), [#allocation17], 32  }
 0x2bb   : > { %23141 = vsyncadd (%p26635_p8), [#allocation17], 4294967264 }
 0x2bc   : > { %23143 = dma.done.wait (%p26635_p8), [#allocation20], 528  }
 0x2bd   : > { %23145 = vsyncadd (%p26635_p8), [#allocation20], 4294966768 }
 0x2be   : > { %23147 = dma.done.wait (%p26635_p8), [#allocation23], 528  }
 0x2bf   : > { %23149 = vsyncadd (%p26635_p8), [#allocation23], 4294966768 }
 0x2c0   : > { %23151 = dma.done.wait (%p26635_p8), [#allocation26], 528  }
 0x2c1   : > { %23153 = vsyncadd (%p26635_p8), [#allocation26], 4294966768 }
 0x2c2   : > { %23155 = dma.done.wait (%p26635_p8), [#allocation29], 528  }
 0x2c3   : > { %23157 = vsyncadd (%p26635_p8), [#allocation29], 4294966768 }
 0x2c4   : > { %23159 = dma.done.wait (%p26635_p8), [#allocation32], 32  }
 0x2c5   : > { %23161 = vsyncadd (%p26635_p8), [#allocation32], 4294967264 }
 0x2c6   : > { %23163 = dma.done.wait (%p26635_p8), [#allocation35], 256  }
 0x2c7   : > { %23165 = vsyncadd (%p26635_p8), [#allocation35], 4294967040 }
 0x2c8   : > { %23167 = dma.done.wait (%p26635_p8), [#allocation38], 32  }
 0x2c9   : > { %23169 = vsyncadd (%p26635_p8), [#allocation38], 4294967264  ;;  %s26636_s10 = sadd.s32 4294967295, %s23172_s28   ;;  %s26637_s22 = sld [smem:[#allocation53_spill]]  ;;  %v26571_v0 = vmov 0.0|0.0   ;;  %vm23238_vm0 = vmmov 0  }
 0x2ca   : > { %s18443_s11 = sshll.u32 %s26636_s10, 2  ;;  %s26638_s1 = sld [smem:[#allocation54_spill]]  ;;  %20746 = vmatprep.subr.bf16.mxu0 %v26571_v0  ;;  %v26569_v1 = vmov 0.0   ;;  %vm1573_vm1 = vcmask 1043456   ;;  %vm1548_vm2 = vcmask 31744   ;;  %v1454_v15 = vld [vmem:[#allocation34] sm:$0xff] }
 0x2cb   : > { %p1413_p5 = scmp.lt.s32.totalorder %s18443_s11, 7  ;;  %19523 = vmatprep.mubr.msk.f32.mxu0 %vm23238_vm0, %v26569_v1  ;;  %v1540_v2 = vld [vmem:[#allocation4] sm:$0xf]  ;;  %vm1466_vm3 = vcmask 261120   ;;  %v18453_v18 = vld [vmem:[#allocation6] ss:$0 sm:$0xff] }
 0x2cc   : > { %19526 = vmatprep.subr.msk.mxu1 %vm1573_vm1, %v1540_v2  ;;  %vm1682_vm4 = vcmask 64512   ;;  %s23240_s14 = smov 120   ;;  %v18451_v30 = vld [vmem:[#allocation2] ss:$0 sm:$0xff]  ;;  %vm1994_vm6 = vcmask 130048   ;;  %s23241_s4 = smov 32  }
 0x2cd   : > { %s26692_s11 = smov (!%p1413_p5, %s18443_s11), 7  ;;  %19527 = vmatpush3.msk.msra.mxu1 %vm1573_vm1, %v1540_v2  ;;  %vm23862_vm5 = vmpackc.low %vm1682_vm4, %vm1682_vm4  ;;  %s23242_s8 = smov 96  }
 0x2ce   : > { %s18899_s7 = sshll.u32 %s26692_s11, 4  ;;  %20756 = vmatprep.subr.bf16.mxu1 %v26571_v0  ;;  %s26584_s0 = smov 112  }
 0x2cf   : > { %s23824_s3 = scalar_lea.vmem %s26637_s22, %s18899_s7  ;;  %s26582_s13 = smov 104  }
 0x2d0   : > { %v1424_v3 = vld [vmem:[%s23824_s3] sm:$0xff]  ;;  %v1425_v4 = vld [vmem:[%s23824_s3 + $0x8] sm:$0xff]  ;;  %v1426_v5 = vld [vmem:[%s23824_s3 + $0x10] sm:$0xff]  ;;  %s26645_s9 = sld [smem:[#allocation56_spill]]  ;;  %s26646_s10 = sld [smem:[#allocation59_spill]] }
 0x2d1   : > { %19528 = vmatprep.mubr.msk.f32.mxu1 %vm1548_vm2, %v1424_v3  ;;  %v1455_v6 = vld [vmem:[%s26638_s1] sm:$0xff]  ;;  %v1456_v7 = vld [vmem:[%s26638_s1 + $0x8] sm:$0xff]  ;;  %v1457_v9 = vld [vmem:[%s26638_s1 + $0x10] sm:$0xff]  ;;  %s26647_s22 = sld [smem:[#allocation61_spill]]  ;;  %s26648_s7 = sld [smem:[#allocation62_spill]] }
 0x2d2   : > { %v20747_v8 = vpack.c.bf16 %v1456_v7, %v1455_v6  ;;  %19529 = vmatmul.mubr.msk.f32.vlgmr.msra.gmra.mrb[0].mxu1 %vm1548_vm2, %v1425_v4  ;;  %v1458_v10 = vld [vmem:[%s26638_s1 + $0x18] sm:$0xff]  ;;  %v1428_v13 = vld [vmem:[%s23824_s3 + $0x20] sm:$0xff]  ;;  %v1429_v14 = vld [vmem:[%s23824_s3 + $0x28] sm:$0xff] }
 0x2d3   : > { %19531 = vmatprep.mubr.msk.f32.mxu1 %vm1548_vm2, %v1426_v5  ;;  %v1427_v11 = vld [vmem:[%s23824_s3 + $0x18] sm:$0xff]  ;;  %v20750_v12 = vpack.c.bf16 %v1458_v10, %v1457_v9  ;;  %v1430_v16 = vld [vmem:[%s23824_s3 + $0x30] sm:$0xff] }
 0x2d4   : > { %20748 = vmatpush3.bf16.msra.mxu0 %v20747_v8  ;;  %v1431_v17 = vld [vmem:[%s23824_s3 + $0x38] sm:$0xff] }
 0x2d5   : > { %20749 = vmatprep.subr.bf16.mxu0 %v26571_v0 }
 0x2d6   : > { %19532 = vmatmul.mubr.msk.f32.gmra.mrb[2].mxu1 %vm1548_vm2, %v1427_v11 }
 0x2d7   : > { %19534 = vmatprep.mubr.msk.f32.mxu1 %vm1548_vm2, %v1428_v13 }
 0x2d8   : > { %20751 = vmatpush3.bf16.msra.mxu0 %v20750_v12 }
 0x2d9   : > { %20752 = vmatprep.subr.bf16.mxu0 %v26571_v0 }
 0x2da   : > { %19535 = vmatmul.mubr.msk.f32.gmra.mrb[4].mxu1 %vm1548_vm2, %v1429_v14 }
 0x2db   : > { %19524 = vmatmul.mubr.msk.f32.vlgmr.msra.gmra.mrb[0].mxu0 %vm1466_vm3, %v1454_v15  ;;  %19537 = vmatprep.mubr.msk.f32.mxu1 %vm1548_vm2, %v1430_v16 }
 0x2dc   : > { %19544 = vmatprep.mubr.msk.f32.mxu0 %vm23238_vm0, %v26569_v1 }
 0x2de   : > { %19538 = vmatmul.mubr.msk.f32.gmra.mrb[6].mxu1 %vm1548_vm2, %v1431_v17 }
 0x2df   : > { %19551 = vmatprep.mubr.msk.f32.mxu1 %vm23238_vm0, %v26569_v1 }
 0x3a5   : > { %v19530_v19 = vpop.f32.mrb[0].mxu1 }
 0x3a6   : > { %v23856_v20 = vadd.f32 %v19530_v19, %v18453_v18  ;;  %v1643_v21 = vpop.f32.mrb[1].mxu1 }
 0x3a7   : > { %v23858_v22 = vadd.f32 %v18453_v18, %v1643_v21 }
 0x3a9   : > { %v19533_v24 = vpop.f32.mrb[2].mxu1  ;;  %v23868_v25 = vpack.i.bf16 %v23856_v20, %v23858_v22  ;;  %v20753_v26 = vpack.c.bf16 %v23856_v20, %v23858_v22 }
 0x3aa   : > { %v23872_v27 = vadd.f32 %v19533_v24, %v18453_v18  ;;  %v1653_v28 = vpop.f32.mrb[3].mxu1 }
 0x3ab   : > { %v23874_v29 = vadd.f32 %v18453_v18, %v1653_v28  ;;  %21539 = vrot.lane.b32.xlu0 %v23868_v25, %s23240_s14  ;;  %20755 = vmatpush3.bf16.xpose.msk.msra.mxu0 %vm23862_vm5, %v20753_v26 }
 0x3ac   : > { %20760 = vmatprep.subr.bf16.mxu0 %v26571_v0 }
 0x3ad   : > { %v19536_v31 = vpop.f32.mrb[4].mxu1  ;;  %v20757_v32 = vpack.c.bf16 %v23872_v27, %v23874_v29  ;;  %v23885_v33 = vpack.i.bf16 %v23872_v27, %v23874_v29 }
 0x3ae   : > { %v1536_v34 = vpop.f32.mrb[0].mxu0  ;;  %v23887_v35 = vadd.f32 %v19536_v31, %v18453_v18  ;;  %v1663_v36 = vpop.f32.mrb[5].mxu1 }
 0x3af   : > { %v23889_v37 = vadd.f32 %v18451_v30, %v1536_v34  ;;  %v19525_v38 = vpop.f32.mrb[1].mxu0  ;;  %v23891_v39 = vadd.f32 %v18453_v18, %v1663_v36  ;;  %20759 = vmatpush3.bf16.xpose.msk.msra.mxu1 %vm23862_vm5, %v20757_v32  ;;  %21544 = vrot.lane.b32.xlu0 %v23885_v33, %s23240_s14 }
 0x3b0   : > { %20764 = vmatprep.subr.bf16.mxu1 %v26571_v0 }
 0x3b1   : > { %v19539_v40 = vpop.f32.mrb[6].mxu1  ;;  %v23900_v41 = vpack.i.bf16 %v23887_v35, %v23891_v39  ;;  %v20761_v42 = vpack.c.bf16 %v23887_v35, %v23891_v39 }
 0x3b2   : > { %v23904_v43 = vadd.f32 %v19539_v40, %v18453_v18  ;;  %v1673_v44 = vpop.f32.mrb[7].mxu1  ;;  %19545 = vmatmul.mubr.msk.f32.vlgmr.msra.gmra.mrb[2].mxu0 %vm1682_vm4, %v23889_v37 }
 0x3b3   : > { %v23908_v45 = vadd.f32 %v18453_v18, %v1673_v44  ;;  %21549 = vrot.lane.b32.xlu1 %v23900_v41, %s23240_s14  ;;  %20763 = vmatpush3.bf16.xpose.msk.msra.mxu0 %vm23862_vm5, %v20761_v42 }
 0x3b4   : > { %2051 = vrot.lane.b32.xlu0 %v23889_v37, %s23240_s14  ;;  %19558 = vmatprep.mubr.msk.f32.mxu0 %vm23238_vm0, %v26569_v1 }
 0x3b5   : > { %v23920_v46 = vpack.i.bf16 %v23904_v43, %v23908_v45  ;;  %v20765_v47 = vpack.c.bf16 %v23904_v43, %v23908_v45  ;;  %20768 = vmatprep.subr.bf16.mxu0 %v26571_v0 }
 0x3b6   : > { %19552 = vmatmul.mubr.msk.f32.vlgmr.msra.gmra.mrb[8].mxu1 %vm1682_vm4, %v23889_v37 }
 0x3b7   : > { %21554 = vrot.lane.b32.xlu1 %v23920_v46, %s23240_s14  ;;  %20767 = vmatpush3.bf16.xpose.msk.msra.mxu1 %vm23862_vm5, %v20765_v47 }
 0x3b8   : > { %19565 = vmatprep.mubr.msk.f32.mxu1 %vm23238_vm0, %v26569_v1  ;;  %20772 = vmatprep.subr.bf16.mxu1 %v26571_v0 }
 0x3ba   : > { %19559 = vmatmul.mubr.msk.f32.vlgmr.msra.gmra.mrb[4].mxu0 %vm1682_vm4, %v23889_v37 }
 0x3bb   : > { %19572 = vmatprep.mubr.msk.f32.mxu0 %vm23238_vm0, %v26569_v1 }
 0x3be   : > { %19566 = vmatmul.mubr.msk.f32.vlgmr.msra.gmra.mrb[10].mxu1 %vm1682_vm4, %v23889_v37 }
 0x3bf   : > { %19579 = vmatprep.mubr.msk.f32.mxu1 %vm23238_vm0, %v26569_v1 }
 0x41d   : > { %v21540_v48 = vpop.permute.xlu0 %21539 }
 0x41e   : > { %v21542_v49 = vunpack.i.h.bf16 %v21540_v48  ;;  %v21541_v50 = vunpack.i.l.bf16 %v21540_v48 }
 0x420   : > { %v20769_v51 = vpack.c.bf16 %v21542_v49, %v21541_v50  ;;  %v26568_v49 = vlaneseq }
 0x421   : > { %v21545_v52 = vpop.permute.xlu0 %21544 }
 0x422   : > { %v21547_v53 = vunpack.i.h.bf16 %v21545_v52  ;;  %v21546_v54 = vunpack.i.l.bf16 %v21545_v52  ;;  %20771 = vmatpush3.bf16.xpose.msk.msra.mxu0 %vm23862_vm5, %v20769_v51  ;;  %v23999_v50 = vand.u32 127, %v26568_v49 }
 0x423   : > { %20776 = vmatprep.subr.bf16.mxu0 %v26571_v0 }
 0x424   : > { %v20773_v55 = vpack.c.bf16 %v21547_v53, %v21546_v54  ;;  %vm1435_vm7 = vcmp.lt.s32.totalorder %v23999_v50, 8  ;;  %vm1439_vm8 = vcmp.ge.s32.totalorder %v23999_v50, 8  ;;  %vm1440_vm9 = vcmp.lt.s32.totalorder %v23999_v50, 16 }
 0x425   : > { %v21550_v56 = vpop.permute.xlu1 %21549  ;;  %v18447_v51 = vsel %vm1435_vm7, 1.0, %v26569_v1  ;;  %vm1441_vm10 = vmand %vm1439_vm8, %vm1440_vm9  ;;  %vm1444_vm11 = vcmp.ge.s32.totalorder %v23999_v50, 16  ;;  %vm1445_vm12 = vcmp.lt.s32.totalorder %v23999_v50, 24  ;;  %vm1449_vm14 = vcmp.ge.s32.totalorder %v23999_v50, 24 }
 0x426   : > { %v21552_v57 = vunpack.i.h.bf16 %v21550_v56  ;;  %v21551_v58 = vunpack.i.l.bf16 %v21550_v56  ;;  %20775 = vmatpush3.bf16.xpose.msk.msra.mxu1 %vm23862_vm5, %v20773_v55  ;;  %v2052_v59 = vpop.permute.xlu0 %2051  ;;  %v18448_v52 = vsel %vm1441_vm10, 1.0, %v26569_v1  ;;  %vm1446_vm13 = vmand %vm1444_vm11, %vm1445_vm12  ;;  %vm1450_vm15 = vcmp.lt.s32.totalorder %v23999_v50, 32 }
 0x427   : > { %20780 = vmatprep.subr.bf16.mxu1 %v26571_v0  ;;  %vm1451_vm7 = vmand %vm1449_vm14, %vm1450_vm15 }
 0x428   : > { %v20777_v60 = vpack.c.bf16 %v21552_v57, %v21551_v58 }
 0x429   : > { %v21555_v61 = vpop.permute.xlu1 %21554  ;;  %19573 = vmatmul.mubr.msk.f32.vlgmr.msra.gmra.mrb[6].mxu0 %vm1682_vm4, %v2052_v59 }
 0x42a   : > { %v21557_v62 = vunpack.i.h.bf16 %v21555_v61  ;;  %v21556_v63 = vunpack.i.l.bf16 %v21555_v61  ;;  %20779 = vmatpush3.bf16.xpose.msk.msra.mxu0 %vm23862_vm5, %v20777_v60  ;;  %19586 = vmatprep.mubr.msk.f32.mxu0 %vm23238_vm0, %v26569_v1 }
 0x42b   : > { %20784 = vmatprep.subr.bf16.mxu0 %v26571_v0 }
 0x42c   : > { %v20781_v2 = vpack.c.bf16 %v21557_v62, %v21556_v63 }
 0x42d   : > { %19580 = vmatmul.mubr.msk.f32.vlgmr.msra.gmra.mrb[12].mxu1 %vm1682_vm4, %v2052_v59 }
 0x42e   : > { %20783 = vmatpush3.bf16.xpose.msk.msra.mxu1 %vm23862_vm5, %v20781_v2  ;;  %19593 = vmatprep.mubr.msk.f32.mxu1 %vm23238_vm0, %v26569_v1 }
 0x42f   : > { %20787 = vmatprep.subr.bf16.mxu1 %v26571_v0 }
 0x431   : > { %19587 = vmatmul.mubr.msk.f32.vlgmr.msra.gmra.mrb[8].mxu0 %vm1682_vm4, %v2052_v59 }
 0x432   : > { %19600 = vmatprep.mubr.msk.f32.mxu0 %vm23238_vm0, %v26569_v1 }
 0x435   : > { %19594 = vmatmul.mubr.msk.f32.vlgmr.msra.gmra.mrb[14].mxu1 %vm1682_vm4, %v2052_v59 }
 0x436   : > { %19607 = vmatprep.mubr.msk.f32.mxu1 %vm23238_vm0, %v26569_v1 }
 0x485   : > { %v1758_v3 = vpop.f32.mrb[2].mxu0 }
 0x486   : > { %v19546_v4 = vpop.f32.mrb[3].mxu0  ;;  %v23980_v30 = vmul.f32 0.17677669, %v1758_v3 }
 0x488   : > { %v1995_v44 = vsel %vm1994_vm6, %v23980_v30, -inf }
 0x489   : > { %v1834_v5 = vpop.f32.mrb[8].mxu1 }
 0x48a   : > { %v19553_v6 = vpop.f32.mrb[9].mxu1  ;;  %v23968_v14 = vmul.f32 0.17677669, %v1834_v5 }
 0x48c   : > { %v1998_v21 = vsel %vm1994_vm6, %v23968_v14, -inf }
 0x48d   : > { %v1910_v7 = vpop.f32.mrb[4].mxu0 }
 0x48e   : > { %v19560_v8 = vpop.f32.mrb[5].mxu0  ;;  %v23986_v38 = vmul.f32 0.17677669, %v1910_v7 }
 0x490   : > { %v2001_v48 = vsel %vm1994_vm6, %v23986_v38, -inf }
 0x491   : > { %v1986_v9 = vpop.f32.mrb[10].mxu1 }
 0x492   : > { %v19567_v10 = vpop.f32.mrb[11].mxu1  ;;  %v23988_v40 = vmul.f32 0.17677669, %v1986_v9 }
 0x494   : > { %v2004_v47 = vsel %vm1994_vm6, %v23988_v40, -inf }
 0x4fc   : > { %v2129_v11 = vpop.f32.mrb[6].mxu0 }
 0x4fd   : > { %v23966_v12 = vmul.f32 0.17677669, %v2129_v11  ;;  %v19574_v13 = vpop.f32.mrb[7].mxu0 }
 0x4ff   : > { %v2371_v15 = vsel %vm1994_vm6, %v23966_v12, -inf }
 0x500   : > { %v2207_v16 = vpop.f32.mrb[12].mxu1  ;;  %2372 = vmax.xlane.f32.xlu1 %v2371_v15 }
 0x501   : > { %v23972_v17 = vmul.f32 0.17677669, %v2207_v16  ;;  %v19581_v18 = vpop.f32.mrb[13].mxu1 }
 0x503   : > { %v2374_v19 = vsel %vm1994_vm6, %v23972_v17, -inf }
 0x504   : > { %2375 = vmax.xlane.f32.xlu0 %v2374_v19  ;;  %1999 = vmax.xlane.f32.xlu1 %v1998_v21  ;;  %v2285_v24 = vpop.f32.mrb[8].mxu0 }
 0x505   : > { %v23978_v26 = vmul.f32 0.17677669, %v2285_v24  ;;  %v19588_v28 = vpop.f32.mrb[9].mxu0 }
 0x507   : > { %v2377_v31 = vsel %vm1994_vm6, %v23978_v26, -inf }
 0x508   : > { %v2363_v32 = vpop.f32.mrb[14].mxu1  ;;  %2378 = vmax.xlane.f32.xlu0 %v2377_v31 }
 0x509   : > { %v23984_v34 = vmul.f32 0.17677669, %v2363_v32  ;;  %v19595_v36 = vpop.f32.mrb[15].mxu1 }
 0x50b   : > { %v2380_v42 = vsel %vm1994_vm6, %v23984_v34, -inf }
 0x50c   : > { %2381 = vmax.xlane.f32.xlu1 %v2380_v42  ;;  %1996 = vmax.xlane.f32.xlu0 %v1995_v44 }
 0x510   : > { %2005 = vmax.xlane.f32.xlu1 %v2004_v47  ;;  %2002 = vmax.xlane.f32.xlu0 %v2001_v48 }
 0x521   : > { %2040 = vrot.lane.b32.xlu1 %v18447_v51, %s23241_s4 }
 0x526   : > { %2416 = vrot.lane.b32.xlu0 %v18448_v52, %s23241_s4 }
 0x58d   : > { %v2373_v53 = vpop.xlane.xlu1 %2372 }
 0x58e   : > { %v2383_v51 = vsub.f32 %v23966_v12, %v2373_v53 }
 0x591   : > { %v2376_v54 = vpop.xlane.xlu0 %2375  ;;  %v2000_v55 = vpop.xlane.xlu1 %1999 }
 0x592   : > { %v2008_v31 = vsub.f32 %v23968_v14, %v2000_v55  ;;  %v2384_v42 = vsub.f32 %v23972_v17, %v2376_v54 }
 0x594   : > { %v2013_v44 = vmul.f32 1.442695, %v2008_v31  ;;  %v2389_v52 = vmul.f32 1.442695, %v2384_v42 }
 0x595   : > { %v2379_v56 = vpop.xlane.xlu0 %2378 }
 0x599   : > { %v2382_v57 = vpop.xlane.xlu1 %2381  ;;  %v1997_v58 = vpop.xlane.xlu0 %1996 }
 0x59a   : > { %v2007_v28 = vsub.f32 %v23980_v30, %v1997_v58  ;;  %v2387_v30 = vmul.f32 1.442695, %v2383_v51 }
 0x59c   : > { %v2011_v32 = vmul.f32 1.442695, %v2007_v28 }
 0x59d   : > { %v2003_v59 = vpop.xlane.xlu0 %2002  ;;  %v2006_v60 = vpop.xlane.xlu1 %2005 }
 0x59e   : > { %v2009_v36 = vsub.f32 %v23986_v38, %v2003_v59  ;;  %21958 = vpow2.f32 %v2011_v32  ;;  %v2010_v47 = vsub.f32 %v23988_v40, %v2006_v60  ;;  %v2386_v38 = vsub.f32 %v23984_v34, %v2382_v57 }
 0x59f   : > { %21960 = vpow2.f32 %v2013_v44 }
 0x5a0   : > { %v2015_v48 = vmul.f32 1.442695, %v2009_v36  ;;  %v2393_v40 = vmul.f32 1.442695, %v2386_v38 }
 0x5a1   : > { %v24008_v61 = vpop.permute.xlu0 %2416  ;;  %v24022_v7 = vpop.permute.xlu1 %2040 }
 0x5a2   : > { %26641 = vst [vmem:[#allocation79_spill] sm:$0xff] %v24008_v61  ;;  %v2421_v62 = vmul.f32 %v24008_v61, %v23874_v29  ;;  %v2422_v63 = vmul.f32 %v24008_v61, %v23872_v27  ;;  %v2419_v2 = vmul.f32 %v24008_v61, %v23858_v22  ;;  %v2420_v3 = vmul.f32 %v24008_v61, %v23856_v20 }
 0x5a3   : > { %v2423_v5 = vmul.f32 %v24008_v61, %v23891_v39  ;;  %v2424_v6 = vmul.f32 %v24008_v61, %v23887_v35  ;;  %26642 = vst [vmem:[#allocation80_spill] sm:$0xff] %v24022_v7  ;;  %v2425_v9 = vmul.f32 %v24008_v61, %v23908_v45  ;;  %v2426_v10 = vmul.f32 %v24008_v61, %v23904_v43 }
 0x5a4   : > { %v21563_v4 = vpack.i.bf16 %v2422_v63, %v2421_v62  ;;  %v21558_v8 = vpack.i.bf16 %v2420_v3, %v2419_v2  ;;  %v2043_v13 = vmul.f32 %v24022_v7, %v23858_v22  ;;  %v2044_v15 = vmul.f32 %v24022_v7, %v23856_v20 }
 0x5a5   : > { %v21568_v11 = vpack.i.bf16 %v2424_v6, %v2423_v5  ;;  %v21573_v16 = vpack.i.bf16 %v2426_v10, %v2425_v9  ;;  %v2045_v18 = vmul.f32 %v24022_v7, %v23874_v29  ;;  %v2046_v19 = vmul.f32 %v24022_v7, %v23872_v27 }
 0x5a6   : > { %21564 = vrot.lane.b32.xlu1 %v21563_v4, %s23242_s8  ;;  %21559 = vrot.lane.b32.xlu0 %v21558_v8, %s23242_s8  ;;  %v21578_v21 = vpack.i.bf16 %v2044_v15, %v2043_v13  ;;  %v2385_v62 = vsub.f32 %v23978_v26, %v2379_v56  ;;  %v2017_v63 = vmul.f32 1.442695, %v2010_v47  ;;  %21962 = vpow2.f32 %v2015_v48 }
 0x5a7   : > { %v21583_v24 = vpack.i.bf16 %v2046_v19, %v2045_v18  ;;  %21964 = vpow2.f32 %v2389_v52  ;;  %v2047_v6 = vmul.f32 %v24022_v7, %v23891_v39  ;;  %v2048_v8 = vmul.f32 %v24022_v7, %v23887_v35 }
 0x5a8   : > { %v2391_v14 = vmul.f32 1.442695, %v2385_v62  ;;  %21966 = vpow2.f32 %v2017_v63  ;;  %v24050_v17 = vpop.eup %21958  ;;  %v2049_v9 = vmul.f32 %v24022_v7, %v23908_v45  ;;  %v2050_v10 = vmul.f32 %v24022_v7, %v23904_v43 }
 0x5a9   : > { %21968 = vpow2.f32 %v2387_v30  ;;  %v24052_v54 = vpop.eup %21960  ;;  %v2019_v12 = vsel %vm1994_vm6, %v24050_v17, 0.0 }
 0x5aa   : > { %21569 = vrot.lane.b32.xlu1 %v21568_v11, %s23242_s8  ;;  %21574 = vrot.lane.b32.xlu0 %v21573_v16, %s23242_s8  ;;  %21970 = vpow2.f32 %v2391_v14  ;;  %v2022_v55 = vsel %vm1994_vm6, %v24052_v54, 0.0  ;;  %v21588_v11 = vpack.i.bf16 %v2048_v8, %v2047_v6  ;;  %v21593_v13 = vpack.i.bf16 %v2050_v10, %v2049_v9 }
 0x5ab   : > { %21972 = vpow2.f32 %v2393_v40 }
 0x5ae   : > { %21579 = vrot.lane.b32.xlu1 %v21578_v21, %s23242_s8  ;;  %21584 = vrot.lane.b32.xlu0 %v21583_v24, %s23242_s8 }
 0x5b0   : > { %v24056_v53 = vpop.eup %21962 }
 0x5b1   : > { %v24058_v26 = vpop.eup %21964  ;;  %v2025_v34 = vsel %vm1994_vm6, %v24056_v53, 0.0 }
 0x5b2   : > { %v24064_v56 = vpop.eup %21966  ;;  %v2398_v58 = vsel %vm1994_vm6, %v24058_v26, 0.0 }
 0x5b3   : > { %v24066_v57 = vpop.eup %21968  ;;  %v2028_v59 = vsel %vm1994_vm6, %v24064_v56, 0.0 }
 0x5b4   : > { %v24072_v60 = vpop.eup %21970  ;;  %v2395_v3 = vsel %vm1994_vm6, %v24066_v57, 0.0 }
 0x5b5   : > { %v2401_v2 = vsel %vm1994_vm6, %v24072_v60, 0.0  ;;  %v24078_v4 = vpop.eup %21972 }
 0x5b6   : > { %v2404_v5 = vsel %vm1994_vm6, %v24078_v4, 0.0 }
 0x5cd   : > { %2020 = vadd.xlane.f32.xlu0 %v2019_v12 }
 0x5d1   : > { %2026 = vadd.xlane.f32.xlu0 %v2025_v34 }
 0x5d2   : > { %2023 = vadd.xlane.f32.xlu1 %v2022_v55 }
 0x5d5   : > { %2399 = vadd.xlane.f32.xlu0 %v2398_v58 }
 0x5d6   : > { %2029 = vadd.xlane.f32.xlu1 %v2028_v59 }
 0x5d9   : > { %2402 = vadd.xlane.f32.xlu0 %v2401_v2 }
 0x5da   : > { %2396 = vadd.xlane.f32.xlu1 %v2395_v3 }
 0x5de   : > { %2405 = vadd.xlane.f32.xlu1 %v2404_v5 }
 0x5ef   : > { %21589 = vrot.lane.b32.xlu1 %v21588_v11, %s23242_s8  ;;  %21594 = vrot.lane.b32.xlu0 %v21593_v13, %s23242_s8 }
 0x5f3   : > { %21599 = vrot.lane.b32.xlu1 %v23868_v25, %s26584_s0  ;;  %21604 = vrot.lane.b32.xlu0 %v23885_v33, %s26584_s0 }
 0x5f7   : > { %3075 = vrot.lane.b32.xlu1 %v23889_v37, %s26584_s0  ;;  %21609 = vrot.lane.b32.xlu0 %v23900_v41, %s26584_s0 }
 0x5fb   : > { %21614 = vrot.lane.b32.xlu1 %v23920_v46, %s26584_s0 }
 0x618   : > { %v21565_v15 = vpop.permute.xlu1 %21564  ;;  %v21560_v19 = vpop.permute.xlu0 %21559 }
 0x619   : > { %v21567_v16 = vunpack.i.h.bf16 %v21565_v15  ;;  %v21566_v18 = vunpack.i.l.bf16 %v21565_v15  ;;  %v21562_v21 = vunpack.i.h.bf16 %v21560_v19  ;;  %v21561_v24 = vunpack.i.l.bf16 %v21560_v19 }
 0x61b   : > { %v20788_v28 = vpack.c.bf16 %v21567_v16, %v21566_v18  ;;  %v20785_v31 = vpack.c.bf16 %v21562_v21, %v21561_v24 }
 0x61c   : > { %v21575_v32 = vpop.permute.xlu0 %21574  ;;  %v21570_v36 = vpop.permute.xlu1 %21569 }
 0x61d   : > { %20789 = vmatpush3.bf16.msra.mxu1 %v20788_v28  ;;  %20786 = vmatpush3.bf16.msra.mxu0 %v20785_v31  ;;  %v21577_v38 = vunpack.i.h.bf16 %v21575_v32  ;;  %v21576_v40 = vunpack.i.l.bf16 %v21575_v32  ;;  %v21572_v58 = vunpack.i.h.bf16 %v21570_v36  ;;  %v21571_v59 = vunpack.i.l.bf16 %v21570_v36 }
 0x61e   : > { %20793 = vmatprep.subr.bf16.mxu1 %v26571_v0  ;;  %20790 = vmatprep.subr.bf16.mxu0 %v26571_v0 }
 0x61f   : > { %v20794_v55 = vpack.c.bf16 %v21577_v38, %v21576_v40  ;;  %v20791_v11 = vpack.c.bf16 %v21572_v58, %v21571_v59 }
 0x620   : > { %v21585_v42 = vpop.permute.xlu0 %21584  ;;  %v21580_v44 = vpop.permute.xlu1 %21579 }
 0x621   : > { %v21587_v3 = vunpack.i.h.bf16 %v21585_v42  ;;  %v21586_v5 = vunpack.i.l.bf16 %v21585_v42  ;;  %v21582_v13 = vunpack.i.h.bf16 %v21580_v44  ;;  %v21581_v15 = vunpack.i.l.bf16 %v21580_v44 }
 0x623   : > { %v20800_v19 = vpack.c.bf16 %v21587_v3, %v21586_v5  ;;  %v20797_v31 = vpack.c.bf16 %v21582_v13, %v21581_v15 }
 0x65a   : > { %v2021_v47 = vpop.xlane.xlu0 %2020 }
 0x65e   : > { %v2027_v48 = vpop.xlane.xlu0 %2026 }
 0x65f   : > { %v2024_v51 = vpop.xlane.xlu1 %2023 }
 0x662   : > { %v2400_v52 = vpop.xlane.xlu0 %2399 }
 0x663   : > { %v2030_v62 = vpop.xlane.xlu1 %2029  ;;  %21974 = vrcp.f32 %v2400_v52 }
 0x666   : > { %v2403_v30 = vpop.xlane.xlu0 %2402 }
 0x667   : > { %v2397_v63 = vpop.xlane.xlu1 %2396 }
 0x668   : > { %21976 = vrcp.f32 %v2397_v63 }
 0x669   : > { %21978 = vrcp.f32 %v2403_v30 }
 0x66b   : > { %v2406_v14 = vpop.xlane.xlu1 %2405 }
 0x66c   : > { %21980 = vrcp.f32 %v2406_v14 }
 0x66d   : > { %v21975_v12 = vpop.eup %21974  ;;  %21982 = vrcp.f32 %v2024_v51 }
 0x66e   : > { %v2412_v34 = vmul.f32 %v21975_v12, %v24058_v26  ;;  %21984 = vrcp.f32 %v2021_v47  ;;  %v21595_v26 = vpop.permute.xlu0 %21594 }
 0x66f   : > { %21986 = vrcp.f32 %v2030_v62  ;;  %v21590_v6 = vpop.permute.xlu1 %21589  ;;  %v21597_v21 = vunpack.i.h.bf16 %v21595_v26  ;;  %v21596_v24 = vunpack.i.l.bf16 %v21595_v26 }
 0x670   : > { %19608 = vmatmul.mubr.msk.f32.vlgmr.msra.gmra.mrb[16].mxu1 %vm1994_vm6, %v2412_v34  ;;  %21988 = vrcp.f32 %v2027_v48  ;;  %v21592_v32 = vunpack.i.h.bf16 %v21590_v6  ;;  %v21591_v36 = vunpack.i.l.bf16 %v21590_v6 }
 0x671   : > { %20795 = vmatpush3.bf16.msra.mxu1 %v20794_v55  ;;  %19621 = vmatprep.mubr.msk.f32.mxu1 %vm23238_vm0, %v26569_v1  ;;  %v20806_v47 = vpack.c.bf16 %v21597_v21, %v21596_v24 }
 0x672   : > { %v21977_v2 = vpop.eup %21976  ;;  %20799 = vmatprep.subr.bf16.mxu1 %v26571_v0  ;;  %v21605_v51 = vpop.permute.xlu0 %21604  ;;  %v20803_v52 = vpack.c.bf16 %v21592_v32, %v21591_v36 }
 0x673   : > { %v21979_v8 = vpop.eup %21978  ;;  %v2411_v9 = vmul.f32 %v21977_v2, %v24066_v57  ;;  %v21600_v42 = vpop.permute.xlu1 %21599  ;;  %v21606_v63 = vunpack.i.l.bf16 %v21605_v51 }
 0x674   : > { %v2413_v57 = vmul.f32 %v21979_v8, %v24072_v60  ;;  %v21602_v14 = vunpack.i.h.bf16 %v21600_v42 }
 0x675   : > { %19601 = vmatmul.mubr.msk.f32.vlgmr.msra.gmra.mrb[10].mxu0 %vm1994_vm6, %v2411_v9 }
 0x676   : > { %v21981_v10 = vpop.eup %21980  ;;  %20792 = vmatpush3.bf16.msra.mxu0 %v20791_v11  ;;  %19614 = vmatprep.mubr.msk.f32.mxu0 %vm23238_vm0, %v26569_v1 }
 0x677   : > { %v2414_v16 = vmul.f32 %v21981_v10, %v24078_v4  ;;  %v21983_v18 = vpop.eup %21982  ;;  %20796 = vmatprep.subr.bf16.mxu0 %v26571_v0  ;;  %v3076_v62 = vpop.permute.xlu1 %3075 }
 0x678   : > { %v21985_v28 = vpop.eup %21984  ;;  %v2036_v4 = vmul.f32 %v21983_v18, %v24052_v54 }
 0x679   : > { %19622 = vmatmul.mubr.msk.f32.vlgmr.msra.gmra.mrb[18].mxu1 %vm1994_vm6, %v2414_v16  ;;  %19615 = vmatmul.mubr.msk.f32.vlgmr.msra.gmra.mrb[12].mxu0 %vm1994_vm6, %v2413_v57  ;;  %v21987_v44 = vpop.eup %21986  ;;  %v2035_v60 = vmul.f32 %v21985_v28, %v24050_v17  ;;  %v21607_v17 = vunpack.i.h.bf16 %v21605_v51 }
 0x67a   : > { %20801 = vmatpush3.bf16.msra.mxu1 %v20800_v19  ;;  %19635 = vmatprep.mubr.msk.f32.mxu1 %vm23238_vm0, %v26569_v1  ;;  %v21989_v48 = vpop.eup %21988  ;;  %v2038_v54 = vmul.f32 %v21987_v44, %v24064_v56  ;;  %v21601_v56 = vunpack.i.l.bf16 %v21600_v42 }
 0x67b   : > { %20805 = vmatprep.subr.bf16.mxu1 %v26571_v0  ;;  %20798 = vmatpush3.bf16.msra.mxu0 %v20797_v31  ;;  %v2037_v30 = vmul.f32 %v21989_v48, %v24056_v53  ;;  %v20813_v38 = vpack.c.bf16 %v21607_v17, %v21606_v63  ;;  %v21615_v40 = vpop.permute.xlu1 %21614  ;;  %v21610_v53 = vpop.permute.xlu0 %21609 }
 0x67c   : > { %19628 = vmatprep.mubr.msk.f32.mxu0 %vm23238_vm0, %v26569_v1  ;;  %20802 = vmatprep.subr.bf16.mxu0 %v26571_v0  ;;  %v20809_v12 = vpack.c.bf16 %v21602_v14, %v21601_v56  ;;  %v21617_v34 = vunpack.i.h.bf16 %v21615_v40  ;;  %v21616_v55 = vunpack.i.l.bf16 %v21615_v40  ;;  %v21612_v58 = vunpack.i.h.bf16 %v21610_v53 }
 0x67d   : > { %19636 = vmatmul.mubr.msk.f32.vlgmr.msra.gmra.mrb[20].mxu1 %vm1994_vm6, %v2036_v4  ;;  %v21611_v59 = vunpack.i.l.bf16 %v21610_v53 }
 0x67e   : > { %20807 = vmatpush3.bf16.msra.mxu1 %v20806_v47  ;;  %19649 = vmatprep.mubr.msk.f32.mxu1 %vm23238_vm0, %v26569_v1  ;;  %v20821_v2 = vpack.c.bf16 %v21617_v34, %v21616_v55 }
 0x67f   : > { %19629 = vmatmul.mubr.msk.f32.vlgmr.msra.gmra.mrb[14].mxu0 %vm1994_vm6, %v2035_v60  ;;  %20812 = vmatprep.subr.bf16.mxu1 %v26571_v0  ;;  %v20817_v3 = vpack.c.bf16 %v21612_v58, %v21611_v59 }
 0x680   : > { %20804 = vmatpush3.bf16.msra.mxu0 %v20803_v52  ;;  %19642 = vmatprep.mubr.msk.f32.mxu0 %vm23238_vm0, %v26569_v1 }
 0x681   : > { %19650 = vmatmul.mubr.msk.f32.vlgmr.msra.gmra.mrb[22].mxu1 %vm1994_vm6, %v2038_v54  ;;  %20808 = vmatprep.subr.bf16.mxu0 %v26571_v0 }
 0x682   : > { %19663 = vmatprep.mubr.msk.f32.mxu1 %vm23238_vm0, %v26569_v1 }
 0x683   : > { %19643 = vmatmul.mubr.msk.f32.vlgmr.msra.gmra.mrb[16].mxu0 %vm1994_vm6, %v2037_v30 }
 0x684   : > { %19656 = vmatprep.mubr.msk.f32.mxu0 %vm23238_vm0, %v26569_v1 }
 0x687   : > { %20815 = vmatpush3.bf16.xpose.msk.msra.mxu1 %vm23862_vm5, %v20813_v38 }
 0x688   : > { %20820 = vmatprep.subr.bf16.mxu1 %v26571_v0 }
 0x689   : > { %20811 = vmatpush3.bf16.xpose.msk.msra.mxu0 %vm23862_vm5, %v20809_v12  ;;  %v18449_v12 = vsel %vm1446_vm13, 1.0, %v26569_v1 }
 0x68a   : > { %20816 = vmatprep.subr.bf16.mxu0 %v26571_v0 }
 0x68e   : > { %19664 = vmatmul.mubr.msk.f32.vlgmr.msra.gmra.mrb[24].mxu1 %vm1682_vm4, %v3076_v62 }
 0x68f   : > { %20823 = vmatpush3.bf16.xpose.msk.msra.mxu1 %vm23862_vm5, %v20821_v2  ;;  %19677 = vmatprep.mubr.msk.f32.mxu1 %vm23238_vm0, %v26569_v1 }
 0x690   : > { %19657 = vmatmul.mubr.msk.f32.vlgmr.msra.gmra.mrb[18].mxu0 %vm1682_vm4, %v3076_v62  ;;  %20827 = vmatprep.subr.bf16.mxu1 %v26571_v0 }
 0x691   : > { %20819 = vmatpush3.bf16.xpose.msk.msra.mxu0 %vm23862_vm5, %v20817_v3  ;;  %19670 = vmatprep.mubr.msk.f32.mxu0 %vm23238_vm0, %v26569_v1 }
 0x692   : > { %20824 = vmatprep.subr.bf16.mxu0 %v26571_v0 }
 0x696   : > { %19678 = vmatmul.mubr.msk.f32.vlgmr.msra.gmra.mrb[26].mxu1 %vm1682_vm4, %v3076_v62 }
 0x697   : > { %19691 = vmatprep.mubr.msk.f32.mxu1 %vm23238_vm0, %v26569_v1 }
 0x698   : > { %19671 = vmatmul.mubr.msk.f32.vlgmr.msra.gmra.mrb[20].mxu0 %vm1682_vm4, %v3076_v62 }
 0x699   : > { %19684 = vmatprep.mubr.msk.f32.mxu0 %vm23238_vm0, %v26569_v1 }
 0x743   : > { %v2585_v5 = vpop.f32.mrb[16].mxu1 }
 0x744   : > { %v19609_v6 = vpop.f32.mrb[17].mxu1 }
 0x748   : > { %v2504_v8 = vpop.f32.mrb[10].mxu0 }
 0x749   : > { %v19602_v26 = vpop.f32.mrb[11].mxu0 }
 0x74c   : > { %v2747_v9 = vpop.f32.mrb[18].mxu1  ;;  %v2666_v11 = vpop.f32.mrb[12].mxu0 }
 0x74d   : > { %v19623_v10 = vpop.f32.mrb[19].mxu1  ;;  %v19616_v13 = vpop.f32.mrb[13].mxu0 }
 0x750   : > { %v2909_v15 = vpop.f32.mrb[20].mxu1 }
 0x751   : > { %v24166_v16 = vadd.f32 %v2909_v15, %v2585_v5  ;;  %v19637_v18 = vpop.f32.mrb[21].mxu1 }
 0x752   : > { %v2828_v19 = vpop.f32.mrb[14].mxu0 }
 0x753   : > { %v24168_v21 = vadd.f32 %v2828_v19, %v2504_v8  ;;  %v19630_v24 = vpop.f32.mrb[15].mxu0 }
 0x754   : > { %v3071_v57 = vpop.f32.mrb[22].mxu1 }
 0x755   : > { %v24170_v28 = vadd.f32 %v3071_v57, %v2747_v9  ;;  %v19651_v31 = vpop.f32.mrb[23].mxu1 }
 0x756   : > { %v2990_v32 = vpop.f32.mrb[16].mxu0 }
 0x757   : > { %v24172_v36 = vadd.f32 %v2990_v32, %v2666_v11  ;;  %v19644_v42 = vpop.f32.mrb[17].mxu0 }
 0x761   : > { %v3231_v4 = vpop.f32.mrb[24].mxu1 }
 0x762   : > { %v3392_v44 = vmul.f32 0.17677669, %v3231_v4  ;;  %v19665_v47 = vpop.f32.mrb[25].mxu1 }
 0x763   : > { %v3153_v60 = vpop.f32.mrb[18].mxu0 }
 0x764   : > { %v3391_v48 = vmul.f32 0.17677669, %v3153_v60  ;;  %v19658_v51 = vpop.f32.mrb[19].mxu0  ;;  %v3398_v52 = vsel %vm1994_vm6, %v3392_v44, -inf }
 0x765   : > { %3399 = vmax.xlane.f32.xlu1 %v3398_v52 }
 0x766   : > { %v3395_v54 = vsel %vm1994_vm6, %v3391_v48, -inf }
 0x767   : > { %3396 = vmax.xlane.f32.xlu0 %v3395_v54 }
 0x769   : > { %v3387_v62 = vpop.f32.mrb[26].mxu1 }
 0x76a   : > { %v19679_v17 = vpop.f32.mrb[27].mxu1  ;;  %v3394_v56 = vmul.f32 0.17677669, %v3387_v62 }
 0x76b   : > { %v3309_v63 = vpop.f32.mrb[20].mxu0 }
 0x76c   : > { %v3393_v30 = vmul.f32 0.17677669, %v3309_v63  ;;  %v19672_v14 = vpop.f32.mrb[21].mxu0  ;;  %v3404_v40 = vsel %vm1994_vm6, %v3394_v56, -inf }
 0x76e   : > { %v3401_v38 = vsel %vm1994_vm6, %v3393_v30, -inf }
 0x76f   : > { %3402 = vmax.xlane.f32.xlu0 %v3401_v38 }
 0x773   : > { %3405 = vmax.xlane.f32.xlu0 %v3404_v40 }
 0x776   : > { %3440 = vrot.lane.b32.xlu1 %v18449_v12, %s23241_s4 }
 0x7f2   : > { %v3400_v53 = vpop.xlane.xlu1 %3399 }
 0x7f3   : > { %v3408_v34 = vsub.f32 %v3392_v44, %v3400_v53 }
 0x7f4   : > { %v3397_v55 = vpop.xlane.xlu0 %3396 }
 0x7f5   : > { %v3407_v58 = vsub.f32 %v3391_v48, %v3397_v55  ;;  %v3413_v2 = vmul.f32 1.442695, %v3408_v34 }
 0x7f6   : > { %v24182_v59 = vpop.permute.xlu1 %3440 }
 0x7f7   : > { %26643 = vst [vmem:[#allocation81_spill] sm:$0xff] %v24182_v59  ;;  %v3411_v3 = vmul.f32 1.442695, %v3407_v58  ;;  %v3443_v5 = vmul.f32 %v24182_v59, %v23858_v22  ;;  %v3444_v6 = vmul.f32 %v24182_v59, %v23856_v20  ;;  %v3447_v26 = vmul.f32 %v24182_v59, %v23891_v39 }
 0x7f8   : > { %v3448_v9 = vmul.f32 %v24182_v59, %v23887_v35  ;;  %v3449_v15 = vmul.f32 %v24182_v59, %v23908_v45  ;;  %v3450_v18 = vmul.f32 %v24182_v59, %v23904_v43 }
 0x7f9   : > { %21990 = vpow2.f32 %v3411_v3  ;;  %v21618_v8 = vpack.i.bf16 %v3444_v6, %v3443_v5 }
 0x7fa   : > { %21992 = vpow2.f32 %v3413_v2  ;;  %v21628_v13 = vpack.i.bf16 %v3448_v9, %v3447_v26  ;;  %v21633_v31 = vpack.i.bf16 %v3450_v18, %v3449_v15 }
 0x7fb   : > { %21619 = vrot.lane.b32.xlu1 %v21618_v8, %s23242_s8 }
 0x7fc   : > { %v3403_v10 = vpop.xlane.xlu0 %3402 }
 0x7fd   : > { %v3409_v11 = vsub.f32 %v3393_v30, %v3403_v10 }
 0x7ff   : > { %v3415_v19 = vmul.f32 1.442695, %v3409_v11  ;;  %21629 = vrot.lane.b32.xlu1 %v21628_v13, %s23242_s8 }
 0x800   : > { %v3406_v24 = vpop.xlane.xlu0 %3405 }
 0x801   : > { %21994 = vpow2.f32 %v3415_v19  ;;  %v3410_v57 = vsub.f32 %v3394_v56, %v3406_v24 }
 0x803   : > { %v21991_v32 = vpop.eup %21990  ;;  %v3417_v42 = vmul.f32 1.442695, %v3410_v57  ;;  %21634 = vrot.lane.b32.xlu1 %v21633_v31, %s23242_s8 }
 0x804   : > { %v3419_v4 = vsel %vm1994_vm6, %v21991_v32, 0.0  ;;  %v21993_v44 = vpop.eup %21992 }
 0x805   : > { %21996 = vpow2.f32 %v3417_v42  ;;  %3420 = vadd.xlane.f32.xlu0 %v3419_v4  ;;  %v3422_v47 = vsel %vm1994_vm6, %v21993_v44, 0.0 }
 0x807   : > { %21639 = vrot.lane.b32.xlu1 %v23868_v25, %s26582_s13  ;;  %v3445_v25 = vmul.f32 %v24182_v59, %v23874_v29 }
 0x809   : > { %3423 = vadd.xlane.f32.xlu0 %v3422_v47 }
 0x80b   : > { %v21995_v60 = vpop.eup %21994  ;;  %21644 = vrot.lane.b32.xlu1 %v23885_v33, %s26582_s13  ;;  %v3446_v33 = vmul.f32 %v24182_v59, %v23872_v27 }
 0x80c   : > { %v3425_v48 = vsel %vm1994_vm6, %v21995_v60, 0.0 }
 0x80d   : > { %3426 = vadd.xlane.f32.xlu0 %v3425_v48  ;;  %v21623_v54 = vpack.i.bf16 %v3446_v33, %v3445_v25 }
 0x80f   : > { %v24206_v51 = vpop.eup %21996  ;;  %21649 = vrot.lane.b32.xlu1 %v23900_v41, %s26582_s13 }
 0x810   : > { %v3428_v52 = vsel %vm1994_vm6, %v24206_v51, 0.0 }
 0x811   : > { %3429 = vadd.xlane.f32.xlu0 %v3428_v52 }
 0x813   : > { %3779 = vrot.lane.b32.xlu1 %v23889_v37, %s26582_s13 }
 0x827   : > { %21624 = vrot.lane.b32.xlu0 %v21623_v54, %s23242_s8 }
 0x82b   : > { %21654 = vrot.lane.b32.xlu0 %v23920_v46, %s26582_s13 }
 0x86d   : > { %v21620_v41 = vpop.permute.xlu1 %21619 }
 0x86e   : > { %v21622_v62 = vunpack.i.h.bf16 %v21620_v41  ;;  %v21621_v17 = vunpack.i.l.bf16 %v21620_v41 }
 0x870   : > { %v20825_v63 = vpack.c.bf16 %v21622_v62, %v21621_v17 }
 0x871   : > { %v21630_v30 = vpop.permute.xlu1 %21629 }
 0x872   : > { %20826 = vmatpush3.bf16.msra.mxu0 %v20825_v63  ;;  %v21632_v12 = vunpack.i.h.bf16 %v21630_v30  ;;  %v21631_v53 = vunpack.i.l.bf16 %v21630_v30 }
 0x873   : > { %20830 = vmatprep.subr.bf16.mxu0 %v26571_v0 }
 0x874   : > { %v20831_v2 = vpack.c.bf16 %v21632_v12, %v21631_v53 }
 0x875   : > { %v21635_v38 = vpop.permute.xlu1 %21634 }
 0x876   : > { %v21637_v13 = vunpack.i.h.bf16 %v21635_v38  ;;  %v21636_v15 = vunpack.i.l.bf16 %v21635_v38 }
 0x879   : > { %v21640_v55 = vpop.permute.xlu1 %21639 }
 0x87a   : > { %v21642_v9 = vunpack.i.h.bf16 %v21640_v55  ;;  %v21641_v10 = vunpack.i.l.bf16 %v21640_v55 }
 0x87c   : > { %v20837_v24 = vpack.c.bf16 %v21642_v9, %v21641_v10 }
 0x87d   : > { %v21645_v5 = vpop.permute.xlu1 %21644 }
 0x87e   : > { %v21646_v48 = vunpack.i.l.bf16 %v21645_v5 }
 0x881   : > { %v21650_v42 = vpop.permute.xlu1 %21649 }
 0x882   : > { %v21652_v4 = vunpack.i.h.bf16 %v21650_v42  ;;  %v21651_v47 = vunpack.i.l.bf16 %v21650_v42 }
 0x884   : > { %v20845_v52 = vpack.c.bf16 %v21652_v4, %v21651_v47 }
 0x885   : > { %v3780_v25 = vpop.permute.xlu1 %3779 }
 0x892   : > { %v3421_v14 = vpop.xlane.xlu0 %3420 }
 0x893   : > { %21998 = vrcp.f32 %v3421_v14 }
 0x896   : > { %v3424_v56 = vpop.xlane.xlu0 %3423 }
 0x897   : > { %22000 = vrcp.f32 %v3424_v56 }
 0x89a   : > { %v3427_v40 = vpop.xlane.xlu0 %3426 }
 0x89b   : > { %22002 = vrcp.f32 %v3427_v40 }
 0x89d   : > { %v21999_v34 = vpop.eup %21998 }
 0x89e   : > { %v3430_v46 = vpop.xlane.xlu0 %3429  ;;  %v3435_v58 = vmul.f32 %v21999_v34, %v21991_v32  ;;  %v20834_v32 = vpack.c.bf16 %v21637_v13, %v21636_v15 }
 0x89f   : > { %22004 = vrcp.f32 %v3430_v46 }
 0x8a0   : > { %19685 = vmatmul.mubr.msk.f32.vlgmr.msra.gmra.mrb[22].mxu0 %vm1994_vm6, %v3435_v58 }
 0x8a1   : > { %20832 = vmatpush3.bf16.msra.mxu0 %v20831_v2  ;;  %19698 = vmatprep.mubr.msk.f32.mxu0 %vm23238_vm0, %v26569_v1  ;;  %v22001_v26 = vpop.eup %22000 }
 0x8a2   : > { %v21625_v3 = vpop.permute.xlu0 %21624  ;;  %20836 = vmatprep.subr.bf16.mxu0 %v26571_v0  ;;  %v3436_v57 = vmul.f32 %v22001_v26, %v21993_v44 }
 0x8a3   : > { %v21627_v6 = vunpack.i.h.bf16 %v21625_v3  ;;  %v21626_v8 = vunpack.i.l.bf16 %v21625_v3 }
 0x8a5   : > { %v22003_v11 = vpop.eup %22002  ;;  %v20828_v18 = vpack.c.bf16 %v21627_v6, %v21626_v8 }
 0x8a6   : > { %v3437_v19 = vmul.f32 %v22003_v11, %v21995_v60  ;;  %v21647_v60 = vunpack.i.h.bf16 %v21645_v5 }
 0x8a7   : > { %20829 = vmatpush3.bf16.msra.mxu1 %v20828_v18  ;;  %v18450_v18 = vsel %vm1451_vm7, 1.0, %v26569_v1 }
 0x8a8   : > { %19699 = vmatmul.mubr.msk.f32.vlgmr.msra.gmra.mrb[24].mxu0 %vm1994_vm6, %v3437_v19  ;;  %20833 = vmatprep.subr.bf16.mxu1 %v26571_v0  ;;  %v20841_v33 = vpack.c.bf16 %v21647_v60, %v21646_v48 }
 0x8a9   : > { %v22005_v31 = vpop.eup %22004  ;;  %19712 = vmatprep.mubr.msk.f32.mxu0 %vm23238_vm0, %v26569_v1 }
 0x8aa   : > { %20839 = vmatpush3.bf16.xpose.msk.msra.mxu0 %vm23862_vm5, %v20837_v24  ;;  %19692 = vmatmul.mubr.msk.f32.vlgmr.msra.gmra.mrb[28].mxu1 %vm1994_vm6, %v3436_v57  ;;  %v3438_v44 = vmul.f32 %v22005_v31, %v24206_v51  ;;  %v21655_v51 = vpop.permute.xlu0 %21654 }
 0x8ab   : > { %20835 = vmatpush3.bf16.msra.mxu1 %v20834_v32  ;;  %19705 = vmatprep.mubr.msk.f32.mxu1 %vm23238_vm0, %v26569_v1  ;;  %v21657_v54 = vunpack.i.h.bf16 %v21655_v51  ;;  %v21656_v41 = vunpack.i.l.bf16 %v21655_v51 }
 0x8ac   : > { %20844 = vmatprep.subr.bf16.mxu0 %v26571_v0  ;;  %20840 = vmatprep.subr.bf16.mxu1 %v26571_v0 }
 0x8ad   : > { %v20849_v62 = vpack.c.bf16 %v21657_v54, %v21656_v41 }
 0x8ae   : > { %19706 = vmatmul.mubr.msk.f32.vlgmr.msra.gmra.mrb[30].mxu1 %vm1994_vm6, %v3438_v44 }
 0x8af   : > { %19719 = vmatprep.mubr.msk.f32.mxu1 %vm23238_vm0, %v26569_v1 }
 0x8b1   : > { %19713 = vmatmul.mubr.msk.f32.vlgmr.msra.gmra.mrb[26].mxu0 %vm1682_vm4, %v3780_v25 }
 0x8b2   : > { %20847 = vmatpush3.bf16.xpose.msk.msra.mxu0 %vm23862_vm5, %v20845_v52  ;;  %19726 = vmatprep.mubr.msk.f32.mxu0 %vm23238_vm0, %v26569_v1 }
 0x8b3   : > { %20852 = vmatprep.subr.bf16.mxu0 %v26571_v0 }
 0x8b4   : > { %20843 = vmatpush3.bf16.xpose.msk.msra.mxu1 %vm23862_vm5, %v20841_v33 }
 0x8b5   : > { %20848 = vmatprep.subr.bf16.mxu1 %v26571_v0 }
 0x8b9   : > { %19727 = vmatmul.mubr.msk.f32.vlgmr.msra.gmra.mrb[28].mxu0 %vm1682_vm4, %v3780_v25 }
 0x8ba   : > { %19740 = vmatprep.mubr.msk.f32.mxu0 %vm23238_vm0, %v26569_v1 }
 0x8bb   : > { %19720 = vmatmul.mubr.msk.f32.vlgmr.msra.gmra.mrb[32].mxu1 %vm1682_vm4, %v3780_v25 }
 0x8bc   : > { %20851 = vmatpush3.bf16.xpose.msk.msra.mxu1 %vm23862_vm5, %v20849_v62  ;;  %19733 = vmatprep.mubr.msk.f32.mxu1 %vm23238_vm0, %v26569_v1 }
 0x8bd   : > { %20855 = vmatprep.subr.bf16.mxu1 %v26571_v0 }
 0x8c3   : > { %19734 = vmatmul.mubr.msk.f32.vlgmr.msra.gmra.mrb[34].mxu1 %vm1682_vm4, %v3780_v25 }
 0x8c4   : > { %19747 = vmatprep.mubr.msk.f32.mxu1 %vm23238_vm0, %v26569_v1 }
 0x973   : > { %v3528_v17 = vpop.f32.mrb[22].mxu0 }
 0x974   : > { %v24263_v63 = vadd.f32 %v3528_v17, %v24168_v21  ;;  %v19686_v30 = vpop.f32.mrb[23].mxu0 }
 0x97b   : > { %v3690_v14 = vpop.f32.mrb[24].mxu0 }
 0x97c   : > { %v24266_v56 = vadd.f32 %v3690_v14, %v24172_v36  ;;  %v19700_v38 = vpop.f32.mrb[25].mxu0 }
 0x97d   : > { %v3609_v40 = vpop.f32.mrb[28].mxu1 }
 0x97e   : > { %v24269_v12 = vadd.f32 %v3609_v40, %v24166_v16  ;;  %v19693_v53 = vpop.f32.mrb[29].mxu1 }
 0x981   : > { %v3771_v34 = vpop.f32.mrb[30].mxu1 }
 0x982   : > { %v24272_v55 = vadd.f32 %v3771_v34, %v24170_v28  ;;  %v19707_v46 = vpop.f32.mrb[31].mxu1 }
 0x984   : > { %v3857_v58 = vpop.f32.mrb[26].mxu0 }
 0x985   : > { %v4095_v2 = vmul.f32 0.17677669, %v3857_v58  ;;  %v19714_v21 = vpop.f32.mrb[27].mxu0 }
 0x987   : > { %v4099_v3 = vsel %vm1994_vm6, %v4095_v2, -inf }
 0x988   : > { %4100 = vmax.xlane.f32.xlu0 %v4099_v3 }
 0x98c   : > { %v4013_v5 = vpop.f32.mrb[28].mxu0 }
 0x98d   : > { %v4097_v36 = vmul.f32 0.17677669, %v4013_v5  ;;  %v19728_v6 = vpop.f32.mrb[29].mxu0 }
 0x98e   : > { %v3935_v8 = vpop.f32.mrb[32].mxu1 }
 0x98f   : > { %v4096_v26 = vmul.f32 0.17677669, %v3935_v8  ;;  %v19721_v9 = vpop.f32.mrb[33].mxu1  ;;  %v4105_v16 = vsel %vm1994_vm6, %v4097_v36, -inf }
 0x990   : > { %4106 = vmax.xlane.f32.xlu0 %v4105_v16 }
 0x991   : > { %v4102_v10 = vsel %vm1994_vm6, %v4096_v26, -inf }
 0x992   : > { %4103 = vmax.xlane.f32.xlu1 %v4102_v10 }
 0x996   : > { %v4091_v28 = vpop.f32.mrb[34].mxu1 }
 0x997   : > { %v4098_v11 = vmul.f32 0.17677669, %v4091_v28  ;;  %v19735_v13 = vpop.f32.mrb[35].mxu1 }
 0x999   : > { %v4108_v15 = vsel %vm1994_vm6, %v4098_v11, -inf }
 0x99a   : > { %4109 = vmax.xlane.f32.xlu0 %v4108_v15 }
 0x9a3   : > { %4144 = vrot.lane.b32.xlu1 %v18450_v18, %s23241_s4  ;;  %s26669_s4 = sld [smem:[#allocation65_spill]] }
 0xa15   : > { %v4101_v19 = vpop.xlane.xlu0 %4100 }
 0xa16   : > { %v4111_v24 = vsub.f32 %v4095_v2, %v4101_v19 }
 0xa18   : > { %v4115_v57 = vmul.f32 1.442695, %v4111_v24 }
 0xa1a   : > { %22006 = vpow2.f32 %v4115_v57 }
 0xa1d   : > { %v4107_v31 = vpop.xlane.xlu0 %4106 }
 0xa1e   : > { %v4113_v32 = vsub.f32 %v4097_v36, %v4107_v31 }
 0xa1f   : > { %v4104_v42 = vpop.xlane.xlu1 %4103 }
 0xa20   : > { %v4112_v4 = vsub.f32 %v4096_v26, %v4104_v42  ;;  %v4119_v47 = vmul.f32 1.442695, %v4113_v32 }
 0xa22   : > { %v4117_v44 = vmul.f32 1.442695, %v4112_v4 }
 0xa23   : > { %v24282_v60 = vpop.permute.xlu1 %4144 }
 0xa24   : > { %26644 = vst [vmem:[#allocation82_spill] sm:$0xff] %v24282_v60  ;;  %v22007_v48 = vpop.eup %22006  ;;  %22008 = vpow2.f32 %v4117_v44  ;;  %v4147_v50 = vmul.f32 %v24282_v60, %v23858_v22  ;;  %v4148_v52 = vmul.f32 %v24282_v60, %v23856_v20  ;;  %v4151_v51 = vmul.f32 %v24282_v60, %v23891_v39 }
 0xa25   : > { %v4123_v25 = vsel %vm1994_vm6, %v22007_v48, 0.0  ;;  %22010 = vpow2.f32 %v4119_v47  ;;  %v4152_v54 = vmul.f32 %v24282_v60, %v23887_v35  ;;  %v4153_v20 = vmul.f32 %v24282_v60, %v23908_v45 }
 0xa26   : > { %4124 = vadd.xlane.f32.xlu0 %v4123_v25  ;;  %v21658_v33 = vpack.i.bf16 %v4148_v52, %v4147_v50  ;;  %v4154_v30 = vmul.f32 %v24282_v60, %v23904_v43  ;;  %v4149_v43 = vmul.f32 %v24282_v60, %v23874_v29  ;;  %v4150_v34 = vmul.f32 %v24282_v60, %v23872_v27  ;;  %v4487_v50 = vld [vmem:[%s26645_s9] sm:$0xff]  ;;  %v4488_v52 = vld [vmem:[%s26645_s9 + $0x8] sm:$0xff] }
 0xa27   : > { %v4110_v41 = vpop.xlane.xlu0 %4109  ;;  %v21668_v22 = vpack.i.bf16 %v4152_v54, %v4151_v51  ;;  %v20864_v25 = vpack.c.bf16 %v4488_v52, %v4487_v50  ;;  %v4490_v51 = vld [vmem:[%s26645_s9 + $0x18] sm:$0xff] }
 0xa28   : > { %v4114_v62 = vsub.f32 %v4098_v11, %v4110_v41  ;;  %21659 = vrot.lane.b32.xlu1 %v21658_v33, %s23242_s8  ;;  %v21673_v39 = vpack.i.bf16 %v4154_v30, %v4153_v20  ;;  %v21663_v46 = vpack.i.bf16 %v4150_v34, %v4149_v43  ;;  %v4489_v33 = vld [vmem:[%s26645_s9 + $0x10] sm:$0xff]  ;;  %v4603_v41 = vld [vmem:[#allocation9] sm:$0xf]  ;;  %v22410_v20 = vld [vmem:[%s23824_s3 + $0x20] sm:$0xff] }
 0xa29   : > { %v20868_v54 = vpack.c.bf16 %v4490_v51, %v4489_v33  ;;  %v22411_v30 = vld [vmem:[%s23824_s3 + $0x28] sm:$0xff] }
 0xa2a   : > { %v4121_v17 = vmul.f32 1.442695, %v4114_v62  ;;  %v22407_v62 = vld [vmem:[%s23824_s3 + $0x8] sm:$0xff] }
 0xa2c   : > { %22012 = vpow2.f32 %v4121_v17  ;;  %21669 = vrot.lane.b32.xlu1 %v21668_v22, %s23242_s8  ;;  %v22408_v17 = vld [vmem:[%s23824_s3 + $0x10] sm:$0xff]  ;;  %v22409_v22 = vld [vmem:[%s23824_s3 + $0x18] sm:$0xff] }
 0xa2e   : > { %v22009_v14 = vpop.eup %22008 }
 0xa2f   : > { %v4126_v38 = vsel %vm1994_vm6, %v22009_v14, 0.0  ;;  %v22011_v35 = vpop.eup %22010 }
 0xa30   : > { %21674 = vrot.lane.b32.xlu1 %v21673_v39, %s23242_s8  ;;  %4127 = vadd.xlane.f32.xlu0 %v4126_v38  ;;  %v4129_v40 = vsel %vm1994_vm6, %v22011_v35, 0.0  ;;  %v22413_v39 = vld [vmem:[%s23824_s3 + $0x38] sm:$0xff] }
 0xa34   : > { %4130 = vadd.xlane.f32.xlu0 %v4129_v40 }
 0xa36   : > { %v22013_v53 = vpop.eup %22012 }
 0xa37   : > { %v4132_v45 = vsel %vm1994_vm6, %v22013_v53, 0.0 }
 0xa38   : > { %4133 = vadd.xlane.f32.xlu0 %v4132_v45 }
 0xa4e   : > { %21664 = vrot.lane.b32.xlu0 %v21663_v46, %s23242_s8 }
 0xa9a   : > { %v21660_v58 = vpop.permute.xlu1 %21659 }
 0xa9b   : > { %v21662_v2 = vunpack.i.h.bf16 %v21660_v58  ;;  %v21661_v21 = vunpack.i.l.bf16 %v21660_v58 }
 0xa9d   : > { %v20853_v3 = vpack.c.bf16 %v21662_v2, %v21661_v21 }
 0xa9e   : > { %v21670_v36 = vpop.permute.xlu1 %21669 }
 0xa9f   : > { %20854 = vmatpush3.bf16.msra.mxu0 %v20853_v3  ;;  %v21672_v6 = vunpack.i.h.bf16 %v21670_v36  ;;  %v21671_v8 = vunpack.i.l.bf16 %v21670_v36 }
 0xaa0   : > { %20858 = vmatprep.subr.bf16.mxu0 %v26571_v0 }
 0xaa1   : > { %v20859_v16 = vpack.c.bf16 %v21672_v6, %v21671_v8  ;;  %v4720_v6 = vld [vmem:[%s26646_s10 + $0x8] sm:$0xff] }
 0xaa2   : > { %v21675_v28 = vpop.permute.xlu1 %21674 }
 0xaa3   : > { %v21677_v24 = vunpack.i.h.bf16 %v21675_v28  ;;  %v21676_v57 = vunpack.i.l.bf16 %v21675_v28 }
 0xaa5   : > { %v20862_v47 = vpack.c.bf16 %v21677_v24, %v21676_v57  ;;  %v18527_v57 = vld [vmem:[#allocation7] ss:$0 sm:$0xff] }
 0xab3   : > { %v4125_v5 = vpop.xlane.xlu0 %4124 }
 0xab4   : > { %22014 = vrcp.f32 %v4125_v5 }
 0xabd   : > { %v4128_v26 = vpop.xlane.xlu0 %4127 }
 0xabe   : > { %v22015_v29 = vpop.eup %22014  ;;  %22016 = vrcp.f32 %v4128_v26  ;;  %v4721_v26 = vld [vmem:[%s26646_s10 + $0x10] sm:$0xff] }
 0xabf   : > { %v4139_v9 = vmul.f32 %v22015_v29, %v22007_v48  ;;  %v22406_v48 = vld [vmem:[%s23824_s3] sm:$0xff]  ;;  %v4722_v29 = vld [vmem:[%s26646_s10 + $0x18] sm:$0xff] }
 0xac1   : > { %19741 = vmatmul.mubr.msk.f32.vlgmr.msra.gmra.mrb[30].mxu0 %vm1994_vm6, %v4139_v9  ;;  %v4131_v27 = vpop.xlane.xlu0 %4130  ;;  %v20876_v9 = vpack.c.bf16 %v4722_v29, %v4721_v26 }
 0xac2   : > { %20860 = vmatpush3.bf16.msra.mxu0 %v20859_v16  ;;  %22018 = vrcp.f32 %v4131_v27  ;;  %19754 = vmatprep.mubr.msk.f32.mxu0 %vm23238_vm0, %v26569_v1  ;;  %v24356_v16 = vld [vmem:[#allocation10] ss:$0 sm:$0xff] }
 0xac3   : > { %20865 = vmatprep.subr.bf16.mxu0 %v20864_v25 }
 0xac5   : > { %v4134_v10 = vpop.xlane.xlu0 %4133 }
 0xac6   : > { %22020 = vrcp.f32 %v4134_v10 }
 0xac8   : > { %v22017_v18 = vpop.eup %22016 }
 0xac9   : > { %v21665_v11 = vpop.permute.xlu0 %21664  ;;  %v4140_v42 = vmul.f32 %v22017_v18, %v22009_v14  ;;  %v22412_v14 = vld [vmem:[%s23824_s3 + $0x30] sm:$0xff]  ;;  %s26649_s3 = sld [smem:[#allocation64_spill]] }
 0xaca   : > { %v21667_v13 = vunpack.i.h.bf16 %v21665_v11  ;;  %v21666_v15 = vunpack.i.l.bf16 %v21665_v11 }
 0xacc   : > { %v22019_v19 = vpop.eup %22018  ;;  %v20856_v31 = vpack.c.bf16 %v21667_v13, %v21666_v15 }
 0xacd   : > { %v4141_v32 = vmul.f32 %v22019_v19, %v22011_v35 }
 0xace   : > { %20857 = vmatpush3.bf16.msra.mxu1 %v20856_v31 }
 0xacf   : > { %19755 = vmatmul.mubr.msk.f32.vlgmr.msra.gmra.mrb[32].mxu0 %vm1994_vm6, %v4141_v32  ;;  %20861 = vmatprep.subr.bf16.mxu1 %v26571_v0 }
 0xad0   : > { %v22021_v4 = vpop.eup %22020  ;;  %20867 = vmatpush3.bf16.msra.mxu0 %v20864_v25 }
 0xad1   : > { %19748 = vmatmul.mubr.msk.f32.vlgmr.msra.gmra.mrb[36].mxu1 %vm1994_vm6, %v4140_v42  ;;  %v4142_v44 = vmul.f32 %v22021_v4, %v22013_v53  ;;  %20869 = vmatprep.subr.bf16.mxu0 %v20868_v54 }
 0xad2   : > { %20863 = vmatpush3.bf16.msra.mxu1 %v20862_v47  ;;  %19761 = vmatprep.mubr.msk.f32.mxu1 %vm23238_vm0, %v26569_v1 }
 0xad3   : > { %19778 = vmatprep.subr.msk.mxu1 %vm1573_vm1, %v4603_v41 }
 0xad4   : > { %20871 = vmatpush3.bf16.msra.mxu0 %v20868_v54 }
 0xad5   : > { %19762 = vmatmul.mubr.msk.f32.vlgmr.msra.gmra.mrb[38].mxu1 %vm1994_vm6, %v4142_v44 }
 0xad6   : > { %19780 = vmatprep.mubr.msk.f32.mxu1 %vm1548_vm2, %v22406_v48  ;;  %19779 = vmatpush3.msk.msra.mxu1 %vm1573_vm1, %v4603_v41  ;;  %vm15349_vm1 = vcmask 122880  }
 0xad9   : > { %19781 = vmatmul.mubr.msk.f32.vlgmr.msra.gmra.mrb[40].mxu1 %vm1548_vm2, %v22407_v62 }
 0xada   : > { %19783 = vmatprep.mubr.msk.f32.mxu1 %vm1548_vm2, %v22408_v17 }
 0xadd   : > { %19784 = vmatmul.mubr.msk.f32.gmra.mrb[42].mxu1 %vm1548_vm2, %v22409_v22 }
 0xade   : > { %19786 = vmatprep.mubr.msk.f32.mxu1 %vm1548_vm2, %v22410_v20 }
 0xae1   : > { %19787 = vmatmul.mubr.msk.f32.gmra.mrb[44].mxu1 %vm1548_vm2, %v22411_v30  ;;  %v18542_v30 = vld [vmem:[#allocation12] ss:$0 sm:$0xff] }
 0xae2   : > { %19789 = vmatprep.mubr.msk.f32.mxu1 %vm1548_vm2, %v22412_v14 }
 0xae5   : > { %19790 = vmatmul.mubr.msk.f32.gmra.mrb[46].mxu1 %vm1548_vm2, %v22413_v39  ;;  %vm17845_vm2 = vcmask 1042434  }
 0xb94   : > { %v4232_v38 = vpop.f32.mrb[30].mxu0 }
 0xb95   : > { %v4479_v35 = vadd.f32 %v4232_v38, %v24263_v63  ;;  %v19742_v40 = vpop.f32.mrb[31].mxu0 }
 0xb97   : > { %v4483_v53 = vadd.f32 %v4479_v35, %v23889_v37 }
 0xb99   : > { %19772 = vmatprep.mubr.msk.f32.mxu0 %vm1466_vm3, %v4483_v53 }
 0xba2   : > { %v4394_v45 = vpop.f32.mrb[32].mxu0 }
 0xba3   : > { %v4481_v43 = vadd.f32 %v4394_v45, %v24266_v56  ;;  %v19756_v34 = vpop.f32.mrb[33].mxu0 }
 0xba4   : > { %v4313_v46 = vpop.f32.mrb[36].mxu1 }
 0xba5   : > { %v4480_v58 = vadd.f32 %v4313_v46, %v24269_v12  ;;  %v19749_v2 = vpop.f32.mrb[37].mxu1  ;;  %v4485_v63 = vadd.f32 %v4481_v43, %v23889_v37  ;;  %v4719_v12 = vld [vmem:[%s26646_s10] sm:$0xff] }
 0xba6   : > { %v20872_v8 = vpack.c.bf16 %v4720_v6, %v4719_v12 }
 0xba7   : > { %v4484_v21 = vadd.f32 %v4480_v58, %v23889_v37 }
 0xba8   : > { %v4475_v3 = vpop.f32.mrb[38].mxu1  ;;  %20873 = vmatprep.subr.bf16.mxu0 %v20872_v8 }
 0xba9   : > { %v4482_v5 = vadd.f32 %v4475_v3, %v24272_v55  ;;  %v19763_v36 = vpop.f32.mrb[39].mxu1  ;;  %19773 = vmatmul.mubr.msk.f32.vlgmr.msra.gmra.mrb[34].mxu0 %vm1466_vm3, %v4484_v21 }
 0xbaa   : > { %19775 = vmatprep.mubr.msk.f32.mxu0 %vm1466_vm3, %v4485_v63  ;;  %20875 = vmatpush3.bf16.msra.mxu0 %v20872_v8 }
 0xbab   : > { %v4486_v56 = vadd.f32 %v4482_v5, %v23889_v37  ;;  %20877 = vmatprep.subr.bf16.mxu0 %v20876_v9 }
 0xbac   : > { %v19782_v55 = vpop.f32.mrb[40].mxu1 }
 0xbad   : > { %19776 = vmatmul.mubr.msk.f32.gmra.mrb[36].mxu0 %vm1466_vm3, %v4486_v56  ;;  %v24359_v27 = vadd.f32 %v19782_v55, %v24356_v16  ;;  %v4680_v10 = vpop.f32.mrb[41].mxu1 }
 0xbae   : > { %20879 = vmatpush3.bf16.msra.mxu0 %v20876_v9  ;;  %v24362_v37 = vadd.f32 %v24356_v16, %v4680_v10 }
 0xbaf   : > { %5265 = vrot.lane.b32.xlu1 %v24359_v27, %s23240_s14 }
 0xbb0   : > { %v19785_v28 = vpop.f32.mrb[42].mxu1  ;;  %19808 = vmatprep.mubr.msk.f32.mxu1 %vm1682_vm4, %v24362_v37 }
 0xbb1   : > { %v24367_v11 = vadd.f32 %v19785_v28, %v24356_v16  ;;  %v4690_v13 = vpop.f32.mrb[43].mxu1 }
 0xbb2   : > { %v24374_v18 = vadd.f32 %v24356_v16, %v4690_v13 }
 0xbb3   : > { %5352 = vrot.lane.b32.xlu0 %v24367_v11, %s23240_s14  ;;  %5263 = vrot.lane.b32.xlu1 %v24362_v37, %s23240_s14 }
 0xbb4   : > { %v19788_v15 = vpop.f32.mrb[44].mxu1 }
 0xbb5   : > { %v4700_v19 = vpop.f32.mrb[45].mxu1 }
 0xbb6   : > { %v24379_v24 = vadd.f32 %v24356_v16, %v4700_v19 }
 0xbb7   : > { %5350 = vrot.lane.b32.xlu0 %v24374_v18, %s23240_s14 }
 0xbb8   : > { %5437 = vrot.lane.b32.xlu1 %v24379_v24, %s23240_s14  ;;  %v19791_v22 = vpop.f32.mrb[46].mxu1 }
 0xbb9   : > { %v4710_v20 = vpop.f32.mrb[47].mxu1  ;;  %v24419_v2 = vadd.f32 %v19791_v22, %v24356_v16 }
 0xbba   : > { %v24412_v58 = vadd.f32 %v24356_v16, %v4710_v20 }
 0xc21   : > { %v5266_v46 = vpop.permute.xlu1 %5265 }
 0xc25   : > { %v5264_v3 = vpop.permute.xlu1 %5263 }
 0xc2a   : > { %v5438_v12 = vpop.permute.xlu1 %5437 }
 0xc7c   : > { %v19774_v31 = vpop.f32.mrb[34].mxu0 }
 0xc7d   : > { %v4582_v32 = vadd.f32 %v19774_v31, %v18527_v57  ;;  %v4576_v42 = vpop.f32.mrb[35].mxu0 }
 0xc7e   : > { %v4577_v4 = vadd.f32 %v18527_v57, %v4576_v42 }
 0xc7f   : > { %v4596_v47 = vmax.f32 %v4582_v32, 0.0 }
 0xc80   : > { %v4595_v44 = vmax.f32 %v4577_v4, 0.0  ;;  %v19777_v48 = vpop.f32.mrb[36].mxu0 }
 0xc81   : > { %v4592_v50 = vadd.f32 %v19777_v48, %v18527_v57  ;;  %v4586_v52 = vpop.f32.mrb[37].mxu0  ;;  %v4600_v51 = vadd.f32 %v4596_v47, %v4484_v21 }
 0xc82   : > { %v4599_v25 = vadd.f32 %v4595_v44, %v4483_v53  ;;  %v4587_v33 = vadd.f32 %v18527_v57, %v4586_v52  ;;  %v5353_v53 = vpop.permute.xlu0 %5352 }
 0xc83   : > { %v4598_v54 = vmax.f32 %v4592_v50, 0.0 }
 0xc84   : > { %v4597_v41 = vmax.f32 %v4587_v33, 0.0  ;;  %19800 = vmatprep.mubr.msk.f32.mxu0 %vm1466_vm3, %v4599_v25 }
 0xc85   : > { %19801 = vmatmul.mubr.msk.f32.vlgmr.msra.gmra.mrb[38].mxu0 %vm1466_vm3, %v4600_v51  ;;  %v4602_v17 = vadd.f32 %v4598_v54, %v4486_v56 }
 0xc86   : > { %v4601_v62 = vadd.f32 %v4597_v41, %v4485_v63  ;;  %v5351_v21 = vpop.permute.xlu0 %5350  ;;  %v24434_v63 = vadd.f32 %v19788_v15, %v24356_v16 }
 0xc88   : > { %19803 = vmatprep.mubr.msk.f32.mxu0 %vm1466_vm3, %v4601_v62 }
 0xc89   : > { %19804 = vmatmul.mubr.msk.f32.gmra.mrb[40].mxu0 %vm1466_vm3, %v4602_v17 }
 0xc8a   : > { %19813 = vmatprep.mubr.msk.f32.mxu0 %vm1682_vm4, %v24374_v18 }
 0xd58   : > { %v19802_v14 = vpop.f32.mrb[38].mxu0 }
 0xd59   : > { %v24391_v39 = vadd.f32 %v19802_v14, %v18542_v30  ;;  %v4808_v38 = vpop.f32.mrb[39].mxu0 }
 0xd5a   : > { %v24393_v35 = vadd.f32 %v18542_v30, %v4808_v38 }
 0xd5b   : > { %5354 = vrot.lane.b32.xlu0 %v24391_v39, %s23240_s14  ;;  %19811 = vmatprep.subr.msk.mxu0 %vm1682_vm4, %v24391_v39  ;;  %v5708_v36 = vmul.f32 %v24391_v39, %v24008_v61 }
 0xd5c   : > { %v19805_v40 = vpop.f32.mrb[40].mxu0  ;;  %19812 = vmatpush3.xpose.msk.msra.mxu0 %vm1682_vm4, %v24391_v39  ;;  %5267 = vrot.lane.b32.xlu1 %v24393_v35, %s23240_s14  ;;  %v5707_v5 = vmul.f32 %v24393_v35, %v24008_v61 }
 0xd5d   : > { %v24403_v45 = vadd.f32 %v19805_v40, %v18542_v30  ;;  %19806 = vmatprep.subr.msk.mxu1 %vm1682_vm4, %v24393_v35  ;;  %v4818_v43 = vpop.f32.mrb[41].mxu0 }
 0xd5e   : > { %v24407_v34 = vadd.f32 %v18542_v30, %v4818_v43  ;;  %19807 = vmatpush3.xpose.msk.msra.mxu1 %vm1682_vm4, %v24393_v35 }
 0xd5f   : > { %19814 = vmatmul.mubr.msk.f32.vlgmr.msra.gmra.mrb[42].mxu0 %vm1682_vm4, %v24367_v11  ;;  %5528 = vrot.lane.b32.xlu0 %v24403_v45, %s23240_s14 }
 0xd60   : > { %19821 = vmatprep.subr.msk.mxu0 %vm1682_vm4, %v24403_v45  ;;  %5441 = vrot.lane.b32.xlu1 %v24407_v34, %s23240_s14  ;;  %v5709_v56 = vmul.f32 %v24407_v34, %v24008_v61 }
 0xd61   : > { %19822 = vmatpush3.xpose.msk.msra.mxu0 %vm1682_vm4, %v24403_v45  ;;  %19809 = vmatmul.mubr.msk.f32.vlgmr.msra.gmra.mrb[48].mxu1 %vm1682_vm4, %v24359_v27 }
 0xd62   : > { %19816 = vmatprep.subr.msk.mxu1 %vm1682_vm4, %v24407_v34  ;;  %19818 = vmatprep.mubr.msk.f32.mxu1 %vm1682_vm4, %v24379_v24 }
 0xd63   : > { %19817 = vmatpush3.xpose.msk.msra.mxu1 %vm1682_vm4, %v24407_v34  ;;  %19823 = vmatprep.mubr.msk.f32.mxu0 %vm1682_vm4, %v24412_v58 }
 0xd64   : > { %5526 = vrot.lane.b32.xlu0 %v24419_v2, %s23240_s14  ;;  %19824 = vmatmul.mubr.msk.f32.vlgmr.msra.gmra.mrb[44].mxu0 %vm1682_vm4, %v24419_v2 }
 0xd65   : > { %5439 = vrot.lane.b32.xlu1 %v24434_v63, %s23240_s14  ;;  %19833 = vmatprep.mubr.msk.f32.mxu0 %vm1682_vm4, %v5351_v21 }
 0xd66   : > { %19819 = vmatmul.mubr.msk.f32.vlgmr.msra.gmra.mrb[50].mxu1 %vm1682_vm4, %v24434_v63 }
 0xd67   : > { %19828 = vmatprep.mubr.msk.f32.mxu1 %vm1682_vm4, %v5264_v3 }
 0xd68   : > { %5712 = vrot.lane.b32.xlu0 %v5707_v5, %s23242_s8 }
 0xd69   : > { %5524 = vrot.lane.b32.xlu1 %v24412_v58, %s23240_s14 }
 0xd6d   : > { %5797 = vrot.lane.b32.xlu1 %v5708_v36, %s23242_s8 }
 0xd71   : > { %5882 = vrot.lane.b32.xlu1 %v5709_v56, %s23242_s8 }
 0xdcd   : > { %v5355_v6 = vpop.permute.xlu0 %5354 }
 0xdce   : > { %19831 = vmatprep.subr.msk.mxu0 %vm1682_vm4, %v5355_v6  ;;  %v5268_v8 = vpop.permute.xlu1 %5267 }
 0xdcf   : > { %19826 = vmatprep.subr.msk.mxu1 %vm1682_vm4, %v5268_v8  ;;  %19832 = vmatpush3.xpose.msk.msra.mxu0 %vm1682_vm4, %v5355_v6 }
 0xdd0   : > { %19827 = vmatpush3.xpose.msk.msra.mxu1 %vm1682_vm4, %v5268_v8 }
 0xdd1   : > { %v5529_v26 = vpop.permute.xlu0 %5528 }
 0xdd2   : > { %19834 = vmatmul.mubr.msk.f32.vlgmr.msra.gmra.mrb[46].mxu0 %vm1682_vm4, %v5353_v53  ;;  %19841 = vmatprep.subr.msk.mxu0 %vm1682_vm4, %v5529_v26  ;;  %v5442_v29 = vpop.permute.xlu1 %5441 }
 0xdd3   : > { %19829 = vmatmul.mubr.msk.f32.vlgmr.msra.gmra.mrb[52].mxu1 %vm1682_vm4, %v5266_v46  ;;  %19836 = vmatprep.subr.msk.mxu1 %vm1682_vm4, %v5442_v29 }
 0xdd4   : > { %19842 = vmatpush3.xpose.msk.msra.mxu0 %vm1682_vm4, %v5529_v26  ;;  %19837 = vmatpush3.xpose.msk.msra.mxu1 %vm1682_vm4, %v5442_v29 }
 0xdd5   : > { %19838 = vmatprep.mubr.msk.f32.mxu1 %vm1682_vm4, %v5438_v12 }
 0xdd6   : > { %v5527_v9 = vpop.permute.xlu0 %5526 }
 0xdd7   : > { %v5440_v55 = vpop.permute.xlu1 %5439 }
 0xdd8   : > { %19839 = vmatmul.mubr.msk.f32.vlgmr.msra.gmra.mrb[54].mxu1 %vm1682_vm4, %v5440_v55 }
 0xdda   : > { %v5713_v16 = vpop.permute.xlu0 %5712 }
 0xddb   : > { %v5525_v10 = vpop.permute.xlu1 %5524  ;;  %19846 = vmatprep.subr.mxu1 %v5713_v16 }
 0xddc   : > { %19843 = vmatprep.mubr.msk.f32.mxu0 %vm1682_vm4, %v5525_v10  ;;  %19847 = vmatpush3.msra.mxu1 %v5713_v16 }
 0xddd   : > { %19844 = vmatmul.mubr.msk.f32.vlgmr.msra.gmra.mrb[48].mxu0 %vm1682_vm4, %v5527_v9 }
 0xddf   : > { %v5798_v28 = vpop.permute.xlu1 %5797 }
 0xde0   : > { %19851 = vmatprep.subr.mxu0 %v5798_v28 }
 0xde1   : > { %19852 = vmatpush3.msra.mxu0 %v5798_v28 }
 0xde3   : > { %v24475_v13 = vpop.permute.xlu1 %5882 }
 0xde4   : > { %19856 = vmatprep.subr.mxu1 %v24475_v13 }
 0xe32   : > { %v19815_v15 = vpop.f32.mrb[42].mxu0 }
 0xe33   : > { %v24478_v19 = vmul.f32 0.17677669, %v19815_v15  ;;  %v4986_v57 = vpop.f32.mrb[43].mxu0 }
 0xe34   : > { %v19810_v31 = vpop.f32.mrb[48].mxu1  ;;  %v24484_v47 = vmul.f32 0.17677669, %v4986_v57 }
 0xe35   : > { %v24480_v32 = vmul.f32 0.17677669, %v19810_v31  ;;  %v4902_v42 = vpop.f32.mrb[49].mxu1  ;;  %v5180_v4 = vsel %vm1682_vm4, %v24478_v19, -inf }
 0xe36   : > { %5181 = vmax.xlane.f32.xlu1 %v5180_v4  ;;  %v5163_v41 = vmul.f32 0.17677669, %v4902_v42  ;;  %v5177_v62 = vsel %vm1682_vm4, %v24484_v47, -inf }
 0xe37   : > { %v19825_v44 = vpop.f32.mrb[44].mxu0  ;;  %v5174_v48 = vsel %vm1682_vm4, %v24480_v32, -inf }
 0xe38   : > { %v24488_v50 = vmul.f32 0.17677669, %v19825_v44  ;;  %5175 = vmax.xlane.f32.xlu0 %v5174_v48  ;;  %v5154_v52 = vpop.f32.mrb[45].mxu0  ;;  %v5171_v20 = vsel %vm1682_vm4, %v5163_v41, -inf  ;;  %v5259_v48 = vmul.f32 %v24393_v35, %v24022_v7 }
 0xe39   : > { %v19820_v25 = vpop.f32.mrb[50].mxu1  ;;  %v24496_v17 = vmul.f32 0.17677669, %v5154_v52 }
 0xe3a   : > { %v24490_v33 = vmul.f32 0.17677669, %v19820_v25  ;;  %v5070_v51 = vpop.f32.mrb[51].mxu1  ;;  %v5192_v54 = vsel %vm1682_vm4, %v24488_v50, -inf  ;;  %v5710_v25 = vmul.f32 %v24403_v45, %v24008_v61 }
 0xe3b   : > { %5193 = vmax.xlane.f32.xlu1 %v5192_v54  ;;  %v5189_v30 = vsel %vm1682_vm4, %v24496_v17, -inf  ;;  %v24503_v14 = vmul.f32 0.17677669, %v5070_v51 }
 0xe3c   : > { %5178 = vmax.xlane.f32.xlu0 %v5177_v62  ;;  %v5186_v22 = vsel %vm1682_vm4, %v24490_v33, -inf }
 0xe3d   : > { %v5183_v38 = vsel %vm1682_vm4, %v24503_v14, -inf }
 0xe3f   : > { %5187 = vmax.xlane.f32.xlu1 %v5186_v22 }
 0xe40   : > { %5172 = vmax.xlane.f32.xlu0 %v5171_v20 }
 0xe44   : > { %5190 = vmax.xlane.f32.xlu0 %v5189_v30 }
 0xe48   : > { %5184 = vmax.xlane.f32.xlu0 %v5183_v38 }
 0xea5   : > { %v19835_v40 = vpop.f32.mrb[46].mxu0 }
 0xea6   : > { %v24507_v53 = vmul.f32 0.17677669, %v19835_v40  ;;  %v19830_v43 = vpop.f32.mrb[52].mxu1  ;;  %v5428_v46 = vpop.f32.mrb[47].mxu0 }
 0xea7   : > { %v5341_v21 = vpop.f32.mrb[53].mxu1  ;;  %v24509_v3 = vmul.f32 0.17677669, %v19830_v43  ;;  %v24517_v6 = vmul.f32 0.17677669, %v5428_v46 }
 0xea8   : > { %v24511_v5 = vmul.f32 0.17677669, %v5341_v21  ;;  %v5628_v36 = vsel %vm1682_vm4, %v24507_v53, -inf }
 0xea9   : > { %5629 = vmax.xlane.f32.xlu0 %v5628_v36  ;;  %v5622_v26 = vsel %vm1682_vm4, %v24509_v3, -inf  ;;  %v5625_v9 = vsel %vm1682_vm4, %v24517_v6, -inf }
 0xeaa   : > { %v5619_v56 = vsel %vm1682_vm4, %v24511_v5, -inf }
 0xeab   : > { %v19840_v12 = vpop.f32.mrb[54].mxu1  ;;  %5620 = vmax.xlane.f32.xlu1 %v5619_v56 }
 0xeac   : > { %v5515_v8 = vpop.f32.mrb[55].mxu1  ;;  %v24525_v10 = vmul.f32 0.17677669, %v19840_v12 }
 0xead   : > { %5623 = vmax.xlane.f32.xlu0 %v5622_v26  ;;  %v24535_v42 = vmul.f32 0.17677669, %v5515_v8 }
 0xeae   : > { %v5634_v57 = vsel %vm1682_vm4, %v24525_v10, -inf }
 0xeaf   : > { %v5631_v4 = vsel %vm1682_vm4, %v24535_v42, -inf }
 0xeb0   : > { %v19845_v29 = vpop.f32.mrb[48].mxu0 }
 0xeb1   : > { %v24523_v55 = vmul.f32 0.17677669, %v19845_v29  ;;  %5626 = vmax.xlane.f32.xlu0 %v5625_v9  ;;  %v5602_v16 = vpop.f32.mrb[49].mxu0 }
 0xeb2   : > { %v24529_v15 = vmul.f32 0.17677669, %v5602_v16 }
 0xeb3   : > { %v5640_v28 = vsel %vm1682_vm4, %v24523_v55, -inf }
 0xeb4   : > { %5641 = vmax.xlane.f32.xlu1 %v5640_v28  ;;  %v5637_v31 = vsel %vm1682_vm4, %v24529_v15, -inf }
 0xeb8   : > { %5635 = vmax.xlane.f32.xlu1 %v5634_v57 }
 0xebc   : > { %5638 = vmax.xlane.f32.xlu1 %v5637_v31 }
 0xec0   : > { %5632 = vmax.xlane.f32.xlu1 %v5631_v4 }
 0xec3   : > { %v5182_v30 = vpop.xlane.xlu1 %5181 }
 0xec4   : > { %v5198_v56 = vsub.f32 %v24478_v19, %v5182_v30 }
 0xec5   : > { %v5176_v44 = vpop.xlane.xlu0 %5175 }
 0xec6   : > { %v5196_v51 = vsub.f32 %v24480_v32, %v5176_v44 }
 0xec7   : > { %6052 = vrot.lane.b32.xlu0 %v5259_v48, %s23242_s8 }
 0xec8   : > { %v5205_v62 = vmul.f32 1.442695, %v5196_v51  ;;  %v5194_v36 = vpop.xlane.xlu1 %5193 }
 0xec9   : > { %v5179_v52 = vpop.xlane.xlu0 %5178  ;;  %v5202_v26 = vsub.f32 %v24488_v50, %v5194_v36 }
 0xeca   : > { %v5197_v22 = vsub.f32 %v24484_v47, %v5179_v52  ;;  %22022 = vpow2.f32 %v5205_v62  ;;  %v5209_v47 = vmul.f32 1.442695, %v5198_v56 }
 0xecb   : > { %v5217_v19 = vmul.f32 1.442695, %v5202_v26 }
 0xecc   : > { %v5207_v38 = vmul.f32 1.442695, %v5197_v22  ;;  %v5188_v29 = vpop.xlane.xlu1 %5187 }
 0xecd   : > { %v5173_v54 = vpop.xlane.xlu0 %5172  ;;  %v5200_v16 = vsub.f32 %v24490_v33, %v5188_v29 }
 0xece   : > { %v5195_v40 = vsub.f32 %v5163_v41, %v5173_v54  ;;  %22024 = vpow2.f32 %v5207_v38 }
 0xecf   : > { %v5213_v50 = vmul.f32 1.442695, %v5200_v16 }
 0xed0   : > { %v5203_v43 = vmul.f32 1.442695, %v5195_v40 }
 0xed1   : > { %5967 = vrot.lane.b32.xlu1 %v5710_v25, %s23242_s8  ;;  %v5191_v20 = vpop.xlane.xlu0 %5190 }
 0xed2   : > { %v5201_v46 = vsub.f32 %v24496_v17, %v5191_v20  ;;  %22026 = vpow2.f32 %v5203_v43 }
 0xed4   : > { %v5215_v32 = vmul.f32 1.442695, %v5201_v46  ;;  %v24550_v8 = vpop.eup %22022 }
 0xed5   : > { %v5185_v21 = vpop.xlane.xlu0 %5184  ;;  %v5222_v9 = vsel %vm1682_vm4, %v24550_v8, 0.0 }
 0xed6   : > { %v5199_v12 = vsub.f32 %v24503_v14, %v5185_v21  ;;  %22028 = vpow2.f32 %v5215_v32 }
 0xed7   : > { %22030 = vpow2.f32 %v5209_v47 }
 0xed8   : > { %v5211_v41 = vmul.f32 1.442695, %v5199_v12  ;;  %v24555_v17 = vpop.eup %22024 }
 0xed9   : > { %v5225_v14 = vsel %vm1682_vm4, %v24555_v17, 0.0 }
 0xeda   : > { %22032 = vpow2.f32 %v5211_v41 }
 0xedb   : > { %22034 = vpow2.f32 %v5217_v19 }
 0xedc   : > { %v24560_v28 = vpop.eup %22026  ;;  %22036 = vpow2.f32 %v5213_v50 }
 0xedd   : > { %v5219_v57 = vsel %vm1682_vm4, %v24560_v28, 0.0 }
 0xee0   : > { %v24564_v31 = vpop.eup %22028 }
 0xee1   : > { %v24566_v4 = vpop.eup %22030  ;;  %v5237_v33 = vsel %vm1682_vm4, %v24564_v31, 0.0 }
 0xee2   : > { %v5228_v48 = vsel %vm1682_vm4, %v24566_v4, 0.0 }
 0xee4   : > { %v24570_v44 = vpop.eup %22032 }
 0xee5   : > { %v24574_v52 = vpop.eup %22034  ;;  %v5231_v25 = vsel %vm1682_vm4, %v24570_v44, 0.0 }
 0xee6   : > { %5223 = vadd.xlane.f32.xlu0 %v5222_v9  ;;  %v5240_v51 = vsel %vm1682_vm4, %v24574_v52, 0.0  ;;  %v24580_v54 = vpop.eup %22036 }
 0xee7   : > { %v5234_v62 = vsel %vm1682_vm4, %v24580_v54, 0.0 }
 0xeea   : > { %5226 = vadd.xlane.f32.xlu0 %v5225_v14 }
 0xeee   : > { %5220 = vadd.xlane.f32.xlu0 %v5219_v57  ;;  %v5260_v57 = vmul.f32 %v24391_v39, %v24022_v7 }
 0xef2   : > { %5238 = vadd.xlane.f32.xlu0 %v5237_v33  ;;  %v5261_v33 = vmul.f32 %v24407_v34, %v24022_v7 }
 0xef5   : > { %5229 = vadd.xlane.f32.xlu1 %v5228_v48  ;;  %v5262_v48 = vmul.f32 %v24403_v45, %v24022_v7 }
 0xef6   : > { %5232 = vadd.xlane.f32.xlu0 %v5231_v25 }
 0xef9   : > { %5241 = vadd.xlane.f32.xlu1 %v5240_v51 }
 0xefd   : > { %5235 = vadd.xlane.f32.xlu1 %v5234_v62 }
 0xf36   : > { %v5630_v22 = vpop.xlane.xlu0 %5629 }
 0xf37   : > { %v5646_v20 = vsub.f32 %v24507_v53, %v5630_v22 }
 0xf38   : > { %v5621_v38 = vpop.xlane.xlu1 %5620 }
 0xf39   : > { %v5657_v30 = vmul.f32 1.442695, %v5646_v20  ;;  %v5643_v46 = vsub.f32 %v24511_v5, %v5621_v38 }
 0xf3a   : > { %v5624_v40 = vpop.xlane.xlu0 %5623 }
 0xf3b   : > { %22038 = vpow2.f32 %v5657_v30  ;;  %v5644_v43 = vsub.f32 %v24509_v3, %v5624_v40  ;;  %v5651_v32 = vmul.f32 1.442695, %v5643_v46 }
 0xf3d   : > { %v5653_v21 = vmul.f32 1.442695, %v5644_v43 }
 0xf3e   : > { %v5627_v36 = vpop.xlane.xlu0 %5626 }
 0xf3f   : > { %22040 = vpow2.f32 %v5653_v21  ;;  %v5645_v56 = vsub.f32 %v24517_v6, %v5627_v36 }
 0xf41   : > { %v5655_v12 = vmul.f32 1.442695, %v5645_v56  ;;  %v5642_v47 = vpop.xlane.xlu1 %5641 }
 0xf42   : > { %v5650_v25 = vsub.f32 %v24523_v55, %v5642_v47  ;;  %v24660_v56 = vpop.permute.xlu0 %6052 }
 0xf43   : > { %22042 = vpow2.f32 %v5655_v12 }
 0xf44   : > { %22044 = vpow2.f32 %v5651_v32  ;;  %v5665_v51 = vmul.f32 1.442695, %v5650_v25 }
 0xf45   : > { %v24588_v26 = vpop.eup %22038  ;;  %v5636_v53 = vpop.xlane.xlu1 %5635 }
 0xf46   : > { %v5676_v29 = vsel %vm1682_vm4, %v24588_v26, 0.0  ;;  %v5648_v62 = vsub.f32 %v24525_v10, %v5636_v53  ;;  %22046 = vpow2.f32 %v5665_v51 }
 0xf47   : > { %5677 = vadd.xlane.f32.xlu0 %v5676_v29 }
 0xf48   : > { %v5661_v22 = vmul.f32 1.442695, %v5648_v62 }
 0xf49   : > { %v24592_v3 = vpop.eup %22040  ;;  %v5639_v5 = vpop.xlane.xlu1 %5638 }
 0xf4a   : > { %v5670_v41 = vsel %vm1682_vm4, %v24592_v3, 0.0  ;;  %v5649_v20 = vsub.f32 %v24529_v15, %v5639_v5  ;;  %22048 = vpow2.f32 %v5661_v22 }
 0xf4b   : > { %5671 = vadd.xlane.f32.xlu1 %v5670_v41 }
 0xf4c   : > { %v5663_v30 = vmul.f32 1.442695, %v5649_v20 }
 0xf4d   : > { %v24596_v6 = vpop.eup %22042  ;;  %v5633_v9 = vpop.xlane.xlu1 %5632 }
 0xf4e   : > { %v5673_v19 = vsel %vm1682_vm4, %v24596_v6, 0.0  ;;  %v24600_v16 = vpop.eup %22044  ;;  %v5647_v55 = vsub.f32 %v24535_v42, %v5633_v9  ;;  %22050 = vpow2.f32 %v5663_v30 }
 0xf4f   : > { %5674 = vadd.xlane.f32.xlu0 %v5673_v19  ;;  %v5667_v50 = vsel %vm1682_vm4, %v24600_v16, 0.0 }
 0xf50   : > { %v5659_v38 = vmul.f32 1.442695, %v5647_v55  ;;  %v24630_v10 = vpop.eup %22046 }
 0xf51   : > { %v24602_v14 = vpop.permute.xlu1 %5967  ;;  %v5688_v15 = vsel %vm1682_vm4, %v24630_v10, 0.0 }
 0xf52   : > { %19861 = vmatprep.subr.mxu0 %v24602_v14  ;;  %22052 = vpow2.f32 %v5659_v38 }
 0xf53   : > { %5668 = vadd.xlane.f32.xlu0 %v5667_v50 }
 0xf54   : > { %v24636_v40 = vpop.eup %22048 }
 0xf55   : > { %v5682_v42 = vsel %vm1682_vm4, %v24636_v40, 0.0 }
 0xf58   : > { %v24642_v43 = vpop.eup %22050 }
 0xf59   : > { %v5685_v46 = vsel %vm1682_vm4, %v24642_v43, 0.0 }
 0xf5c   : > { %6137 = vrot.lane.b32.xlu1 %v5260_v57, %s23242_s8  ;;  %v24646_v21 = vpop.eup %22052 }
 0xf5d   : > { %v5679_v36 = vsel %vm1682_vm4, %v24646_v21, 0.0 }
 0xf60   : > { %6395 = vrot.lane.b32.xlu1 %v24393_v35, %s26584_s0 }
 0xf69   : > { %6222 = vrot.lane.b32.xlu0 %v5261_v33, %s23242_s8 }
 0xf6d   : > { %6307 = vrot.lane.b32.xlu0 %v5262_v48, %s23242_s8 }
 0xf71   : > { %6391 = vrot.lane.b32.xlu0 %v24362_v37, %s26584_s0 }
 0xf73   : > { %v5224_v32 = vpop.xlane.xlu0 %5223 }
 0xf75   : > { %6482 = vrot.lane.b32.xlu0 %v24391_v39, %s26584_s0 }
 0xf77   : > { %v5227_v12 = vpop.xlane.xlu0 %5226 }
 0xf79   : > { %6478 = vrot.lane.b32.xlu0 %v24374_v18, %s26584_s0 }
 0xf7b   : > { %v5221_v47 = vpop.xlane.xlu0 %5220 }
 0xf7d   : > { %6565 = vrot.lane.b32.xlu0 %v24379_v24, %s26584_s0 }
 0xf7f   : > { %v5239_v29 = vpop.xlane.xlu0 %5238 }
 0xf81   : > { %6656 = vrot.lane.b32.xlu0 %v24403_v45, %s26584_s0 }
 0xf82   : > { %v5230_v53 = vpop.xlane.xlu1 %5229 }
 0xf83   : > { %v5233_v41 = vpop.xlane.xlu0 %5232 }
 0xf84   : > { %5689 = vadd.xlane.f32.xlu1 %v5688_v15 }
 0xf85   : > { %6654 = vrot.lane.b32.xlu0 %v24419_v2, %s26584_s0 }
 0xf86   : > { %v5242_v5 = vpop.xlane.xlu1 %5241 }
 0xf88   : > { %5683 = vadd.xlane.f32.xlu1 %v5682_v42 }
 0xf8a   : > { %v5236_v19 = vpop.xlane.xlu1 %5235 }
 0xf8c   : > { %5686 = vadd.xlane.f32.xlu1 %v5685_v46 }
 0xf90   : > { %5680 = vadd.xlane.f32.xlu1 %v5679_v36 }
 0xfa1   : > { %6393 = vrot.lane.b32.xlu1 %v24359_v27, %s26584_s0 }
 0xfa5   : > { %6569 = vrot.lane.b32.xlu1 %v24407_v34, %s26584_s0 }
 0xfa9   : > { %6480 = vrot.lane.b32.xlu1 %v24367_v11, %s26584_s0 }
 0xfad   : > { %6567 = vrot.lane.b32.xlu1 %v24434_v63, %s26584_s0 }
 0xfb1   : > { %6652 = vrot.lane.b32.xlu1 %v24412_v58, %s26584_s0 }
 0xfd4   : > { %v5678_v9 = vpop.xlane.xlu0 %5677 }
 0xfd5   : > { %22054 = vrcp.f32 %v5678_v9 }
 0xfd8   : > { %v5672_v57 = vpop.xlane.xlu1 %5671 }
 0xfdc   : > { %v5675_v50 = vpop.xlane.xlu0 %5674  ;;  %v6138_v30 = vpop.permute.xlu1 %6137 }
 0xfdd   : > { %22056 = vrcp.f32 %v5675_v50 }
 0xfde   : > { %22058 = vrcp.f32 %v5672_v57 }
 0xfdf   : > { %v22055_v48 = vpop.eup %22054 }
 0xfe0   : > { %v5669_v33 = vpop.xlane.xlu0 %5668  ;;  %v5702_v62 = vmul.f32 %v22055_v48, %v24588_v26  ;;  %v24673_v26 = vpop.permute.xlu1 %6395 }
 0xfe1   : > { %22060 = vrcp.f32 %v5669_v33 }
 0xfe2   : > { %22062 = vrcp.f32 %v5227_v12 }
 0xfe7   : > { %v22057_v25 = vpop.eup %22056 }
 0xfe8   : > { %v5701_v51 = vmul.f32 %v22057_v25, %v24596_v6  ;;  %v22059_v22 = vpop.eup %22058  ;;  %v24675_v6 = vpop.permute.xlu0 %6222 }
 0xfe9   : > { %v5700_v38 = vmul.f32 %v22059_v22, %v24592_v3 }
 0xfea   : > { %19853 = vmatprep.mubr.msk.f32.mxu0 %vm1682_vm4, %v5701_v51 }
 0xfeb   : > { %v22061_v20 = vpop.eup %22060  ;;  %19854 = vmatmul.mubr.msk.f32.vlgmr.msra.gmra.mrb[50].mxu0 %vm1682_vm4, %v5702_v62 }
 0xfec   : > { %19862 = vmatpush3.msra.mxu0 %v24602_v14  ;;  %v5699_v55 = vmul.f32 %v22061_v20, %v24600_v16  ;;  %v6308_v14 = vpop.permute.xlu0 %6307  ;;  %v22063_v36 = vpop.eup %22062 }
 0xfed   : > { %19871 = vmatprep.subr.mxu0 %v6138_v30 }
 0xfee   : > { %19848 = vmatprep.mubr.msk.f32.mxu1 %vm1682_vm4, %v5699_v55 }
 0xfef   : > { %19849 = vmatmul.mubr.msk.f32.vlgmr.msra.gmra.mrb[56].mxu1 %vm1682_vm4, %v5700_v38 }
 0xff0   : > { %19857 = vmatpush3.msra.mxu1 %v24475_v13  ;;  %v24677_v3 = vpop.permute.xlu0 %6391 }
 0xff1   : > { %19866 = vmatprep.subr.mxu1 %v24660_v56 }
 0xff4   : > { %v6483_v9 = vpop.permute.xlu0 %6482 }
0x1011   : > { %v5690_v15 = vpop.xlane.xlu1 %5689 }
0x1012   : > { %22064 = vrcp.f32 %v5690_v15 }
0x1015   : > { %v5684_v42 = vpop.xlane.xlu1 %5683 }
0x1019   : > { %v5687_v16 = vpop.xlane.xlu1 %5686 }
0x101a   : > { %22066 = vrcp.f32 %v5687_v16 }
0x101b   : > { %22068 = vrcp.f32 %v5224_v32 }
0x101c   : > { %22070 = vrcp.f32 %v5230_v53  ;;  %v22065_v50 = vpop.eup %22064 }
0x101d   : > { %22072 = vrcp.f32 %v5684_v42  ;;  %v5681_v46 = vpop.xlane.xlu1 %5680  ;;  %v5706_v48 = vmul.f32 %v22065_v50, %v24630_v10 }
0x101e   : > { %22074 = vrcp.f32 %v5681_v46 }
0x101f   : > { %22076 = vrcp.f32 %v5221_v47  ;;  %v5253_v47 = vmul.f32 %v22063_v36, %v24555_v17 }
0x1020   : > { %22078 = vrcp.f32 %v5239_v29 }
0x1021   : > { %22080 = vrcp.f32 %v5242_v5  ;;  %v24679_v13 = vpop.permute.xlu1 %6393  ;;  %v6479_v5 = vpop.permute.xlu0 %6478 }
0x1022   : > { %22082 = vrcp.f32 %v5233_v41 }
0x1023   : > { %22084 = vrcp.f32 %v5236_v19 }
0x1024   : > { %v22067_v12 = vpop.eup %22066 }
0x1025   : > { %v22069_v57 = vpop.eup %22068  ;;  %v5705_v32 = vmul.f32 %v22067_v12, %v24642_v43  ;;  %v6570_v33 = vpop.permute.xlu1 %6569 }
0x1026   : > { %v22071_v53 = vpop.eup %22070 }
0x1027   : > { %v22073_v25 = vpop.eup %22072  ;;  %19863 = vmatprep.mubr.msk.f32.mxu0 %vm1682_vm4, %v5705_v32  ;;  %v5254_v10 = vmul.f32 %v22071_v53, %v24566_v4  ;;  %v5252_v4 = vmul.f32 %v22069_v57, %v24550_v8 }
0x1028   : > { %v22075_v29 = vpop.eup %22074  ;;  %19864 = vmatmul.mubr.msk.f32.vlgmr.msra.gmra.mrb[52].mxu0 %vm1682_vm4, %v5706_v48  ;;  %v5704_v51 = vmul.f32 %v22073_v25, %v24636_v40 }
0x1029   : > { %v22077_v41 = vpop.eup %22076  ;;  %19872 = vmatpush3.msra.mxu0 %v6138_v30  ;;  %19873 = vmatprep.mubr.msk.f32.mxu0 %vm1682_vm4, %v5253_v47  ;;  %v5703_v19 = vmul.f32 %v22075_v29, %v24646_v21  ;;  %v6481_v22 = vpop.permute.xlu1 %6480 }
0x102a   : > { %v22079_v43 = vpop.eup %22078  ;;  %19881 = vmatprep.subr.mxu0 %v6308_v14  ;;  %v5251_v20 = vmul.f32 %v22077_v41, %v24560_v28  ;;  %v6566_v30 = vpop.permute.xlu0 %6565  ;;  %v6837_v41 = vmul.f32 %v24407_v34, %v24182_v59 }
0x102b   : > { %v22081_v62 = vpop.eup %22080  ;;  %19858 = vmatprep.mubr.msk.f32.mxu1 %vm1682_vm4, %v5703_v19  ;;  %v5257_v21 = vmul.f32 %v22079_v43, %v24564_v31  ;;  %v6836_v19 = vmul.f32 %v24391_v39, %v24182_v59  ;;  %v6835_v43 = vmul.f32 %v24393_v35, %v24182_v59 }
0x102c   : > { %v22083_v17 = vpop.eup %22082  ;;  %19859 = vmatmul.mubr.msk.f32.vlgmr.msra.gmra.mrb[58].mxu1 %vm1682_vm4, %v5704_v51  ;;  %19874 = vmatmul.mubr.msk.f32.vlgmr.msra.gmra.mrb[50].mxu0 %vm1682_vm4, %v5254_v10  ;;  %v5258_v40 = vmul.f32 %v22081_v62, %v24574_v52  ;;  %v6838_v51 = vmul.f32 %v24403_v45, %v24182_v59 }
0x102d   : > { %19867 = vmatpush3.msra.mxu1 %v24660_v56  ;;  %19882 = vmatpush3.msra.mxu0 %v6308_v14  ;;  %v22085_v55 = vpop.eup %22084  ;;  %v5255_v28 = vmul.f32 %v22083_v17, %v24570_v44  ;;  %v6568_v31 = vpop.permute.xlu1 %6567 }
0x102e   : > { %19868 = vmatprep.mubr.msk.f32.mxu1 %vm1682_vm4, %v5251_v20  ;;  %19876 = vmatprep.subr.mxu1 %v24675_v6  ;;  %v5256_v8 = vmul.f32 %v22085_v55, %v24580_v54  ;;  %v6657_v52 = vpop.permute.xlu0 %6656 }
0x102f   : > { %19883 = vmatprep.mubr.msk.f32.mxu0 %vm1682_vm4, %v5257_v21  ;;  %19891 = vmatprep.subr.msk.mxu0 %vm1682_vm4, %v6483_v9 }
0x1030   : > { %19869 = vmatmul.mubr.msk.f32.vlgmr.msra.gmra.mrb[56].mxu1 %vm1682_vm4, %v5252_v4  ;;  %19884 = vmatmul.mubr.msk.f32.vlgmr.msra.gmra.mrb[52].mxu0 %vm1682_vm4, %v5258_v40 }
0x1031   : > { %19877 = vmatpush3.msra.mxu1 %v24675_v6  ;;  %19878 = vmatprep.mubr.msk.f32.mxu1 %vm1682_vm4, %v5255_v28  ;;  %v6653_v44 = vpop.permute.xlu1 %6652 }
0x1032   : > { %19886 = vmatprep.subr.msk.mxu1 %vm1682_vm4, %v24673_v26  ;;  %19893 = vmatprep.mubr.msk.f32.mxu0 %vm1682_vm4, %v6479_v5  ;;  %v6655_v54 = vpop.permute.xlu0 %6654 }
0x1034   : > { %19892 = vmatpush3.xpose.msk.msra.mxu0 %vm1682_vm4, %v6483_v9  ;;  %19879 = vmatmul.mubr.msk.f32.vlgmr.msra.gmra.mrb[58].mxu1 %vm1682_vm4, %v5256_v8 }
0x1035   : > { %19901 = vmatprep.subr.msk.mxu0 %vm1682_vm4, %v6657_v52  ;;  %19888 = vmatprep.mubr.msk.f32.mxu1 %vm1682_vm4, %v24677_v3 }
0x1037   : > { %19894 = vmatmul.mubr.msk.f32.vlgmr.msra.gmra.mrb[54].mxu0 %vm1682_vm4, %v6481_v22 }
0x1038   : > { %19887 = vmatpush3.xpose.msk.msra.mxu1 %vm1682_vm4, %v24673_v26  ;;  %19902 = vmatpush3.xpose.msk.msra.mxu0 %vm1682_vm4, %v6657_v52 }
0x1039   : > { %19903 = vmatprep.mubr.msk.f32.mxu0 %vm1682_vm4, %v6653_v44  ;;  %19896 = vmatprep.subr.msk.mxu1 %vm1682_vm4, %v6570_v33 }
0x103b   : > { %19889 = vmatmul.mubr.msk.f32.vlgmr.msra.gmra.mrb[60].mxu1 %vm1682_vm4, %v24679_v13  ;;  %19904 = vmatmul.mubr.msk.f32.vlgmr.msra.gmra.mrb[56].mxu0 %vm1682_vm4, %v6655_v54 }
0x103c   : > { %19897 = vmatpush3.xpose.msk.msra.mxu1 %vm1682_vm4, %v6570_v33  ;;  %19898 = vmatprep.mubr.msk.f32.mxu1 %vm1682_vm4, %v6566_v30 }
0x103f   : > { %19899 = vmatmul.mubr.msk.f32.vlgmr.msra.gmra.mrb[62].mxu1 %vm1682_vm4, %v6568_v31 }
0x110a   : > { %v19895_v56 = vpop.f32.mrb[54].mxu0 }
0x110b   : > { %v6556_v38 = vpop.f32.mrb[55].mxu0  ;;  %v6742_v13 = vmul.f32 0.17677669, %v19895_v56 }
0x110c   : > { %v6741_v3 = vmul.f32 0.17677669, %v6556_v38 }
0x110d   : > { %v6756_v53 = vsel %vm1682_vm4, %v6742_v13, -inf }
0x110e   : > { %v19890_v26 = vpop.f32.mrb[60].mxu1  ;;  %v19905_v6 = vpop.f32.mrb[56].mxu0  ;;  %v6753_v57 = vsel %vm1682_vm4, %v6741_v3, -inf }
0x110f   : > { %v6740_v15 = vmul.f32 0.17677669, %v19890_v26  ;;  %v6469_v42 = vpop.f32.mrb[61].mxu1  ;;  %v6730_v14 = vpop.f32.mrb[57].mxu0  ;;  %v6746_v25 = vmul.f32 0.17677669, %v19905_v6 }
0x1110   : > { %v6739_v16 = vmul.f32 0.17677669, %v6469_v42  ;;  %v6745_v33 = vmul.f32 0.17677669, %v6730_v14 }
0x1111   : > { %v6750_v46 = vsel %vm1682_vm4, %v6740_v15, -inf  ;;  %v6768_v5 = vsel %vm1682_vm4, %v6746_v25, -inf }
0x1112   : > { %6751 = vmax.xlane.f32.xlu0 %v6750_v46  ;;  %v19900_v36 = vpop.f32.mrb[62].mxu1  ;;  %v6747_v9 = vsel %vm1682_vm4, %v6739_v16, -inf  ;;  %v6765_v29 = vsel %vm1682_vm4, %v6745_v33, -inf }
0x1113   : > { %6748 = vmax.xlane.f32.xlu1 %v6747_v9  ;;  %v6643_v50 = vpop.f32.mrb[63].mxu1  ;;  %v6744_v32 = vmul.f32 0.17677669, %v19900_v36 }
0x1114   : > { %v6743_v12 = vmul.f32 0.17677669, %v6643_v50 }
0x1115   : > { %v6762_v47 = vsel %vm1682_vm4, %v6744_v32, -inf }
0x1116   : > { %6754 = vmax.xlane.f32.xlu0 %v6753_v57  ;;  %v6759_v48 = vsel %vm1682_vm4, %v6743_v12, -inf }
0x1117   : > { %6757 = vmax.xlane.f32.xlu1 %v6756_v53 }
0x111a   : > { %6760 = vmax.xlane.f32.xlu0 %v6759_v48 }
0x111b   : > { %6763 = vmax.xlane.f32.xlu1 %v6762_v47 }
0x111e   : > { %6766 = vmax.xlane.f32.xlu0 %v6765_v29 }
0x111f   : > { %6769 = vmax.xlane.f32.xlu1 %v6768_v5 }
0x1130   : > { %7010 = vrot.lane.b32.xlu1 %v6837_v41, %s23242_s8 }
0x1134   : > { %6925 = vrot.lane.b32.xlu1 %v6836_v19, %s23242_s8  ;;  %6840 = vrot.lane.b32.xlu0 %v6835_v43, %s23242_s8 }
0x1138   : > { %7191 = vrot.lane.b32.xlu1 %v24393_v35, %s26582_s13  ;;  %7095 = vrot.lane.b32.xlu0 %v6838_v51, %s23242_s8 }
0x113c   : > { %7189 = vrot.lane.b32.xlu1 %v24359_v27, %s26582_s13  ;;  %7187 = vrot.lane.b32.xlu0 %v24362_v37, %s26582_s13 }
0x119f   : > { %v6752_v10 = vpop.xlane.xlu0 %6751 }
0x11a0   : > { %v6749_v62 = vpop.xlane.xlu1 %6748  ;;  %v6772_v22 = vsub.f32 %v6740_v15, %v6752_v10 }
0x11a1   : > { %v6771_v17 = vsub.f32 %v6739_v16, %v6749_v62 }
0x11a2   : > { %v6781_v28 = vmul.f32 1.442695, %v6772_v22 }
0x11a3   : > { %v6755_v20 = vpop.xlane.xlu0 %6754  ;;  %v6779_v40 = vmul.f32 1.442695, %v6771_v17 }
0x11a4   : > { %v6773_v21 = vsub.f32 %v6741_v3, %v6755_v20  ;;  %v6758_v30 = vpop.xlane.xlu1 %6757 }
0x11a5   : > { %v6774_v4 = vsub.f32 %v6742_v13, %v6758_v30 }
0x11a6   : > { %v6783_v55 = vmul.f32 1.442695, %v6773_v21 }
0x11a7   : > { %v6785_v31 = vmul.f32 1.442695, %v6774_v4  ;;  %v6761_v8 = vpop.xlane.xlu0 %6760 }
0x11a8   : > { %22086 = vpow2.f32 %v6783_v55  ;;  %v6764_v52 = vpop.xlane.xlu1 %6763  ;;  %v6775_v44 = vsub.f32 %v6743_v12, %v6761_v8 }
0x11a9   : > { %22088 = vpow2.f32 %v6785_v31  ;;  %v6776_v54 = vsub.f32 %v6744_v32, %v6764_v52 }
0x11aa   : > { %22090 = vpow2.f32 %v6779_v40  ;;  %v6787_v15 = vmul.f32 1.442695, %v6775_v44 }
0x11ab   : > { %22092 = vpow2.f32 %v6781_v28  ;;  %v6767_v56 = vpop.xlane.xlu0 %6766  ;;  %v6789_v14 = vmul.f32 1.442695, %v6776_v54 }
0x11ac   : > { %v6777_v38 = vsub.f32 %v6745_v33, %v6767_v56  ;;  %v6770_v26 = vpop.xlane.xlu1 %6769 }
0x11ad   : > { %v6778_v6 = vsub.f32 %v6746_v25, %v6770_v26 }
0x11ae   : > { %v6791_v42 = vmul.f32 1.442695, %v6777_v38 }
0x11af   : > { %v6793_v16 = vmul.f32 1.442695, %v6778_v6  ;;  %v6841_v3 = vpop.permute.xlu0 %6840 }
0x11b0   : > { %22094 = vpow2.f32 %v6791_v42  ;;  %v24754_v46 = vpop.permute.xlu1 %7010  ;;  %19906 = vmatprep.subr.mxu1 %v6841_v3 }
0x11b1   : > { %22096 = vpow2.f32 %v6793_v16  ;;  %19907 = vmatpush3.msra.mxu1 %v6841_v3 }
0x11b2   : > { %v22087_v13 = vpop.eup %22086  ;;  %22098 = vpow2.f32 %v6787_v15  ;;  %19916 = vmatprep.subr.mxu1 %v24754_v46 }
0x11b3   : > { %v22089_v36 = vpop.eup %22088  ;;  %22100 = vpow2.f32 %v6789_v14  ;;  %v6801_v9 = vsel %vm1682_vm4, %v22087_v13, 0.0  ;;  %v7096_v53 = vpop.permute.xlu0 %7095 }
0x11b4   : > { %v24758_v50 = vpop.eup %22090  ;;  %v6926_v12 = vpop.permute.xlu1 %6925  ;;  %6802 = vadd.xlane.f32.xlu0 %v6801_v9  ;;  %v6804_v57 = vsel %vm1682_vm4, %v22089_v36, 0.0 }
0x11b5   : > { %v24761_v32 = vpop.eup %22092  ;;  %6805 = vadd.xlane.f32.xlu1 %v6804_v57  ;;  %19911 = vmatprep.subr.mxu0 %v6926_v12  ;;  %v6795_v33 = vsel %vm1682_vm4, %v24758_v50, 0.0 }
0x11b6   : > { %19912 = vmatpush3.msra.mxu0 %v6926_v12  ;;  %v6798_v48 = vsel %vm1682_vm4, %v24761_v32, 0.0 }
0x11b7   : > { %19921 = vmatprep.subr.mxu0 %v7096_v53  ;;  %v7188_v62 = vpop.permute.xlu0 %7187 }
0x11b8   : > { %6796 = vadd.xlane.f32.xlu0 %v6795_v33  ;;  %v7192_v10 = vpop.permute.xlu1 %7191 }
0x11b9   : > { %6799 = vadd.xlane.f32.xlu1 %v6798_v48 }
0x11ba   : > { %v22095_v25 = vpop.eup %22094 }
0x11bb   : > { %v22097_v47 = vpop.eup %22096  ;;  %v6813_v29 = vsel %vm1682_vm4, %v22095_v25, 0.0 }
0x11bc   : > { %v24768_v5 = vpop.eup %22098  ;;  %6814 = vadd.xlane.f32.xlu0 %v6813_v29  ;;  %v6816_v41 = vsel %vm1682_vm4, %v22097_v47, 0.0  ;;  %v7190_v17 = vpop.permute.xlu1 %7189 }
0x11bd   : > { %v24771_v19 = vpop.eup %22100  ;;  %6817 = vadd.xlane.f32.xlu1 %v6816_v41  ;;  %v6807_v43 = vsel %vm1682_vm4, %v24768_v5, 0.0 }
0x11be   : > { %v6810_v51 = vsel %vm1682_vm4, %v24771_v19, 0.0 }
0x11c0   : > { %6808 = vadd.xlane.f32.xlu0 %v6807_v43 }
0x11c1   : > { %6811 = vadd.xlane.f32.xlu1 %v6810_v51 }
0x11d2   : > { %7274 = vrot.lane.b32.xlu1 %v24374_v18, %s26582_s13 }
0x11d6   : > { %7365 = vrot.lane.b32.xlu1 %v24407_v34, %s26582_s13  ;;  %7278 = vrot.lane.b32.xlu0 %v24391_v39, %s26582_s13 }
0x11da   : > { %7363 = vrot.lane.b32.xlu1 %v24434_v63, %s26582_s13  ;;  %7276 = vrot.lane.b32.xlu0 %v24367_v11, %s26582_s13 }
0x11de   : > { %7448 = vrot.lane.b32.xlu1 %v24412_v58, %s26582_s13  ;;  %7361 = vrot.lane.b32.xlu0 %v24379_v24, %s26582_s13 }
0x11e2   : > { %7452 = vrot.lane.b32.xlu0 %v24403_v45, %s26582_s13 }
0x11e6   : > { %7450 = vrot.lane.b32.xlu0 %v24419_v2, %s26582_s13 }
0x1241   : > { %v6803_v22 = vpop.xlane.xlu0 %6802 }
0x1242   : > { %22102 = vrcp.f32 %v6803_v22  ;;  %v6806_v20 = vpop.xlane.xlu1 %6805 }
0x1243   : > { %22104 = vrcp.f32 %v6806_v20 }
0x1245   : > { %v6797_v21 = vpop.xlane.xlu0 %6796 }
0x1246   : > { %22106 = vrcp.f32 %v6797_v21  ;;  %v6800_v30 = vpop.xlane.xlu1 %6799 }
0x1247   : > { %22108 = vrcp.f32 %v6800_v30 }
0x1249   : > { %v6815_v4 = vpop.xlane.xlu0 %6814 }
0x124a   : > { %22110 = vrcp.f32 %v6815_v4  ;;  %v6818_v40 = vpop.xlane.xlu1 %6817 }
0x124b   : > { %22112 = vrcp.f32 %v6818_v40 }
0x124c   : > { %v22103_v55 = vpop.eup %22102 }
0x124d   : > { %v22105_v28 = vpop.eup %22104  ;;  %v6809_v31 = vpop.xlane.xlu0 %6808  ;;  %v6829_v8 = vmul.f32 %v22103_v55, %v22087_v13 }
0x124e   : > { %22114 = vrcp.f32 %v6809_v31  ;;  %v6812_v52 = vpop.xlane.xlu1 %6811  ;;  %v6830_v44 = vmul.f32 %v22105_v28, %v22089_v36 }
0x124f   : > { %22116 = vrcp.f32 %v6812_v52  ;;  %19913 = vmatprep.mubr.msk.f32.mxu0 %vm1682_vm4, %v6829_v8 }
0x1250   : > { %v22107_v54 = vpop.eup %22106  ;;  %19914 = vmatmul.mubr.msk.f32.vlgmr.msra.gmra.mrb[50].mxu0 %vm1682_vm4, %v6830_v44 }
0x1251   : > { %v22109_v56 = vpop.eup %22108  ;;  %19922 = vmatpush3.msra.mxu0 %v7096_v53  ;;  %v7279_v38 = vpop.permute.xlu0 %7278  ;;  %v6827_v26 = vmul.f32 %v22107_v54, %v24758_v50 }
0x1252   : > { %v7275_v6 = vpop.permute.xlu1 %7274  ;;  %19931 = vmatprep.subr.msk.mxu0 %vm1682_vm4, %v7279_v38  ;;  %v6828_v15 = vmul.f32 %v22109_v56, %v24761_v32  ;;  %v7632_v56 = vmul.f32 %v24391_v39, %v24282_v60 }
0x1253   : > { %19908 = vmatprep.mubr.msk.f32.mxu1 %vm1682_vm4, %v6827_v26 }
0x1254   : > { %v22111_v42 = vpop.eup %22110  ;;  %19909 = vmatmul.mubr.msk.f32.vlgmr.msra.gmra.mrb[56].mxu1 %vm1682_vm4, %v6828_v15 }
0x1255   : > { %v22113_v14 = vpop.eup %22112  ;;  %19917 = vmatpush3.msra.mxu1 %v24754_v46  ;;  %v7277_v16 = vpop.permute.xlu0 %7276  ;;  %v6833_v3 = vmul.f32 %v22111_v42, %v22095_v25 }
0x1256   : > { %19926 = vmatprep.subr.msk.mxu1 %vm1682_vm4, %v7192_v10  ;;  %v7366_v13 = vpop.permute.xlu1 %7365  ;;  %v6834_v36 = vmul.f32 %v22113_v14, %v22097_v47 }
0x1257   : > { %19923 = vmatprep.mubr.msk.f32.mxu0 %vm1682_vm4, %v6833_v3 }
0x1258   : > { %v22115_v9 = vpop.eup %22114  ;;  %19924 = vmatmul.mubr.msk.f32.vlgmr.msra.gmra.mrb[52].mxu0 %vm1682_vm4, %v6834_v36 }
0x1259   : > { %v22117_v50 = vpop.eup %22116  ;;  %19932 = vmatpush3.xpose.msk.msra.mxu0 %vm1682_vm4, %v7279_v38  ;;  %19933 = vmatprep.mubr.msk.f32.mxu0 %vm1682_vm4, %v7275_v6  ;;  %v7362_v12 = vpop.permute.xlu0 %7361  ;;  %v6831_v57 = vmul.f32 %v22115_v9, %v24768_v5  ;;  %v7631_v38 = vmul.f32 %v24393_v35, %v24282_v60 }
0x125a   : > { %v7364_v46 = vpop.permute.xlu1 %7363  ;;  %v6832_v32 = vmul.f32 %v22117_v50, %v24771_v19 }
0x125b   : > { %19918 = vmatprep.mubr.msk.f32.mxu1 %vm1682_vm4, %v6831_v57 }
0x125c   : > { %19919 = vmatmul.mubr.msk.f32.vlgmr.msra.gmra.mrb[58].mxu1 %vm1682_vm4, %v6832_v32  ;;  %19934 = vmatmul.mubr.msk.f32.vlgmr.msra.gmra.mrb[58].mxu0 %vm1682_vm4, %v7277_v16 }
0x125d   : > { %19927 = vmatpush3.xpose.msk.msra.mxu1 %vm1682_vm4, %v7192_v10  ;;  %19928 = vmatprep.mubr.msk.f32.mxu1 %vm1682_vm4, %v7188_v62  ;;  %v7453_v53 = vpop.permute.xlu0 %7452 }
0x125e   : > { %19936 = vmatprep.subr.msk.mxu1 %vm1682_vm4, %v7366_v13  ;;  %v7449_v33 = vpop.permute.xlu1 %7448  ;;  %19941 = vmatprep.subr.msk.mxu0 %vm1682_vm4, %v7453_v53 }
0x125f   : > { %19942 = vmatpush3.xpose.msk.msra.mxu0 %vm1682_vm4, %v7453_v53  ;;  %19943 = vmatprep.mubr.msk.f32.mxu0 %vm1682_vm4, %v7449_v33 }
0x1260   : > { %19929 = vmatmul.mubr.msk.f32.vlgmr.msra.gmra.mrb[64].mxu1 %vm1682_vm4, %v7190_v17 }
0x1261   : > { %19937 = vmatpush3.xpose.msk.msra.mxu1 %vm1682_vm4, %v7366_v13  ;;  %19938 = vmatprep.mubr.msk.f32.mxu1 %vm1682_vm4, %v7362_v12  ;;  %v7451_v48 = vpop.permute.xlu0 %7450 }
0x1262   : > { %19944 = vmatmul.mubr.msk.f32.vlgmr.msra.gmra.mrb[60].mxu0 %vm1682_vm4, %v7451_v48 }
0x1264   : > { %19939 = vmatmul.mubr.msk.f32.vlgmr.msra.gmra.mrb[66].mxu1 %vm1682_vm4, %v7364_v46 }
0x132f   : > { %v19935_v25 = vpop.f32.mrb[58].mxu0 }
0x1330   : > { %v7352_v47 = vpop.f32.mrb[59].mxu0  ;;  %v7538_v17 = vmul.f32 0.17677669, %v19935_v25 }
0x1331   : > { %v7537_v51 = vmul.f32 0.17677669, %v7352_v47 }
0x1332   : > { %v7552_v55 = vsel %vm1682_vm4, %v7538_v17, -inf }
0x1333   : > { %v19930_v29 = vpop.f32.mrb[64].mxu1  ;;  %v7549_v4 = vsel %vm1682_vm4, %v7537_v51, -inf }
0x1334   : > { %v7536_v5 = vmul.f32 0.17677669, %v19930_v29  ;;  %v7265_v41 = vpop.f32.mrb[65].mxu1 }
0x1335   : > { %v7535_v19 = vmul.f32 0.17677669, %v7265_v41  ;;  %v19945_v43 = vpop.f32.mrb[60].mxu0 }
0x1336   : > { %v7526_v10 = vpop.f32.mrb[61].mxu0  ;;  %v7546_v62 = vsel %vm1682_vm4, %v7536_v5, -inf  ;;  %v7542_v8 = vmul.f32 0.17677669, %v19945_v43 }
0x1337   : > { %7547 = vmax.xlane.f32.xlu0 %v7546_v62  ;;  %v19940_v22 = vpop.f32.mrb[66].mxu1  ;;  %v7543_v20 = vsel %vm1682_vm4, %v7535_v19, -inf  ;;  %v7541_v28 = vmul.f32 0.17677669, %v7526_v10 }
0x1338   : > { %7544 = vmax.xlane.f32.xlu1 %v7543_v20  ;;  %v7439_v21 = vpop.f32.mrb[67].mxu1  ;;  %v7540_v40 = vmul.f32 0.17677669, %v19940_v22  ;;  %v7564_v54 = vsel %vm1682_vm4, %v7542_v8, -inf }
0x1339   : > { %v7539_v30 = vmul.f32 0.17677669, %v7439_v21  ;;  %v7561_v44 = vsel %vm1682_vm4, %v7541_v28, -inf }
0x133a   : > { %v7558_v52 = vsel %vm1682_vm4, %v7540_v40, -inf }
0x133b   : > { %7550 = vmax.xlane.f32.xlu0 %v7549_v4  ;;  %v7555_v31 = vsel %vm1682_vm4, %v7539_v30, -inf }
0x133c   : > { %7553 = vmax.xlane.f32.xlu1 %v7552_v55 }
0x133f   : > { %7556 = vmax.xlane.f32.xlu0 %v7555_v31 }
0x1340   : > { %7559 = vmax.xlane.f32.xlu1 %v7558_v52 }
0x1343   : > { %7562 = vmax.xlane.f32.xlu0 %v7561_v44  ;;  %v7633_v44 = vmul.f32 %v24407_v34, %v24282_v60 }
0x1344   : > { %7565 = vmax.xlane.f32.xlu1 %v7564_v54  ;;  %v7634_v54 = vmul.f32 %v24403_v45, %v24282_v60 }
0x1355   : > { %7721 = vrot.lane.b32.xlu1 %v7632_v56, %s23242_s8 }
0x1359   : > { %7636 = vrot.lane.b32.xlu0 %v7631_v38, %s23242_s8 }
0x13c4   : > { %v7548_v26 = vpop.xlane.xlu0 %7547 }
0x13c5   : > { %v7545_v6 = vpop.xlane.xlu1 %7544  ;;  %v7568_v42 = vsub.f32 %v7536_v5, %v7548_v26 }
0x13c6   : > { %v7567_v15 = vsub.f32 %v7535_v19, %v7545_v6 }
0x13c7   : > { %v7577_v50 = vmul.f32 1.442695, %v7568_v42 }
0x13c8   : > { %v7551_v14 = vpop.xlane.xlu0 %7550  ;;  %v7575_v36 = vmul.f32 1.442695, %v7567_v15 }
0x13c9   : > { %v7569_v16 = vsub.f32 %v7537_v51, %v7551_v14  ;;  %v7554_v3 = vpop.xlane.xlu1 %7553 }
0x13ca   : > { %v7570_v13 = vsub.f32 %v7538_v17, %v7554_v3 }
0x13cb   : > { %v7579_v9 = vmul.f32 1.442695, %v7569_v16 }
0x13cc   : > { %v7581_v12 = vmul.f32 1.442695, %v7570_v13  ;;  %v7557_v39 = vpop.xlane.xlu0 %7556 }
0x13cd   : > { %22118 = vpow2.f32 %v7579_v9  ;;  %v7560_v57 = vpop.xlane.xlu1 %7559  ;;  %v7571_v35 = vsub.f32 %v7539_v30, %v7557_v39 }
0x13ce   : > { %22120 = vpow2.f32 %v7581_v12  ;;  %v7572_v46 = vsub.f32 %v7540_v40, %v7560_v57 }
0x13cf   : > { %22122 = vpow2.f32 %v7575_v36  ;;  %v7583_v25 = vmul.f32 1.442695, %v7571_v35 }
0x13d0   : > { %22124 = vpow2.f32 %v7577_v50  ;;  %v7563_v32 = vpop.xlane.xlu0 %7562  ;;  %v7585_v29 = vmul.f32 1.442695, %v7572_v46 }
0x13d1   : > { %v7573_v53 = vsub.f32 %v7541_v28, %v7563_v32  ;;  %v7566_v33 = vpop.xlane.xlu1 %7565 }
0x13d2   : > { %v7574_v48 = vsub.f32 %v7542_v8, %v7566_v33 }
0x13d3   : > { %v7587_v47 = vmul.f32 1.442695, %v7573_v53 }
0x13d4   : > { %v7589_v5 = vmul.f32 1.442695, %v7574_v48  ;;  %v7637_v41 = vpop.permute.xlu0 %7636 }
0x13d5   : > { %22126 = vpow2.f32 %v7587_v47  ;;  %v7722_v19 = vpop.permute.xlu1 %7721  ;;  %19946 = vmatprep.subr.mxu1 %v7637_v41 }
0x13d6   : > { %22128 = vpow2.f32 %v7589_v5  ;;  %19947 = vmatpush3.msra.mxu1 %v7637_v41  ;;  %19951 = vmatprep.subr.mxu0 %v7722_v19  ;;  %v7992_v5 = vld [vmem:[%s26647_s22 + $0x8] sm:$0xff] }
0x13d7   : > { %v22119_v43 = vpop.eup %22118  ;;  %22130 = vpow2.f32 %v7583_v25  ;;  %19952 = vmatpush3.msra.mxu0 %v7722_v19  ;;  %v7993_v19 = vld [vmem:[%s26647_s22 + $0x10] sm:$0xff] }
0x13d8   : > { %v22121_v51 = vpop.eup %22120  ;;  %22132 = vpow2.f32 %v7585_v29  ;;  %v7597_v10 = vsel %vm1682_vm4, %v22119_v43, 0.0  ;;  %v7991_v29 = vld [vmem:[%s26647_s22] sm:$0xff] }
0x13d9   : > { %v22123_v62 = vpop.eup %22122  ;;  %7598 = vadd.xlane.f32.xlu0 %v7597_v10  ;;  %v7600_v17 = vsel %vm1682_vm4, %v22121_v51, 0.0  ;;  %v20880_v41 = vpack.c.bf16 %v7992_v5, %v7991_v29  ;;  %v8148_v10 = vld [vmem:[%s26648_s7] sm:$0xff] }
0x13da   : > { %v22125_v22 = vpop.eup %22124  ;;  %7601 = vadd.xlane.f32.xlu1 %v7600_v17  ;;  %v7591_v20 = vsel %vm1682_vm4, %v22123_v62, 0.0  ;;  %v8150_v17 = vld [vmem:[%s26648_s7 + $0x10] sm:$0xff] }
0x13db   : > { %v7594_v21 = vsel %vm1682_vm4, %v22125_v22, 0.0 }
0x13dd   : > { %7592 = vadd.xlane.f32.xlu0 %v7591_v20  ;;  %v8151_v20 = vld [vmem:[%s26648_s7 + $0x18] sm:$0xff] }
0x13de   : > { %7595 = vadd.xlane.f32.xlu1 %v7594_v21  ;;  %v20892_v21 = vpack.c.bf16 %v8151_v20, %v8150_v17 }
0x13df   : > { %v22127_v30 = vpop.eup %22126 }
0x13e0   : > { %v22129_v4 = vpop.eup %22128  ;;  %v7609_v40 = vsel %vm1682_vm4, %v22127_v30, 0.0 }
0x13e1   : > { %v22131_v55 = vpop.eup %22130  ;;  %7610 = vadd.xlane.f32.xlu0 %v7609_v40  ;;  %v7612_v28 = vsel %vm1682_vm4, %v22129_v4, 0.0 }
0x13e2   : > { %v22133_v31 = vpop.eup %22132  ;;  %7613 = vadd.xlane.f32.xlu1 %v7612_v28  ;;  %v7603_v8 = vsel %vm1682_vm4, %v22131_v55, 0.0 }
0x13e3   : > { %v7606_v52 = vsel %vm1682_vm4, %v22133_v31, 0.0 }
0x13e5   : > { %7604 = vadd.xlane.f32.xlu0 %v7603_v8 }
0x13e6   : > { %7607 = vadd.xlane.f32.xlu1 %v7606_v52 }
0x13f7   : > { %7806 = vrot.lane.b32.xlu1 %v7633_v44, %s23242_s8 }
0x13fb   : > { %7891 = vrot.lane.b32.xlu0 %v7634_v54, %s23242_s8 }
0x1466   : > { %v7599_v56 = vpop.xlane.xlu0 %7598 }
0x1467   : > { %22134 = vrcp.f32 %v7599_v56  ;;  %v7602_v38 = vpop.xlane.xlu1 %7601 }
0x1468   : > { %22136 = vrcp.f32 %v7602_v38 }
0x146a   : > { %v7593_v26 = vpop.xlane.xlu0 %7592 }
0x146b   : > { %22138 = vrcp.f32 %v7593_v26  ;;  %v7596_v6 = vpop.xlane.xlu1 %7595  ;;  %v8233_v26 = vld [vmem:[%s26649_s3 + $0x8] sm:$0xff] }
0x146c   : > { %22140 = vrcp.f32 %v7596_v6 }
0x146e   : > { %v7611_v15 = vpop.xlane.xlu0 %7610 }
0x146f   : > { %22142 = vrcp.f32 %v7611_v15  ;;  %v7614_v42 = vpop.xlane.xlu1 %7613  ;;  %v8235_v15 = vld [vmem:[%s26649_s3 + $0x18] sm:$0xff] }
0x1470   : > { %22144 = vrcp.f32 %v7614_v42 }
0x1471   : > { %v22135_v34 = vpop.eup %22134 }
0x1472   : > { %v22137_v14 = vpop.eup %22136  ;;  %v7605_v16 = vpop.xlane.xlu0 %7604  ;;  %v7625_v3 = vmul.f32 %v22135_v34, %v22119_v43  ;;  %v7994_v43 = vld [vmem:[%s26647_s22 + $0x18] sm:$0xff] }
0x1473   : > { %22146 = vrcp.f32 %v7605_v16  ;;  %v7608_v45 = vpop.xlane.xlu1 %7607  ;;  %v7626_v13 = vmul.f32 %v22137_v14, %v22121_v51  ;;  %v20884_v51 = vpack.c.bf16 %v7994_v43, %v7993_v19 }
0x1474   : > { %22148 = vrcp.f32 %v7608_v45  ;;  %19953 = vmatprep.mubr.msk.f32.mxu0 %vm1682_vm4, %v7625_v3 }
0x1475   : > { %v22139_v36 = vpop.eup %22138  ;;  %19954 = vmatmul.mubr.msk.f32.vlgmr.msra.gmra.mrb[50].mxu0 %vm1682_vm4, %v7626_v13 }
0x1476   : > { %v22141_v9 = vpop.eup %22140  ;;  %v7892_v50 = vpop.permute.xlu0 %7891  ;;  %v7623_v12 = vmul.f32 %v22139_v36, %v22123_v62  ;;  %v8149_v62 = vld [vmem:[%s26648_s7 + $0x8] sm:$0xff] }
0x1477   : > { %v7807_v39 = vpop.permute.xlu1 %7806  ;;  %19961 = vmatprep.subr.mxu0 %v7892_v50  ;;  %v7624_v57 = vmul.f32 %v22141_v9, %v22125_v22  ;;  %v20889_v22 = vpack.c.bf16 %v8149_v62, %v8148_v10 }
0x1478   : > { %19948 = vmatprep.mubr.msk.f32.mxu1 %vm1682_vm4, %v7623_v12  ;;  %19956 = vmatprep.subr.mxu1 %v7807_v39 }
0x1479   : > { %v22143_v35 = vpop.eup %22142  ;;  %19962 = vmatpush3.msra.mxu0 %v7892_v50  ;;  %19949 = vmatmul.mubr.msk.f32.vlgmr.msra.gmra.mrb[56].mxu1 %vm1682_vm4, %v7624_v57 }
0x147a   : > { %v22145_v46 = vpop.eup %22144  ;;  %19957 = vmatpush3.msra.mxu1 %v7807_v39  ;;  %v7629_v32 = vmul.f32 %v22143_v35, %v22127_v30  ;;  %20888 = vmatprep.subr.bf16.mxu0 %v26571_v0 }
0x147b   : > { %v7630_v53 = vmul.f32 %v22145_v46, %v22129_v4  ;;  %20881 = vmatprep.subr.bf16.mxu1 %v20880_v41 }
0x147c   : > { %19963 = vmatprep.mubr.msk.f32.mxu0 %vm1682_vm4, %v7629_v32 }
0x147d   : > { %v22147_v33 = vpop.eup %22146  ;;  %19964 = vmatmul.mubr.msk.f32.vlgmr.msra.gmra.mrb[52].mxu0 %vm1682_vm4, %v7630_v53 }
0x147e   : > { %v22149_v48 = vpop.eup %22148  ;;  %v7627_v25 = vmul.f32 %v22147_v33, %v22131_v55  ;;  %19994 = vmatprep.mubr.msk.f32.mxu0 %vm23238_vm0, %v26569_v1  ;;  %20890 = vmatpush3.bf16.msra.mxu0 %v20889_v22 }
0x147f   : > { %v7628_v47 = vmul.f32 %v22149_v48, %v22133_v31  ;;  %20891 = vmatprep.subr.bf16.mxu0 %v26571_v0 }
0x1480   : > { %19958 = vmatprep.mubr.msk.f32.mxu1 %vm1682_vm4, %v7627_v25 }
0x1481   : > { %19959 = vmatmul.mubr.msk.f32.vlgmr.msra.gmra.mrb[58].mxu1 %vm1682_vm4, %v7628_v47 }
0x1482   : > { %20883 = vmatpush3.bf16.msra.mxu1 %v20880_v41  ;;  %20893 = vmatpush3.bf16.msra.mxu0 %v20892_v21 }
0x1483   : > { %20885 = vmatprep.subr.bf16.mxu1 %v20884_v51 }
0x1486   : > { %20887 = vmatpush3.bf16.msra.mxu1 %v20884_v51 }
0x1487   : > { %20902 = vmatprep.subr.bf16.mxu1 %v26571_v0 }
0x1548   : > { %v19955_v30 = vpop.f32.mrb[50].mxu0 }
0x1549   : > { %v7796_v4 = vpop.f32.mrb[51].mxu0  ;;  %v7986_v54 = vadd.f32 %v19955_v30, %v24367_v11 }
0x154a   : > { %v7985_v8 = vadd.f32 %v7796_v4, %v24374_v18 }
0x154c   : > { %v19950_v40 = vpop.f32.mrb[56].mxu1 }
0x154d   : > { %v7711_v55 = vpop.f32.mrb[57].mxu1  ;;  %v7984_v31 = vadd.f32 %v19950_v40, %v24359_v27  ;;  %v18638_v40 = vld [vmem:[#allocation16] ss:$0 sm:$0xff] }
0x154e   : > { %v7983_v28 = vadd.f32 %v7711_v55, %v24362_v37  ;;  %v18636_v55 = vld [vmem:[#allocation15] ss:$0 sm:$0xff] }
0x1550   : > { %v19965_v52 = vpop.f32.mrb[52].mxu0  ;;  %19974 = vmatprep.mubr.msk.f32.mxu1 %vm1466_vm3, %v7983_v28 }
0x1551   : > { %v7966_v44 = vpop.f32.mrb[53].mxu0  ;;  %19975 = vmatmul.mubr.msk.f32.vlgmr.msra.gmra.mrb[68].mxu1 %vm1466_vm3, %v7984_v31  ;;  %v7990_v11 = vadd.f32 %v19965_v52, %v24419_v2  ;;  %v18627_v2 = vld [vmem:[#allocation13] ss:$0 sm:$0xff] }
0x1552   : > { %19977 = vmatprep.mubr.msk.f32.mxu1 %vm1466_vm3, %v7985_v8  ;;  %v7989_v18 = vadd.f32 %v7966_v44, %v24412_v58  ;;  %v8234_v58 = vld [vmem:[%s26649_s3 + $0x10] sm:$0xff] }
0x1553   : > { %v20898_v42 = vpack.c.bf16 %v8235_v15, %v8234_v58 }
0x1554   : > { %v19960_v56 = vpop.f32.mrb[58].mxu1 }
0x1555   : > { %v7881_v38 = vpop.f32.mrb[59].mxu1  ;;  %19978 = vmatmul.mubr.msk.f32.gmra.mrb[70].mxu1 %vm1466_vm3, %v7986_v54  ;;  %v7988_v37 = vadd.f32 %v19960_v56, %v24434_v63  ;;  %v8147_v63 = vld [vmem:[#allocation36] sm:$0xff] }
0x1556   : > { %v7987_v27 = vadd.f32 %v7881_v38, %v24379_v24  ;;  %v8232_v24 = vld [vmem:[%s26649_s3] sm:$0xff]  ;;  %19995 = vmatmul.mubr.msk.f32.vlgmr.msra.gmra.mrb[62].mxu0 %vm1466_vm3, %v8147_v63 }
0x1557   : > { %v20894_v6 = vpack.c.bf16 %v8233_v26, %v8232_v24 }
0x1558   : > { %19980 = vmatprep.mubr.msk.f32.mxu1 %vm1466_vm3, %v7987_v27 }
0x1559   : > { %19981 = vmatmul.mubr.msk.f32.gmra.mrb[72].mxu1 %vm1466_vm3, %v7988_v37  ;;  %20895 = vmatprep.subr.bf16.mxu0 %v20894_v6 }
0x155a   : > { %19983 = vmatprep.mubr.msk.f32.mxu1 %vm1466_vm3, %v7989_v18  ;;  %20897 = vmatpush3.bf16.msra.mxu0 %v20894_v6 }
0x155b   : > { %20899 = vmatprep.subr.bf16.mxu0 %v20898_v42 }
0x155d   : > { %19984 = vmatmul.mubr.msk.f32.gmra.mrb[74].mxu1 %vm1466_vm3, %v7990_v11 }
0x155e   : > { %20021 = vmatprep.mubr.msk.f32.mxu1 %vm23238_vm0, %v26569_v1  ;;  %20901 = vmatpush3.bf16.msra.mxu0 %v20898_v42 }
0x155f   : > { %20910 = vmatprep.subr.bf16.mxu0 %v26571_v0 }
0x1624   : > { %v19976_v34 = vpop.f32.mrb[68].mxu1 }
0x1625   : > { %v8098_v14 = vadd.f32 %v19976_v34, %v18627_v2  ;;  %v8092_v16 = vpop.f32.mrb[69].mxu1 }
0x1626   : > { %v8093_v3 = vadd.f32 %v18627_v2, %v8092_v16 }
0x1627   : > { %v8132_v45 = vmax.f32 %v8098_v14, 0.0 }
0x1628   : > { %v8131_v13 = vmax.f32 %v8093_v3, 0.0  ;;  %v19979_v36 = vpop.f32.mrb[70].mxu1 }
0x1629   : > { %v8108_v9 = vadd.f32 %v19979_v36, %v18627_v2  ;;  %v8102_v50 = vpop.f32.mrb[71].mxu1  ;;  %v24899_v57 = vadd.f32 %v8132_v45, %v7984_v31  ;;  %v8228_v30 = vpop.f32.mrb[62].mxu0 }
0x162a   : > { %v24897_v12 = vadd.f32 %v8131_v13, %v7983_v28  ;;  %v8103_v39 = vadd.f32 %v18627_v2, %v8102_v50  ;;  %v19996_v4 = vpop.f32.mrb[63].mxu0  ;;  %v24931_v52 = vadd.f32 %v18636_v55, %v8228_v30 }
0x162b   : > { %v8134_v35 = vmax.f32 %v8108_v9, 0.0 }
0x162c   : > { %v8133_v46 = vmax.f32 %v8103_v39, 0.0  ;;  %v19982_v32 = vpop.f32.mrb[72].mxu1  ;;  %20005 = vmatprep.mubr.msk.f32.mxu0 %vm1466_vm3, %v24897_v12 }
0x162d   : > { %v8118_v53 = vadd.f32 %v19982_v32, %v18627_v2  ;;  %v8112_v33 = vpop.f32.mrb[73].mxu1  ;;  %20006 = vmatmul.mubr.msk.f32.vlgmr.msra.gmra.mrb[64].mxu0 %vm1466_vm3, %v24899_v57  ;;  %v24907_v47 = vadd.f32 %v8134_v35, %v7986_v54 }
0x162e   : > { %v24905_v48 = vadd.f32 %v8133_v46, %v7985_v8  ;;  %v8113_v25 = vadd.f32 %v18627_v2, %v8112_v33 }
0x162f   : > { %v8136_v29 = vmax.f32 %v8118_v53, 0.0 }
0x1630   : > { %v8135_v5 = vmax.f32 %v8113_v25, 0.0  ;;  %v19985_v41 = vpop.f32.mrb[74].mxu1  ;;  %20008 = vmatprep.mubr.msk.f32.mxu0 %vm1466_vm3, %v24905_v48 }
0x1631   : > { %v8128_v19 = vadd.f32 %v19985_v41, %v18627_v2  ;;  %v8122_v43 = vpop.f32.mrb[75].mxu1  ;;  %20009 = vmatmul.mubr.msk.f32.gmra.mrb[66].mxu0 %vm1466_vm3, %v24907_v47  ;;  %v24915_v62 = vadd.f32 %v8136_v29, %v7988_v37 }
0x1632   : > { %v24913_v51 = vadd.f32 %v8135_v5, %v7987_v27  ;;  %v8123_v10 = vadd.f32 %v18627_v2, %v8122_v43 }
0x1633   : > { %v8138_v17 = vmax.f32 %v8128_v19, 0.0 }
0x1634   : > { %v8137_v22 = vmax.f32 %v8123_v10, 0.0  ;;  %20011 = vmatprep.mubr.msk.f32.mxu0 %vm1466_vm3, %v24913_v51 }
0x1635   : > { %20012 = vmatmul.mubr.msk.f32.gmra.mrb[68].mxu0 %vm1466_vm3, %v24915_v62  ;;  %v24923_v21 = vadd.f32 %v8138_v17, %v7990_v11 }
0x1636   : > { %v24921_v20 = vadd.f32 %v8137_v22, %v7989_v18 }
0x1637   : > { %26650 = vst [vmem:[#allocation83_spill] sm:$0xff] %v24923_v21 }
0x1638   : > { %20014 = vmatprep.mubr.msk.f32.mxu0 %vm1466_vm3, %v24921_v20 }
0x1639   : > { %20015 = vmatmul.mubr.msk.f32.gmra.mrb[70].mxu0 %vm1466_vm3, %v24923_v21 }
0x163a   : > { %20035 = vmatprep.mubr.msk.f32.mxu0 %vm23238_vm0, %v26569_v1 }
0x1700   : > { %v20007_v28 = vpop.f32.mrb[64].mxu0 }
0x1701   : > { %v8339_v31 = vadd.f32 %v20007_v28, %v18638_v40  ;;  %v8333_v8 = vpop.f32.mrb[65].mxu0 }
0x1702   : > { %v8334_v44 = vadd.f32 %v18638_v40, %v8333_v8 }
0x1703   : > { %v24934_v54 = vmul.f32 %v8339_v31, %v24008_v61  ;;  %v24937_v56 = vmul.f32 %v8339_v31, %v24022_v7  ;;  %v24940_v38 = vmul.f32 %v8339_v31, %v24182_v59  ;;  %v24943_v27 = vmul.f32 %v8339_v31, %v24282_v60 }
0x1704   : > { %v20010_v37 = vpop.f32.mrb[66].mxu0  ;;  %v24945_v18 = vpack.i.bf16 %v8339_v31, %v8334_v44  ;;  %v20903_v11 = vpack.c.bf16 %v8339_v31, %v8334_v44  ;;  %v24948_v24 = vmul.f32 %v8334_v44, %v24008_v61  ;;  %v24951_v26 = vmul.f32 %v8334_v44, %v24022_v7 }
0x1705   : > { %v24953_v6 = vadd.f32 %v20010_v37, %v18638_v40  ;;  %v8343_v63 = vpop.f32.mrb[67].mxu0  ;;  %v24956_v58 = vmul.f32 %v8334_v44, %v24182_v59  ;;  %v25008_v25 = vmul.f32 %v8334_v44, %v24282_v60 }
0x1706   : > { %v24958_v15 = vadd.f32 %v18638_v40, %v8343_v63  ;;  %21679 = vrot.lane.b32.xlu1 %v24945_v18, %s23240_s14  ;;  %20905 = vmatpush3.bf16.xpose.msk.msra.mxu1 %vm23862_vm5, %v20903_v11 }
0x1707   : > { %20906 = vmatprep.subr.bf16.mxu1 %v26571_v0  ;;  %v24971_v34 = vmul.f32 %v24953_v6, %v24022_v7  ;;  %v24975_v14 = vmul.f32 %v24953_v6, %v24008_v61  ;;  %v24979_v16 = vmul.f32 %v24953_v6, %v24182_v59 }
0x1708   : > { %v20013_v45 = vpop.f32.mrb[68].mxu0  ;;  %v24985_v13 = vpack.i.bf16 %v24953_v6, %v24958_v15  ;;  %v20907_v36 = vpack.c.bf16 %v24953_v6, %v24958_v15  ;;  %v24991_v9 = vmul.f32 %v24958_v15, %v24022_v7  ;;  %v24995_v50 = vmul.f32 %v24958_v15, %v24008_v61 }
0x1709   : > { %v8359_v39 = vadd.f32 %v20013_v45, %v18638_v40  ;;  %v8353_v35 = vpop.f32.mrb[69].mxu0  ;;  %v24999_v46 = vmul.f32 %v24958_v15, %v24182_v59  ;;  %v25096_v33 = vmul.f32 %v24958_v15, %v24282_v60 }
0x170a   : > { %v8354_v32 = vadd.f32 %v18638_v40, %v8353_v35  ;;  %21684 = vrot.lane.b32.xlu0 %v24985_v13, %s23240_s14 }
0x170b   : > { %v25011_v29 = vmul.f32 %v8359_v39, %v24008_v61  ;;  %v25014_v5 = vmul.f32 %v8359_v39, %v24022_v7  ;;  %v25019_v19 = vmul.f32 %v8359_v39, %v24182_v59 }
0x170c   : > { %v20016_v43 = vpop.f32.mrb[70].mxu0  ;;  %v20911_v10 = vpack.c.bf16 %v8359_v39, %v8354_v32  ;;  %v25021_v17 = vpack.i.bf16 %v8359_v39, %v8354_v32  ;;  %v25024_v22 = vmul.f32 %v8354_v32, %v24008_v61  ;;  %v25029_v55 = vmul.f32 %v8354_v32, %v24022_v7 }
0x170d   : > { %v8369_v30 = vadd.f32 %v20016_v43, %v18638_v40  ;;  %v8363_v4 = vpop.f32.mrb[71].mxu0  ;;  %20022 = vmatmul.mubr.msk.f32.vlgmr.msra.gmra.mrb[76].mxu1 %vm1682_vm4, %v24931_v52  ;;  %v25032_v28 = vmul.f32 %v8354_v32, %v24182_v59  ;;  %v25081_v3 = vmul.f32 %v8354_v32, %v24282_v60  ;;  %v25084_v43 = vmul.f32 %v8359_v39, %v24282_v60 }
0x170e   : > { %v8364_v31 = vadd.f32 %v18638_v40, %v8363_v4  ;;  %20913 = vmatpush3.bf16.xpose.msk.msra.mxu0 %vm23862_vm5, %v20911_v10  ;;  %21689 = vrot.lane.b32.xlu1 %v25021_v17, %s23240_s14  ;;  %v25100_v32 = vmul.f32 %v24953_v6, %v24282_v60 }
0x170f   : > { %20909 = vmatpush3.bf16.xpose.msk.msra.mxu1 %vm23862_vm5, %v20907_v36  ;;  %20028 = vmatprep.mubr.msk.f32.mxu1 %vm23238_vm0, %v26569_v1  ;;  %v25047_v40 = vmul.f32 %v8369_v30, %v24008_v61  ;;  %v25050_v37 = vmul.f32 %v8369_v30, %v24022_v7  ;;  %v25076_v49 = vmul.f32 %v8369_v30, %v24182_v59 }
0x1710   : > { %v25054_v63 = vpack.i.bf16 %v8369_v30, %v8364_v31  ;;  %20914 = vmatprep.subr.bf16.mxu1 %v26571_v0  ;;  %v20915_v45 = vpack.c.bf16 %v8369_v30, %v8364_v31  ;;  %20918 = vmatprep.subr.bf16.mxu0 %v26571_v0  ;;  %v25059_v36 = vmul.f32 %v8364_v31, %v24008_v61 }
0x1711   : > { %v25062_v35 = vmul.f32 %v8364_v31, %v24022_v7  ;;  %v25067_v10 = vmul.f32 %v8364_v31, %v24182_v59  ;;  %v25087_v41 = vmul.f32 %v8364_v31, %v24282_v60  ;;  %v25092_v2 = vmul.f32 %v8369_v30, %v24282_v60 }
0x1712   : > { %8735 = vrot.lane.b32.xlu1 %v24931_v52, %s23240_s14  ;;  %21694 = vrot.lane.b32.xlu0 %v25054_v63, %s23240_s14 }
0x1715   : > { %20036 = vmatmul.mubr.msk.f32.vlgmr.msra.gmra.mrb[72].mxu0 %vm1682_vm4, %v24931_v52 }
0x1716   : > { %20029 = vmatmul.mubr.msk.f32.vlgmr.msra.gmra.mrb[78].mxu1 %vm1682_vm4, %v24931_v52  ;;  %20049 = vmatprep.mubr.msk.f32.mxu0 %vm23238_vm0, %v26569_v1 }
0x1717   : > { %20917 = vmatpush3.bf16.xpose.msk.msra.mxu1 %vm23862_vm5, %v20915_v45  ;;  %20042 = vmatprep.mubr.msk.f32.mxu1 %vm23238_vm0, %v26569_v1 }
0x1718   : > { %20922 = vmatprep.subr.bf16.mxu1 %v26571_v0 }
0x171e   : > { %20043 = vmatmul.mubr.msk.f32.vlgmr.msra.gmra.mrb[80].mxu1 %vm1682_vm4, %v24931_v52 }
0x171f   : > { %20056 = vmatprep.mubr.msk.f32.mxu1 %vm23238_vm0, %v26569_v1 }
0x1778   : > { %v21680_v6 = vpop.permute.xlu1 %21679 }
0x1779   : > { %v21682_v31 = vunpack.i.h.bf16 %v21680_v6  ;;  %v21681_v15 = vunpack.i.l.bf16 %v21680_v6 }
0x177b   : > { %v20919_v39 = vpack.c.bf16 %v21682_v31, %v21681_v15 }
0x177c   : > { %v21685_v11 = vpop.permute.xlu0 %21684 }
0x177d   : > { %v21687_v30 = vunpack.i.h.bf16 %v21685_v11  ;;  %v21686_v44 = vunpack.i.l.bf16 %v21685_v11  ;;  %20921 = vmatpush3.bf16.xpose.msk.msra.mxu0 %vm23862_vm5, %v20919_v39  ;;  %v26651_v11 = vmov 0.0  }
0x177e   : > { %20926 = vmatprep.subr.bf16.mxu0 %v26571_v0 }
0x177f   : > { %v20923_v45 = vpack.c.bf16 %v21687_v30, %v21686_v44 }
0x1780   : > { %v21690_v53 = vpop.permute.xlu1 %21689 }
0x1781   : > { %v21692_v4 = vunpack.i.h.bf16 %v21690_v53  ;;  %v21691_v8 = vunpack.i.l.bf16 %v21690_v53  ;;  %20925 = vmatpush3.bf16.xpose.msk.msra.mxu1 %vm23862_vm5, %v20923_v45 }
0x1782   : > { %20930 = vmatprep.subr.bf16.mxu1 %v26571_v0 }
0x1783   : > { %v20927_v42 = vpack.c.bf16 %v21692_v4, %v21691_v8 }
0x1784   : > { %v8736_v6 = vpop.permute.xlu1 %8735  ;;  %v21695_v15 = vpop.permute.xlu0 %21694 }
0x1785   : > { %v21697_v31 = vunpack.i.h.bf16 %v21695_v15  ;;  %v21696_v1 = vunpack.i.l.bf16 %v21695_v15  ;;  %20050 = vmatmul.mubr.msk.f32.vlgmr.msra.gmra.mrb[74].mxu0 %vm1682_vm4, %v8736_v6 }
0x1786   : > { %20929 = vmatpush3.bf16.xpose.msk.msra.mxu0 %vm23862_vm5, %v20927_v42  ;;  %20063 = vmatprep.mubr.msk.f32.mxu0 %vm23238_vm0, %v26651_v11 }
0x1787   : > { %v20931_v44 = vpack.c.bf16 %v21697_v31, %v21696_v1  ;;  %20934 = vmatprep.subr.bf16.mxu0 %v26571_v0 }
0x1788   : > { %20057 = vmatmul.mubr.msk.f32.vlgmr.msra.gmra.mrb[82].mxu1 %vm1682_vm4, %v8736_v6 }
0x1789   : > { %20933 = vmatpush3.bf16.xpose.msk.msra.mxu1 %vm23862_vm5, %v20931_v44  ;;  %20070 = vmatprep.mubr.msk.f32.mxu1 %vm23238_vm0, %v26651_v11 }
0x178a   : > { %20940 = vmatprep.subr.bf16.mxu1 %v26571_v0 }
0x178d   : > { %20064 = vmatmul.mubr.msk.f32.vlgmr.msra.gmra.mrb[76].mxu0 %vm1682_vm4, %v8736_v6 }
0x178e   : > { %20077 = vmatprep.mubr.msk.f32.mxu0 %vm23238_vm0, %v26651_v11 }
0x1790   : > { %20071 = vmatmul.mubr.msk.f32.vlgmr.msra.gmra.mrb[84].mxu1 %vm1682_vm4, %v8736_v6 }
0x1791   : > { %20091 = vmatprep.mubr.msk.f32.mxu1 %vm23238_vm0, %v26651_v11 }
0x17e0   : > { %v8447_v1 = vpop.f32.mrb[76].mxu1 }
0x17e1   : > { %v20023_v42 = vpop.f32.mrb[77].mxu1  ;;  %v8679_v7 = vmul.f32 0.17677669, %v8447_v1 }
0x17e8   : > { %v8599_v53 = vpop.f32.mrb[72].mxu0 }
0x17e9   : > { %v8523_v8 = vpop.f32.mrb[78].mxu1  ;;  %v20037_v4 = vpop.f32.mrb[73].mxu0  ;;  %v8681_v21 = vmul.f32 0.17677669, %v8599_v53 }
0x17ea   : > { %v20030_v39 = vpop.f32.mrb[79].mxu1 }
0x17eb   : > { %v8689_v1 = vsel %vm1994_vm6, %v8681_v21, -inf }
0x17f1   : > { %v8675_v30 = vpop.f32.mrb[80].mxu1 }
0x17f2   : > { %v20044_v45 = vpop.f32.mrb[81].mxu1 }
0x17f3   : > { %v8683_v45 = vsel %vm1994_vm6, %v8679_v7, -inf }
0x1858   : > { %v8813_v15 = vpop.f32.mrb[74].mxu0 }
0x1859   : > { %v9051_v31 = vmul.f32 0.17677669, %v8813_v15  ;;  %v20051_v44 = vpop.f32.mrb[75].mxu0 }
0x185b   : > { %v8891_v0 = vpop.f32.mrb[82].mxu1  ;;  %v9055_v60 = vsel %vm1994_vm6, %v9051_v31, -inf }
0x185c   : > { %v25148_v59 = vmul.f32 0.17677669, %v8891_v0  ;;  %9056 = vmax.xlane.f32.xlu0 %v9055_v60  ;;  %v20058_v6 = vpop.f32.mrb[83].mxu1 }
0x185e   : > { %v9058_v42 = vsel %vm1994_vm6, %v25148_v59, -inf }
0x185f   : > { %9059 = vmax.xlane.f32.xlu1 %v9058_v42  ;;  %v8680_v42 = vmul.f32 0.17677669, %v8523_v8  ;;  %v26654_v8 = vpack.i.bf16 %v25047_v40, %v25059_v36 }
0x1860   : > { %v8969_v61 = vpop.f32.mrb[76].mxu0 }
0x1861   : > { %v9053_v4 = vmul.f32 0.17677669, %v8969_v61  ;;  %v20065_v39 = vpop.f32.mrb[77].mxu0  ;;  %v8682_v61 = vmul.f32 0.17677669, %v8675_v30  ;;  %v8686_v53 = vsel %vm1994_vm6, %v8680_v42, -inf  ;;  %v26655_v30 = vpack.i.bf16 %v24971_v34, %v24991_v9 }
0x1863   : > { %v9061_v15 = vsel %vm1994_vm6, %v9053_v4, -inf  ;;  %8684 = vmax.xlane.f32.xlu1 %v8683_v45  ;;  %v9047_v44 = vpop.f32.mrb[84].mxu1  ;;  %v8692_v39 = vsel %vm1994_vm6, %v8682_v61, -inf  ;;  %v26652_v45 = vpack.i.bf16 %v24934_v54, %v24948_v24  ;;  %v26656_v54 = vpack.i.bf16 %v24975_v14, %v24995_v50 }
0x1864   : > { %9062 = vmax.xlane.f32.xlu0 %v9061_v15  ;;  %v25154_v0 = vmul.f32 0.17677669, %v9047_v44  ;;  %v20072_v60 = vpop.f32.mrb[85].mxu1  ;;  %v26653_v15 = vpack.i.bf16 %v25011_v29, %v25024_v22  ;;  %v26657_v24 = vpack.i.bf16 %v24937_v56, %v24951_v26 }
0x1866   : > { %v9064_v6 = vsel %vm1994_vm6, %v25154_v0, -inf }
0x1867   : > { %8690 = vmax.xlane.f32.xlu1 %v8689_v1 }
0x1868   : > { %9065 = vmax.xlane.f32.xlu0 %v9064_v6 }
0x186c   : > { %8687 = vmax.xlane.f32.xlu0 %v8686_v53 }
0x1870   : > { %8693 = vmax.xlane.f32.xlu0 %v8692_v39 }
0x1878   : > { %21699 = vrot.lane.b32.xlu1 %v26652_v45, %s23242_s8 }
0x187c   : > { %21709 = vrot.lane.b32.xlu1 %v26653_v15, %s23242_s8 }
0x1880   : > { %21714 = vrot.lane.b32.xlu1 %v26654_v8, %s23242_s8 }
0x1884   : > { %21724 = vrot.lane.b32.xlu1 %v26655_v30, %s23242_s8 }
0x1886   : > { %21704 = vrot.lane.b32.xlu0 %v26656_v54, %s23242_s8 }
0x188a   : > { %21719 = vrot.lane.b32.xlu0 %v26657_v24, %s23242_s8 }
0x18e9   : > { %v9057_v22 = vpop.xlane.xlu0 %9056 }
0x18ea   : > { %v9067_v60 = vsub.f32 %v9051_v31, %v9057_v22 }
0x18ec   : > { %v9060_v29 = vpop.xlane.xlu1 %9059  ;;  %v9071_v53 = vmul.f32 1.442695, %v9067_v60 }
0x18f0   : > { %v8685_v44 = vpop.xlane.xlu1 %8684 }
0x18f1   : > { %v9063_v40 = vpop.xlane.xlu0 %9062  ;;  %v8695_v36 = vsub.f32 %v8679_v7, %v8685_v44  ;;  %v9068_v7 = vsub.f32 %v25148_v59, %v9060_v29  ;;  %v26658_v44 = vmov 0.0|0.0  }
0x18f2   : > { %v9069_v39 = vsub.f32 %v9053_v4, %v9063_v40 }
0x18f3   : > { %v8699_v1 = vmul.f32 1.442695, %v8695_v36 }
0x18f4   : > { %v8691_v6 = vpop.xlane.xlu1 %8690  ;;  %v9075_v8 = vmul.f32 1.442695, %v9069_v39 }
0x18f5   : > { %22150 = vpow2.f32 %v8699_v1  ;;  %v8697_v34 = vsub.f32 %v8681_v21, %v8691_v6  ;;  %v9066_v9 = vpop.xlane.xlu0 %9065 }
0x18f6   : > { %v9070_v60 = vsub.f32 %v25154_v0, %v9066_v9 }
0x18f7   : > { %v8703_v14 = vmul.f32 1.442695, %v8697_v34 }
0x18f8   : > { %v21700_v50 = vpop.permute.xlu1 %21699 }
0x18f9   : > { %22152 = vpow2.f32 %v8703_v14  ;;  %v21702_v45 = vunpack.i.h.bf16 %v21700_v50  ;;  %v21701_v15 = vunpack.i.l.bf16 %v21700_v50  ;;  %v8688_v56 = vpop.xlane.xlu0 %8687 }
0x18fa   : > { %v8696_v26 = vsub.f32 %v8680_v42, %v8688_v56  ;;  %22154 = vpow2.f32 %v9071_v53  ;;  %v9073_v42 = vmul.f32 1.442695, %v9068_v7  ;;  %v26660_v7 = vpack.i.bf16 %v25014_v5, %v25029_v55 }
0x18fb   : > { %v20935_v30 = vpack.c.bf16 %v21702_v45, %v21701_v15 }
0x18fc   : > { %v8701_v31 = vmul.f32 1.442695, %v8696_v26  ;;  %v21710_v54 = vpop.permute.xlu1 %21709 }
0x18fd   : > { %v21712_v24 = vunpack.i.h.bf16 %v21710_v54  ;;  %v21711_v22 = vunpack.i.l.bf16 %v21710_v54  ;;  %v8694_v21 = vpop.xlane.xlu0 %8693  ;;  %20936 = vmatpush3.bf16.msra.mxu0 %v20935_v30  ;;  %v26659_v30 = vpack.i.bf16 %v25050_v37, %v25062_v35 }
0x18fe   : > { %22156 = vpow2.f32 %v8701_v31  ;;  %v8698_v4 = vsub.f32 %v8682_v61, %v8694_v21  ;;  %20937 = vmatprep.subr.bf16.mxu0 %v26658_v44  ;;  %v9077_v61 = vmul.f32 1.442695, %v9070_v60 }
0x18ff   : > { %v25187_v40 = vpop.eup %22150  ;;  %22158 = vpow2.f32 %v9075_v8  ;;  %v20941_v36 = vpack.c.bf16 %v21712_v24, %v21711_v22 }
0x1900   : > { %v8705_v1 = vmul.f32 1.442695, %v8698_v4  ;;  %v8707_v59 = vsel %vm1994_vm6, %v25187_v40, 0.0  ;;  %v21715_v37 = vpop.permute.xlu1 %21714 }
0x1901   : > { %8708 = vadd.xlane.f32.xlu1 %v8707_v59  ;;  %20942 = vmatpush3.bf16.msra.mxu1 %v20941_v36  ;;  %v21705_v31 = vpop.permute.xlu0 %21704 }
0x1902   : > { %22160 = vpow2.f32 %v8705_v1  ;;  %20946 = vmatprep.subr.bf16.mxu1 %v26658_v44  ;;  %v21707_v36 = vunpack.i.h.bf16 %v21705_v31 }
0x1903   : > { %v25193_v29 = vpop.eup %22152  ;;  %22162 = vpow2.f32 %v9073_v42  ;;  %v21706_v42 = vunpack.i.l.bf16 %v21705_v31 }
0x1904   : > { %v8713_v6 = vsel %vm1994_vm6, %v25193_v29, 0.0  ;;  %v22155_v34 = vpop.eup %22154  ;;  %22164 = vpow2.f32 %v9077_v61  ;;  %v21725_v35 = vpop.permute.xlu1 %21724 }
0x1905   : > { %8714 = vadd.xlane.f32.xlu1 %v8713_v6  ;;  %v9079_v0 = vsel %vm1994_vm6, %v22155_v34, 0.0  ;;  %v21720_v22 = vpop.permute.xlu0 %21719  ;;  %v20938_v61 = vpack.c.bf16 %v21707_v36, %v21706_v42  ;;  %v21726_v36 = vunpack.i.l.bf16 %v21725_v35 }
0x1906   : > { %v21722_v6 = vunpack.i.h.bf16 %v21720_v22 }
0x1908   : > { %v25197_v53 = vpop.eup %22156 }
0x1909   : > { %v22159_v9 = vpop.eup %22158  ;;  %9080 = vadd.xlane.f32.xlu1 %v9079_v0  ;;  %v8710_v39 = vsel %vm1994_vm6, %v25197_v53, 0.0  ;;  %v21721_v0 = vunpack.i.l.bf16 %v21720_v22 }
0x190a   : > { %8711 = vadd.xlane.f32.xlu0 %v8710_v39  ;;  %v9085_v50 = vsel %vm1994_vm6, %v22159_v9, 0.0 }
0x190c   : > { %v25202_v14 = vpop.eup %22160 }
0x190d   : > { %9086 = vadd.xlane.f32.xlu1 %v9085_v50  ;;  %v8716_v45 = vsel %vm1994_vm6, %v25202_v14, 0.0  ;;  %v25207_v15 = vpop.eup %22162 }
0x190e   : > { %8717 = vadd.xlane.f32.xlu0 %v8716_v45  ;;  %v9082_v56 = vsel %vm1994_vm6, %v25207_v15, 0.0  ;;  %v25211_v26 = vpop.eup %22164 }
0x190f   : > { %v9088_v8 = vsel %vm1994_vm6, %v25211_v26, 0.0 }
0x1912   : > { %9083 = vadd.xlane.f32.xlu0 %v9082_v56 }
0x1916   : > { %9089 = vadd.xlane.f32.xlu0 %v9088_v8  ;;  %v20947_v8 = vpack.c.bf16 %v21722_v6, %v21721_v0 }
0x191e   : > { %21734 = vrot.lane.b32.xlu1 %v26659_v30, %s23242_s8 }
0x1922   : > { %21744 = vrot.lane.b32.xlu1 %v24985_v13, %s26584_s0 }
0x1926   : > { %21749 = vrot.lane.b32.xlu1 %v25021_v17, %s26584_s0 }
0x192c   : > { %21729 = vrot.lane.b32.xlu0 %v26660_v7, %s23242_s8  ;;  %v21716_v7 = vunpack.i.l.bf16 %v21715_v37 }
0x1930   : > { %21739 = vrot.lane.b32.xlu0 %v24945_v18, %s26584_s0 }
0x1934   : > { %9755 = vrot.lane.b32.xlu0 %v24931_v52, %s26584_s0 }
0x1938   : > { %21754 = vrot.lane.b32.xlu0 %v25054_v63, %s26584_s0 }
0x198e   : > { %v8709_v54 = vpop.xlane.xlu1 %8708 }
0x1992   : > { %v8715_v24 = vpop.xlane.xlu1 %8714 }
0x1996   : > { %v9081_v21 = vpop.xlane.xlu1 %9080 }
0x1997   : > { %22166 = vrcp.f32 %v9081_v21  ;;  %v8712_v4 = vpop.xlane.xlu0 %8711 }
0x199a   : > { %v9087_v5 = vpop.xlane.xlu1 %9086 }
0x199b   : > { %22168 = vrcp.f32 %v9087_v5  ;;  %v8718_v55 = vpop.xlane.xlu0 %8717  ;;  %v21727_v5 = vunpack.i.h.bf16 %v21725_v35 }
0x199c   : > { %22170 = vrcp.f32 %v8709_v54 }
0x199f   : > { %v9084_v60 = vpop.xlane.xlu0 %9083 }
0x19a0   : > { %22172 = vrcp.f32 %v9084_v60 }
0x19a1   : > { %v22167_v1 = vpop.eup %22166  ;;  %22174 = vrcp.f32 %v8715_v24  ;;  %v21735_v24 = vpop.permute.xlu1 %21734 }
0x19a2   : > { %v9095_v59 = vmul.f32 %v22167_v1, %v22155_v34  ;;  %v21717_v34 = vunpack.i.h.bf16 %v21715_v37  ;;  %v21736_v6 = vunpack.i.l.bf16 %v21735_v24 }
0x19a3   : > { %v9090_v39 = vpop.xlane.xlu0 %9089 }
0x19a4   : > { %22176 = vrcp.f32 %v9090_v39  ;;  %20078 = vmatmul.mubr.msk.f32.vlgmr.msra.gmra.mrb[78].mxu0 %vm1994_vm6, %v9095_v59  ;;  %v20944_v42 = vpack.c.bf16 %v21717_v34, %v21716_v7 }
0x19a5   : > { %v22169_v50 = vpop.eup %22168  ;;  %20939 = vmatpush3.bf16.msra.mxu0 %v20938_v61  ;;  %20084 = vmatprep.mubr.msk.f32.mxu0 %vm23238_vm0, %v26651_v11  ;;  %22178 = vrcp.f32 %v8712_v4  ;;  %v21745_v59 = vpop.permute.xlu1 %21744  ;;  %v21737_v61 = vunpack.i.h.bf16 %v21735_v24 }
0x19a6   : > { %v9097_v45 = vmul.f32 %v22169_v50, %v22159_v9  ;;  %20943 = vmatprep.subr.bf16.mxu0 %v26658_v44  ;;  %v22171_v56 = vpop.eup %22170  ;;  %22180 = vrcp.f32 %v8718_v55  ;;  %v21747_v7 = vunpack.i.h.bf16 %v21745_v59 }
0x19a7   : > { %v21730_v30 = vpop.permute.xlu0 %21729  ;;  %v8723_v9 = vmul.f32 %v22171_v56, %v25187_v40  ;;  %v20950_v40 = vpack.c.bf16 %v21727_v5, %v21726_v36  ;;  %v20956_v50 = vpack.c.bf16 %v21737_v61, %v21736_v6 }
0x19a8   : > { %v21732_v31 = vunpack.i.h.bf16 %v21730_v30  ;;  %v21731_v54 = vunpack.i.l.bf16 %v21730_v30  ;;  %20092 = vmatmul.mubr.msk.f32.vlgmr.msra.gmra.mrb[86].mxu1 %vm1994_vm6, %v9097_v45 }
0x19a9   : > { %20948 = vmatpush3.bf16.msra.mxu1 %v20947_v8  ;;  %20105 = vmatprep.mubr.msk.f32.mxu1 %vm23238_vm0, %v26651_v11  ;;  %v21750_v56 = vpop.permute.xlu1 %21749 }
0x19aa   : > { %v22173_v22 = vpop.eup %22172  ;;  %v20953_v21 = vpack.c.bf16 %v21732_v31, %v21731_v54  ;;  %20952 = vmatprep.subr.bf16.mxu1 %v26658_v44  ;;  %v21752_v30 = vunpack.i.h.bf16 %v21750_v56  ;;  %v21751_v34 = vunpack.i.l.bf16 %v21750_v56  ;;  %v21746_v31 = vunpack.i.l.bf16 %v21745_v59 }
0x19ab   : > { %v22175_v4 = vpop.eup %22174  ;;  %v9096_v37 = vmul.f32 %v22173_v22, %v25207_v15  ;;  %v21740_v60 = vpop.permute.xlu0 %21739 }
0x19ac   : > { %20106 = vmatmul.mubr.msk.f32.vlgmr.msra.gmra.mrb[88].mxu1 %vm1994_vm6, %v8723_v9  ;;  %v8725_v55 = vmul.f32 %v22175_v4, %v25193_v29  ;;  %v21742_v0 = vunpack.i.h.bf16 %v21740_v60  ;;  %v21741_v39 = vunpack.i.l.bf16 %v21740_v60  ;;  %v20967_v54 = vpack.c.bf16 %v21752_v30, %v21751_v34 }
0x19ad   : > { %20085 = vmatmul.mubr.msk.f32.vlgmr.msra.gmra.mrb[80].mxu0 %vm1994_vm6, %v9096_v37  ;;  %20954 = vmatpush3.bf16.msra.mxu1 %v20953_v21  ;;  %v20963_v24 = vpack.c.bf16 %v21747_v7, %v21746_v31 }
0x19ae   : > { %v22177_v1 = vpop.eup %22176  ;;  %20945 = vmatpush3.bf16.msra.mxu0 %v20944_v42  ;;  %20098 = vmatprep.mubr.msk.f32.mxu0 %vm23238_vm0, %v26651_v11  ;;  %v20959_v45 = vpack.c.bf16 %v21742_v0, %v21741_v39 }
0x19af   : > { %20949 = vmatprep.subr.bf16.mxu0 %v26658_v44  ;;  %20119 = vmatprep.mubr.msk.f32.mxu1 %vm23238_vm0, %v26651_v11  ;;  %v9098_v15 = vmul.f32 %v22177_v1, %v25211_v26  ;;  %v22179_v35 = vpop.eup %22178 }
0x19b0   : > { %20120 = vmatmul.mubr.msk.f32.vlgmr.msra.gmra.mrb[90].mxu1 %vm1994_vm6, %v8725_v55  ;;  %20958 = vmatprep.subr.bf16.mxu1 %v26658_v44  ;;  %v8724_v29 = vmul.f32 %v22179_v35, %v25197_v53  ;;  %v22181_v26 = vpop.eup %22180  ;;  %v9756_v53 = vpop.permute.xlu0 %9755 }
0x19b1   : > { %20099 = vmatmul.mubr.msk.f32.vlgmr.msra.gmra.mrb[82].mxu0 %vm1994_vm6, %v9098_v15  ;;  %20133 = vmatprep.mubr.msk.f32.mxu1 %vm23238_vm0, %v26651_v11  ;;  %v8726_v8 = vmul.f32 %v22181_v26, %v25202_v14 }
0x19b2   : > { %20951 = vmatpush3.bf16.msra.mxu0 %v20950_v40  ;;  %20112 = vmatprep.mubr.msk.f32.mxu0 %vm23238_vm0, %v26651_v11 }
0x19b3   : > { %20955 = vmatprep.subr.bf16.mxu0 %v26658_v44 }
0x19b4   : > { %v21755_v22 = vpop.permute.xlu0 %21754 }
0x19b5   : > { %20113 = vmatmul.mubr.msk.f32.vlgmr.msra.gmra.mrb[84].mxu0 %vm1994_vm6, %v8724_v29  ;;  %v21757_v14 = vunpack.i.h.bf16 %v21755_v22  ;;  %v21756_v21 = vunpack.i.l.bf16 %v21755_v22 }
0x19b6   : > { %20957 = vmatpush3.bf16.msra.mxu0 %v20956_v50  ;;  %20961 = vmatpush3.bf16.xpose.msk.msra.mxu1 %vm23862_vm5, %v20959_v45 }
0x19b7   : > { %20126 = vmatprep.mubr.msk.f32.mxu0 %vm23238_vm0, %v26651_v11  ;;  %20962 = vmatprep.subr.bf16.mxu0 %v26658_v44  ;;  %v20971_v9 = vpack.c.bf16 %v21757_v14, %v21756_v21 }
0x19b8   : > { %20966 = vmatprep.subr.bf16.mxu1 %v26658_v44 }
0x19b9   : > { %20127 = vmatmul.mubr.msk.f32.vlgmr.msra.gmra.mrb[86].mxu0 %vm1994_vm6, %v8726_v8 }
0x19ba   : > { %20140 = vmatprep.mubr.msk.f32.mxu0 %vm23238_vm0, %v26651_v11 }
0x19bd   : > { %20134 = vmatmul.mubr.msk.f32.vlgmr.msra.gmra.mrb[92].mxu1 %vm1682_vm4, %v9756_v53 }
0x19be   : > { %20969 = vmatpush3.bf16.xpose.msk.msra.mxu1 %vm23862_vm5, %v20967_v54  ;;  %20147 = vmatprep.mubr.msk.f32.mxu1 %vm23238_vm0, %v26651_v11 }
0x19bf   : > { %20965 = vmatpush3.bf16.xpose.msk.msra.mxu0 %vm23862_vm5, %v20963_v24  ;;  %20974 = vmatprep.subr.bf16.mxu1 %v26658_v44 }
0x19c0   : > { %20970 = vmatprep.subr.bf16.mxu0 %v26658_v44 }
0x19c5   : > { %20148 = vmatmul.mubr.msk.f32.vlgmr.msra.gmra.mrb[94].mxu1 %vm1682_vm4, %v9756_v53 }
0x19c6   : > { %20141 = vmatmul.mubr.msk.f32.vlgmr.msra.gmra.mrb[88].mxu0 %vm1682_vm4, %v9756_v53  ;;  %20161 = vmatprep.mubr.msk.f32.mxu1 %vm23238_vm0, %v26651_v11 }
0x19c7   : > { %20973 = vmatpush3.bf16.xpose.msk.msra.mxu0 %vm23862_vm5, %v20971_v9  ;;  %20154 = vmatprep.mubr.msk.f32.mxu0 %vm23238_vm0, %v26651_v11 }
0x19c8   : > { %20977 = vmatprep.subr.bf16.mxu0 %v26658_v44 }
0x19ce   : > { %20155 = vmatmul.mubr.msk.f32.vlgmr.msra.gmra.mrb[90].mxu0 %vm1682_vm4, %v9756_v53 }
0x19cf   : > { %20168 = vmatprep.mubr.msk.f32.mxu0 %vm23238_vm0, %v26651_v11 }
0x1a77   : > { %v9184_v4 = vpop.f32.mrb[78].mxu0 }
0x1a78   : > { %v20079_v5 = vpop.f32.mrb[79].mxu0 }
0x1a79   : > { %v26661_v5 = vpack.i.bf16 %v24979_v16, %v24999_v46 }
0x1a7b   : > { %v9346_v36 = vpop.f32.mrb[86].mxu1 }
0x1a7c   : > { %v20093_v37 = vpop.f32.mrb[87].mxu1 }
0x1a7d   : > { %v26663_v37 = vpack.i.bf16 %v24940_v38, %v24956_v58 }
0x1a7f   : > { %v9508_v42 = vpop.f32.mrb[88].mxu1 }
0x1a80   : > { %v9265_v60 = vpop.f32.mrb[80].mxu0  ;;  %v25293_v1 = vadd.f32 %v9508_v42, %v9184_v4  ;;  %v20107_v55 = vpop.f32.mrb[89].mxu1  ;;  %v26664_v42 = vpack.i.bf16 %v25076_v49, %v25067_v10 }
0x1a81   : > { %v20086_v40 = vpop.f32.mrb[81].mxu0 }
0x1a83   : > { %v9670_v59 = vpop.f32.mrb[90].mxu1 }
0x1a84   : > { %v9427_v15 = vpop.f32.mrb[82].mxu0  ;;  %v25295_v35 = vadd.f32 %v9670_v59, %v9346_v36  ;;  %v20121_v61 = vpop.f32.mrb[91].mxu1  ;;  %v26662_v36 = vpack.i.bf16 %v25019_v19, %v25032_v28 }
0x1a85   : > { %v20100_v6 = vpop.f32.mrb[83].mxu0 }
0x1a88   : > { %v9589_v0 = vpop.f32.mrb[84].mxu0 }
0x1a89   : > { %v25297_v39 = vadd.f32 %v9589_v0, %v9265_v60  ;;  %v20114_v29 = vpop.f32.mrb[85].mxu0 }
0x1a8c   : > { %v9751_v26 = vpop.f32.mrb[86].mxu0 }
0x1a8d   : > { %v25299_v50 = vadd.f32 %v9751_v26, %v9427_v15  ;;  %v20128_v45 = vpop.f32.mrb[87].mxu0 }
0x1a90   : > { %v9833_v56 = vpop.f32.mrb[92].mxu1 }
0x1a91   : > { %v10071_v8 = vmul.f32 0.17677669, %v9833_v56  ;;  %v20135_v30 = vpop.f32.mrb[93].mxu1 }
0x1a93   : > { %v10075_v34 = vsel %vm1994_vm6, %v10071_v8, -inf }
0x1a94   : > { %10076 = vmax.xlane.f32.xlu1 %v10075_v34 }
0x1a98   : > { %v9989_v53 = vpop.f32.mrb[94].mxu1 }
0x1a99   : > { %v9911_v7 = vpop.f32.mrb[88].mxu0  ;;  %v20149_v31 = vpop.f32.mrb[95].mxu1  ;;  %v10073_v22 = vmul.f32 0.17677669, %v9989_v53 }
0x1a9a   : > { %v10072_v54 = vmul.f32 0.17677669, %v9911_v7  ;;  %v20142_v24 = vpop.f32.mrb[89].mxu0 }
0x1a9b   : > { %v10081_v21 = vsel %vm1994_vm6, %v10073_v22, -inf }
0x1a9c   : > { %v10078_v14 = vsel %vm1994_vm6, %v10072_v54, -inf }
0x1a9d   : > { %10079 = vmax.xlane.f32.xlu0 %v10078_v14 }
0x1aa1   : > { %v10067_v9 = vpop.f32.mrb[90].mxu0  ;;  %10082 = vmax.xlane.f32.xlu0 %v10081_v21 }
0x1aa2   : > { %v20156_v4 = vpop.f32.mrb[91].mxu0  ;;  %v10074_v60 = vmul.f32 0.17677669, %v10067_v9 }
0x1aa4   : > { %v10084_v55 = vsel %vm1994_vm6, %v10074_v60, -inf }
0x1aa5   : > { %21764 = vrot.lane.b32.xlu1 %v26661_v5, %s23242_s8 }
0x1aa9   : > { %21769 = vrot.lane.b32.xlu1 %v26662_v36, %s23242_s8 }
0x1ab7   : > { %21759 = vrot.lane.b32.xlu0 %v26663_v37, %s23242_s8 }
0x1abb   : > { %21774 = vrot.lane.b32.xlu0 %v26664_v42, %s23242_s8 }
0x1acd   : > { %10085 = vmax.xlane.f32.xlu1 %v10084_v55 }
0x1ade   : > { %21779 = vrot.lane.b32.xlu1 %v24945_v18, %s26582_s13 }
0x1b21   : > { %v10077_v16 = vpop.xlane.xlu1 %10076 }
0x1b22   : > { %v10087_v46 = vsub.f32 %v10071_v8, %v10077_v16 }
0x1b24   : > { %v10091_v19 = vmul.f32 1.442695, %v10087_v46 }
0x1b25   : > { %v21765_v28 = vpop.permute.xlu1 %21764 }
0x1b26   : > { %22182 = vpow2.f32 %v10091_v19  ;;  %v21767_v40 = vunpack.i.h.bf16 %v21765_v28  ;;  %v21766_v38 = vunpack.i.l.bf16 %v21765_v28 }
0x1b28   : > { %v20978_v58 = vpack.c.bf16 %v21767_v40, %v21766_v38 }
0x1b29   : > { %v21770_v7 = vpop.permute.xlu1 %21769 }
0x1b2a   : > { %v10080_v59 = vpop.xlane.xlu0 %10079  ;;  %20979 = vmatpush3.bf16.msra.mxu0 %v20978_v58  ;;  %v21771_v4 = vunpack.i.l.bf16 %v21770_v7 }
0x1b2b   : > { %v10088_v15 = vsub.f32 %v10072_v54, %v10080_v59  ;;  %20983 = vmatprep.subr.bf16.mxu0 %v26658_v44 }
0x1b2d   : > { %v10093_v49 = vmul.f32 1.442695, %v10088_v15 }
0x1b2e   : > { %v10083_v10 = vpop.xlane.xlu0 %10082 }
0x1b2f   : > { %22184 = vpow2.f32 %v10093_v49  ;;  %v10089_v61 = vsub.f32 %v10073_v22, %v10083_v10 }
0x1b30   : > { %v22183_v6 = vpop.eup %22182 }
0x1b31   : > { %v10095_v0 = vmul.f32 1.442695, %v10089_v61  ;;  %v10099_v18 = vsel %vm1994_vm6, %v22183_v6, 0.0 }
0x1b32   : > { %v21760_v29 = vpop.permute.xlu0 %21759  ;;  %10100 = vadd.xlane.f32.xlu0 %v10099_v18 }
0x1b33   : > { %22186 = vpow2.f32 %v10095_v0  ;;  %v21762_v26 = vunpack.i.h.bf16 %v21760_v29  ;;  %v21761_v45 = vunpack.i.l.bf16 %v21760_v29 }
0x1b35   : > { %v20975_v56 = vpack.c.bf16 %v21762_v26, %v21761_v45 }
0x1b36   : > { %v21775_v21 = vpop.permute.xlu0 %21774 }
0x1b37   : > { %20976 = vmatpush3.bf16.msra.mxu1 %v20975_v56  ;;  %v21776_v55 = vunpack.i.l.bf16 %v21775_v21 }
0x1b38   : > { %20980 = vmatprep.subr.bf16.mxu1 %v26658_v44 }
0x1b39   : > { %v22185_v8 = vpop.eup %22184 }
0x1b3a   : > { %v10102_v30 = vsel %vm1994_vm6, %v22185_v8, 0.0 }
0x1b3b   : > { %10103 = vadd.xlane.f32.xlu1 %v10102_v30 }
0x1b3d   : > { %v22187_v34 = vpop.eup %22186 }
0x1b3e   : > { %v10105_v53 = vsel %vm1994_vm6, %v22187_v34, 0.0 }
0x1b3f   : > { %10106 = vadd.xlane.f32.xlu0 %v10105_v53 }
0x1b4c   : > { %21789 = vrot.lane.b32.xlu1 %v25021_v17, %s26582_s13 }
0x1b55   : > { %21784 = vrot.lane.b32.xlu0 %v24985_v13, %s26582_s13  ;;  %v21772_v13 = vunpack.i.h.bf16 %v21770_v7 }
0x1b57   : > { %v20981_v37 = vpack.c.bf16 %v21772_v13, %v21771_v4 }
0x1b59   : > { %21794 = vrot.lane.b32.xlu0 %v25054_v63, %s26582_s13 }
0x1b5a   : > { %v10086_v31 = vpop.xlane.xlu1 %10085 }
0x1b5b   : > { %v10090_v54 = vsub.f32 %v10074_v60, %v10086_v31  ;;  %v21777_v60 = vunpack.i.h.bf16 %v21775_v21 }
0x1b5d   : > { %v10097_v24 = vmul.f32 1.442695, %v10090_v54  ;;  %v20984_v19 = vpack.c.bf16 %v21777_v60, %v21776_v55 }
0x1b5e   : > { %v21780_v9 = vpop.permute.xlu1 %21779 }
0x1b5f   : > { %22188 = vpow2.f32 %v10097_v24  ;;  %v21782_v28 = vunpack.i.h.bf16 %v21780_v9  ;;  %v21781_v40 = vunpack.i.l.bf16 %v21780_v9 }
0x1b61   : > { %v20987_v59 = vpack.c.bf16 %v21782_v28, %v21781_v40 }
0x1b69   : > { %v22189_v22 = vpop.eup %22188 }
0x1b6a   : > { %v10108_v14 = vsel %vm1994_vm6, %v22189_v22, 0.0 }
0x1b70   : > { %10109 = vadd.xlane.f32.xlu1 %v10108_v14 }
0x1b81   : > { %10455 = vrot.lane.b32.xlu1 %v24931_v52, %s26582_s13  ;;  %s26671_s13 = sld [smem:[#allocation68_spill]] }
0x1bbf   : > { %v10101_v17 = vpop.xlane.xlu0 %10100 }
0x1bc0   : > { %22190 = vrcp.f32 %v10101_v17 }
0x1bc8   : > { %v10104_v5 = vpop.xlane.xlu1 %10103 }
0x1bc9   : > { %22192 = vrcp.f32 %v10104_v5 }
0x1bca   : > { %v22191_v63 = vpop.eup %22190 }
0x1bcb   : > { %v10115_v36 = vmul.f32 %v22191_v63, %v22183_v6 }
0x1bcc   : > { %v10107_v42 = vpop.xlane.xlu0 %10106  ;;  %v21790_v15 = vpop.permute.xlu1 %21789 }
0x1bcd   : > { %22194 = vrcp.f32 %v10107_v42  ;;  %20162 = vmatmul.mubr.msk.f32.vlgmr.msra.gmra.mrb[96].mxu1 %vm1994_vm6, %v10115_v36  ;;  %v21792_v49 = vunpack.i.h.bf16 %v21790_v15  ;;  %v21791_v10 = vunpack.i.l.bf16 %v21790_v15 }
0x1bce   : > { %20982 = vmatpush3.bf16.msra.mxu1 %v20981_v37  ;;  %20175 = vmatprep.mubr.msk.f32.mxu1 %vm23238_vm0, %v26651_v11 }
0x1bcf   : > { %20986 = vmatprep.subr.bf16.mxu1 %v26658_v44  ;;  %v20995_v6 = vpack.c.bf16 %v21792_v49, %v21791_v10 }
0x1bd0   : > { %v21785_v18 = vpop.permute.xlu0 %21784 }
0x1bd1   : > { %v21787_v29 = vunpack.i.h.bf16 %v21785_v18  ;;  %v21786_v26 = vunpack.i.l.bf16 %v21785_v18 }
0x1bd3   : > { %v22193_v16 = vpop.eup %22192 }
0x1bd4   : > { %v10116_v46 = vmul.f32 %v22193_v16, %v22185_v8  ;;  %v20991_v8 = vpack.c.bf16 %v21787_v29, %v21786_v26  ;;  %v21795_v30 = vpop.permute.xlu0 %21794 }
0x1bd5   : > { %v21796_v53 = vunpack.i.l.bf16 %v21795_v30 }
0x1bd6   : > { %20169 = vmatmul.mubr.msk.f32.vlgmr.msra.gmra.mrb[92].mxu0 %vm1994_vm6, %v10116_v46 }
0x1bd7   : > { %v22195_v38 = vpop.eup %22194  ;;  %20985 = vmatpush3.bf16.msra.mxu0 %v20984_v19  ;;  %20182 = vmatprep.mubr.msk.f32.mxu0 %vm23238_vm0, %v26651_v11 }
0x1bd8   : > { %v10117_v58 = vmul.f32 %v22195_v38, %v22187_v34  ;;  %20990 = vmatprep.subr.bf16.mxu0 %v26658_v44  ;;  %v21797_v34 = vunpack.i.h.bf16 %v21795_v30 }
0x1bda   : > { %20176 = vmatmul.mubr.msk.f32.vlgmr.msra.gmra.mrb[98].mxu1 %vm1994_vm6, %v10117_v58  ;;  %v20999_v7 = vpack.c.bf16 %v21797_v34, %v21796_v53 }
0x1bdb   : > { %20989 = vmatpush3.bf16.xpose.msk.msra.mxu1 %vm23862_vm5, %v20987_v59  ;;  %20189 = vmatprep.mubr.msk.f32.mxu1 %vm23238_vm0, %v26651_v11 }
0x1bdc   : > { %20994 = vmatprep.subr.bf16.mxu1 %v26658_v44 }
0x1bfd   : > { %v10110_v61 = vpop.xlane.xlu1 %10109 }
0x1bfe   : > { %22196 = vrcp.f32 %v10110_v61 }
0x1c01   : > { %v10456_v0 = vpop.permute.xlu1 %10455 }
0x1c02   : > { %20190 = vmatmul.mubr.msk.f32.vlgmr.msra.gmra.mrb[100].mxu1 %vm1682_vm4, %v10456_v0 }
0x1c03   : > { %20997 = vmatpush3.bf16.xpose.msk.msra.mxu1 %vm23862_vm5, %v20995_v6  ;;  %20203 = vmatprep.mubr.msk.f32.mxu1 %vm23238_vm0, %v26651_v11 }
0x1c04   : > { %21002 = vmatprep.subr.bf16.mxu1 %v26658_v44 }
0x1c08   : > { %v22197_v45 = vpop.eup %22196 }
0x1c09   : > { %v10118_v56 = vmul.f32 %v22197_v45, %v22189_v22 }
0x1c0a   : > { %20204 = vmatmul.mubr.msk.f32.vlgmr.msra.gmra.mrb[102].mxu1 %vm1682_vm4, %v10456_v0 }
0x1c0b   : > { %20183 = vmatmul.mubr.msk.f32.vlgmr.msra.gmra.mrb[94].mxu0 %vm1994_vm6, %v10118_v56  ;;  %20217 = vmatprep.mubr.msk.f32.mxu1 %vm23238_vm0, %v26651_v11 }
0x1c0c   : > { %20993 = vmatpush3.bf16.xpose.msk.msra.mxu0 %vm23862_vm5, %v20991_v8  ;;  %20196 = vmatprep.mubr.msk.f32.mxu0 %vm23238_vm0, %v26651_v11 }
0x1c0d   : > { %20998 = vmatprep.subr.bf16.mxu0 %v26658_v44 }
0x1c13   : > { %20197 = vmatmul.mubr.msk.f32.vlgmr.msra.gmra.mrb[96].mxu0 %vm1682_vm4, %v10456_v0 }
0x1c14   : > { %21001 = vmatpush3.bf16.xpose.msk.msra.mxu0 %vm23862_vm5, %v20999_v7  ;;  %20210 = vmatprep.mubr.msk.f32.mxu0 %vm23238_vm0, %v26651_v11 }
0x1c15   : > { %21005 = vmatprep.subr.bf16.mxu0 %v26658_v44 }
0x1c1b   : > { %20211 = vmatmul.mubr.msk.f32.vlgmr.msra.gmra.mrb[98].mxu0 %vm1682_vm4, %v10456_v0 }
0x1c1c   : > { %20224 = vmatprep.mubr.msk.f32.mxu0 %vm23238_vm0, %v26651_v11 }
0x1ca0   : > { %v10204_v31 = vpop.f32.mrb[96].mxu1 }
0x1ca1   : > { %v25376_v54 = vadd.f32 %v10204_v31, %v25293_v1  ;;  %v20163_v24 = vpop.f32.mrb[97].mxu1 }
0x1ca9   : > { %v10285_v22 = vpop.f32.mrb[92].mxu0 }
0x1caa   : > { %v25379_v14 = vadd.f32 %v10285_v22, %v25297_v39  ;;  %v20170_v21 = vpop.f32.mrb[93].mxu0 }
0x1cad   : > { %v10366_v17 = vpop.f32.mrb[98].mxu1 }
0x1cae   : > { %v25382_v9 = vadd.f32 %v10366_v17, %v25295_v35  ;;  %v20177_v13 = vpop.f32.mrb[99].mxu1 }
0x1cd5   : > { %v10533_v4 = vpop.f32.mrb[100].mxu1 }
0x1cd6   : > { %v10771_v5 = vmul.f32 0.17677669, %v10533_v4  ;;  %v20191_v63 = vpop.f32.mrb[101].mxu1  ;;  %v26666_v4 = vpack.i.bf16 %v25084_v43, %v25081_v3 }
0x1cd7   : > { %v26668_v63 = vpack.i.bf16 %v25100_v32, %v25096_v33 }
0x1cd8   : > { %v10775_v36 = vsel %vm1994_vm6, %v10771_v5, -inf }
0x1cd9   : > { %10776 = vmax.xlane.f32.xlu0 %v10775_v36 }
0x1cdd   : > { %v10689_v37 = vpop.f32.mrb[102].mxu1 }
0x1cde   : > { %v10773_v1 = vmul.f32 0.17677669, %v10689_v37  ;;  %v20205_v42 = vpop.f32.mrb[103].mxu1  ;;  %v10447_v60 = vpop.f32.mrb[94].mxu0 }
0x1cdf   : > { %v25386_v55 = vadd.f32 %v10447_v60, %v25299_v50  ;;  %v20184_v39 = vpop.f32.mrb[95].mxu0  ;;  %v26665_v50 = vpack.i.bf16 %v24943_v27, %v25008_v25 }
0x1ce0   : > { %v10781_v16 = vsel %vm1994_vm6, %v10773_v1, -inf }
0x1ce1   : > { %10782 = vmax.xlane.f32.xlu0 %v10781_v16 }
0x1ce6   : > { %v10611_v35 = vpop.f32.mrb[96].mxu0 }
0x1ce7   : > { %v10772_v46 = vmul.f32 0.17677669, %v10611_v35  ;;  %v20198_v19 = vpop.f32.mrb[97].mxu0 }
0x1ce9   : > { %v10778_v28 = vsel %vm1994_vm6, %v10772_v46, -inf }
0x1cea   : > { %10779 = vmax.xlane.f32.xlu1 %v10778_v28 }
0x1cee   : > { %v10767_v40 = vpop.f32.mrb[98].mxu0 }
0x1cef   : > { %v10774_v38 = vmul.f32 0.17677669, %v10767_v40  ;;  %v20212_v58 = vpop.f32.mrb[99].mxu0 }
0x1cf1   : > { %v10784_v59 = vsel %vm1994_vm6, %v10774_v38, -inf }
0x1cf2   : > { %10785 = vmax.xlane.f32.xlu0 %v10784_v59  ;;  %v11275_v59 = vld [vmem:[#allocation19] sm:$0xff] }
0x1cfb   : > { %21799 = vrot.lane.b32.xlu1 %v26665_v50, %s23242_s8  ;;  %v11276_v50 = vld [vmem:[#allocation19 + $0x8] sm:$0xff] }
0x1d66   : > { %v10777_v15 = vpop.xlane.xlu0 %10776 }
0x1d67   : > { %v10787_v49 = vsub.f32 %v10771_v5, %v10777_v15  ;;  %v26667_v5 = vpack.i.bf16 %v25092_v2, %v25087_v41 }
0x1d69   : > { %v10791_v10 = vmul.f32 1.442695, %v10787_v49  ;;  %v21022_v49 = vpack.c.bf16 %v11276_v50, %v11275_v59 }
0x1d6b   : > { %22198 = vpow2.f32 %v10791_v10 }
0x1d6e   : > { %v10783_v61 = vpop.xlane.xlu0 %10782 }
0x1d6f   : > { %v10789_v6 = vsub.f32 %v10773_v1, %v10783_v61 }
0x1d71   : > { %v10795_v0 = vmul.f32 1.442695, %v10789_v6  ;;  %v11277_v6 = vld [vmem:[#allocation19 + $0x10] sm:$0xff] }
0x1d73   : > { %22200 = vpow2.f32 %v10795_v0  ;;  %v11278_v0 = vld [vmem:[#allocation19 + $0x18] sm:$0xff] }
0x1d75   : > { %v22199_v18 = vpop.eup %22198 }
0x1d76   : > { %v10799_v29 = vsel %vm1994_vm6, %v22199_v18, 0.0 }
0x1d77   : > { %v10780_v26 = vpop.xlane.xlu1 %10779  ;;  %10800 = vadd.xlane.f32.xlu1 %v10799_v29  ;;  %v21026_v29 = vpack.c.bf16 %v11278_v0, %v11277_v6 }
0x1d78   : > { %v10788_v45 = vsub.f32 %v10772_v46, %v10780_v26  ;;  %v11159_v26 = vld [vmem:[%s26669_s4] sm:$0xff] }
0x1d7a   : > { %v10793_v56 = vmul.f32 1.442695, %v10788_v45 }
0x1d7b   : > { %v21800_v8 = vpop.permute.xlu1 %21799 }
0x1d7c   : > { %22202 = vpow2.f32 %v10793_v56  ;;  %v21802_v30 = vunpack.i.h.bf16 %v21800_v8  ;;  %v21801_v27 = vunpack.i.l.bf16 %v21800_v8  ;;  %v11162_v56 = vld [vmem:[%s26669_s4 + $0x18] sm:$0xff] }
0x1d7d   : > { %v22201_v25 = vpop.eup %22200 }
0x1d7e   : > { %v21003_v34 = vpack.c.bf16 %v21802_v30, %v21801_v27  ;;  %v10805_v53 = vsel %vm1994_vm6, %v22201_v25, 0.0 }
0x1d7f   : > { %10806 = vadd.xlane.f32.xlu1 %v10805_v53  ;;  %v10786_v7 = vpop.xlane.xlu0 %10785 }
0x1d80   : > { %v10790_v31 = vsub.f32 %v10774_v38, %v10786_v7  ;;  %21004 = vmatpush3.bf16.msra.mxu1 %v21003_v34 }
0x1d81   : > { %21008 = vmatprep.subr.bf16.mxu1 %v26658_v44 }
0x1d82   : > { %v10797_v24 = vmul.f32 1.442695, %v10790_v31 }
0x1d84   : > { %22204 = vpow2.f32 %v10797_v24 }
0x1d86   : > { %v22203_v22 = vpop.eup %22202 }
0x1d87   : > { %v10802_v21 = vsel %vm1994_vm6, %v22203_v22, 0.0 }
0x1d88   : > { %10803 = vadd.xlane.f32.xlu0 %v10802_v21 }
0x1d8e   : > { %v22205_v17 = vpop.eup %22204 }
0x1d8f   : > { %v10808_v13 = vsel %vm1994_vm6, %v22205_v17, 0.0 }
0x1d90   : > { %21809 = vrot.lane.b32.xlu1 %v26666_v4, %s23242_s8  ;;  %10809 = vadd.xlane.f32.xlu0 %v10808_v13 }
0x1d94   : > { %21814 = vrot.lane.b32.xlu1 %v26667_v5, %s23242_s8 }
0x1da6   : > { %21804 = vrot.lane.b32.xlu0 %v26668_v63, %s23242_s8 }
0x1e04   : > { %v10801_v36 = vpop.xlane.xlu1 %10800 }
0x1e05   : > { %22206 = vrcp.f32 %v10801_v36 }
0x1e0c   : > { %v10807_v37 = vpop.xlane.xlu1 %10806 }
0x1e0d   : > { %22208 = vrcp.f32 %v10807_v37 }
0x1e0f   : > { %v22207_v1 = vpop.eup %22206 }
0x1e10   : > { %v21810_v42 = vpop.permute.xlu1 %21809  ;;  %v10815_v60 = vmul.f32 %v22207_v1, %v22199_v18 }
0x1e11   : > { %v21812_v3 = vunpack.i.h.bf16 %v21810_v42  ;;  %v21811_v43 = vunpack.i.l.bf16 %v21810_v42 }
0x1e12   : > { %20218 = vmatmul.mubr.msk.f32.vlgmr.msra.gmra.mrb[104].mxu1 %vm1994_vm6, %v10815_v60 }
0x1e13   : > { %v21009_v39 = vpack.c.bf16 %v21812_v3, %v21811_v43  ;;  %20231 = vmatprep.mubr.msk.f32.mxu1 %vm23238_vm0, %v26651_v11 }
0x1e14   : > { %v21815_v16 = vpop.permute.xlu1 %21814 }
0x1e15   : > { %21010 = vmatpush3.bf16.msra.mxu1 %v21009_v39  ;;  %v10804_v41 = vpop.xlane.xlu0 %10803  ;;  %v21817_v40 = vunpack.i.h.bf16 %v21815_v16  ;;  %v21816_v38 = vunpack.i.l.bf16 %v21815_v16  ;;  %v11393_v16 = vld [vmem:[%s26671_s13 + $0x10] sm:$0xff] }
0x1e16   : > { %22210 = vrcp.f32 %v10804_v41  ;;  %v11391_v41 = vld [vmem:[%s26671_s13] sm:$0xff] }
0x1e17   : > { %v22209_v2 = vpop.eup %22208  ;;  %v21012_v61 = vpack.c.bf16 %v21817_v40, %v21816_v38 }
0x1e18   : > { %v10817_v33 = vmul.f32 %v22209_v2, %v22201_v25 }
0x1e1a   : > { %20232 = vmatmul.mubr.msk.f32.vlgmr.msra.gmra.mrb[106].mxu1 %vm1994_vm6, %v10817_v33  ;;  %v11392_v33 = vld [vmem:[%s26671_s13 + $0x8] sm:$0xff] }
0x1e1d   : > { %v10810_v32 = vpop.xlane.xlu0 %10809 }
0x1e1e   : > { %22212 = vrcp.f32 %v10810_v32  ;;  %v21030_v32 = vpack.c.bf16 %v11392_v33, %v11391_v41 }
0x1e20   : > { %v22211_v28 = vpop.eup %22210 }
0x1e21   : > { %v21805_v35 = vpop.permute.xlu0 %21804  ;;  %v10816_v15 = vmul.f32 %v22211_v28, %v22203_v22 }
0x1e22   : > { %v21807_v46 = vunpack.i.h.bf16 %v21805_v35  ;;  %v21806_v19 = vunpack.i.l.bf16 %v21805_v35  ;;  %v11394_v35 = vld [vmem:[%s26671_s13 + $0x18] sm:$0xff] }
0x1e24   : > { %v21006_v58 = vpack.c.bf16 %v21807_v46, %v21806_v19  ;;  %v21034_v46 = vpack.c.bf16 %v11394_v35, %v11393_v16  ;;  %v18711_v19 = vld [vmem:[#allocation18] ss:$0 sm:$0xff] }
0x1e26   : > { %21007 = vmatpush3.bf16.msra.mxu0 %v21006_v58 }
0x1e27   : > { %21011 = vmatprep.subr.bf16.mxu0 %v26658_v44 }
0x1e28   : > { %v22213_v10 = vpop.eup %22212 }
0x1e29   : > { %20225 = vmatmul.mubr.msk.f32.vlgmr.msra.gmra.mrb[100].mxu0 %vm1994_vm6, %v10816_v15  ;;  %v10818_v18 = vmul.f32 %v22213_v10, %v22205_v17 }
0x1e2a   : > { %21013 = vmatpush3.bf16.msra.mxu0 %v21012_v61  ;;  %20238 = vmatprep.mubr.msk.f32.mxu0 %vm23238_vm0, %v26651_v11 }
0x1e2b   : > { %21023 = vmatprep.subr.bf16.mxu0 %v21022_v49 }
0x1e2d   : > { %20239 = vmatmul.mubr.msk.f32.vlgmr.msra.gmra.mrb[102].mxu0 %vm1994_vm6, %v10818_v18 }
0x1e2e   : > { %21025 = vmatpush3.bf16.msra.mxu0 %v21022_v49  ;;  %20263 = vmatprep.mubr.msk.f32.mxu0 %vm1466_vm3, %v24897_v12  ;;  %v26670_v12 = vld [vmem:[#allocation83_spill] sm:$0xff] }
0x1e2f   : > { %21027 = vmatprep.subr.bf16.mxu0 %v21026_v29 }
0x1e32   : > { %21029 = vmatpush3.bf16.msra.mxu0 %v21026_v29 }
0x1e35   : > { %20264 = vmatmul.mubr.msk.f32.vlgmr.msra.gmra.mrb[104].mxu0 %vm1466_vm3, %v24899_v57  ;;  %v11160_v57 = vld [vmem:[%s26669_s4 + $0x8] sm:$0xff] }
0x1e36   : > { %20266 = vmatprep.mubr.msk.f32.mxu0 %vm1466_vm3, %v24905_v48  ;;  %v21014_v45 = vpack.c.bf16 %v11160_v57, %v11159_v26  ;;  %v11161_v48 = vld [vmem:[%s26669_s4 + $0x10] sm:$0xff]  ;;  %v18725_v57 = vld [vmem:[#allocation22] ss:$0 sm:$0xff] }
0x1e38   : > { %21015 = vmatprep.subr.bf16.mxu1 %v21014_v45 }
0x1e39   : > { %20267 = vmatmul.mubr.msk.f32.gmra.mrb[106].mxu0 %vm1466_vm3, %v24907_v47  ;;  %21017 = vmatpush3.bf16.msra.mxu1 %v21014_v45  ;;  %v21018_v47 = vpack.c.bf16 %v11162_v56, %v11161_v48 }
0x1e3a   : > { %20269 = vmatprep.mubr.msk.f32.mxu0 %vm1466_vm3, %v24913_v51 }
0x1e3b   : > { %21019 = vmatprep.subr.bf16.mxu1 %v21018_v47 }
0x1e3d   : > { %20270 = vmatmul.mubr.msk.f32.gmra.mrb[108].mxu0 %vm1466_vm3, %v24915_v62  ;;  %21021 = vmatpush3.bf16.msra.mxu1 %v21018_v47 }
0x1e3e   : > { %20272 = vmatprep.mubr.msk.f32.mxu0 %vm1466_vm3, %v24921_v20  ;;  %21031 = vmatprep.subr.bf16.mxu1 %v21030_v32 }
0x1e41   : > { %20273 = vmatmul.mubr.msk.f32.gmra.mrb[110].mxu0 %vm1466_vm3, %v26670_v12 }
0x1ee5   : > { %v10904_v51 = vpop.f32.mrb[104].mxu1 }
0x1ee6   : > { %v11151_v8 = vadd.f32 %v10904_v51, %v25376_v54  ;;  %v20219_v62 = vpop.f32.mrb[105].mxu1 }
0x1ee8   : > { %v11155_v30 = vadd.f32 %v11151_v8, %v24931_v52 }
0x1eea   : > { %20249 = vmatprep.mubr.msk.f32.mxu1 %vm1466_vm3, %v11155_v30 }
0x1eed   : > { %v11066_v20 = vpop.f32.mrb[106].mxu1 }
0x1eee   : > { %v11153_v27 = vadd.f32 %v11066_v20, %v25382_v9  ;;  %v20233_v25 = vpop.f32.mrb[107].mxu1  ;;  %v18716_v9 = vld [vmem:[#allocation21] ss:$0 sm:$0xff] }
0x1ef0   : > { %v11157_v24 = vadd.f32 %v11153_v27, %v24931_v52 }
0x1efc   : > { %v10985_v34 = vpop.f32.mrb[100].mxu0 }
0x1efd   : > { %v11152_v53 = vadd.f32 %v10985_v34, %v25379_v14  ;;  %v20226_v7 = vpop.f32.mrb[101].mxu0  ;;  %v26672_v34 = vld [vmem:[#allocation79_spill] sm:$0xff] }
0x1eff   : > { %v11156_v31 = vadd.f32 %v11152_v53, %v24931_v52 }
0x1f00   : > { %v11147_v22 = vpop.f32.mrb[102].mxu0 }
0x1f01   : > { %v11154_v54 = vadd.f32 %v11147_v22, %v25386_v55  ;;  %v20240_v21 = vpop.f32.mrb[103].mxu0  ;;  %20250 = vmatmul.mubr.msk.f32.vlgmr.msra.gmra.mrb[108].mxu1 %vm1466_vm3, %v11156_v31 }
0x1f02   : > { %20252 = vmatprep.mubr.msk.f32.mxu1 %vm1466_vm3, %v11157_v24  ;;  %21033 = vmatpush3.bf16.msra.mxu1 %v21030_v32 }
0x1f03   : > { %v11158_v17 = vadd.f32 %v11154_v54, %v24931_v52  ;;  %21035 = vmatprep.subr.bf16.mxu1 %v21034_v46 }
0x1f05   : > { %20253 = vmatmul.mubr.msk.f32.gmra.mrb[110].mxu1 %vm1466_vm3, %v11158_v17 }
0x1f06   : > { %21037 = vmatpush3.bf16.msra.mxu1 %v21034_v46 }
0x1f08   : > { %v20265_v13 = vpop.f32.mrb[104].mxu0 }
0x1f09   : > { %v25453_v14 = vadd.f32 %v20265_v13, %v18716_v9  ;;  %v11352_v4 = vpop.f32.mrb[105].mxu0 }
0x1f0a   : > { %v25455_v5 = vadd.f32 %v18716_v9, %v11352_v4 }
0x1f0b   : > { %11937 = vrot.lane.b32.xlu0 %v25453_v14, %s23240_s14 }
0x1f0c   : > { %v20268_v55 = vpop.f32.mrb[106].mxu0  ;;  %11935 = vrot.lane.b32.xlu1 %v25455_v5, %s23240_s14 }
0x1f0d   : > { %v25461_v63 = vadd.f32 %v20268_v55, %v18716_v9  ;;  %v11362_v52 = vpop.f32.mrb[107].mxu0 }
0x1f0e   : > { %v25463_v36 = vadd.f32 %v18716_v9, %v11362_v52 }
0x1f10   : > { %v20271_v37 = vpop.f32.mrb[108].mxu0  ;;  %20296 = vmatprep.mubr.msk.f32.mxu0 %vm1682_vm4, %v25463_v36  ;;  %12024 = vrot.lane.b32.xlu1 %v25461_v63, %s23240_s14 }
0x1f11   : > { %v25469_v1 = vadd.f32 %v20271_v37, %v18716_v9  ;;  %v11372_v42 = vpop.f32.mrb[109].mxu0 }
0x1f12   : > { %v25471_v60 = vadd.f32 %v18716_v9, %v11372_v42 }
0x1f14   : > { %v20274_v3 = vpop.f32.mrb[110].mxu0  ;;  %12109 = vrot.lane.b32.xlu0 %v25471_v60, %s23240_s14  ;;  %12022 = vrot.lane.b32.xlu1 %v25463_v36, %s23240_s14 }
0x1f15   : > { %v25477_v43 = vadd.f32 %v20274_v3, %v18716_v9  ;;  %v11382_v39 = vpop.f32.mrb[111].mxu0 }
0x1f16   : > { %v25479_v2 = vadd.f32 %v18716_v9, %v11382_v39 }
0x1f7d   : > { %v11938_v7 = vpop.permute.xlu0 %11937 }
0x1f7e   : > { %v11936_v45 = vpop.permute.xlu1 %11935 }
0x1f82   : > { %v12025_v20 = vpop.permute.xlu1 %12024 }
0x1f86   : > { %v12023_v25 = vpop.permute.xlu1 %12022 }
0x1fd4   : > { %v20251_v28 = vpop.f32.mrb[108].mxu1 }
0x1fd5   : > { %v11254_v40 = vadd.f32 %v20251_v28, %v18711_v19  ;;  %v11248_v38 = vpop.f32.mrb[109].mxu1 }
0x1fd6   : > { %v11249_v58 = vadd.f32 %v18711_v19, %v11248_v38 }
0x1fd7   : > { %v11268_v59 = vmax.f32 %v11254_v40, 0.0 }
0x1fd8   : > { %v11267_v50 = vmax.f32 %v11249_v58, 0.0  ;;  %v20254_v15 = vpop.f32.mrb[110].mxu1 }
0x1fd9   : > { %v11264_v49 = vadd.f32 %v20254_v15, %v18711_v19  ;;  %v11258_v10 = vpop.f32.mrb[111].mxu1  ;;  %v11272_v0 = vadd.f32 %v11268_v59, %v11156_v31  ;;  %v12110_v31 = vpop.permute.xlu0 %12109 }
0x1fda   : > { %v11271_v61 = vadd.f32 %v11267_v50, %v11155_v30  ;;  %v11259_v6 = vadd.f32 %v18711_v19, %v11258_v10 }
0x1fdb   : > { %v11270_v18 = vmax.f32 %v11264_v49, 0.0 }
0x1fdc   : > { %v11269_v29 = vmax.f32 %v11259_v6, 0.0  ;;  %20283 = vmatprep.mubr.msk.f32.mxu1 %vm1466_vm3, %v11271_v61 }
0x1fdd   : > { %20284 = vmatmul.mubr.msk.f32.vlgmr.msra.gmra.mrb[112].mxu1 %vm1466_vm3, %v11272_v0  ;;  %v11274_v26 = vadd.f32 %v11270_v18, %v11158_v17 }
0x1fde   : > { %v11273_v12 = vadd.f32 %v11269_v29, %v11157_v24 }
0x1fe0   : > { %20286 = vmatprep.mubr.msk.f32.mxu1 %vm1466_vm3, %v11273_v12 }
0x1fe1   : > { %20287 = vmatmul.mubr.msk.f32.gmra.mrb[114].mxu1 %vm1466_vm3, %v11274_v26 }
0x1fe2   : > { %20291 = vmatprep.mubr.msk.f32.mxu1 %vm1682_vm4, %v25455_v5 }
0x20b0   : > { %v20285_v48 = vpop.f32.mrb[112].mxu1 }
0x20b1   : > { %v25491_v56 = vadd.f32 %v20285_v48, %v18725_v57  ;;  %v11480_v47 = vpop.f32.mrb[113].mxu1 }
0x20b2   : > { %v25493_v51 = vadd.f32 %v18725_v57, %v11480_v47 }
0x20b3   : > { %12026 = vrot.lane.b32.xlu1 %v25491_v56, %s23240_s14  ;;  %20294 = vmatprep.subr.msk.mxu0 %vm1682_vm4, %v25491_v56 }
0x20b4   : > { %v20288_v8 = vpop.f32.mrb[114].mxu1  ;;  %20295 = vmatpush3.xpose.msk.msra.mxu0 %vm1682_vm4, %v25491_v56  ;;  %11939 = vrot.lane.b32.xlu0 %v25493_v51, %s23240_s14  ;;  %v12379_v53 = vmul.f32 %v25493_v51, %v26672_v34 }
0x20b5   : > { %v25503_v62 = vadd.f32 %v20288_v8, %v18725_v57  ;;  %20289 = vmatprep.subr.msk.mxu1 %vm1682_vm4, %v25493_v51  ;;  %v11490_v30 = vpop.f32.mrb[115].mxu1 }
0x20b6   : > { %v25507_v27 = vadd.f32 %v18725_v57, %v11490_v30  ;;  %20290 = vmatpush3.xpose.msk.msra.mxu1 %vm1682_vm4, %v25493_v51 }
0x20b7   : > { %20297 = vmatmul.mubr.msk.f32.vlgmr.msra.gmra.mrb[112].mxu0 %vm1682_vm4, %v25461_v63  ;;  %12200 = vrot.lane.b32.xlu1 %v25503_v62, %s23240_s14 }
0x20b8   : > { %20304 = vmatprep.subr.msk.mxu0 %vm1682_vm4, %v25503_v62  ;;  %20306 = vmatprep.mubr.msk.f32.mxu0 %vm1682_vm4, %v25479_v2 }
0x20b9   : > { %20305 = vmatpush3.xpose.msk.msra.mxu0 %vm1682_vm4, %v25503_v62  ;;  %12113 = vrot.lane.b32.xlu0 %v25507_v27, %s23240_s14 }
0x20ba   : > { %20292 = vmatmul.mubr.msk.f32.vlgmr.msra.gmra.mrb[116].mxu1 %vm1682_vm4, %v25453_v14  ;;  %20299 = vmatprep.subr.msk.mxu1 %vm1682_vm4, %v25507_v27 }
0x20bb   : > { %20300 = vmatpush3.xpose.msk.msra.mxu1 %vm1682_vm4, %v25507_v27  ;;  %20301 = vmatprep.mubr.msk.f32.mxu1 %vm1682_vm4, %v25471_v60 }
0x20bc   : > { %12198 = vrot.lane.b32.xlu1 %v25477_v43, %s23240_s14  ;;  %20307 = vmatmul.mubr.msk.f32.vlgmr.msra.gmra.mrb[114].mxu0 %vm1682_vm4, %v25477_v43 }
0x20bd   : > { %20316 = vmatprep.mubr.msk.f32.mxu0 %vm1682_vm4, %v12023_v25  ;;  %12111 = vrot.lane.b32.xlu0 %v25469_v1, %s23240_s14 }
0x20be   : > { %20302 = vmatmul.mubr.msk.f32.vlgmr.msra.gmra.mrb[118].mxu1 %vm1682_vm4, %v25469_v1 }
0x20bf   : > { %20311 = vmatprep.mubr.msk.f32.mxu1 %vm1682_vm4, %v11936_v45 }
0x20c0   : > { %12384 = vrot.lane.b32.xlu1 %v12379_v53, %s23242_s8 }
0x20c1   : > { %12196 = vrot.lane.b32.xlu0 %v25479_v2, %s23240_s14 }
0x2125   : > { %v12027_v24 = vpop.permute.xlu1 %12026 }
0x2126   : > { %20314 = vmatprep.subr.msk.mxu0 %vm1682_vm4, %v12027_v24  ;;  %v11940_v22 = vpop.permute.xlu0 %11939 }
0x2127   : > { %20309 = vmatprep.subr.msk.mxu1 %vm1682_vm4, %v11940_v22  ;;  %20315 = vmatpush3.xpose.msk.msra.mxu0 %vm1682_vm4, %v12027_v24 }
0x2128   : > { %20310 = vmatpush3.xpose.msk.msra.mxu1 %vm1682_vm4, %v11940_v22 }
0x2129   : > { %v12201_v54 = vpop.permute.xlu1 %12200 }
0x212a   : > { %20317 = vmatmul.mubr.msk.f32.vlgmr.msra.gmra.mrb[116].mxu0 %vm1682_vm4, %v12025_v20  ;;  %20324 = vmatprep.subr.msk.mxu0 %vm1682_vm4, %v12201_v54 }
0x212b   : > { %v12114_v21 = vpop.permute.xlu0 %12113  ;;  %20312 = vmatmul.mubr.msk.f32.vlgmr.msra.gmra.mrb[120].mxu1 %vm1682_vm4, %v11938_v7  ;;  %20325 = vmatpush3.xpose.msk.msra.mxu0 %vm1682_vm4, %v12201_v54 }
0x212c   : > { %20319 = vmatprep.subr.msk.mxu1 %vm1682_vm4, %v12114_v21  ;;  %20321 = vmatprep.mubr.msk.f32.mxu1 %vm1682_vm4, %v12110_v31 }
0x212d   : > { %20320 = vmatpush3.xpose.msk.msra.mxu1 %vm1682_vm4, %v12114_v21 }
0x212e   : > { %v12199_v17 = vpop.permute.xlu1 %12198 }
0x212f   : > { %v12112_v9 = vpop.permute.xlu0 %12111 }
0x2130   : > { %20322 = vmatmul.mubr.msk.f32.vlgmr.msra.gmra.mrb[122].mxu1 %vm1682_vm4, %v12112_v9 }
0x2132   : > { %v12385_v13 = vpop.permute.xlu1 %12384 }
0x2133   : > { %v12197_v4 = vpop.permute.xlu0 %12196  ;;  %20329 = vmatprep.subr.mxu1 %v12385_v13 }
0x2134   : > { %20326 = vmatprep.mubr.msk.f32.mxu0 %vm1682_vm4, %v12197_v4  ;;  %20330 = vmatpush3.msra.mxu1 %v12385_v13  ;;  %v12381_v4 = vmul.f32 %v25507_v27, %v26672_v34 }
0x2135   : > { %20327 = vmatmul.mubr.msk.f32.vlgmr.msra.gmra.mrb[118].mxu0 %vm1682_vm4, %v12199_v17 }
0x218a   : > { %v20298_v55 = vpop.f32.mrb[112].mxu0 }
0x218b   : > { %v25560_v52 = vmul.f32 0.17677669, %v20298_v55  ;;  %v11658_v37 = vpop.f32.mrb[113].mxu0 }
0x218c   : > { %v25566_v32 = vmul.f32 0.17677669, %v11658_v37  ;;  %v26673_v37 = vld [vmem:[#allocation80_spill] sm:$0xff] }
0x218d   : > { %v20293_v42 = vpop.f32.mrb[116].mxu1  ;;  %v11852_v3 = vsel %vm1682_vm4, %v25560_v52, -inf }
0x218e   : > { %v25564_v39 = vmul.f32 0.17677669, %v20293_v42  ;;  %v11574_v41 = vpop.f32.mrb[117].mxu1  ;;  %11853 = vmax.xlane.f32.xlu0 %v11852_v3  ;;  %v11849_v59 = vsel %vm1682_vm4, %v25566_v32, -inf  ;;  %v11931_v42 = vmul.f32 %v25493_v51, %v26673_v37  ;;  %v11933_v3 = vmul.f32 %v25507_v27, %v26673_v37 }
0x218f   : > { %v20308_v33 = vpop.f32.mrb[114].mxu0  ;;  %v25576_v58 = vmul.f32 0.17677669, %v11574_v41  ;;  %v11934_v41 = vmul.f32 %v25503_v62, %v26673_v37 }
0x2190   : > { %v25568_v16 = vmul.f32 0.17677669, %v20308_v33  ;;  %v11826_v35 = vpop.f32.mrb[115].mxu0  ;;  %v11846_v46 = vsel %vm1682_vm4, %v25564_v39, -inf }
0x2191   : > { %11847 = vmax.xlane.f32.xlu1 %v11846_v46  ;;  %v20303_v19 = vpop.f32.mrb[118].mxu1  ;;  %v25582_v15 = vmul.f32 0.17677669, %v11826_v35  ;;  %v11843_v49 = vsel %vm1682_vm4, %v25576_v58, -inf  ;;  %v12380_v46 = vmul.f32 %v25491_v56, %v26672_v34 }
0x2192   : > { %v25572_v28 = vmul.f32 0.17677669, %v20303_v19  ;;  %v11742_v40 = vpop.f32.mrb[119].mxu1  ;;  %v11864_v38 = vsel %vm1682_vm4, %v25568_v16, -inf }
0x2193   : > { %11865 = vmax.xlane.f32.xlu0 %v11864_v38  ;;  %v25586_v10 = vmul.f32 0.17677669, %v11742_v40  ;;  %v11861_v61 = vsel %vm1682_vm4, %v25582_v15, -inf  ;;  %v12382_v40 = vmul.f32 %v25503_v62, %v26672_v34 }
0x2194   : > { %v11858_v50 = vsel %vm1682_vm4, %v25572_v28, -inf }
0x2195   : > { %11850 = vmax.xlane.f32.xlu1 %v11849_v59  ;;  %v11855_v6 = vsel %vm1682_vm4, %v25586_v10, -inf }
0x2197   : > { %11859 = vmax.xlane.f32.xlu0 %v11858_v50 }
0x2199   : > { %11844 = vmax.xlane.f32.xlu1 %v11843_v49  ;;  %v11932_v49 = vmul.f32 %v25491_v56, %v26673_v37 }
0x219d   : > { %11862 = vmax.xlane.f32.xlu1 %v11861_v61 }
0x21a1   : > { %11856 = vmax.xlane.f32.xlu1 %v11855_v6 }
0x21fd   : > { %v20318_v0 = vpop.f32.mrb[116].mxu0 }
0x21fe   : > { %v25592_v18 = vmul.f32 0.17677669, %v20318_v0  ;;  %v20313_v29 = vpop.f32.mrb[120].mxu1  ;;  %v12100_v12 = vpop.f32.mrb[117].mxu0 }
0x21ff   : > { %v25594_v26 = vmul.f32 0.17677669, %v12100_v12  ;;  %v12013_v57 = vpop.f32.mrb[121].mxu1  ;;  %v25596_v45 = vmul.f32 0.17677669, %v20313_v29 }
0x2200   : > { %v12300_v48 = vsel %vm1682_vm4, %v25592_v18, -inf  ;;  %v25600_v47 = vmul.f32 0.17677669, %v12013_v57 }
0x2201   : > { %12301 = vmax.xlane.f32.xlu1 %v12300_v48  ;;  %v12297_v8 = vsel %vm1682_vm4, %v25594_v26, -inf  ;;  %v12294_v25 = vsel %vm1682_vm4, %v25596_v45, -inf }
0x2202   : > { %12298 = vmax.xlane.f32.xlu0 %v12297_v8  ;;  %v12291_v53 = vsel %vm1682_vm4, %v25600_v47, -inf }
0x2203   : > { %v20323_v30 = vpop.f32.mrb[122].mxu1 }
0x2204   : > { %v12187_v20 = vpop.f32.mrb[123].mxu1  ;;  %v25610_v22 = vmul.f32 0.17677669, %v20323_v30 }
0x2205   : > { %12295 = vmax.xlane.f32.xlu1 %v12294_v25  ;;  %v25618_v9 = vmul.f32 0.17677669, %v12187_v20 }
0x2206   : > { %12292 = vmax.xlane.f32.xlu0 %v12291_v53  ;;  %v12306_v17 = vsel %vm1682_vm4, %v25610_v22, -inf }
0x2207   : > { %v12303_v55 = vsel %vm1682_vm4, %v25618_v9, -inf }
0x2208   : > { %v20328_v7 = vpop.f32.mrb[118].mxu0 }
0x2209   : > { %v25608_v31 = vmul.f32 0.17677669, %v20328_v7  ;;  %v12274_v24 = vpop.f32.mrb[119].mxu0 }
0x220a   : > { %v25614_v21 = vmul.f32 0.17677669, %v12274_v24 }
0x220b   : > { %v12312_v54 = vsel %vm1682_vm4, %v25608_v31, -inf }
0x220c   : > { %12313 = vmax.xlane.f32.xlu0 %v12312_v54  ;;  %v12309_v13 = vsel %vm1682_vm4, %v25614_v21, -inf }
0x2210   : > { %12307 = vmax.xlane.f32.xlu0 %v12306_v17 }
0x2214   : > { %12310 = vmax.xlane.f32.xlu0 %v12309_v13 }
0x2216   : > { %12554 = vrot.lane.b32.xlu1 %v12381_v4, %s23242_s8 }
0x2218   : > { %12304 = vmax.xlane.f32.xlu0 %v12303_v55 }
0x221a   : > { %12724 = vrot.lane.b32.xlu1 %v11931_v42, %s23242_s8 }
0x221b   : > { %v11854_v6 = vpop.xlane.xlu0 %11853 }
0x221c   : > { %v11870_v8 = vsub.f32 %v25560_v52, %v11854_v6 }
0x221e   : > { %12894 = vrot.lane.b32.xlu1 %v11933_v3, %s23242_s8  ;;  %v11848_v33 = vpop.xlane.xlu1 %11847  ;;  %v11881_v25 = vmul.f32 1.442695, %v11870_v8 }
0x221f   : > { %v11868_v19 = vsub.f32 %v25564_v39, %v11848_v33 }
0x2220   : > { %v11866_v48 = vpop.xlane.xlu0 %11865 }
0x2221   : > { %v11877_v59 = vmul.f32 1.442695, %v11868_v19  ;;  %v11874_v53 = vsub.f32 %v25568_v16, %v11866_v48 }
0x2222   : > { %12979 = vrot.lane.b32.xlu1 %v11934_v41, %s23242_s8  ;;  %v11851_v35 = vpop.xlane.xlu1 %11850 }
0x2223   : > { %v11869_v50 = vsub.f32 %v25566_v32, %v11851_v35  ;;  %22214 = vpow2.f32 %v11877_v59  ;;  %v11889_v52 = vmul.f32 1.442695, %v11874_v53 }
0x2224   : > { %v11860_v7 = vpop.xlane.xlu0 %11859 }
0x2225   : > { %v11879_v0 = vmul.f32 1.442695, %v11869_v50  ;;  %v11872_v54 = vsub.f32 %v25572_v28, %v11860_v7 }
0x2226   : > { %v11845_v38 = vpop.xlane.xlu1 %11844 }
0x2227   : > { %v11867_v39 = vsub.f32 %v25576_v58, %v11845_v38  ;;  %22216 = vpow2.f32 %v11879_v0  ;;  %v11885_v16 = vmul.f32 1.442695, %v11872_v54 }
0x2229   : > { %v11875_v29 = vmul.f32 1.442695, %v11867_v39 }
0x222a   : > { %v11863_v61 = vpop.xlane.xlu1 %11862 }
0x222b   : > { %v11873_v12 = vsub.f32 %v25582_v15, %v11863_v61  ;;  %22218 = vpow2.f32 %v11875_v29 }
0x222d   : > { %v11887_v32 = vmul.f32 1.442695, %v11873_v12  ;;  %v25651_v20 = vpop.eup %22214 }
0x222e   : > { %12469 = vrot.lane.b32.xlu0 %v12380_v46, %s23242_s8  ;;  %v11857_v57 = vpop.xlane.xlu1 %11856  ;;  %v11894_v24 = vsel %vm1682_vm4, %v25651_v20, 0.0 }
0x222f   : > { %v11871_v30 = vsub.f32 %v25586_v10, %v11857_v57  ;;  %22220 = vpow2.f32 %v11887_v32 }
0x2230   : > { %22222 = vpow2.f32 %v11881_v25 }
0x2231   : > { %v11883_v58 = vmul.f32 1.442695, %v11871_v30  ;;  %v25656_v15 = vpop.eup %22216 }
0x2232   : > { %12639 = vrot.lane.b32.xlu0 %v12382_v40, %s23242_s8  ;;  %v11897_v10 = vsel %vm1682_vm4, %v25656_v15, 0.0 }
0x2233   : > { %22224 = vpow2.f32 %v11883_v58 }
0x2234   : > { %22226 = vpow2.f32 %v11889_v52 }
0x2235   : > { %v25661_v17 = vpop.eup %22218  ;;  %22228 = vpow2.f32 %v11885_v16 }
0x2236   : > { %12809 = vrot.lane.b32.xlu0 %v11932_v49, %s23242_s8  ;;  %v11891_v13 = vsel %vm1682_vm4, %v25661_v17, 0.0 }
0x2239   : > { %v25665_v4 = vpop.eup %22220 }
0x223a   : > { %v25667_v55 = vpop.eup %22222  ;;  %v11909_v28 = vsel %vm1682_vm4, %v25665_v4, 0.0 }
0x223b   : > { %v11900_v3 = vsel %vm1682_vm4, %v25667_v55, 0.0 }
0x223d   : > { %v25671_v42 = vpop.eup %22224 }
0x223e   : > { %v25675_v41 = vpop.eup %22226  ;;  %v11903_v33 = vsel %vm1682_vm4, %v25671_v42, 0.0 }
0x223f   : > { %v11912_v35 = vsel %vm1682_vm4, %v25675_v41, 0.0  ;;  %v25681_v46 = vpop.eup %22228 }
0x2240   : > { %v11906_v19 = vsel %vm1682_vm4, %v25681_v46, 0.0 }
0x2246   : > { %11895 = vadd.xlane.f32.xlu1 %v11894_v24 }
0x224a   : > { %11898 = vadd.xlane.f32.xlu1 %v11897_v10 }
0x224e   : > { %11892 = vadd.xlane.f32.xlu1 %v11891_v13 }
0x2252   : > { %11910 = vadd.xlane.f32.xlu1 %v11909_v28 }
0x2255   : > { %11901 = vadd.xlane.f32.xlu0 %v11900_v3 }
0x2256   : > { %11904 = vadd.xlane.f32.xlu1 %v11903_v33 }
0x2259   : > { %11913 = vadd.xlane.f32.xlu0 %v11912_v35 }
0x225d   : > { %11907 = vadd.xlane.f32.xlu0 %v11906_v19 }
0x228e   : > { %v12302_v40 = vpop.xlane.xlu1 %12301 }
0x228f   : > { %v12318_v38 = vsub.f32 %v25592_v18, %v12302_v40  ;;  %v12299_v59 = vpop.xlane.xlu0 %12298 }
0x2290   : > { %v12317_v50 = vsub.f32 %v25594_v26, %v12299_v59 }
0x2291   : > { %v12329_v49 = vmul.f32 1.442695, %v12318_v38 }
0x2292   : > { %v12327_v61 = vmul.f32 1.442695, %v12317_v50  ;;  %v12296_v6 = vpop.xlane.xlu1 %12295 }
0x2293   : > { %22230 = vpow2.f32 %v12329_v49  ;;  %v12316_v0 = vsub.f32 %v25596_v45, %v12296_v6  ;;  %v12293_v39 = vpop.xlane.xlu0 %12292 }
0x2294   : > { %v12315_v29 = vsub.f32 %v25600_v47, %v12293_v39  ;;  %22232 = vpow2.f32 %v12327_v61 }
0x2295   : > { %v12325_v12 = vmul.f32 1.442695, %v12316_v0 }
0x2296   : > { %v12323_v57 = vmul.f32 1.442695, %v12315_v29  ;;  %v25689_v48 = vpop.permute.xlu1 %12554 }
0x2297   : > { %22234 = vpow2.f32 %v12325_v12  ;;  %20339 = vmatprep.subr.mxu1 %v25689_v48 }
0x2298   : > { %22236 = vpow2.f32 %v12323_v57 }
0x2299   : > { %v12314_v18 = vpop.xlane.xlu0 %12313 }
0x229a   : > { %v12322_v26 = vsub.f32 %v25608_v31, %v12314_v18  ;;  %v25752_v49 = vpop.permute.xlu1 %12724 }
0x229c   : > { %v12337_v8 = vmul.f32 1.442695, %v12322_v26 }
0x229d   : > { %v25693_v32 = vpop.eup %22230  ;;  %v12308_v30 = vpop.xlane.xlu0 %12307 }
0x229e   : > { %22238 = vpow2.f32 %v12337_v8  ;;  %v12320_v45 = vsub.f32 %v25610_v22, %v12308_v30  ;;  %v12348_v47 = vsel %vm1682_vm4, %v25693_v32, 0.0  ;;  %v25698_v25 = vpop.eup %22232  ;;  %v25754_v61 = vpop.permute.xlu1 %12894 }
0x229f   : > { %12349 = vadd.xlane.f32.xlu1 %v12348_v47  ;;  %v12345_v24 = vsel %vm1682_vm4, %v25698_v25, 0.0 }
0x22a0   : > { %v12333_v53 = vmul.f32 1.442695, %v12320_v45 }
0x22a1   : > { %v25700_v7 = vpop.eup %22234  ;;  %v12311_v58 = vpop.xlane.xlu0 %12310 }
0x22a2   : > { %22240 = vpow2.f32 %v12333_v53  ;;  %v12321_v31 = vsub.f32 %v25614_v21, %v12311_v58  ;;  %v12342_v52 = vsel %vm1682_vm4, %v25700_v7, 0.0  ;;  %v25707_v22 = vpop.eup %22236  ;;  %v25756_v6 = vpop.permute.xlu1 %12979 }
0x22a3   : > { %12346 = vadd.xlane.f32.xlu1 %v12345_v24  ;;  %12343 = vadd.xlane.f32.xlu0 %v12342_v52  ;;  %v12339_v13 = vsel %vm1682_vm4, %v25707_v22, 0.0 }
0x22a4   : > { %v12335_v54 = vmul.f32 1.442695, %v12321_v31 }
0x22a5   : > { %v12305_v10 = vpop.xlane.xlu0 %12304 }
0x22a6   : > { %22242 = vpow2.f32 %v12335_v54  ;;  %v12319_v16 = vsub.f32 %v25618_v9, %v12305_v10 }
0x22a7   : > { %12340 = vadd.xlane.f32.xlu1 %v12339_v13 }
0x22a8   : > { %v25712_v21 = vpop.eup %22238  ;;  %v12331_v28 = vmul.f32 1.442695, %v12319_v16 }
0x22a9   : > { %v12470_v3 = vpop.permute.xlu0 %12469  ;;  %v12360_v33 = vsel %vm1682_vm4, %v25712_v21, 0.0 }
0x22aa   : > { %22244 = vpow2.f32 %v12331_v28  ;;  %20334 = vmatprep.subr.mxu0 %v12470_v3  ;;  %12361 = vadd.xlane.f32.xlu0 %v12360_v33 }
0x22ab   : > { %20335 = vmatpush3.msra.mxu0 %v12470_v3 }
0x22ac   : > { %v25716_v35 = vpop.eup %22240 }
0x22ad   : > { %v12640_v19 = vpop.permute.xlu0 %12639  ;;  %v12354_v9 = vsel %vm1682_vm4, %v25716_v35, 0.0 }
0x22ae   : > { %20344 = vmatprep.subr.mxu0 %v12640_v19  ;;  %12355 = vadd.xlane.f32.xlu0 %v12354_v9 }
0x22b0   : > { %v25720_v40 = vpop.eup %22242 }
0x22b1   : > { %v12357_v38 = vsel %vm1682_vm4, %v25720_v40, 0.0  ;;  %v25758_v12 = vpop.permute.xlu0 %12809 }
0x22b2   : > { %12358 = vadd.xlane.f32.xlu0 %v12357_v38 }
0x22b4   : > { %v25724_v59 = vpop.eup %22244 }
0x22b5   : > { %v12351_v50 = vsel %vm1682_vm4, %v25724_v59, 0.0 }
0x22b6   : > { %12352 = vadd.xlane.f32.xlu0 %v12351_v50 }
0x22b8   : > { %13063 = vrot.lane.b32.xlu1 %v25455_v5, %s26584_s0 }
0x22bc   : > { %13154 = vrot.lane.b32.xlu1 %v25491_v56, %s26584_s0 }
0x22c0   : > { %13150 = vrot.lane.b32.xlu1 %v25463_v36, %s26584_s0 }
0x22c4   : > { %13237 = vrot.lane.b32.xlu1 %v25471_v60, %s26584_s0 }
0x22c8   : > { %13328 = vrot.lane.b32.xlu1 %v25503_v62, %s26584_s0 }
0x22cc   : > { %13067 = vrot.lane.b32.xlu0 %v25493_v51, %s26584_s0  ;;  %13326 = vrot.lane.b32.xlu1 %v25477_v43, %s26584_s0 }
0x22d0   : > { %13065 = vrot.lane.b32.xlu0 %v25453_v14, %s26584_s0 }
0x22d3   : > { %v11896_v0 = vpop.xlane.xlu1 %11895 }
0x22d4   : > { %13241 = vrot.lane.b32.xlu0 %v25507_v27, %s26584_s0 }
0x22d7   : > { %v11899_v39 = vpop.xlane.xlu1 %11898 }
0x22d8   : > { %13152 = vrot.lane.b32.xlu0 %v25461_v63, %s26584_s0 }
0x22db   : > { %v11893_v29 = vpop.xlane.xlu1 %11892 }
0x22dc   : > { %13239 = vrot.lane.b32.xlu0 %v25469_v1, %s26584_s0 }
0x22df   : > { %v11911_v18 = vpop.xlane.xlu1 %11910 }
0x22e0   : > { %13324 = vrot.lane.b32.xlu0 %v25479_v2, %s26584_s0  ;;  %s26675_s0 = smov 104  }
0x22e2   : > { %v11902_v57 = vpop.xlane.xlu0 %11901 }
0x22e3   : > { %v11905_v8 = vpop.xlane.xlu1 %11904 }
0x22e6   : > { %v11914_v26 = vpop.xlane.xlu0 %11913 }
0x22ea   : > { %v11908_v45 = vpop.xlane.xlu0 %11907 }
0x232c   : > { %v12350_v30 = vpop.xlane.xlu1 %12349 }
0x232d   : > { %22246 = vrcp.f32 %v12350_v30 }
0x2330   : > { %v12347_v47 = vpop.xlane.xlu1 %12346  ;;  %v12344_v53 = vpop.xlane.xlu0 %12343 }
0x2331   : > { %22248 = vrcp.f32 %v12347_v47 }
0x2332   : > { %22250 = vrcp.f32 %v12344_v53 }
0x2334   : > { %v12341_v58 = vpop.xlane.xlu1 %12340 }
0x2335   : > { %22252 = vrcp.f32 %v12341_v58 }
0x2336   : > { %22254 = vrcp.f32 %v11899_v39 }
0x2337   : > { %v12362_v31 = vpop.xlane.xlu0 %12361  ;;  %v22247_v24 = vpop.eup %22246 }
0x2338   : > { %v12374_v13 = vmul.f32 %v22247_v24, %v25693_v32  ;;  %22256 = vrcp.f32 %v12362_v31 }
0x233b   : > { %v12356_v52 = vpop.xlane.xlu0 %12355  ;;  %v22249_v54 = vpop.eup %22248 }
0x233c   : > { %v12373_v10 = vmul.f32 %v22249_v54, %v25698_v25  ;;  %v22251_v16 = vpop.eup %22250  ;;  %v25766_v25 = vpop.permute.xlu1 %13063 }
0x233d   : > { %v12372_v9 = vmul.f32 %v22251_v16, %v25700_v7 }
0x233e   : > { %20336 = vmatprep.mubr.msk.f32.mxu0 %vm1682_vm4, %v12373_v10 }
0x233f   : > { %v22253_v28 = vpop.eup %22252  ;;  %v12359_v3 = vpop.xlane.xlu0 %12358  ;;  %20337 = vmatmul.mubr.msk.f32.vlgmr.msra.gmra.mrb[120].mxu0 %vm1682_vm4, %v12374_v13 }
0x2340   : > { %22258 = vrcp.f32 %v12359_v3  ;;  %v12371_v33 = vmul.f32 %v22253_v28, %v25707_v22  ;;  %20345 = vmatpush3.msra.mxu0 %v12640_v19  ;;  %v22255_v22 = vpop.eup %22254  ;;  %v13155_v19 = vpop.permute.xlu1 %13154 }
0x2341   : > { %22260 = vrcp.f32 %v11896_v0  ;;  %20354 = vmatprep.subr.mxu0 %v25758_v12 }
0x2342   : > { %22262 = vrcp.f32 %v11902_v57  ;;  %20331 = vmatprep.mubr.msk.f32.mxu1 %vm1682_vm4, %v12371_v33  ;;  %v22257_v38 = vpop.eup %22256 }
0x2343   : > { %22264 = vrcp.f32 %v12356_v52  ;;  %v12353_v32 = vpop.xlane.xlu0 %12352  ;;  %20332 = vmatmul.mubr.msk.f32.vlgmr.msra.gmra.mrb[124].mxu1 %vm1682_vm4, %v12372_v9  ;;  %v12378_v47 = vmul.f32 %v22257_v38, %v25712_v21 }
0x2344   : > { %22266 = vrcp.f32 %v12353_v32  ;;  %20340 = vmatpush3.msra.mxu1 %v25689_v48 }
0x2345   : > { %22268 = vrcp.f32 %v11893_v29  ;;  %20349 = vmatprep.subr.mxu1 %v25752_v49  ;;  %v11925_v29 = vmul.f32 %v22255_v22, %v25656_v15 }
0x2346   : > { %22270 = vrcp.f32 %v11911_v18 }
0x2347   : > { %22272 = vrcp.f32 %v11914_v26  ;;  %v13068_v7 = vpop.permute.xlu0 %13067  ;;  %v13151_v26 = vpop.permute.xlu1 %13150 }
0x2348   : > { %22274 = vrcp.f32 %v11905_v8 }
0x2349   : > { %22276 = vrcp.f32 %v11908_v45 }
0x234a   : > { %v22259_v50 = vpop.eup %22258 }
0x234b   : > { %v22261_v0 = vpop.eup %22260  ;;  %v13066_v39 = vpop.permute.xlu0 %13065  ;;  %v12377_v57 = vmul.f32 %v22259_v50, %v25720_v40 }
0x234c   : > { %v22263_v30 = vpop.eup %22262 }
0x234d   : > { %v22265_v48 = vpop.eup %22264  ;;  %20346 = vmatprep.mubr.msk.f32.mxu0 %vm1682_vm4, %v12377_v57  ;;  %v11926_v58 = vmul.f32 %v22263_v30, %v25667_v55  ;;  %v11924_v55 = vmul.f32 %v22261_v0, %v25651_v20  ;;  %v26674_v30 = vld [vmem:[#allocation81_spill] sm:$0xff] }
0x234e   : > { %v22267_v18 = vpop.eup %22266  ;;  %20347 = vmatmul.mubr.msk.f32.vlgmr.msra.gmra.mrb[122].mxu0 %vm1682_vm4, %v12378_v47  ;;  %v12376_v21 = vmul.f32 %v22265_v48, %v25716_v35  ;;  %v13238_v35 = vpop.permute.xlu1 %13237  ;;  %v13507_v47 = vmul.f32 %v25493_v51, %v26674_v30  ;;  %v13508_v48 = vmul.f32 %v25491_v56, %v26674_v30 }
0x234f   : > { %v22269_v8 = vpop.eup %22268  ;;  %20355 = vmatpush3.msra.mxu0 %v25758_v12  ;;  %v13242_v53 = vpop.permute.xlu0 %13241  ;;  %20356 = vmatprep.mubr.msk.f32.mxu0 %vm1682_vm4, %v11925_v29  ;;  %v12375_v40 = vmul.f32 %v22267_v18, %v25724_v59  ;;  %v13510_v29 = vmul.f32 %v25503_v62, %v26674_v30  ;;  %v13509_v18 = vmul.f32 %v25507_v27, %v26674_v30 }
0x2350   : > { %v22271_v45 = vpop.eup %22270  ;;  %20364 = vmatprep.subr.mxu0 %v25756_v6  ;;  %v11923_v12 = vmul.f32 %v22269_v8, %v25661_v17 }
0x2351   : > { %v22273_v15 = vpop.eup %22272  ;;  %20341 = vmatprep.mubr.msk.f32.mxu1 %vm1682_vm4, %v12375_v40  ;;  %v11929_v24 = vmul.f32 %v22271_v45, %v25665_v4 }
0x2352   : > { %v22275_v31 = vpop.eup %22274  ;;  %20342 = vmatmul.mubr.msk.f32.vlgmr.msra.gmra.mrb[126].mxu1 %vm1682_vm4, %v12376_v21  ;;  %20357 = vmatmul.mubr.msk.f32.vlgmr.msra.gmra.mrb[120].mxu0 %vm1682_vm4, %v11926_v58  ;;  %v11930_v52 = vmul.f32 %v22273_v15, %v25675_v41  ;;  %v13329_v41 = vpop.permute.xlu1 %13328 }
0x2353   : > { %20350 = vmatpush3.msra.mxu1 %v25752_v49  ;;  %20365 = vmatpush3.msra.mxu0 %v25756_v6  ;;  %v13153_v59 = vpop.permute.xlu0 %13152  ;;  %v22277_v54 = vpop.eup %22276  ;;  %v11927_v17 = vmul.f32 %v22275_v31, %v25671_v42 }
0x2354   : > { %20351 = vmatprep.mubr.msk.f32.mxu1 %vm1682_vm4, %v11923_v12  ;;  %20359 = vmatprep.subr.mxu1 %v25754_v61  ;;  %v11928_v20 = vmul.f32 %v22277_v54, %v25681_v46 }
0x2355   : > { %20366 = vmatprep.mubr.msk.f32.mxu0 %vm1682_vm4, %v11929_v24  ;;  %20374 = vmatprep.subr.msk.mxu0 %vm1682_vm4, %v13155_v19 }
0x2356   : > { %20352 = vmatmul.mubr.msk.f32.vlgmr.msra.gmra.mrb[124].mxu1 %vm1682_vm4, %v11924_v55  ;;  %20367 = vmatmul.mubr.msk.f32.vlgmr.msra.gmra.mrb[122].mxu0 %vm1682_vm4, %v11930_v52  ;;  %v13327_v46 = vpop.permute.xlu1 %13326 }
0x2357   : > { %20360 = vmatpush3.msra.mxu1 %v25754_v61  ;;  %v13240_v4 = vpop.permute.xlu0 %13239  ;;  %20361 = vmatprep.mubr.msk.f32.mxu1 %vm1682_vm4, %v11927_v17 }
0x2358   : > { %20369 = vmatprep.subr.msk.mxu1 %vm1682_vm4, %v13068_v7  ;;  %20376 = vmatprep.mubr.msk.f32.mxu0 %vm1682_vm4, %v13151_v26 }
0x235a   : > { %20375 = vmatpush3.xpose.msk.msra.mxu0 %vm1682_vm4, %v13155_v19  ;;  %20362 = vmatmul.mubr.msk.f32.vlgmr.msra.gmra.mrb[126].mxu1 %vm1682_vm4, %v11928_v20 }
0x235b   : > { %20384 = vmatprep.subr.msk.mxu0 %vm1682_vm4, %v13329_v41  ;;  %20371 = vmatprep.mubr.msk.f32.mxu1 %vm1682_vm4, %v25766_v25  ;;  %v13325_v42 = vpop.permute.xlu0 %13324 }
0x235d   : > { %20377 = vmatmul.mubr.msk.f32.vlgmr.msra.gmra.mrb[124].mxu0 %vm1682_vm4, %v13153_v59 }
0x235e   : > { %20370 = vmatpush3.xpose.msk.msra.mxu1 %vm1682_vm4, %v13068_v7  ;;  %20385 = vmatpush3.xpose.msk.msra.mxu0 %vm1682_vm4, %v13329_v41 }
0x235f   : > { %20386 = vmatprep.mubr.msk.f32.mxu0 %vm1682_vm4, %v13325_v42  ;;  %20379 = vmatprep.subr.msk.mxu1 %vm1682_vm4, %v13242_v53 }
0x2361   : > { %20372 = vmatmul.mubr.msk.f32.vlgmr.msra.gmra.mrb[128].mxu1 %vm1682_vm4, %v13066_v39  ;;  %20387 = vmatmul.mubr.msk.f32.vlgmr.msra.gmra.mrb[126].mxu0 %vm1682_vm4, %v13327_v46 }
0x2362   : > { %20380 = vmatpush3.xpose.msk.msra.mxu1 %vm1682_vm4, %v13242_v53  ;;  %20381 = vmatprep.mubr.msk.f32.mxu1 %vm1682_vm4, %v13238_v35 }
0x2365   : > { %20382 = vmatmul.mubr.msk.f32.vlgmr.msra.gmra.mrb[130].mxu1 %vm1682_vm4, %v13240_v4 }
0x2430   : > { %v20378_v49 = vpop.f32.mrb[124].mxu0 }
0x2431   : > { %v13228_v61 = vpop.f32.mrb[125].mxu0  ;;  %v13414_v32 = vmul.f32 0.17677669, %v20378_v49 }
0x2432   : > { %v13413_v6 = vmul.f32 0.17677669, %v13228_v61 }
0x2433   : > { %v13428_v50 = vsel %vm1682_vm4, %v13414_v32, -inf }
0x2434   : > { %v20373_v10 = vpop.f32.mrb[128].mxu1  ;;  %v20388_v16 = vpop.f32.mrb[126].mxu0  ;;  %v13425_v13 = vsel %vm1682_vm4, %v13413_v6, -inf }
0x2435   : > { %v13412_v28 = vmul.f32 0.17677669, %v20373_v10  ;;  %v13141_v3 = vpop.f32.mrb[129].mxu1  ;;  %13426 = vmax.xlane.f32.xlu0 %v13425_v13  ;;  %v13402_v33 = vpop.f32.mrb[127].mxu0  ;;  %v13418_v0 = vmul.f32 0.17677669, %v20388_v16 }
0x2436   : > { %v13411_v9 = vmul.f32 0.17677669, %v13141_v3  ;;  %v25844_v26 = vmul.f32 0.17677669, %v13402_v33 }
0x2437   : > { %v13422_v25 = vsel %vm1682_vm4, %v13412_v28, -inf  ;;  %v13440_v57 = vsel %vm1682_vm4, %v13418_v0, -inf }
0x2438   : > { %13423 = vmax.xlane.f32.xlu1 %v13422_v25  ;;  %v20383_v7 = vpop.f32.mrb[130].mxu1  ;;  %v13419_v22 = vsel %vm1682_vm4, %v13411_v9, -inf  ;;  %v13437_v53 = vsel %vm1682_vm4, %v25844_v26, -inf }
0x2439   : > { %13420 = vmax.xlane.f32.xlu0 %v13419_v22  ;;  %v13315_v19 = vpop.f32.mrb[131].mxu1  ;;  %v13416_v38 = vmul.f32 0.17677669, %v20383_v7 }
0x243a   : > { %v25846_v8 = vmul.f32 0.17677669, %v13315_v19 }
0x243b   : > { %v13434_v39 = vsel %vm1682_vm4, %v13416_v38, -inf }
0x243c   : > { %v13431_v40 = vsel %vm1682_vm4, %v25846_v8, -inf }
0x243d   : > { %13429 = vmax.xlane.f32.xlu0 %v13428_v50 }
0x2441   : > { %13435 = vmax.xlane.f32.xlu0 %v13434_v39 }
0x2445   : > { %13441 = vmax.xlane.f32.xlu0 %v13440_v57 }
0x2449   : > { %13512 = vrot.lane.b32.xlu1 %v13507_v47, %s23242_s8 }
0x244d   : > { %13597 = vrot.lane.b32.xlu1 %v13508_v48, %s23242_s8 }
0x2451   : > { %13767 = vrot.lane.b32.xlu1 %v13510_v29, %s23242_s8 }
0x2455   : > { %13859 = vrot.lane.b32.xlu1 %v25455_v5, %s26675_s0 }
0x245b   : > { %13682 = vrot.lane.b32.xlu0 %v13509_v18, %s23242_s8 }
0x245f   : > { %13863 = vrot.lane.b32.xlu0 %v25493_v51, %s26675_s0 }
0x2463   : > { %13861 = vrot.lane.b32.xlu0 %v25453_v14, %s26675_s0 }
0x2479   : > { %13438 = vmax.xlane.f32.xlu1 %v13437_v53 }
0x247d   : > { %13432 = vmax.xlane.f32.xlu1 %v13431_v40 }
0x248e   : > { %13950 = vrot.lane.b32.xlu1 %v25491_v56, %s26675_s0 }
0x24c2   : > { %v13427_v45 = vpop.xlane.xlu0 %13426 }
0x24c3   : > { %v13445_v21 = vsub.f32 %v13413_v6, %v13427_v45 }
0x24c5   : > { %v13455_v58 = vmul.f32 1.442695, %v13445_v21  ;;  %v13424_v15 = vpop.xlane.xlu1 %13423 }
0x24c6   : > { %v13421_v31 = vpop.xlane.xlu0 %13420  ;;  %v13444_v59 = vsub.f32 %v13412_v28, %v13424_v15 }
0x24c7   : > { %22278 = vpow2.f32 %v13455_v58  ;;  %v13443_v12 = vsub.f32 %v13411_v9, %v13421_v31 }
0x24c8   : > { %v13453_v54 = vmul.f32 1.442695, %v13444_v59 }
0x24c9   : > { %v13451_v24 = vmul.f32 1.442695, %v13443_v12  ;;  %v13513_v35 = vpop.permute.xlu1 %13512 }
0x24ca   : > { %v13430_v55 = vpop.xlane.xlu0 %13429  ;;  %20389 = vmatprep.subr.mxu1 %v13513_v35 }
0x24cb   : > { %22280 = vpow2.f32 %v13451_v24  ;;  %v13446_v52 = vsub.f32 %v13414_v32, %v13430_v55  ;;  %20390 = vmatpush3.msra.mxu1 %v13513_v35 }
0x24cd   : > { %v13457_v17 = vmul.f32 1.442695, %v13446_v52  ;;  %v13598_v4 = vpop.permute.xlu1 %13597 }
0x24ce   : > { %v13436_v20 = vpop.xlane.xlu0 %13435  ;;  %20394 = vmatprep.subr.mxu0 %v13598_v4 }
0x24cf   : > { %22282 = vpow2.f32 %v13457_v17  ;;  %20395 = vmatpush3.msra.mxu0 %v13598_v4  ;;  %v13448_v42 = vsub.f32 %v13416_v38, %v13436_v20 }
0x24d0   : > { %22284 = vpow2.f32 %v13453_v54 }
0x24d1   : > { %v25854_v41 = vpop.eup %22278  ;;  %v25856_v46 = vpop.permute.xlu1 %13767  ;;  %v13461_v16 = vmul.f32 1.442695, %v13448_v42 }
0x24d2   : > { %v13442_v49 = vpop.xlane.xlu0 %13441  ;;  %20404 = vmatprep.subr.mxu0 %v25856_v46  ;;  %v13473_v61 = vsel %vm1682_vm4, %v25854_v41, 0.0 }
0x24d3   : > { %v13450_v6 = vsub.f32 %v13418_v0, %v13442_v49  ;;  %13474 = vadd.xlane.f32.xlu1 %v13473_v61 }
0x24d5   : > { %v22281_v10 = vpop.eup %22280  ;;  %v13465_v13 = vmul.f32 1.442695, %v13450_v6  ;;  %v25881_v50 = vpop.permute.xlu1 %13859 }
0x24d6   : > { %v25861_v28 = vpop.permute.xlu0 %13682  ;;  %v13467_v3 = vsel %vm1682_vm4, %v22281_v10, 0.0 }
0x24d7   : > { %22286 = vpow2.f32 %v13465_v13  ;;  %13468 = vadd.xlane.f32.xlu1 %v13467_v3  ;;  %20399 = vmatprep.subr.mxu1 %v25861_v28 }
0x24d8   : > { %22288 = vpow2.f32 %v13461_v16 }
0x24d9   : > { %v22283_v33 = vpop.eup %22282 }
0x24da   : > { %v13476_v9 = vsel %vm1682_vm4, %v22283_v33, 0.0  ;;  %v22285_v25 = vpop.eup %22284 }
0x24db   : > { %13477 = vadd.xlane.f32.xlu0 %v13476_v9  ;;  %v13470_v32 = vsel %vm1682_vm4, %v22285_v25, 0.0 }
0x24df   : > { %13471 = vadd.xlane.f32.xlu0 %v13470_v32 }
0x24e1   : > { %v25867_v7 = vpop.eup %22286 }
0x24e2   : > { %v13488_v22 = vsel %vm1682_vm4, %v25867_v7, 0.0  ;;  %v25871_v19 = vpop.eup %22288 }
0x24e3   : > { %13489 = vadd.xlane.f32.xlu0 %v13488_v22  ;;  %v13482_v38 = vsel %vm1682_vm4, %v25871_v19, 0.0 }
0x24e7   : > { %13483 = vadd.xlane.f32.xlu0 %v13482_v38 }
0x24e8   : > { %13948 = vrot.lane.b32.xlu1 %v25461_v63, %s26675_s0 }
0x24fd   : > { %13946 = vrot.lane.b32.xlu0 %v25463_v36, %s26675_s0 }
0x2501   : > { %14037 = vrot.lane.b32.xlu0 %v25507_v27, %s26675_s0 }
0x2505   : > { %14035 = vrot.lane.b32.xlu0 %v25469_v1, %s26675_s0 }
0x2506   : > { %v13439_v0 = vpop.xlane.xlu1 %13438 }
0x2507   : > { %v13449_v39 = vsub.f32 %v25844_v26, %v13439_v0 }
0x2509   : > { %v13463_v57 = vmul.f32 1.442695, %v13449_v39  ;;  %14120 = vrot.lane.b32.xlu0 %v25479_v2, %s26675_s0 }
0x250a   : > { %v13433_v47 = vpop.xlane.xlu1 %13432 }
0x250b   : > { %22290 = vpow2.f32 %v13463_v57  ;;  %v13447_v48 = vsub.f32 %v25846_v8, %v13433_v47  ;;  %v13864_v8 = vpop.permute.xlu0 %13863 }
0x250d   : > { %v13459_v29 = vmul.f32 1.442695, %v13447_v48 }
0x250e   : > { %v13951_v26 = vpop.permute.xlu1 %13950 }
0x250f   : > { %22292 = vpow2.f32 %v13459_v29  ;;  %v13862_v58 = vpop.permute.xlu0 %13861 }
0x2515   : > { %v22291_v18 = vpop.eup %22290 }
0x2516   : > { %v13485_v53 = vsel %vm1682_vm4, %v22291_v18, 0.0 }
0x2517   : > { %13486 = vadd.xlane.f32.xlu1 %v13485_v53 }
0x2519   : > { %v22293_v40 = vpop.eup %22292 }
0x251a   : > { %v13479_v45 = vsel %vm1682_vm4, %v22293_v40, 0.0 }
0x251b   : > { %13480 = vadd.xlane.f32.xlu1 %v13479_v45 }
0x252c   : > { %14033 = vrot.lane.b32.xlu1 %v25471_v60, %s26675_s0 }
0x2530   : > { %14124 = vrot.lane.b32.xlu1 %v25503_v62, %s26675_s0 }
0x2534   : > { %14122 = vrot.lane.b32.xlu1 %v25477_v43, %s26675_s0 }
0x2560   : > { %v13475_v21 = vpop.xlane.xlu1 %13474 }
0x2561   : > { %22294 = vrcp.f32 %v13475_v21 }
0x2564   : > { %v13469_v15 = vpop.xlane.xlu1 %13468 }
0x2565   : > { %22296 = vrcp.f32 %v13469_v15 }
0x2568   : > { %v13478_v31 = vpop.xlane.xlu0 %13477 }
0x2569   : > { %22298 = vrcp.f32 %v13478_v31 }
0x256b   : > { %v22295_v12 = vpop.eup %22294 }
0x256c   : > { %v13472_v59 = vpop.xlane.xlu0 %13471  ;;  %v13501_v24 = vmul.f32 %v22295_v12, %v25854_v41  ;;  %v13949_v41 = vpop.permute.xlu1 %13948 }
0x256d   : > { %22300 = vrcp.f32 %v13472_v59 }
0x256e   : > { %20396 = vmatprep.mubr.msk.f32.mxu0 %vm1682_vm4, %v13501_v24 }
0x256f   : > { %v22297_v35 = vpop.eup %22296 }
0x2570   : > { %v13499_v55 = vmul.f32 %v22297_v35, %v22281_v10  ;;  %v13490_v20 = vpop.xlane.xlu0 %13489 }
0x2571   : > { %22302 = vrcp.f32 %v13490_v20 }
0x2572   : > { %20391 = vmatprep.mubr.msk.f32.mxu1 %vm1682_vm4, %v13499_v55 }
0x2573   : > { %v22299_v52 = vpop.eup %22298 }
0x2574   : > { %v13502_v54 = vmul.f32 %v22299_v52, %v22283_v33  ;;  %v13484_v42 = vpop.xlane.xlu0 %13483 }
0x2576   : > { %20397 = vmatmul.mubr.msk.f32.vlgmr.msra.gmra.mrb[120].mxu0 %vm1682_vm4, %v13502_v54 }
0x2577   : > { %v22301_v17 = vpop.eup %22300  ;;  %20405 = vmatpush3.msra.mxu0 %v25856_v46 }
0x2578   : > { %v13500_v4 = vmul.f32 %v22301_v17, %v22285_v25  ;;  %20414 = vmatprep.subr.msk.mxu0 %vm1682_vm4, %v13951_v26  ;;  %v13947_v61 = vpop.permute.xlu0 %13946  ;;  %v26676_v17 = vld [vmem:[#allocation82_spill] sm:$0xff] }
0x257a   : > { %20392 = vmatmul.mubr.msk.f32.vlgmr.msra.gmra.mrb[124].mxu1 %vm1682_vm4, %v13500_v4  ;;  %v14303_v4 = vmul.f32 %v25493_v51, %v26676_v17 }
0x257b   : > { %20400 = vmatpush3.msra.mxu1 %v25861_v28  ;;  %v22303_v10 = vpop.eup %22302 }
0x257c   : > { %20409 = vmatprep.subr.msk.mxu1 %vm1682_vm4, %v13864_v8  ;;  %v14038_v46 = vpop.permute.xlu0 %14037  ;;  %v13506_v33 = vmul.f32 %v22303_v10, %v25867_v7 }
0x2580   : > { %v14036_v25 = vpop.permute.xlu0 %14035 }
0x2584   : > { %v14121_v7 = vpop.permute.xlu0 %14120 }
0x25a4   : > { %v13487_v49 = vpop.xlane.xlu1 %13486 }
0x25a5   : > { %22304 = vrcp.f32 %v13487_v49 }
0x25a6   : > { %22306 = vrcp.f32 %v13484_v42 }
0x25a8   : > { %v13481_v6 = vpop.xlane.xlu1 %13480 }
0x25a9   : > { %22308 = vrcp.f32 %v13481_v6 }
0x25ac   : > { %v14034_v16 = vpop.permute.xlu1 %14033 }
0x25af   : > { %v22305_v13 = vpop.eup %22304 }
0x25b0   : > { %v13505_v3 = vmul.f32 %v22305_v13, %v22291_v18  ;;  %v22307_v28 = vpop.eup %22306  ;;  %v14125_v32 = vpop.permute.xlu1 %14124 }
0x25b1   : > { %v13504_v38 = vmul.f32 %v22307_v28, %v25871_v19 }
0x25b2   : > { %20406 = vmatprep.mubr.msk.f32.mxu0 %vm1682_vm4, %v13505_v3 }
0x25b3   : > { %v22309_v9 = vpop.eup %22308  ;;  %20407 = vmatmul.mubr.msk.f32.vlgmr.msra.gmra.mrb[122].mxu0 %vm1682_vm4, %v13506_v33 }
0x25b4   : > { %20415 = vmatpush3.xpose.msk.msra.mxu0 %vm1682_vm4, %v13951_v26  ;;  %20416 = vmatprep.mubr.msk.f32.mxu0 %vm1682_vm4, %v13947_v61  ;;  %v13503_v22 = vmul.f32 %v22309_v9, %v22293_v40  ;;  %v14123_v0 = vpop.permute.xlu1 %14122 }
0x25b5   : > { %20424 = vmatprep.subr.msk.mxu0 %vm1682_vm4, %v14125_v32 }
0x25b6   : > { %20401 = vmatprep.mubr.msk.f32.mxu1 %vm1682_vm4, %v13503_v22 }
0x25b7   : > { %20402 = vmatmul.mubr.msk.f32.vlgmr.msra.gmra.mrb[126].mxu1 %vm1682_vm4, %v13504_v38  ;;  %20417 = vmatmul.mubr.msk.f32.vlgmr.msra.gmra.mrb[128].mxu0 %vm1682_vm4, %v13949_v41 }
0x25b8   : > { %20410 = vmatpush3.xpose.msk.msra.mxu1 %vm1682_vm4, %v13864_v8  ;;  %20425 = vmatpush3.xpose.msk.msra.mxu0 %vm1682_vm4, %v14125_v32 }
0x25b9   : > { %20411 = vmatprep.mubr.msk.f32.mxu1 %vm1682_vm4, %v25881_v50  ;;  %20419 = vmatprep.subr.msk.mxu1 %vm1682_vm4, %v14038_v46 }
0x25ba   : > { %20426 = vmatprep.mubr.msk.f32.mxu0 %vm1682_vm4, %v14121_v7 }
0x25bb   : > { %20412 = vmatmul.mubr.msk.f32.vlgmr.msra.gmra.mrb[132].mxu1 %vm1682_vm4, %v13862_v58  ;;  %20427 = vmatmul.mubr.msk.f32.vlgmr.msra.gmra.mrb[130].mxu0 %vm1682_vm4, %v14123_v0 }
0x25bc   : > { %20420 = vmatpush3.xpose.msk.msra.mxu1 %vm1682_vm4, %v14038_v46  ;;  %20421 = vmatprep.mubr.msk.f32.mxu1 %vm1682_vm4, %v14034_v16 }
0x25bf   : > { %20422 = vmatmul.mubr.msk.f32.vlgmr.msra.gmra.mrb[134].mxu1 %vm1682_vm4, %v14036_v25 }
0x268a   : > { %v20418_v19 = vpop.f32.mrb[128].mxu0 }
0x268b   : > { %v14024_v39 = vpop.f32.mrb[129].mxu0  ;;  %v14210_v31 = vmul.f32 0.17677669, %v20418_v19 }
0x268c   : > { %v14209_v45 = vmul.f32 0.17677669, %v14024_v39 }
0x268d   : > { %v14224_v35 = vsel %vm1682_vm4, %v14210_v31, -inf }
0x268e   : > { %v20413_v57 = vpop.f32.mrb[132].mxu1  ;;  %v20428_v47 = vpop.f32.mrb[130].mxu0  ;;  %v14221_v12 = vsel %vm1682_vm4, %v14209_v45, -inf }
0x268f   : > { %v14208_v50 = vmul.f32 0.17677669, %v20413_v57  ;;  %v13937_v48 = vpop.f32.mrb[133].mxu1  ;;  %v14198_v29 = vpop.f32.mrb[131].mxu0  ;;  %v14214_v55 = vmul.f32 0.17677669, %v20428_v47 }
0x2690   : > { %v14207_v18 = vmul.f32 0.17677669, %v13937_v48  ;;  %v25927_v53 = vmul.f32 0.17677669, %v14198_v29 }
0x2691   : > { %v14218_v40 = vsel %vm1682_vm4, %v14208_v50, -inf  ;;  %v14236_v54 = vsel %vm1682_vm4, %v14214_v55, -inf }
0x2692   : > { %14219 = vmax.xlane.f32.xlu1 %v14218_v40  ;;  %v20423_v26 = vpop.f32.mrb[134].mxu1  ;;  %v14215_v8 = vsel %vm1682_vm4, %v14207_v18, -inf  ;;  %v14233_v15 = vsel %vm1682_vm4, %v25927_v53, -inf }
0x2693   : > { %14216 = vmax.xlane.f32.xlu0 %v14215_v8  ;;  %v14111_v21 = vpop.f32.mrb[135].mxu1  ;;  %v14212_v24 = vmul.f32 0.17677669, %v20423_v26 }
0x2694   : > { %v25931_v58 = vmul.f32 0.17677669, %v14111_v21  ;;  %v14305_v21 = vmul.f32 %v25507_v27, %v26676_v17 }
0x2695   : > { %v14230_v52 = vsel %vm1682_vm4, %v14212_v24, -inf }
0x2696   : > { %14234 = vmax.xlane.f32.xlu1 %v14233_v15  ;;  %v14227_v59 = vsel %vm1682_vm4, %v25931_v58, -inf }
0x2697   : > { %14222 = vmax.xlane.f32.xlu0 %v14221_v12 }
0x269a   : > { %14228 = vmax.xlane.f32.xlu1 %v14227_v59 }
0x269b   : > { %14225 = vmax.xlane.f32.xlu0 %v14224_v35 }
0x269f   : > { %14231 = vmax.xlane.f32.xlu0 %v14230_v52 }
0x26a3   : > { %14237 = vmax.xlane.f32.xlu0 %v14236_v54 }
0x26ab   : > { %14308 = vrot.lane.b32.xlu1 %v14303_v4, %s23242_s8 }
0x271f   : > { %v14220_v20 = vpop.xlane.xlu1 %14219 }
0x2720   : > { %v14217_v41 = vpop.xlane.xlu0 %14216  ;;  %v14240_v46 = vsub.f32 %v14208_v50, %v14220_v20 }
0x2721   : > { %v14239_v42 = vsub.f32 %v14207_v18, %v14217_v41 }
0x2722   : > { %v14249_v28 = vmul.f32 1.442695, %v14240_v46  ;;  %v14663_v46 = vld [vmem:[#allocation24] sm:$0xff] }
0x2723   : > { %v14235_v49 = vpop.xlane.xlu1 %14234  ;;  %v14247_v10 = vmul.f32 1.442695, %v14239_v42 }
0x2724   : > { %v14223_v61 = vpop.xlane.xlu0 %14222  ;;  %v14245_v15 = vsub.f32 %v25927_v53, %v14235_v49  ;;  %v14306_v53 = vmul.f32 %v25503_v62, %v26676_v17 }
0x2725   : > { %v14241_v6 = vsub.f32 %v14209_v45, %v14223_v61 }
0x2726   : > { %v14259_v12 = vmul.f32 1.442695, %v14245_v15 }
0x2727   : > { %v14251_v16 = vmul.f32 1.442695, %v14241_v6  ;;  %v14229_v13 = vpop.xlane.xlu1 %14228 }
0x2728   : > { %v14226_v3 = vpop.xlane.xlu0 %14225  ;;  %v14243_v59 = vsub.f32 %v25931_v58, %v14229_v13 }
0x2729   : > { %22310 = vpow2.f32 %v14251_v16  ;;  %v14242_v33 = vsub.f32 %v14210_v31, %v14226_v3  ;;  %v14304_v31 = vmul.f32 %v25491_v56, %v26676_v17 }
0x272a   : > { %22312 = vpow2.f32 %v14247_v10  ;;  %v14664_v10 = vld [vmem:[#allocation24 + $0x8] sm:$0xff] }
0x272b   : > { %v14253_v9 = vmul.f32 1.442695, %v14242_v33  ;;  %v14309_v25 = vpop.permute.xlu1 %14308 }
0x272c   : > { %v14232_v51 = vpop.xlane.xlu0 %14231  ;;  %20429 = vmatprep.subr.mxu1 %v14309_v25 }
0x272d   : > { %22314 = vpow2.f32 %v14253_v9  ;;  %20430 = vmatpush3.msra.mxu1 %v14309_v25  ;;  %v14244_v32 = vsub.f32 %v14212_v24, %v14232_v51  ;;  %v14255_v24 = vmul.f32 1.442695, %v14243_v59 }
0x272e   : > { %22316 = vpow2.f32 %v14249_v28  ;;  %v21038_v28 = vpack.c.bf16 %v14664_v10, %v14663_v46 }
0x272f   : > { %v14257_v0 = vmul.f32 1.442695, %v14244_v32 }
0x2730   : > { %v14238_v22 = vpop.xlane.xlu0 %14237 }
0x2731   : > { %v14246_v38 = vsub.f32 %v14214_v55, %v14238_v22 }
0x2733   : > { %v22311_v7 = vpop.eup %22310  ;;  %v14261_v19 = vmul.f32 1.442695, %v14246_v38 }
0x2734   : > { %v14269_v39 = vsel %vm1682_vm4, %v22311_v7, 0.0  ;;  %v22313_v57 = vpop.eup %22312 }
0x2735   : > { %22318 = vpow2.f32 %v14261_v19  ;;  %14270 = vadd.xlane.f32.xlu1 %v14269_v39  ;;  %v14263_v48 = vsel %vm1682_vm4, %v22313_v57, 0.0 }
0x2736   : > { %22320 = vpow2.f32 %v14257_v0 }
0x2737   : > { %v22315_v47 = vpop.eup %22314  ;;  %22322 = vpow2.f32 %v14259_v12 }
0x2738   : > { %v14272_v50 = vsel %vm1682_vm4, %v22315_v47, 0.0  ;;  %v22317_v29 = vpop.eup %22316  ;;  %22324 = vpow2.f32 %v14255_v24 }
0x2739   : > { %14273 = vadd.xlane.f32.xlu0 %v14272_v50  ;;  %14264 = vadd.xlane.f32.xlu1 %v14263_v48  ;;  %v14266_v18 = vsel %vm1682_vm4, %v22317_v29, 0.0  ;;  %v14665_v50 = vld [vmem:[#allocation24 + $0x10] sm:$0xff]  ;;  %v14666_v48 = vld [vmem:[#allocation24 + $0x18] sm:$0xff] }
0x273d   : > { %14267 = vadd.xlane.f32.xlu0 %v14266_v18  ;;  %v14820_v18 = vld [vmem:[#allocation27] sm:$0xff] }
0x273f   : > { %v25948_v40 = vpop.eup %22318 }
0x2740   : > { %v14284_v45 = vsel %vm1682_vm4, %v25948_v40, 0.0  ;;  %v25952_v26 = vpop.eup %22320 }
0x2741   : > { %14285 = vadd.xlane.f32.xlu0 %v14284_v45  ;;  %v14278_v8 = vsel %vm1682_vm4, %v25952_v26, 0.0  ;;  %v22323_v35 = vpop.eup %22322  ;;  %v14822_v45 = vld [vmem:[#allocation27 + $0x10] sm:$0xff] }
0x2742   : > { %v14281_v55 = vsel %vm1682_vm4, %v22323_v35, 0.0  ;;  %v22325_v52 = vpop.eup %22324 }
0x2743   : > { %v14275_v27 = vsel %vm1682_vm4, %v22325_v52, 0.0 }
0x2745   : > { %14279 = vadd.xlane.f32.xlu0 %v14278_v8 }
0x274a   : > { %14478 = vrot.lane.b32.xlu1 %v14305_v21, %s23242_s8  ;;  %v14823_v21 = vld [vmem:[#allocation27 + $0x18] sm:$0xff] }
0x274b   : > { %v21050_v15 = vpack.c.bf16 %v14823_v21, %v14822_v45 }
0x275b   : > { %14393 = vrot.lane.b32.xlu0 %v14304_v31, %s23242_s8 }
0x276e   : > { %14282 = vadd.xlane.f32.xlu1 %v14281_v55 }
0x2772   : > { %14276 = vadd.xlane.f32.xlu1 %v14275_v27 }
0x2783   : > { %14563 = vrot.lane.b32.xlu1 %v14306_v53, %s23242_s8 }
0x27c2   : > { %v14271_v56 = vpop.xlane.xlu1 %14270 }
0x27c3   : > { %22326 = vrcp.f32 %v14271_v56 }
0x27c6   : > { %v14274_v54 = vpop.xlane.xlu0 %14273  ;;  %v14265_v58 = vpop.xlane.xlu1 %14264 }
0x27c7   : > { %22328 = vrcp.f32 %v14265_v58  ;;  %v14898_v58 = vld [vmem:[#allocation30] sm:$0xff] }
0x27c8   : > { %22330 = vrcp.f32 %v14274_v54 }
0x27ca   : > { %v14268_v4 = vpop.xlane.xlu0 %14267  ;;  %v14479_v20 = vpop.permute.xlu1 %14478 }
0x27cb   : > { %22332 = vrcp.f32 %v14268_v4  ;;  %20439 = vmatprep.subr.mxu1 %v14479_v20  ;;  %v14899_v4 = vld [vmem:[#allocation30 + $0x8] sm:$0xff] }
0x27cd   : > { %v22327_v41 = vpop.eup %22326 }
0x27ce   : > { %v14286_v42 = vpop.xlane.xlu0 %14285  ;;  %v14297_v49 = vmul.f32 %v22327_v41, %v22311_v7 }
0x27cf   : > { %22334 = vrcp.f32 %v14286_v42 }
0x27d0   : > { %20436 = vmatprep.mubr.msk.f32.mxu0 %vm1682_vm4, %v14297_v49 }
0x27d1   : > { %v22329_v61 = vpop.eup %22328 }
0x27d2   : > { %v14280_v6 = vpop.xlane.xlu0 %14279  ;;  %v14295_v62 = vmul.f32 %v22329_v61, %v22313_v57  ;;  %v22331_v16 = vpop.eup %22330 }
0x27d3   : > { %v14298_v9 = vmul.f32 %v22331_v16, %v22315_v47 }
0x27d4   : > { %20431 = vmatprep.mubr.msk.f32.mxu1 %vm1682_vm4, %v14295_v62 }
0x27d5   : > { %v22333_v13 = vpop.eup %22332 }
0x27d6   : > { %v14296_v3 = vmul.f32 %v22333_v13, %v22317_v29  ;;  %v14394_v33 = vpop.permute.xlu0 %14393  ;;  %v21042_v29 = vpack.c.bf16 %v14666_v48, %v14665_v50 }
0x27d7   : > { %20434 = vmatprep.subr.mxu0 %v14394_v33 }
0x27d8   : > { %20432 = vmatmul.mubr.msk.f32.vlgmr.msra.gmra.mrb[124].mxu1 %vm1682_vm4, %v14296_v3  ;;  %20435 = vmatpush3.msra.mxu0 %v14394_v33 }
0x27d9   : > { %20440 = vmatpush3.msra.mxu1 %v14479_v20  ;;  %20437 = vmatmul.mubr.msk.f32.vlgmr.msra.gmra.mrb[120].mxu0 %vm1682_vm4, %v14298_v9  ;;  %v22335_v22 = vpop.eup %22334  ;;  %v21052_v20 = vpack.c.bf16 %v14899_v4, %v14898_v58 }
0x27da   : > { %21039 = vmatprep.subr.bf16.mxu1 %v21038_v28  ;;  %v14302_v0 = vmul.f32 %v22335_v22, %v25948_v40  ;;  %v14821_v40 = vld [vmem:[#allocation27 + $0x8] sm:$0xff] }
0x27db   : > { %v21047_v8 = vpack.c.bf16 %v14821_v40, %v14820_v18 }
0x27fb   : > { %v14283_v25 = vpop.xlane.xlu1 %14282 }
0x27fc   : > { %22336 = vrcp.f32 %v14283_v25 }
0x27fd   : > { %22338 = vrcp.f32 %v14280_v6 }
0x27ff   : > { %v14277_v51 = vpop.xlane.xlu1 %14276 }
0x2800   : > { %22340 = vrcp.f32 %v14277_v51 }
0x2803   : > { %v14564_v32 = vpop.permute.xlu1 %14563 }
0x2804   : > { %20444 = vmatprep.subr.mxu0 %v14564_v32 }
0x2805   : > { %20445 = vmatpush3.msra.mxu0 %v14564_v32 }
0x2806   : > { %v22337_v38 = vpop.eup %22336  ;;  %21046 = vmatprep.subr.bf16.mxu0 %v26658_v44 }
0x2807   : > { %v14301_v7 = vmul.f32 %v22337_v38, %v22323_v35  ;;  %v22339_v19 = vpop.eup %22338 }
0x2808   : > { %v14300_v47 = vmul.f32 %v22339_v19, %v25952_v26 }
0x2809   : > { %20446 = vmatprep.mubr.msk.f32.mxu0 %vm1682_vm4, %v14301_v7 }
0x280a   : > { %v22341_v39 = vpop.eup %22340  ;;  %20447 = vmatmul.mubr.msk.f32.vlgmr.msra.gmra.mrb[122].mxu0 %vm1682_vm4, %v14302_v0 }
0x280b   : > { %v14299_v57 = vmul.f32 %v22341_v39, %v22325_v52  ;;  %20477 = vmatprep.mubr.msk.f32.mxu0 %vm23238_vm0, %v26651_v11  ;;  %21048 = vmatpush3.bf16.msra.mxu0 %v21047_v8 }
0x280c   : > { %21049 = vmatprep.subr.bf16.mxu0 %v26658_v44 }
0x280d   : > { %20441 = vmatprep.mubr.msk.f32.mxu1 %vm1682_vm4, %v14299_v57 }
0x280e   : > { %20442 = vmatmul.mubr.msk.f32.vlgmr.msra.gmra.mrb[126].mxu1 %vm1682_vm4, %v14300_v47 }
0x280f   : > { %21041 = vmatpush3.bf16.msra.mxu1 %v21038_v28  ;;  %21051 = vmatpush3.bf16.msra.mxu0 %v21050_v15 }
0x2810   : > { %21043 = vmatprep.subr.bf16.mxu1 %v21042_v29  ;;  %21053 = vmatprep.subr.bf16.mxu0 %v21052_v20 }
0x2813   : > { %21045 = vmatpush3.bf16.msra.mxu1 %v21042_v29 }
0x2814   : > { %21060 = vmatprep.subr.bf16.mxu1 %v26658_v44 }
0x28ab   : > { %v20433_v26 = vpop.f32.mrb[124].mxu1 }
0x28ac   : > { %v14383_v31 = vpop.f32.mrb[125].mxu1  ;;  %v20438_v12 = vpop.f32.mrb[120].mxu0  ;;  %v14656_v35 = vadd.f32 %v20433_v26, %v25453_v14 }
0x28ad   : > { %v14655_v59 = vadd.f32 %v14383_v31, %v25455_v5  ;;  %v14468_v24 = vpop.f32.mrb[121].mxu0  ;;  %v14658_v52 = vadd.f32 %v20438_v12, %v25461_v63  ;;  %v26014_v31 = vld [vmem:[#allocation31] ss:$0 sm:$0xff]  ;;  %v14824_v12 = vld [vmem:[#allocation28] sm:$0x1] }
0x28ae   : > { %v14657_v55 = vadd.f32 %v14468_v24, %v25463_v36 }
0x28af   : > { %20457 = vmatprep.mubr.msk.f32.mxu1 %vm1466_vm3, %v14655_v59 }
0x28b0   : > { %20458 = vmatmul.mubr.msk.f32.vlgmr.msra.gmra.mrb[136].mxu1 %vm1466_vm3, %v14656_v35 }
0x28b1   : > { %20460 = vmatprep.mubr.msk.f32.mxu1 %vm1466_vm3, %v14657_v55 }
0x28b4   : > { %20461 = vmatmul.mubr.msk.f32.gmra.mrb[138].mxu1 %vm1466_vm3, %v14658_v52 }
0x28dd   : > { %v20448_v27 = vpop.f32.mrb[122].mxu0 }
0x28de   : > { %v14638_v53 = vpop.f32.mrb[123].mxu0  ;;  %v14662_v63 = vadd.f32 %v20448_v27, %v25477_v43  ;;  %v18810_v43 = vld [vmem:[#allocation25] ss:$0 sm:$0xff] }
0x28df   : > { %v14661_v36 = vadd.f32 %v14638_v53, %v25479_v2  ;;  %v14901_v2 = vld [vmem:[#allocation30 + $0x18] sm:$0xff] }
0x28e1   : > { %v20443_v56 = vpop.f32.mrb[126].mxu1 }
0x28e2   : > { %v14553_v54 = vpop.f32.mrb[127].mxu1  ;;  %v14660_v14 = vadd.f32 %v20443_v56, %v25469_v1  ;;  %v14900_v1 = vld [vmem:[#allocation30 + $0x10] sm:$0xff] }
0x28e3   : > { %v14659_v5 = vadd.f32 %v14553_v54, %v25471_v60  ;;  %v14819_v60 = vld [vmem:[#allocation37] sm:$0x1]  ;;  %v21056_v41 = vpack.c.bf16 %v14901_v2, %v14900_v1 }
0x28e4   : > { %20478 = vmatmul.mubr.msk.f32.vlgmr.msra.gmra.mrb[132].mxu0 %vm1466_vm3, %v14819_v60 }
0x28e5   : > { %20463 = vmatprep.mubr.msk.f32.mxu1 %vm1466_vm3, %v14659_v5  ;;  %21055 = vmatpush3.bf16.msra.mxu0 %v21052_v20 }
0x28e6   : > { %20464 = vmatmul.mubr.msk.f32.gmra.mrb[140].mxu1 %vm1466_vm3, %v14660_v14  ;;  %21057 = vmatprep.subr.bf16.mxu0 %v21056_v41 }
0x28e7   : > { %20466 = vmatprep.mubr.msk.f32.mxu1 %vm1466_vm3, %v14661_v36 }
0x28e9   : > { %21059 = vmatpush3.bf16.msra.mxu0 %v21056_v41 }
0x28ea   : > { %20467 = vmatmul.mubr.msk.f32.gmra.mrb[142].mxu1 %vm1466_vm3, %v14662_v63  ;;  %21068 = vmatprep.subr.bf16.mxu0 %v26658_v44 }
0x28eb   : > { %20504 = vmatprep.mubr.msk.f32.mxu1 %vm23238_vm0, %v26651_v11 }
0x2983   : > { %v20459_v42 = vpop.f32.mrb[136].mxu1 }
0x2984   : > { %v14770_v49 = vadd.f32 %v20459_v42, %v18810_v43  ;;  %v14764_v61 = vpop.f32.mrb[137].mxu1 }
0x2985   : > { %v14765_v6 = vadd.f32 %v18810_v43, %v14764_v61 }
0x2986   : > { %v14804_v62 = vmax.f32 %v14770_v49, 0.0 }
0x2987   : > { %v14803_v46 = vmax.f32 %v14765_v6, 0.0  ;;  %v20462_v10 = vpop.f32.mrb[138].mxu1 }
0x2988   : > { %v14780_v16 = vadd.f32 %v20462_v10, %v18810_v43  ;;  %v14774_v13 = vpop.f32.mrb[139].mxu1  ;;  %v14812_v28 = vadd.f32 %v14804_v62, %v14656_v35 }
0x2989   : > { %v14811_v3 = vadd.f32 %v14803_v46, %v14655_v59  ;;  %v14775_v33 = vadd.f32 %v18810_v43, %v14774_v13 }
0x298a   : > { %v14806_v9 = vmax.f32 %v14780_v16, 0.0 }
0x298b   : > { %v14805_v25 = vmax.f32 %v14775_v33, 0.0  ;;  %20488 = vmatprep.mubr.msk.f32.mxu0 %vm1466_vm3, %v14811_v3 }
0x298c   : > { %20489 = vmatmul.mubr.msk.f32.vlgmr.msra.gmra.mrb[134].mxu0 %vm1466_vm3, %v14812_v28  ;;  %v14814_v32 = vadd.f32 %v14806_v9, %v14658_v52 }
0x298d   : > { %v14813_v51 = vadd.f32 %v14805_v25, %v14657_v55 }
0x298f   : > { %20491 = vmatprep.mubr.msk.f32.mxu0 %vm1466_vm3, %v14813_v51 }
0x2990   : > { %20492 = vmatmul.mubr.msk.f32.gmra.mrb[136].mxu0 %vm1466_vm3, %v14814_v32 }
0x29b7   : > { %v14894_v15 = vpop.f32.mrb[132].mxu0 }
0x29b8   : > { %v20479_v26 = vpop.f32.mrb[133].mxu0  ;;  %v26017_v55 = vadd.f32 %v14894_v15, %v14824_v12 }
0x29b9   : > { %v20465_v22 = vpop.f32.mrb[140].mxu1 }
0x29ba   : > { %v14790_v38 = vadd.f32 %v20465_v22, %v18810_v43  ;;  %v14784_v7 = vpop.f32.mrb[141].mxu1 }
0x29bb   : > { %v14785_v0 = vadd.f32 %v18810_v43, %v14784_v7 }
0x29bc   : > { %v14808_v19 = vmax.f32 %v14790_v38, 0.0 }
0x29bd   : > { %v14807_v39 = vmax.f32 %v14785_v0, 0.0  ;;  %v20468_v57 = vpop.f32.mrb[142].mxu1 }
0x29be   : > { %v14800_v47 = vadd.f32 %v20468_v57, %v18810_v43  ;;  %v14794_v50 = vpop.f32.mrb[143].mxu1  ;;  %v14816_v18 = vadd.f32 %v14808_v19, %v14660_v14 }
0x29bf   : > { %v14815_v48 = vadd.f32 %v14807_v39, %v14659_v5  ;;  %v14795_v29 = vadd.f32 %v18810_v43, %v14794_v50 }
0x29c0   : > { %v14810_v40 = vmax.f32 %v14800_v47, 0.0 }
0x29c1   : > { %v14809_v45 = vmax.f32 %v14795_v29, 0.0  ;;  %20494 = vmatprep.mubr.msk.f32.mxu0 %vm1466_vm3, %v14815_v48 }
0x29c2   : > { %20495 = vmatmul.mubr.msk.f32.gmra.mrb[138].mxu0 %vm1466_vm3, %v14816_v18  ;;  %v14818_v21 = vadd.f32 %v14810_v40, %v14662_v63 }
0x29c3   : > { %v14817_v8 = vadd.f32 %v14809_v45, %v14661_v36 }
0x29c5   : > { %20497 = vmatprep.mubr.msk.f32.mxu0 %vm1466_vm3, %v14817_v8 }
0x29c6   : > { %20498 = vmatmul.mubr.msk.f32.gmra.mrb[140].mxu0 %vm1466_vm3, %v14818_v21 }
0x29c7   : > { %20518 = vmatprep.mubr.msk.f32.mxu0 %vm23238_vm0, %v26651_v11 }
0x2a5f   : > { %v20490_v59 = vpop.f32.mrb[134].mxu0 }
0x2a60   : > { %v15005_v24 = vadd.f32 %v20490_v59, %v26014_v31  ;;  %v14999_v35 = vpop.f32.mrb[135].mxu0 }
0x2a61   : > { %v15000_v52 = vadd.f32 %v26014_v31, %v14999_v35 }
0x2a62   : > { %v26021_v27 = vmul.f32 %v15005_v24, %v26672_v34  ;;  %v26024_v53 = vmul.f32 %v15005_v24, %v26673_v37  ;;  %v26027_v56 = vmul.f32 %v15005_v24, %v26674_v30  ;;  %v26030_v54 = vmul.f32 %v15005_v24, %v26676_v17 }
0x2a63   : > { %v20493_v5 = vpop.f32.mrb[136].mxu0  ;;  %v26032_v14 = vpack.i.bf16 %v15005_v24, %v15000_v52  ;;  %v21061_v36 = vpack.c.bf16 %v15005_v24, %v15000_v52  ;;  %v26035_v63 = vmul.f32 %v15000_v52, %v26672_v34  ;;  %v26038_v58 = vmul.f32 %v15000_v52, %v26673_v37 }
0x2a64   : > { %v15015_v4 = vadd.f32 %v20493_v5, %v26014_v31  ;;  %v15009_v60 = vpop.f32.mrb[137].mxu0  ;;  %v26042_v20 = vmul.f32 %v15000_v52, %v26674_v30  ;;  %v26089_v9 = vmul.f32 %v15000_v52, %v26676_v17 }
0x2a65   : > { %v15010_v1 = vadd.f32 %v26014_v31, %v15009_v60  ;;  %21819 = vrot.lane.b32.xlu0 %v26032_v14, %s23240_s14  ;;  %21063 = vmatpush3.bf16.xpose.msk.msra.mxu1 %vm23862_vm5, %v21061_v36  ;;  %v21838_v2 = vpack.i.bf16 %v26021_v27, %v26035_v63  ;;  %v21858_v41 = vpack.i.bf16 %v26024_v53, %v26038_v58 }
0x2a66   : > { %21064 = vmatprep.subr.bf16.mxu1 %v26658_v44  ;;  %v26055_v43 = vmul.f32 %v15015_v4, %v26672_v34  ;;  %v26058_v42 = vmul.f32 %v15015_v4, %v26673_v37  ;;  %v26063_v61 = vmul.f32 %v15015_v4, %v26674_v30  ;;  %v26086_v28 = vmul.f32 %v15015_v4, %v26676_v17 }
0x2a67   : > { %v26065_v6 = vpack.i.bf16 %v15015_v4, %v15010_v1  ;;  %v21065_v62 = vpack.c.bf16 %v15015_v4, %v15010_v1  ;;  %v26068_v46 = vmul.f32 %v15010_v1, %v26672_v34  ;;  %v26071_v10 = vmul.f32 %v15010_v1, %v26673_v37 }
0x2a68   : > { %v26074_v16 = vmul.f32 %v15010_v1, %v26674_v30  ;;  %v26077_v13 = vmul.f32 %v15010_v1, %v26676_v17 }
0x2a69   : > { %21824 = vrot.lane.b32.xlu1 %v26065_v6, %s23240_s14  ;;  %v21843_v3 = vpack.i.bf16 %v26055_v43, %v26068_v46 }
0x2a6c   : > { %20505 = vmatmul.mubr.msk.f32.vlgmr.msra.gmra.mrb[144].mxu1 %vm1682_vm4, %v26017_v55 }
0x2a6d   : > { %21067 = vmatpush3.bf16.xpose.msk.msra.mxu1 %vm23862_vm5, %v21065_v62  ;;  %20511 = vmatprep.mubr.msk.f32.mxu1 %vm23238_vm0, %v26651_v11 }
0x2a6e   : > { %21072 = vmatprep.subr.bf16.mxu1 %v26658_v44 }
0x2a74   : > { %20512 = vmatmul.mubr.msk.f32.vlgmr.msra.gmra.mrb[146].mxu1 %vm1682_vm4, %v26017_v55 }
0x2a75   : > { %20525 = vmatprep.mubr.msk.f32.mxu1 %vm23238_vm0, %v26651_v11 }
0x2a95   : > { %v20496_v22 = vpop.f32.mrb[138].mxu0 }
0x2a96   : > { %v15025_v38 = vadd.f32 %v20496_v22, %v26014_v31  ;;  %v15019_v7 = vpop.f32.mrb[139].mxu0 }
0x2a97   : > { %v15020_v0 = vadd.f32 %v26014_v31, %v15019_v7 }
0x2a98   : > { %v26111_v19 = vmul.f32 %v15025_v38, %v26672_v34  ;;  %v26114_v39 = vmul.f32 %v15025_v38, %v26673_v37  ;;  %v26117_v57 = vmul.f32 %v15025_v38, %v26674_v30  ;;  %v26120_v47 = vmul.f32 %v15025_v38, %v26676_v17 }
0x2a99   : > { %v20499_v50 = vpop.f32.mrb[140].mxu0  ;;  %v21069_v48 = vpack.c.bf16 %v15025_v38, %v15020_v0  ;;  %v26122_v29 = vpack.i.bf16 %v15025_v38, %v15020_v0  ;;  %v26125_v18 = vmul.f32 %v15020_v0, %v26672_v34  ;;  %v26128_v40 = vmul.f32 %v15020_v0, %v26673_v37 }
0x2a9a   : > { %v15035_v45 = vadd.f32 %v20499_v50, %v26014_v31  ;;  %v15029_v8 = vpop.f32.mrb[141].mxu0  ;;  %v26132_v21 = vmul.f32 %v15020_v0, %v26674_v30  ;;  %v26167_v1 = vmul.f32 %v15020_v0, %v26676_v17 }
0x2a9b   : > { %v15030_v15 = vadd.f32 %v26014_v31, %v15029_v8  ;;  %21071 = vmatpush3.bf16.xpose.msk.msra.mxu0 %vm23862_vm5, %v21069_v48  ;;  %21829 = vrot.lane.b32.xlu0 %v26122_v29, %s23240_s14  ;;  %v21848_v26 = vpack.i.bf16 %v26111_v19, %v26125_v18 }
0x2a9c   : > { %21076 = vmatprep.subr.bf16.mxu0 %v26658_v44  ;;  %v26145_v59 = vmul.f32 %v15035_v45, %v26672_v34  ;;  %v26148_v24 = vmul.f32 %v15035_v45, %v26673_v37  ;;  %v26153_v35 = vmul.f32 %v15035_v45, %v26674_v30 }
0x2a9d   : > { %v26155_v52 = vpack.i.bf16 %v15035_v45, %v15030_v15  ;;  %v21073_v5 = vpack.c.bf16 %v15035_v45, %v15030_v15  ;;  %v26158_v36 = vmul.f32 %v15030_v15, %v26672_v34  ;;  %v26161_v4 = vmul.f32 %v15030_v15, %v26673_v37 }
0x2a9e   : > { %v26164_v60 = vmul.f32 %v15030_v15, %v26674_v30  ;;  %v26176_v34 = vmul.f32 %v15030_v15, %v26676_v17  ;;  %v26179_v37 = vmul.f32 %v15035_v45, %v26676_v17 }
0x2a9f   : > { %15402 = vrot.lane.b32.xlu0 %v26017_v55, %s23240_s14  ;;  %21834 = vrot.lane.b32.xlu1 %v26155_v52, %s23240_s14  ;;  %v21853_v62 = vpack.i.bf16 %v26145_v59, %v26158_v36  ;;  %s26679_s14 = smov 112  }
0x2aa0   : > { %21075 = vmatpush3.bf16.xpose.msk.msra.mxu1 %vm23862_vm5, %v21073_v5 }
0x2aa1   : > { %21080 = vmatprep.subr.bf16.mxu1 %v26658_v44 }
0x2aa2   : > { %20519 = vmatmul.mubr.msk.f32.vlgmr.msra.gmra.mrb[142].mxu0 %vm1682_vm4, %v26017_v55 }
0x2aa3   : > { %20532 = vmatprep.mubr.msk.f32.mxu0 %vm23238_vm0, %v26651_v11 }
0x2aa7   : > { %20526 = vmatmul.mubr.msk.f32.vlgmr.msra.gmra.mrb[148].mxu1 %vm1682_vm4, %v26017_v55 }
0x2aa8   : > { %20539 = vmatprep.mubr.msk.f32.mxu1 %vm23238_vm0, %v26651_v11 }
0x2ad7   : > { %v21820_v17 = vpop.permute.xlu0 %21819 }
0x2ad8   : > { %v21822_v0 = vunpack.i.h.bf16 %v21820_v17  ;;  %v21821_v50 = vunpack.i.l.bf16 %v21820_v17 }
0x2ada   : > { %v21077_v48 = vpack.c.bf16 %v21822_v0, %v21821_v50 }
0x2adb   : > { %v21825_v45 = vpop.permute.xlu1 %21824 }
0x2adc   : > { %v21827_v8 = vunpack.i.h.bf16 %v21825_v45  ;;  %v21826_v15 = vunpack.i.l.bf16 %v21825_v45  ;;  %21079 = vmatpush3.bf16.xpose.msk.msra.mxu0 %vm23862_vm5, %v21077_v48 }
0x2add   : > { %21084 = vmatprep.subr.bf16.mxu0 %v26658_v44 }
0x2ade   : > { %v21081_v5 = vpack.c.bf16 %v21827_v8, %v21826_v15 }
0x2ae0   : > { %21083 = vmatpush3.bf16.xpose.msk.msra.mxu1 %vm23862_vm5, %v21081_v5 }
0x2ae1   : > { %21088 = vmatprep.subr.bf16.mxu1 %v26658_v44 }
0x2b0d   : > { %v21830_v7 = vpop.permute.xlu0 %21829 }
0x2b0e   : > { %v21832_v38 = vunpack.i.h.bf16 %v21830_v7  ;;  %v21831_v32 = vunpack.i.l.bf16 %v21830_v7 }
0x2b10   : > { %v21085_v51 = vpack.c.bf16 %v21832_v38, %v21831_v32 }
0x2b11   : > { %v15403_v17 = vpop.permute.xlu0 %15402  ;;  %v21835_v0 = vpop.permute.xlu1 %21834 }
0x2b12   : > { %v21837_v50 = vunpack.i.h.bf16 %v21835_v0  ;;  %v21836_v25 = vunpack.i.l.bf16 %v21835_v0  ;;  %20533 = vmatmul.mubr.msk.f32.vlgmr.msra.gmra.mrb[144].mxu0 %vm1682_vm4, %v15403_v17  ;;  %20540 = vmatmul.mubr.msk.f32.vlgmr.msra.gmra.mrb[150].mxu1 %vm1682_vm4, %v15403_v17 }
0x2b13   : > { %21087 = vmatpush3.bf16.xpose.msk.msra.mxu0 %vm23862_vm5, %v21085_v51  ;;  %20546 = vmatprep.mubr.msk.f32.mxu0 %vm23238_vm0, %v26651_v11 }
0x2b14   : > { %v21089_v48 = vpack.c.bf16 %v21837_v50, %v21836_v25  ;;  %20553 = vmatprep.mubr.msk.f32.mxu1 %vm23238_vm0, %v26651_v11  ;;  %21092 = vmatprep.subr.bf16.mxu0 %v26658_v44 }
0x2b16   : > { %21091 = vmatpush3.bf16.xpose.msk.msra.mxu1 %vm23862_vm5, %v21089_v48 }
0x2b17   : > { %21098 = vmatprep.subr.bf16.mxu1 %v26658_v44 }
0x2b1a   : > { %20547 = vmatmul.mubr.msk.f32.vlgmr.msra.gmra.mrb[146].mxu0 %vm1682_vm4, %v15403_v17 }
0x2b1b   : > { %20560 = vmatprep.mubr.msk.f32.mxu0 %vm23238_vm0, %v26651_v11 }
0x2b1d   : > { %20554 = vmatmul.mubr.msk.f32.vlgmr.msra.gmra.mrb[152].mxu1 %vm1682_vm4, %v15403_v17 }
0x2b1e   : > { %20574 = vmatprep.mubr.msk.f32.mxu1 %vm23238_vm0, %v26651_v11 }
0x2b3f   : > { %v15113_v25 = vpop.f32.mrb[144].mxu1 }
0x2b40   : > { %v15345_v51 = vmul.f32 0.17677669, %v15113_v25  ;;  %v20506_v32 = vpop.f32.mrb[145].mxu1 }
0x2b42   : > { %v15350_v38 = vsel %vm15349_vm1, %v15345_v51, -inf }
0x2b43   : > { %15351 = vmax.xlane.f32.xlu0 %v15350_v38 }
0x2b47   : > { %v15189_v7 = vpop.f32.mrb[146].mxu1 }
0x2b48   : > { %v20513_v45 = vpop.f32.mrb[147].mxu1 }
0x2b75   : > { %v15265_v8 = vpop.f32.mrb[142].mxu0 }
0x2b76   : > { %v20520_v15 = vpop.f32.mrb[143].mxu0  ;;  %v15347_v12 = vmul.f32 0.17677669, %v15265_v8 }
0x2b78   : > { %v15356_v33 = vsel %vm15349_vm1, %v15347_v12, -inf }
0x2b7a   : > { %v15341_v5 = vpop.f32.mrb[148].mxu1 }
0x2b7b   : > { %v20527_v0 = vpop.f32.mrb[149].mxu1 }
0x2be5   : > { %v15480_v50 = vpop.f32.mrb[144].mxu0  ;;  %v15558_v48 = vpop.f32.mrb[150].mxu1 }
0x2be6   : > { %v15718_v22 = vmul.f32 0.17677669, %v15480_v50  ;;  %v15719_v17 = vmul.f32 0.17677669, %v15558_v48  ;;  %v20534_v31 = vpop.f32.mrb[145].mxu0  ;;  %v20541_v30 = vpop.f32.mrb[151].mxu1 }
0x2be7   : > { %v15346_v31 = vmul.f32 0.17677669, %v15189_v7 }
0x2be8   : > { %v15722_v49 = vsel %vm15349_vm1, %v15718_v22, -inf  ;;  %v15725_v25 = vsel %vm15349_vm1, %v15719_v17, -inf }
0x2be9   : > { %15723 = vmax.xlane.f32.xlu1 %v15722_v49  ;;  %15726 = vmax.xlane.f32.xlu0 %v15725_v25  ;;  %v15348_v49 = vmul.f32 0.17677669, %v15341_v5  ;;  %v15353_v25 = vsel %vm15349_vm1, %v15346_v31, -inf }
0x2beb   : > { %v15359_v8 = vsel %vm15349_vm1, %v15348_v49, -inf }
0x2bed   : > { %v15636_v32 = vpop.f32.mrb[146].mxu0 }
0x2bee   : > { %v26227_v38 = vmul.f32 0.17677669, %v15636_v32  ;;  %v20548_v45 = vpop.f32.mrb[147].mxu0 }
0x2bf0   : > { %v15728_v15 = vsel %vm15349_vm1, %v26227_v38, -inf  ;;  %v15714_v0 = vpop.f32.mrb[152].mxu1 }
0x2bf1   : > { %15729 = vmax.xlane.f32.xlu0 %v15728_v15  ;;  %v15721_v50 = vmul.f32 0.17677669, %v15714_v0  ;;  %v20555_v48 = vpop.f32.mrb[153].mxu1 }
0x2bf3   : > { %v15731_v30 = vsel %vm15349_vm1, %v15721_v50, -inf }
0x2bf4   : > { %15732 = vmax.xlane.f32.xlu1 %v15731_v30 }
0x2bf5   : > { %15357 = vmax.xlane.f32.xlu0 %v15356_v33  ;;  %v15352_v33 = vpop.xlane.xlu0 %15351 }
0x2bf6   : > { %v15362_v27 = vsub.f32 %v15345_v51, %v15352_v33 }
0x2bf8   : > { %15354 = vmax.xlane.f32.xlu1 %v15353_v25  ;;  %v15366_v63 = vmul.f32 1.442695, %v15362_v27 }
0x2bfa   : > { %22342 = vpow2.f32 %v15366_v63 }
0x2bfc   : > { %15360 = vmax.xlane.f32.xlu1 %v15359_v8 }
0x2c0b   : > { %21839 = vrot.lane.b32.xlu0 %v21838_v2, %s23242_s8  ;;  %v26255_v2 = vpop.eup %22342 }
0x2c0c   : > { %v15374_v43 = vsel %vm15349_vm1, %v26255_v2, 0.0 }
0x2c0d   : > { %21844 = vrot.lane.b32.xlu1 %v21843_v3, %s23242_s8 }
0x2c0f   : > { %21854 = vrot.lane.b32.xlu0 %v21853_v62, %s23242_s8 }
0x2c11   : > { %21849 = vrot.lane.b32.xlu1 %v21848_v26, %s23242_s8 }
0x2c15   : > { %21859 = vrot.lane.b32.xlu1 %v21858_v41, %s23242_s8 }
0x2c2e   : > { %15375 = vadd.xlane.f32.xlu0 %v15374_v43 }
0x2c76   : > { %v15727_v46 = vpop.xlane.xlu0 %15726  ;;  %v15724_v3 = vpop.xlane.xlu1 %15723 }
0x2c77   : > { %v15734_v19 = vsub.f32 %v15718_v22, %v15724_v3  ;;  %v15735_v32 = vsub.f32 %v15719_v17, %v15727_v46 }
0x2c79   : > { %v15738_v62 = vmul.f32 1.442695, %v15734_v19  ;;  %v15740_v22 = vmul.f32 1.442695, %v15735_v32 }
0x2c7e   : > { %v15730_v59 = vpop.xlane.xlu0 %15729 }
0x2c81   : > { %v15733_v18 = vpop.xlane.xlu1 %15732 }
0x2c82   : > { %v15358_v26 = vpop.xlane.xlu0 %15357  ;;  %v15737_v30 = vsub.f32 %v15721_v50, %v15733_v18 }
0x2c83   : > { %v15364_v36 = vsub.f32 %v15347_v12, %v15358_v26 }
0x2c85   : > { %v15370_v7 = vmul.f32 1.442695, %v15364_v36  ;;  %v15355_v53 = vpop.xlane.xlu1 %15354 }
0x2c86   : > { %v21840_v58 = vpop.permute.xlu0 %21839  ;;  %v15363_v41 = vsub.f32 %v15346_v31, %v15355_v53  ;;  %v15744_v31 = vmul.f32 1.442695, %v15737_v30  ;;  %v26677_v53 = vpack.i.bf16 %v26058_v42, %v26071_v10  ;;  %v26680_v42 = vpack.i.bf16 %v26027_v56, %v26042_v20 }
0x2c87   : > { %22344 = vpow2.f32 %v15370_v7  ;;  %v21842_v51 = vunpack.i.h.bf16 %v21840_v58  ;;  %v21841_v5 = vunpack.i.l.bf16 %v21840_v58  ;;  %v26678_v58 = vpack.i.bf16 %v26114_v39, %v26128_v40 }
0x2c88   : > { %v15368_v45 = vmul.f32 1.442695, %v15363_v41  ;;  %22346 = vpow2.f32 %v15738_v62  ;;  %v15736_v41 = vsub.f32 %v26227_v38, %v15730_v59  ;;  %v26681_v40 = vpack.i.bf16 %v26148_v24, %v26161_v4 }
0x2c89   : > { %v21093_v15 = vpack.c.bf16 %v21842_v51, %v21841_v5  ;;  %v15361_v0 = vpop.xlane.xlu1 %15360 }
0x2c8a   : > { %22348 = vpow2.f32 %v15368_v45  ;;  %v15365_v48 = vsub.f32 %v15348_v49, %v15361_v0  ;;  %v15742_v51 = vmul.f32 1.442695, %v15736_v41  ;;  %v21855_v38 = vpop.permute.xlu0 %21854 }
0x2c8b   : > { %21094 = vmatpush3.bf16.msra.mxu0 %v21093_v15 }
0x2c8c   : > { %v15372_v25 = vmul.f32 1.442695, %v15365_v48  ;;  %21095 = vmatprep.subr.bf16.mxu0 %v26658_v44 }
0x2c8d   : > { %v21845_v12 = vpop.permute.xlu1 %21844 }
0x2c8e   : > { %22350 = vpow2.f32 %v15372_v25  ;;  %v21847_v0 = vunpack.i.h.bf16 %v21845_v12  ;;  %v21846_v24 = vunpack.i.l.bf16 %v21845_v12  ;;  %v21857_v25 = vunpack.i.h.bf16 %v21855_v38 }
0x2c8f   : > { %22352 = vpow2.f32 %v15740_v22 }
0x2c90   : > { %22354 = vpow2.f32 %v15744_v31  ;;  %v21096_v30 = vpack.c.bf16 %v21847_v0, %v21846_v24  ;;  %v21856_v31 = vunpack.i.l.bf16 %v21855_v38 }
0x2c91   : > { %v26260_v8 = vpop.eup %22344  ;;  %v21850_v33 = vpop.permute.xlu1 %21849  ;;  %22356 = vpow2.f32 %v15742_v51 }
0x2c92   : > { %v21852_v17 = vunpack.i.h.bf16 %v21850_v33  ;;  %v21851_v27 = vunpack.i.l.bf16 %v21850_v33  ;;  %v15380_v63 = vsel %vm15349_vm1, %v26260_v8, 0.0  ;;  %v22347_v43 = vpop.eup %22346  ;;  %v21102_v12 = vpack.c.bf16 %v21857_v25, %v21856_v31 }
0x2c93   : > { %15381 = vadd.xlane.f32.xlu0 %v15380_v63  ;;  %v15746_v3 = vsel %vm15349_vm1, %v22347_v43, 0.0 }
0x2c94   : > { %v26264_v49 = vpop.eup %22348  ;;  %v21099_v50 = vpack.c.bf16 %v21852_v17, %v21851_v27 }
0x2c95   : > { %v15377_v46 = vsel %vm15349_vm1, %v26264_v49, 0.0  ;;  %v26307_v20 = vpop.permute.xlu1 %21859 }
0x2c96   : > { %15378 = vadd.xlane.f32.xlu1 %v15377_v46  ;;  %21100 = vmatpush3.bf16.msra.mxu1 %v21099_v50 }
0x2c97   : > { %15747 = vadd.xlane.f32.xlu0 %v15746_v3  ;;  %21104 = vmatprep.subr.bf16.mxu1 %v26658_v44 }
0x2c98   : > { %v26270_v19 = vpop.eup %22350 }
0x2c99   : > { %v15383_v18 = vsel %vm15349_vm1, %v26270_v19, 0.0  ;;  %v22353_v26 = vpop.eup %22352 }
0x2c9a   : > { %15384 = vadd.xlane.f32.xlu1 %v15383_v18  ;;  %v15749_v36 = vsel %vm15349_vm1, %v22353_v26, 0.0  ;;  %v22355_v62 = vpop.eup %22354 }
0x2c9b   : > { %v15755_v7 = vsel %vm15349_vm1, %v22355_v62, 0.0  ;;  %v26295_v10 = vpop.eup %22356 }
0x2c9c   : > { %v15752_v39 = vsel %vm15349_vm1, %v26295_v10, 0.0 }
0x2c9e   : > { %15750 = vadd.xlane.f32.xlu1 %v15749_v36 }
0x2ca2   : > { %15756 = vadd.xlane.f32.xlu1 %v15755_v7 }
0x2cad   : > { %21864 = vrot.lane.b32.xlu0 %v26677_v53, %s23242_s8 }
0x2cb3   : > { %21869 = vrot.lane.b32.xlu1 %v26678_v58, %s23242_s8 }
0x2cb7   : > { %21879 = vrot.lane.b32.xlu1 %v26032_v14, %s26679_s14 }
0x2cbb   : > { %16422 = vrot.lane.b32.xlu1 %v26017_v55, %s26679_s14  ;;  %v15376_v56 = vpop.xlane.xlu0 %15375 }
0x2cbf   : > { %21894 = vrot.lane.b32.xlu1 %v26155_v52, %s26679_s14 }
0x2cc3   : > { %21899 = vrot.lane.b32.xlu1 %v26680_v42, %s23242_s8 }
0x2ccc   : > { %15753 = vadd.xlane.f32.xlu0 %v15752_v39  ;;  %v21861_v39 = vunpack.i.l.bf16 %v26307_v20 }
0x2ce2   : > { %21874 = vrot.lane.b32.xlu0 %v26681_v40, %s23242_s8 }
0x2ce6   : > { %21884 = vrot.lane.b32.xlu0 %v26065_v6, %s26679_s14 }
0x2cea   : > { %21889 = vrot.lane.b32.xlu0 %v26122_v29, %s26679_s14 }
0x2d20   : > { %v15382_v59 = vpop.xlane.xlu0 %15381 }
0x2d23   : > { %v15379_v5 = vpop.xlane.xlu1 %15378 }
0x2d24   : > { %v15748_v32 = vpop.xlane.xlu0 %15747 }
0x2d25   : > { %22358 = vrcp.f32 %v15748_v32 }
0x2d27   : > { %v15385_v45 = vpop.xlane.xlu1 %15384 }
0x2d28   : > { %v21865_v33 = vpop.permute.xlu0 %21864 }
0x2d29   : > { %v21867_v63 = vunpack.i.h.bf16 %v21865_v33  ;;  %v21866_v50 = vunpack.i.l.bf16 %v21865_v33 }
0x2d2b   : > { %v15751_v15 = vpop.xlane.xlu1 %15750  ;;  %v21108_v18 = vpack.c.bf16 %v21867_v63, %v21866_v50 }
0x2d2c   : > { %22360 = vrcp.f32 %v15751_v15 }
0x2d2f   : > { %v22359_v4 = vpop.eup %22358  ;;  %v15757_v48 = vpop.xlane.xlu1 %15756 }
0x2d30   : > { %v15762_v22 = vmul.f32 %v22359_v4, %v22347_v43  ;;  %22362 = vrcp.f32 %v15757_v48 }
0x2d31   : > { %22364 = vrcp.f32 %v15379_v5 }
0x2d32   : > { %20561 = vmatmul.mubr.msk.f32.vlgmr.msra.gmra.mrb[148].mxu0 %vm1994_vm6, %v15762_v22  ;;  %22366 = vrcp.f32 %v15385_v45 }
0x2d33   : > { %21097 = vmatpush3.bf16.msra.mxu0 %v21096_v30  ;;  %20567 = vmatprep.mubr.msk.f32.mxu0 %vm23238_vm0, %v26651_v11  ;;  %v21870_v36 = vpop.permute.xlu1 %21869 }
0x2d34   : > { %21101 = vmatprep.subr.bf16.mxu0 %v26658_v44  ;;  %v21872_v24 = vunpack.i.h.bf16 %v21870_v36  ;;  %v21871_v4 = vunpack.i.l.bf16 %v21870_v36 }
0x2d36   : > { %v22361_v17 = vpop.eup %22360  ;;  %v21111_v48 = vpack.c.bf16 %v21872_v24, %v21871_v4 }
0x2d37   : > { %v15763_v27 = vmul.f32 %v22361_v17, %v22353_v26  ;;  %v21880_v53 = vpop.permute.xlu1 %21879 }
0x2d38   : > { %v21881_v33 = vunpack.i.l.bf16 %v21880_v53 }
0x2d39   : > { %20568 = vmatmul.mubr.msk.f32.vlgmr.msra.gmra.mrb[150].mxu0 %vm1994_vm6, %v15763_v27 }
0x2d3a   : > { %v22363_v43 = vpop.eup %22362  ;;  %21103 = vmatpush3.bf16.msra.mxu0 %v21102_v12  ;;  %20581 = vmatprep.mubr.msk.f32.mxu0 %vm23238_vm0, %v26651_v11 }
0x2d3b   : > { %v15765_v46 = vmul.f32 %v22363_v43, %v22355_v62  ;;  %21107 = vmatprep.subr.bf16.mxu0 %v26658_v44  ;;  %v22365_v3 = vpop.eup %22364  ;;  %v16423_v32 = vpop.permute.xlu1 %16422 }
0x2d3c   : > { %v15391_v26 = vmul.f32 %v22365_v3, %v26264_v49  ;;  %v22367_v51 = vpop.eup %22366  ;;  %v21862_v49 = vunpack.i.h.bf16 %v26307_v20 }
0x2d3d   : > { %20582 = vmatmul.mubr.msk.f32.vlgmr.msra.gmra.mrb[152].mxu0 %vm1994_vm6, %v15765_v46  ;;  %v15393_v38 = vmul.f32 %v22367_v51, %v26270_v19 }
0x2d3e   : > { %21109 = vmatpush3.bf16.msra.mxu0 %v21108_v18  ;;  %20595 = vmatprep.mubr.msk.f32.mxu0 %vm23238_vm0, %v26651_v11  ;;  %v21105_v0 = vpack.c.bf16 %v21862_v49, %v21861_v39 }
0x2d3f   : > { %21113 = vmatprep.subr.bf16.mxu0 %v26658_v44  ;;  %v21895_v22 = vpop.permute.xlu1 %21894 }
0x2d40   : > { %v21897_v25 = vunpack.i.h.bf16 %v21895_v22  ;;  %v21896_v31 = vunpack.i.l.bf16 %v21895_v22 }
0x2d41   : > { %20596 = vmatmul.mubr.msk.f32.vlgmr.msra.gmra.mrb[154].mxu0 %vm1994_vm6, %v15391_v26 }
0x2d42   : > { %20609 = vmatprep.mubr.msk.f32.mxu0 %vm23238_vm0, %v26651_v11  ;;  %v21129_v17 = vpack.c.bf16 %v21897_v25, %v21896_v31 }
0x2d43   : > { %v21900_v43 = vpop.permute.xlu1 %21899 }
0x2d44   : > { %v21902_v46 = vunpack.i.h.bf16 %v21900_v43  ;;  %v21901_v3 = vunpack.i.l.bf16 %v21900_v43  ;;  %v26684_v43 = vpack.i.bf16 %v26063_v61, %v26074_v16 }
0x2d46   : > { %v21133_v18 = vpack.c.bf16 %v21902_v46, %v21901_v3 }
0x2d59   : > { %v15754_v62 = vpop.xlane.xlu0 %15753 }
0x2d5a   : > { %22368 = vrcp.f32 %v15754_v62 }
0x2d5b   : > { %22370 = vrcp.f32 %v15376_v56 }
0x2d5c   : > { %22372 = vrcp.f32 %v15382_v59 }
0x2d5d   : > { %v21875_v7 = vpop.permute.xlu0 %21874 }
0x2d5e   : > { %v21877_v58 = vunpack.i.h.bf16 %v21875_v7  ;;  %v21876_v41 = vunpack.i.l.bf16 %v21875_v7 }
0x2d60   : > { %v21114_v42 = vpack.c.bf16 %v21877_v58, %v21876_v41 }
0x2d61   : > { %v21885_v40 = vpop.permute.xlu0 %21884 }
0x2d62   : > { %21115 = vmatpush3.bf16.msra.mxu0 %v21114_v42  ;;  %v21887_v45 = vunpack.i.h.bf16 %v21885_v40  ;;  %v21886_v15 = vunpack.i.l.bf16 %v21885_v40 }
0x2d63   : > { %21120 = vmatprep.subr.bf16.mxu0 %v26658_v44 }
0x2d64   : > { %v22369_v5 = vpop.eup %22368 }
0x2d65   : > { %v15764_v56 = vmul.f32 %v22369_v5, %v26295_v10  ;;  %20610 = vmatmul.mubr.msk.f32.vlgmr.msra.gmra.mrb[156].mxu0 %vm1994_vm6, %v15393_v38  ;;  %v22371_v59 = vpop.eup %22370  ;;  %v21121_v10 = vpack.c.bf16 %v21887_v45, %v21886_v15 }
0x2d66   : > { %20623 = vmatprep.mubr.msk.f32.mxu0 %vm23238_vm0, %v26651_v11  ;;  %v15390_v19 = vmul.f32 %v22371_v59, %v26255_v2  ;;  %v22373_v20 = vpop.eup %22372  ;;  %v21882_v2 = vunpack.i.h.bf16 %v21880_v53 }
0x2d67   : > { %20575 = vmatmul.mubr.msk.f32.vlgmr.msra.gmra.mrb[154].mxu1 %vm1994_vm6, %v15764_v56  ;;  %v15392_v30 = vmul.f32 %v22373_v20, %v26260_v8  ;;  %v21890_v8 = vpop.permute.xlu0 %21889 }
0x2d68   : > { %21106 = vmatpush3.bf16.msra.mxu1 %v21105_v0  ;;  %20588 = vmatprep.mubr.msk.f32.mxu1 %vm23238_vm0, %v26651_v11  ;;  %v21117_v27 = vpack.c.bf16 %v21882_v2, %v21881_v33  ;;  %v21892_v12 = vunpack.i.h.bf16 %v21890_v8  ;;  %v21891_v63 = vunpack.i.l.bf16 %v21890_v8  ;;  %v26682_v8 = vpack.i.bf16 %v26117_v57, %v26132_v21 }
0x2d69   : > { %21110 = vmatprep.subr.bf16.mxu1 %v26658_v44 }
0x2d6a   : > { %v21125_v50 = vpack.c.bf16 %v21892_v12, %v21891_v63  ;;  %v26683_v63 = vpack.i.bf16 %v26153_v35, %v26164_v60 }
0x2d6b   : > { %20589 = vmatmul.mubr.msk.f32.vlgmr.msra.gmra.mrb[156].mxu1 %vm1994_vm6, %v15390_v19  ;;  %21123 = vmatpush3.bf16.xpose.msk.msra.mxu0 %vm23862_vm5, %v21121_v10 }
0x2d6c   : > { %21112 = vmatpush3.bf16.msra.mxu1 %v21111_v48  ;;  %20602 = vmatprep.mubr.msk.f32.mxu1 %vm23238_vm0, %v26651_v11 }
0x2d6d   : > { %21128 = vmatprep.subr.bf16.mxu0 %v26658_v44  ;;  %21116 = vmatprep.subr.bf16.mxu1 %v26658_v44 }
0x2d6f   : > { %20603 = vmatmul.mubr.msk.f32.vlgmr.msra.gmra.mrb[158].mxu1 %vm1994_vm6, %v15392_v30 }
0x2d70   : > { %20616 = vmatprep.mubr.msk.f32.mxu1 %vm23238_vm0, %v26651_v11 }
0x2d72   : > { %20624 = vmatmul.mubr.msk.f32.vlgmr.msra.gmra.mrb[158].mxu0 %vm1682_vm4, %v16423_v32 }
0x2d73   : > { %21131 = vmatpush3.bf16.xpose.msk.msra.mxu0 %vm23862_vm5, %v21129_v17  ;;  %20637 = vmatprep.mubr.msk.f32.mxu0 %vm23238_vm0, %v26651_v11 }
0x2d74   : > { %21135 = vmatprep.subr.bf16.mxu0 %v26658_v44 }
0x2d75   : > { %21119 = vmatpush3.bf16.xpose.msk.msra.mxu1 %vm23862_vm5, %v21117_v27 }
0x2d76   : > { %21124 = vmatprep.subr.bf16.mxu1 %v26658_v44 }
0x2d7a   : > { %20638 = vmatmul.mubr.msk.f32.vlgmr.msra.gmra.mrb[160].mxu0 %vm1682_vm4, %v16423_v32 }
0x2d7b   : > { %20651 = vmatprep.mubr.msk.f32.mxu0 %vm23238_vm0, %v26651_v11 }
0x2d7c   : > { %20617 = vmatmul.mubr.msk.f32.vlgmr.msra.gmra.mrb[160].mxu1 %vm1682_vm4, %v16423_v32 }
0x2d7d   : > { %21127 = vmatpush3.bf16.xpose.msk.msra.mxu1 %vm23862_vm5, %v21125_v50  ;;  %20630 = vmatprep.mubr.msk.f32.mxu1 %vm23238_vm0, %v26651_v11 }
0x2d7e   : > { %21132 = vmatprep.subr.bf16.mxu1 %v26658_v44 }
0x2d84   : > { %20631 = vmatmul.mubr.msk.f32.vlgmr.msra.gmra.mrb[162].mxu1 %vm1682_vm4, %v16423_v32 }
0x2d85   : > { %21134 = vmatpush3.bf16.msra.mxu1 %v21133_v18  ;;  %20644 = vmatprep.mubr.msk.f32.mxu1 %vm23238_vm0, %v26651_v11 }
0x2d86   : > { %21138 = vmatprep.subr.bf16.mxu1 %v26658_v44 }
0x2e05   : > { %v15851_v26 = vpop.f32.mrb[148].mxu0 }
0x2e06   : > { %v20562_v36 = vpop.f32.mrb[149].mxu0 }
0x2e0c   : > { %v15932_v62 = vpop.f32.mrb[150].mxu0 }
0x2e0d   : > { %v20569_v7 = vpop.f32.mrb[151].mxu0 }
0x2e10   : > { %v16094_v53 = vpop.f32.mrb[152].mxu0 }
0x2e11   : > { %v20583_v58 = vpop.f32.mrb[153].mxu0 }
0x2e14   : > { %v16256_v41 = vpop.f32.mrb[154].mxu0 }
0x2e15   : > { %v26371_v51 = vadd.f32 %v16256_v41, %v15932_v62  ;;  %v20597_v42 = vpop.f32.mrb[155].mxu0 }
0x2e38   : > { %v16418_v49 = vpop.f32.mrb[156].mxu0 }
0x2e39   : > { %v26373_v39 = vadd.f32 %v16418_v49, %v16094_v53  ;;  %v20611_v40 = vpop.f32.mrb[157].mxu0 }
0x2e3a   : > { %v16013_v38 = vpop.f32.mrb[154].mxu1 }
0x2e3b   : > { %v20576_v5 = vpop.f32.mrb[155].mxu1 }
0x2e3e   : > { %v16175_v32 = vpop.f32.mrb[156].mxu1 }
0x2e3f   : > { %v26375_v56 = vadd.f32 %v16175_v32, %v15851_v26  ;;  %v20590_v45 = vpop.f32.mrb[157].mxu1 }
0x2e42   : > { %v16337_v15 = vpop.f32.mrb[158].mxu1 }
0x2e43   : > { %v26377_v59 = vadd.f32 %v16337_v15, %v16013_v38  ;;  %v20604_v0 = vpop.f32.mrb[159].mxu1 }
0x2e45   : > { %v16578_v24 = vpop.f32.mrb[158].mxu0 }
0x2e46   : > { %v16739_v4 = vmul.f32 0.17677669, %v16578_v24  ;;  %v20625_v19 = vpop.f32.mrb[159].mxu0 }
0x2e48   : > { %v16745_v10 = vsel %vm15349_vm1, %v16739_v4, -inf }
0x2e49   : > { %16746 = vmax.xlane.f32.xlu1 %v16745_v10 }
0x2e4d   : > { %v16734_v20 = vpop.f32.mrb[160].mxu0 }
0x2e4e   : > { %v20639_v48 = vpop.f32.mrb[161].mxu0  ;;  %v16741_v27 = vmul.f32 0.17677669, %v16734_v20 }
0x2e4f   : > { %v16500_v22 = vpop.f32.mrb[160].mxu1 }
0x2e50   : > { %v16738_v30 = vmul.f32 0.17677669, %v16500_v22  ;;  %v20618_v25 = vpop.f32.mrb[161].mxu1  ;;  %v16751_v50 = vsel %vm15349_vm1, %v16741_v27, -inf }
0x2e52   : > { %v16742_v31 = vsel %vm15349_vm1, %v16738_v30, -inf }
0x2e53   : > { %16743 = vmax.xlane.f32.xlu0 %v16742_v31 }
0x2e57   : > { %v16656_v2 = vpop.f32.mrb[162].mxu1 }
0x2e58   : > { %v16740_v33 = vmul.f32 0.17677669, %v16656_v2  ;;  %v20632_v17 = vpop.f32.mrb[163].mxu1 }
0x2e5a   : > { %21909 = vrot.lane.b32.xlu1 %v26682_v8, %s23242_s8  ;;  %v16748_v12 = vsel %vm15349_vm1, %v16740_v33, -inf }
0x2e5b   : > { %16749 = vmax.xlane.f32.xlu0 %v16748_v12 }
0x2e5e   : > { %21914 = vrot.lane.b32.xlu1 %v26683_v63, %s23242_s8 }
0x2e5f   : > { %16752 = vmax.xlane.f32.xlu0 %v16751_v50 }
0x2e75   : > { %21904 = vrot.lane.b32.xlu0 %v26684_v43, %s23242_s8 }
0x2ed6   : > { %v16747_v46 = vpop.xlane.xlu1 %16746 }
0x2ed7   : > { %v16755_v3 = vsub.f32 %v16739_v4, %v16747_v46 }
0x2ed9   : > { %v16760_v57 = vmul.f32 1.442695, %v16755_v3 }
0x2edb   : > { %22374 = vpow2.f32 %v16760_v57 }
0x2ee0   : > { %v16744_v21 = vpop.xlane.xlu0 %16743 }
0x2ee1   : > { %v16754_v18 = vsub.f32 %v16738_v30, %v16744_v21 }
0x2ee3   : > { %v16758_v26 = vmul.f32 1.442695, %v16754_v18 }
0x2ee5   : > { %v22375_v36 = vpop.eup %22374  ;;  %22376 = vpow2.f32 %v16758_v26 }
0x2ee6   : > { %v16769_v35 = vsel %vm15349_vm1, %v22375_v36, 0.0 }
0x2ee7   : > { %16770 = vadd.xlane.f32.xlu0 %v16769_v35 }
0x2ee8   : > { %v16750_v60 = vpop.xlane.xlu0 %16749 }
0x2ee9   : > { %v16756_v40 = vsub.f32 %v16740_v33, %v16750_v60 }
0x2eeb   : > { %v16762_v38 = vmul.f32 1.442695, %v16756_v40 }
0x2eec   : > { %v16753_v62 = vpop.xlane.xlu0 %16752 }
0x2eed   : > { %v16757_v42 = vsub.f32 %v16741_v27, %v16753_v62 }
0x2eef   : > { %v22377_v7 = vpop.eup %22376  ;;  %v16764_v49 = vmul.f32 1.442695, %v16757_v42 }
0x2ef0   : > { %v21905_v53 = vpop.permute.xlu0 %21904  ;;  %v16766_v58 = vsel %vm15349_vm1, %v22377_v7, 0.0 }
0x2ef1   : > { %v21907_v61 = vunpack.i.h.bf16 %v21905_v53  ;;  %v21906_v16 = vunpack.i.l.bf16 %v21905_v53  ;;  %16767 = vadd.xlane.f32.xlu1 %v16766_v58  ;;  %22378 = vpow2.f32 %v16764_v49 }
0x2ef2   : > { %22380 = vpow2.f32 %v16762_v38 }
0x2ef3   : > { %v21136_v41 = vpack.c.bf16 %v21907_v61, %v21906_v16 }
0x2ef5   : > { %21137 = vmatpush3.bf16.msra.mxu0 %v21136_v41 }
0x2ef6   : > { %21141 = vmatprep.subr.bf16.mxu0 %v26658_v44 }
0x2efb   : > { %v22379_v5 = vpop.eup %22378 }
0x2efc   : > { %v16775_v32 = vsel %vm15349_vm1, %v22379_v5, 0.0  ;;  %v22381_v45 = vpop.eup %22380 }
0x2efd   : > { %21919 = vrot.lane.b32.xlu0 %v26032_v14, %s26675_s0  ;;  %v16772_v15 = vsel %vm15349_vm1, %v22381_v45, 0.0  ;;  %v21910_v14 = vpop.permute.xlu1 %21909 }
0x2f01   : > { %v21915_v0 = vpop.permute.xlu1 %21914 }
0x2f02   : > { %21924 = vrot.lane.b32.xlu1 %v26065_v6, %s26675_s0  ;;  %v21917_v24 = vunpack.i.h.bf16 %v21915_v0  ;;  %v21916_v4 = vunpack.i.l.bf16 %v21915_v0 }
0x2f04   : > { %v21142_v48 = vpack.c.bf16 %v21917_v24, %v21916_v4 }
0x2f1c   : > { %16776 = vadd.xlane.f32.xlu0 %v16775_v32 }
0x2f26   : > { %16773 = vadd.xlane.f32.xlu1 %v16772_v15 }
0x2f32   : > { %21929 = vrot.lane.b32.xlu0 %v26122_v29, %s26675_s0  ;;  %v21912_v29 = vunpack.i.h.bf16 %v21910_v14 }
0x2f36   : > { %17122 = vrot.lane.b32.xlu0 %v26017_v55, %s26675_s0 }
0x2f37   : > { %21934 = vrot.lane.b32.xlu1 %v26155_v52, %s26675_s0  ;;  %v21911_v52 = vunpack.i.l.bf16 %v21910_v14  ;;  %s1422_s0 = scalar_lea.vmem %s23434_s12, %s26692_s11 }
0x2f39   : > { %v21139_v25 = vpack.c.bf16 %v21912_v29, %v21911_v52 }
0x2f74   : > { %v16771_v6 = vpop.xlane.xlu0 %16770 }
0x2f75   : > { %22382 = vrcp.f32 %v16771_v6 }
0x2f78   : > { %v21920_v31 = vpop.permute.xlu0 %21919 }
0x2f79   : > { %v21922_v21 = vunpack.i.h.bf16 %v21920_v31  ;;  %v21921_v18 = vunpack.i.l.bf16 %v21920_v31 }
0x2f7b   : > { %v21145_v62 = vpack.c.bf16 %v21922_v21, %v21921_v18 }
0x2f7e   : > { %v16768_v19 = vpop.xlane.xlu1 %16767 }
0x2f7f   : > { %v22383_v10 = vpop.eup %22382  ;;  %22384 = vrcp.f32 %v16768_v19 }
0x2f80   : > { %v16783_v20 = vmul.f32 %v22383_v10, %v22375_v36 }
0x2f82   : > { %20652 = vmatmul.mubr.msk.f32.vlgmr.msra.gmra.mrb[162].mxu0 %vm1994_vm6, %v16783_v20  ;;  %v21925_v33 = vpop.permute.xlu1 %21924 }
0x2f83   : > { %21143 = vmatpush3.bf16.msra.mxu0 %v21142_v48  ;;  %20665 = vmatprep.mubr.msk.f32.mxu0 %vm23238_vm0, %v26651_v11  ;;  %v21927_v17 = vunpack.i.h.bf16 %v21925_v33  ;;  %v21926_v27 = vunpack.i.l.bf16 %v21925_v33 }
0x2f84   : > { %21148 = vmatprep.subr.bf16.mxu0 %v26658_v44 }
0x2f85   : > { %v21149_v50 = vpack.c.bf16 %v21927_v17, %v21926_v27 }
0x2f89   : > { %v22385_v22 = vpop.eup %22384 }
0x2f8a   : > { %v16782_v30 = vmul.f32 %v22385_v22, %v22377_v7 }
0x2f8c   : > { %20645 = vmatmul.mubr.msk.f32.vlgmr.msra.gmra.mrb[164].mxu1 %vm1994_vm6, %v16782_v30  ;;  %v26685_v30 = vpack.i.bf16 %v26086_v28, %v26077_v13 }
0x2f8d   : > { %21140 = vmatpush3.bf16.msra.mxu1 %v21139_v25  ;;  %20658 = vmatprep.mubr.msk.f32.mxu1 %vm23238_vm0, %v26651_v11  ;;  %v26686_v25 = vpack.i.bf16 %v26030_v54, %v26089_v9 }
0x2f8e   : > { %21144 = vmatprep.subr.bf16.mxu1 %v26658_v44 }
0x2fa9   : > { %v16777_v2 = vpop.xlane.xlu0 %16776 }
0x2faa   : > { %22386 = vrcp.f32 %v16777_v2 }
0x2fad   : > { %v21930_v46 = vpop.permute.xlu0 %21929 }
0x2fae   : > { %v21932_v7 = vunpack.i.h.bf16 %v21930_v46  ;;  %v21931_v53 = vunpack.i.l.bf16 %v21930_v46 }
0x2fb0   : > { %v21153_v58 = vpack.c.bf16 %v21932_v7, %v21931_v53 }
0x2fb1   : > { %v17123_v36 = vpop.permute.xlu0 %17122 }
0x2fb3   : > { %v16774_v8 = vpop.xlane.xlu1 %16773 }
0x2fb4   : > { %v22387_v12 = vpop.eup %22386  ;;  %22388 = vrcp.f32 %v16774_v8 }
0x2fb5   : > { %v16785_v63 = vmul.f32 %v22387_v12, %v22379_v5 }
0x2fb7   : > { %v21935_v43 = vpop.permute.xlu1 %21934  ;;  %20666 = vmatmul.mubr.msk.f32.vlgmr.msra.gmra.mrb[164].mxu0 %vm1994_vm6, %v16785_v63 }
0x2fb8   : > { %21151 = vmatpush3.bf16.xpose.msk.msra.mxu0 %vm23862_vm5, %v21149_v50  ;;  %20679 = vmatprep.mubr.msk.f32.mxu0 %vm23238_vm0, %v26651_v11  ;;  %v21937_v3 = vunpack.i.h.bf16 %v21935_v43  ;;  %v21936_v57 = vunpack.i.l.bf16 %v21935_v43 }
0x2fb9   : > { %21156 = vmatprep.subr.bf16.mxu0 %v26658_v44 }
0x2fba   : > { %v21157_v35 = vpack.c.bf16 %v21937_v3, %v21936_v57 }
0x2fbe   : > { %v22389_v26 = vpop.eup %22388 }
0x2fbf   : > { %v16784_v60 = vmul.f32 %v22389_v26, %v22381_v45  ;;  %20680 = vmatmul.mubr.msk.f32.vlgmr.msra.gmra.mrb[166].mxu0 %vm1682_vm4, %v17123_v36 }
0x2fc0   : > { %21159 = vmatpush3.bf16.xpose.msk.msra.mxu0 %vm23862_vm5, %v21157_v35  ;;  %20693 = vmatprep.mubr.msk.f32.mxu0 %vm23238_vm0, %v26651_v11 }
0x2fc1   : > { %20659 = vmatmul.mubr.msk.f32.vlgmr.msra.gmra.mrb[166].mxu1 %vm1994_vm6, %v16784_v60  ;;  %21163 = vmatprep.subr.bf16.mxu0 %v26658_v44 }
0x2fc2   : > { %21147 = vmatpush3.bf16.xpose.msk.msra.mxu1 %vm23862_vm5, %v21145_v62  ;;  %20672 = vmatprep.mubr.msk.f32.mxu1 %vm23238_vm0, %v26651_v11 }
0x2fc3   : > { %21152 = vmatprep.subr.bf16.mxu1 %v26658_v44 }
0x2fc7   : > { %20694 = vmatmul.mubr.msk.f32.vlgmr.msra.gmra.mrb[168].mxu0 %vm1682_vm4, %v17123_v36 }
0x2fc8   : > { %20707 = vmatprep.mubr.msk.f32.mxu0 %vm23238_vm0, %v26651_v11 }
0x2fc9   : > { %20673 = vmatmul.mubr.msk.f32.vlgmr.msra.gmra.mrb[168].mxu1 %vm1682_vm4, %v17123_v36 }
0x2fca   : > { %21155 = vmatpush3.bf16.xpose.msk.msra.mxu1 %vm23862_vm5, %v21153_v58  ;;  %20686 = vmatprep.mubr.msk.f32.mxu1 %vm23238_vm0, %v26651_v11  ;;  %vm18057_vm5 = vcmask 16384  }
0x2fcb   : > { %21160 = vmatprep.subr.bf16.mxu1 %v26658_v44 }
0x2fd1   : > { %20687 = vmatmul.mubr.msk.f32.vlgmr.msra.gmra.mrb[170].mxu1 %vm1682_vm4, %v17123_v36  ;;  %vm17848_vm4 = vcmask 1043459  }
0x2fd2   : > { %20700 = vmatprep.mubr.msk.f32.mxu1 %vm23238_vm0, %v26651_v11 }
0x3055   : > { %v16952_v61 = vpop.f32.mrb[162].mxu0 }
0x3056   : > { %v26449_v16 = vadd.f32 %v16952_v61, %v26371_v51  ;;  %v20653_v41 = vpop.f32.mrb[163].mxu0 }
0x3057   : > { %v26687_v41 = vpack.i.bf16 %v26120_v47, %v26167_v1 }
0x305f   : > { %v16871_v42 = vpop.f32.mrb[164].mxu1 }
0x3060   : > { %v26452_v49 = vadd.f32 %v16871_v42, %v26375_v56  ;;  %v20646_v23 = vpop.f32.mrb[165].mxu1  ;;  %v26688_v42 = vpack.i.bf16 %v26179_v37, %v26176_v34 }
0x308a   : > { %v17114_v40 = vpop.f32.mrb[164].mxu0 }
0x308b   : > { %v26455_v38 = vadd.f32 %v17114_v40, %v26373_v39  ;;  %v20667_v5 = vpop.f32.mrb[165].mxu0 }
0x3092   : > { %v17278_v32 = vpop.f32.mrb[166].mxu0 }
0x3093   : > { %v17439_v45 = vmul.f32 0.17677669, %v17278_v32  ;;  %v20681_v15 = vpop.f32.mrb[167].mxu0 }
0x3094   : > { %v17033_v14 = vpop.f32.mrb[166].mxu1 }
0x3095   : > { %v26458_v6 = vadd.f32 %v17033_v14, %v26377_v59  ;;  %v20660_v51 = vpop.f32.mrb[167].mxu1  ;;  %v17445_v0 = vsel %vm15349_vm1, %v17439_v45, -inf }
0x3096   : > { %17446 = vmax.xlane.f32.xlu0 %v17445_v0 }
0x309a   : > { %v17434_v24 = vpop.f32.mrb[168].mxu0 }
0x309b   : > { %v20695_v56 = vpop.f32.mrb[169].mxu0  ;;  %v17441_v20 = vmul.f32 0.17677669, %v17434_v24 }
0x309c   : > { %v17200_v4 = vpop.f32.mrb[168].mxu1 }
0x309d   : > { %v17438_v19 = vmul.f32 0.17677669, %v17200_v4  ;;  %v20674_v10 = vpop.f32.mrb[169].mxu1  ;;  %v17451_v48 = vsel %vm15349_vm1, %v17441_v20, -inf }
0x309f   : > { %v17442_v39 = vsel %vm15349_vm1, %v17438_v19, -inf }
0x30a0   : > { %17443 = vmax.xlane.f32.xlu1 %v17442_v39 }
0x30a4   : > { %17452 = vmax.xlane.f32.xlu1 %v17451_v48  ;;  %v17356_v29 = vpop.f32.mrb[170].mxu1 }
0x30a5   : > { %v17440_v52 = vmul.f32 0.17677669, %v17356_v29  ;;  %v20688_v59 = vpop.f32.mrb[171].mxu1 }
0x30a7   : > { %v17448_v22 = vsel %vm15349_vm1, %v17440_v52, -inf }
0x30a8   : > { %17449 = vmax.xlane.f32.xlu0 %v17448_v22 }
0x30b5   : > { %21944 = vrot.lane.b32.xlu1 %v26685_v30, %s23242_s8 }
0x30be   : > { %21939 = vrot.lane.b32.xlu0 %v26686_v25, %s23242_s8 }
0x3123   : > { %v17447_v31 = vpop.xlane.xlu0 %17446 }
0x3124   : > { %v17455_v2 = vsub.f32 %v17439_v45, %v17447_v31 }
0x3126   : > { %v17460_v33 = vmul.f32 1.442695, %v17455_v2 }
0x3128   : > { %22390 = vpow2.f32 %v17460_v33 }
0x312d   : > { %v17444_v17 = vpop.xlane.xlu1 %17443 }
0x312e   : > { %v17454_v27 = vsub.f32 %v17438_v19, %v17444_v17 }
0x3130   : > { %v17458_v8 = vmul.f32 1.442695, %v17454_v27 }
0x3131   : > { %v17453_v12 = vpop.xlane.xlu1 %17452 }
0x3132   : > { %v22391_v63 = vpop.eup %22390  ;;  %22392 = vpow2.f32 %v17458_v8  ;;  %v17457_v50 = vsub.f32 %v17441_v20, %v17453_v12 }
0x3133   : > { %v17469_v43 = vsel %vm15349_vm1, %v22391_v63, 0.0 }
0x3134   : > { %v17464_v13 = vmul.f32 1.442695, %v17457_v50  ;;  %17470 = vadd.xlane.f32.xlu1 %v17469_v43 }
0x3135   : > { %v21945_v28 = vpop.permute.xlu1 %21944  ;;  %v17450_v46 = vpop.xlane.xlu0 %17449 }
0x3136   : > { %22394 = vpow2.f32 %v17464_v13  ;;  %v21947_v54 = vunpack.i.h.bf16 %v21945_v28  ;;  %v21946_v9 = vunpack.i.l.bf16 %v21945_v28  ;;  %v17456_v3 = vsub.f32 %v17440_v52, %v17450_v46 }
0x3138   : > { %v21164_v57 = vpack.c.bf16 %v21947_v54, %v21946_v9  ;;  %v17462_v21 = vmul.f32 1.442695, %v17456_v3 }
0x3139   : > { %v21940_v18 = vpop.permute.xlu0 %21939 }
0x313a   : > { %22396 = vpow2.f32 %v17462_v21  ;;  %v21942_v26 = vunpack.i.h.bf16 %v21940_v18  ;;  %v21941_v36 = vunpack.i.l.bf16 %v21940_v18  ;;  %21165 = vmatpush3.bf16.msra.mxu0 %v21164_v57  ;;  %v17935_v57 = vld [vmem:[%s23424_s6] sm:$0xff]  ;;  %v17936_v21 = vld [vmem:[%s23424_s6 + $0x8] sm:$0xff]  ;;  %v17937_v18 = vld [vmem:[%s23424_s6 + $0x10] sm:$0xff] }
0x313b   : > { %21169 = vmatprep.subr.bf16.mxu0 %v26658_v44 }
0x313c   : > { %v22393_v35 = vpop.eup %22392  ;;  %v21161_v60 = vpack.c.bf16 %v21942_v26, %v21941_v36  ;;  %v21179_v26 = vpack.c.bf16 %v17936_v21, %v17935_v57  ;;  %v17938_v36 = vld [vmem:[%s23424_s6 + $0x18] sm:$0xff] }
0x313d   : > { %v17466_v62 = vsel %vm15349_vm1, %v22393_v35, 0.0 }
0x313e   : > { %17467 = vadd.xlane.f32.xlu0 %v17466_v62  ;;  %21162 = vmatpush3.bf16.msra.mxu1 %v21161_v60 }
0x313f   : > { %21166 = vmatprep.subr.bf16.mxu1 %v26658_v44 }
0x3140   : > { %v22395_v7 = vpop.eup %22394 }
0x3141   : > { %v17475_v53 = vsel %vm15349_vm1, %v22395_v7, 0.0 }
0x3142   : > { %17476 = vadd.xlane.f32.xlu1 %v17475_v53 }
0x3144   : > { %v22397_v58 = vpop.eup %22396 }
0x3145   : > { %v17472_v61 = vsel %vm15349_vm1, %v22397_v58, 0.0 }
0x3146   : > { %17473 = vadd.xlane.f32.xlu0 %v17472_v61 }
0x3153   : > { %21949 = vrot.lane.b32.xlu1 %v26687_v41, %s23242_s8 }
0x315c   : > { %21954 = vrot.lane.b32.xlu0 %v26688_v42, %s23242_s8  ;;  %s26689_s8 = sld [smem:[#allocation75_spill]] }
0x3162   : > { %v17826_v48 = vld [vmem:[%s26689_s8] sm:$0xff]  ;;  %v17827_v29 = vld [vmem:[%s26689_s8 + $0x8] sm:$0xff]  ;;  %v17828_v59 = vld [vmem:[%s26689_s8 + $0x10] sm:$0xff] }
0x3163   : > { %v21173_v52 = vpack.c.bf16 %v17827_v29, %v17826_v48  ;;  %v17829_v22 = vld [vmem:[%s26689_s8 + $0x18] sm:$0xff] }
0x3164   : > { %v21176_v30 = vpack.c.bf16 %v17829_v22, %v17828_v59 }
0x31c1   : > { %v17471_v23 = vpop.xlane.xlu1 %17470 }
0x31c2   : > { %22398 = vrcp.f32 %v17471_v23 }
0x31cb   : > { %v17468_v40 = vpop.xlane.xlu0 %17467 }
0x31cc   : > { %v22399_v5 = vpop.eup %22398  ;;  %22400 = vrcp.f32 %v17468_v40 }
0x31cd   : > { %v17483_v32 = vmul.f32 %v22399_v5, %v22391_v63 }
0x31cf   : > { %v17477_v45 = vpop.xlane.xlu1 %17476  ;;  %20708 = vmatmul.mubr.msk.f32.vlgmr.msra.gmra.mrb[170].mxu0 %vm1994_vm6, %v17483_v32 }
0x31d0   : > { %22402 = vrcp.f32 %v17477_v45  ;;  %20721 = vmatprep.mubr.msk.f32.mxu0 %vm23238_vm0, %v26651_v11 }
0x31d3   : > { %v21950_v47 = vpop.permute.xlu1 %21949  ;;  %v17474_v1 = vpop.xlane.xlu0 %17473 }
0x31d4   : > { %v21952_v15 = vunpack.i.h.bf16 %v21950_v47  ;;  %v21951_v14 = vunpack.i.l.bf16 %v21950_v47  ;;  %22404 = vrcp.f32 %v17474_v1 }
0x31d6   : > { %v22401_v34 = vpop.eup %22400  ;;  %v21167_v37 = vpack.c.bf16 %v21952_v15, %v21951_v14  ;;  %v23245_v14 = vmov 1966171168  }
0x31d7   : > { %v17482_v51 = vmul.f32 %v22401_v34, %v22393_v35  ;;  %v21955_v0 = vpop.permute.xlu0 %21954  ;;  %v18893_v35 = vld [vmem:[#allocation33] ss:$0 sm:$0xff]  ;;  %v18030_v34 = vunpack.c.l.s4 %v23245_v14 }
0x31d8   : > { %v21957_v24 = vunpack.i.h.bf16 %v21955_v0  ;;  %v21956_v56 = vunpack.i.l.bf16 %v21955_v0 }
0x31d9   : > { %20701 = vmatmul.mubr.msk.f32.vlgmr.msra.gmra.mrb[172].mxu1 %vm1994_vm6, %v17482_v51  ;;  %v26690_v51 = vlaneseq }
0x31da   : > { %v22403_v4 = vpop.eup %22402  ;;  %v21170_v19 = vpack.c.bf16 %v21957_v24, %v21956_v56  ;;  %21168 = vmatpush3.bf16.msra.mxu1 %v21167_v37  ;;  %20714 = vmatprep.mubr.msk.f32.mxu1 %vm23238_vm0, %v26651_v11  ;;  %v18031_v37 = vunpack.c.0.s8 %v18030_v34  ;;  %v18895_v24 = vld [vmem:[#allocation39] ss:$0 sm:$0xff] }
0x31db   : > { %21172 = vmatprep.subr.bf16.mxu1 %v26658_v44  ;;  %v17485_v10 = vmul.f32 %v22403_v4, %v22395_v7  ;;  %v18033_v0 = vshrl.u32 %v26690_v51, 7 }
0x31dc   : > { %21171 = vmatpush3.bf16.msra.mxu0 %v21170_v19 }
0x31dd   : > { %21178 = vmatprep.subr.bf16.mxu0 %v26658_v44  ;;  %v18034_v56 = vsub.s32 %v18031_v37, %v18033_v0 }
0x31de   : > { %v22405_v20 = vpop.eup %22404 }
0x31df   : > { %v17484_v39 = vmul.f32 %v22405_v20, %v22397_v58  ;;  %20722 = vmatmul.mubr.msk.f32.vlgmr.msra.gmra.mrb[172].mxu0 %vm1994_vm6, %v17485_v10 }
0x31e0   : > { %20743 = vmatprep.mubr.msk.f32.mxu0 %vm23238_vm0, %v26651_v11  ;;  %21180 = vmatpush3.bf16.msra.mxu0 %v21179_v26 }
0x31e1   : > { %20715 = vmatmul.mubr.msk.f32.vlgmr.msra.gmra.mrb[174].mxu1 %vm1994_vm6, %v17484_v39  ;;  %21181 = vmatprep.subr.bf16.mxu0 %v26658_v44 }
0x31e2   : > { %20732 = vmatprep.mubr.msk.f32.mxu1 %vm23238_vm0, %v26651_v11  ;;  %21174 = vmatpush3.bf16.msra.mxu1 %v21173_v52  ;;  %vm17842_vm0 = vcmask 1041409  }
0x31e3   : > { %21175 = vmatprep.subr.bf16.mxu1 %v26658_v44 }
0x31e6   : > { %21177 = vmatpush3.bf16.msra.mxu1 %v21176_v30 }
0x32a2   : > { %v17652_v25 = vpop.f32.mrb[170].mxu0 }
0x32a3   : > { %v17819_v31 = vadd.f32 %v17652_v25, %v26449_v16  ;;  %v20709_v2 = vpop.f32.mrb[171].mxu0 }
0x32a5   : > { %v17823_v63 = vadd.f32 %v17819_v31, %v26017_v55 }
0x32a7   : > { %v17841_v46 = vrot.slane %v17823_v63, 7 }
0x32ac   : > { %v17571_v33 = vpop.f32.mrb[172].mxu1 }
0x32ad   : > { %v17818_v17 = vadd.f32 %v17571_v33, %v26452_v49  ;;  %v20702_v27 = vpop.f32.mrb[173].mxu1 }
0x32af   : > { %v17822_v16 = vadd.f32 %v17818_v17, %v26017_v55 }
0x32b1   : > { %v17843_v54 = vsel %vm17842_vm0, %v17841_v46, %v17822_v16 }
0x32b2   : > { %v17814_v8 = vpop.f32.mrb[172].mxu0 }
0x32b3   : > { %v17821_v11 = vadd.f32 %v17814_v8, %v26455_v38  ;;  %v20723_v12 = vpop.f32.mrb[173].mxu0 }
0x32b4   : > { %v17733_v50 = vpop.f32.mrb[174].mxu1 }
0x32b5   : > { %v17820_v43 = vadd.f32 %v17733_v50, %v26458_v6  ;;  %v20716_v13 = vpop.f32.mrb[175].mxu1  ;;  %v17825_v28 = vadd.f32 %v17821_v11, %v26017_v55 }
0x32b7   : > { %v17824_v49 = vadd.f32 %v17820_v43, %v26017_v55  ;;  %v17847_v9 = vrot.slane %v17825_v28, 5  ;;  %v21182_v55 = vpack.c.bf16 %v17938_v36, %v17937_v18 }
0x32b9   : > { %v17844_v38 = vrot.slane %v17824_v49, 6  ;;  %21183 = vmatpush3.bf16.msra.mxu0 %v21182_v55 }
0x32bb   : > { %v17846_v6 = vsel %vm17845_vm2, %v17844_v38, %v17843_v54 }
0x32bc   : > { %v17849_v3 = vsel %vm17848_vm4, %v17847_v9, %v17846_v6 }
0x32bd   : > { %20733 = vmatmul.mubr.msk.f32.vlgmr.msra.gmra.mrb[176].mxu1 %vm1466_vm3, %v17849_v3 }
0x3390   : > { %v17918_v60 = vpop.f32.mrb[176].mxu1 }
0x3391   : > { %v17919_v62 = vadd.f32 %v18893_v35, %v17918_v60  ;;  %v20734_v7 = vpop.f32.mrb[177].mxu1 }
0x3393   : > { %v17922_v53 = vmax.f32 %v17919_v62, 0.0 }
0x3395   : > { %v17924_v58 = vrot.slane %v17922_v53, 1  ;;  %v17925_v61 = vrot.slane %v17922_v53, 2  ;;  %v17926_v41 = vrot.slane %v17922_v53, 3  ;;  %v17931_v5 = vadd.f32 %v17922_v53, %v17822_v16 }
0x3397   : > { %v17932_v42 = vadd.f32 %v17924_v58, %v17823_v63  ;;  %v17933_v23 = vadd.f32 %v17925_v61, %v17824_v49  ;;  %v17934_v40 = vadd.f32 %v17926_v41, %v17825_v28 }
0x3399   : > { %v17950_v32 = vrot.slane %v17932_v42, 7  ;;  %v17952_v45 = vrot.slane %v17933_v23, 6  ;;  %v17954_v44 = vrot.slane %v17934_v40, 5 }
0x339b   : > { %v17951_v47 = vsel %vm17842_vm0, %v17950_v32, %v17931_v5 }
0x339c   : > { %v17953_v1 = vsel %vm17845_vm2, %v17952_v45, %v17951_v47 }
0x339d   : > { %v17955_v15 = vsel %vm17848_vm4, %v17954_v44, %v17953_v1 }
0x339e   : > { %20744 = vmatmul.mubr.msk.f32.vlgmr.msra.gmra.mrb[174].mxu0 %vm1466_vm3, %v17955_v15 }
0x3471   : > { %v18024_v4 = vpop.f32.mrb[174].mxu0 }
0x3472   : > { %v18025_v19 = vadd.f32 %v18895_v24, %v18024_v4  ;;  %v20745_v10 = vpop.f32.mrb[175].mxu0 }
0x3474   : > { %v18035_v20 = vrot.slane %v18025_v19, %v18034_v56 }
0x3476   : > { %v18036_v39 = vcombine.high %v18035_v20, %v18035_v20  ;;  %v18043_v48 = vrot.slane %v18035_v20, %v18034_v56 }
0x3478   : > { %v18050_v29 = vrot.slane %v18036_v39, %v18034_v56  ;;  %v18051_v52 = vcombine.high %v18043_v48, %v18043_v48  ;;  %18058 = vst.msk [vmem:[%s1422_s0] sm:$0x1] %vm18057_vm5, %v18043_v48 }
0x347a   : > { %v18052_v59 = vcombine.high %v18050_v29, %v18050_v29  ;;  %18059 = vst.msk [vmem:[%s1422_s0 + $0x1] sm:$0x1] %vm18057_vm5, %v18050_v29  ;;  %18060 = vst.msk [vmem:[%s1422_s0 + $0x2] sm:$0x1] %vm18057_vm5, %v18051_v52 }
0x347c   : > { %18061 = vst.msk [vmem:[%s1422_s0 + $0x3] sm:$0x1] %vm18057_vm5, %v18052_v59 }
0x347d PF: > { %s96_s28 = sadd.s32 1, %s23172_s28  }
0x347e   : > { %p93_p7 = scmp.ge.s32.totalorder %s96_s28, 4  }
0x3480   :  { %95 = sbr.rel (!%p93_p7) target bundleno = 80 (0x50), region = 331 }
0x3487   :  { %18082 = vsyncpa [#allocation3], 1 }
0x3488   :  { %18084 = vsyncpa [#allocation3 + $0x1], 1 }
0x3489   :  { %18085 = vsyncpa [#allocation5], 1 }
0x348a   :  { %18086 = vsyncpa [#allocation8], 1 }
0x348b   :  { %18087 = vsyncpa [#allocation11], 1 }
0x348c   :  { %18088 = vsyncpa [#allocation14], 1 }
0x348d   :  { %18089 = vsyncpa [#allocation17], 1 }
0x348e   :  { %18090 = vsyncpa [#allocation20], 1 }
0x348f   :  { %18091 = vsyncpa [#allocation23], 1 }
0x3490   :  { %18092 = vsyncpa [#allocation26], 1 }
0x3491   :  { %18093 = vsyncpa [#allocation29], 1 }
0x3492   :  { %18094 = vsyncpa [#allocation32], 1 }
0x3493   :  { %18095 = vsyncpa [#allocation35], 1 }
0x3494   :  { %18096 = vsyncpa [#allocation38], 1 }

</bundles_post_ra>
